<compile_context>
chip_gen: v6e
topology: v6e:2x2x1
jax: 0.10.0
libtpu: 0.0.40
codegen_flags: <defaults>
</compile_context>

<pallas_src>
import jax
import jax.numpy as jnp
import numpy as np
from jax.experimental import pallas as pl
from jax.experimental.pallas import tpu as pltpu

HIDDEN = 256                      # both heads use 256 hidden units
NUM_INPUTS = 84 * 84 * 3          # 21168, hard-coded in the PyTorch forward
NUM_OUTPUTS = 8                   # small action space for the example
TK = 10752                        # K tile (84 * 128) -> 2 K-steps per head
K_PAD = 2 * TK                    # 21504 = zero-padded reduction length
OUT_LANES = 128                   # lane-dense output / padded second-layer width

# TODO(synk): self.log_std is a module parameter but is unused in forward(); omitted.


def actor_critic_kernel(x_ref, w1_ref, b1_ref, w2_ref, b2_ref, out_ref, acc_ref):
    n = pl.program_id(0)          # 0 = critic head, 1 = actor head
    k = pl.program_id(1)          # K-reduction step

    @pl.when(k == 0)
    def _():
        acc_ref[...] = jnp.zeros_like(acc_ref)

    # bf16 x bf16 -> f32 accumulate on the MXU. x_ref holds all K tiles
    # (fetched once, constant block index); w1_ref is this head's contiguous
    # (TK, 256) weight tile.
    acc_ref[...] += jnp.dot(x_ref[k], w1_ref[0],
                            preferred_element_type=jnp.float32)

    @pl.when(k == pl.num_programs(1) - 1)
    def _():
        # First-layer epilogue: bias + ReLU (f32), then the tiny second layer.
        h = jnp.maximum(acc_ref[...] + b1_ref[0], 0.0)                  # (B, 256)
        y = jnp.dot(h, w2_ref[0], preferred_element_type=jnp.float32) + b2_ref[0]
        # y: (B, 128). Critic: lane 0 = value, lanes 1..127 exactly 0 (zero pad).
        # Actor: lanes 0..A-1 = logits, lanes A..127 = -1e30 (bias pad).

        @pl.when(n == 0)
        def _():
            out_ref[0, :, :] = y                                        # value head

        @pl.when(n == 1)
        def _():
            summed = jnp.sum(y, axis=0, keepdims=True)                  # .sum(dim=0)
            m = jnp.max(summed, axis=-1, keepdims=True)
            e = jnp.exp(summed - m)                                     # pad lanes -> 0
            p = e / jnp.sum(e, axis=-1, keepdims=True)
            out_ref[0, :, :] = jnp.broadcast_to(p, out_ref.shape[1:])   # lane-dense


def init_params(key, num_inputs=NUM_INPUTS, num_outputs=NUM_OUTPUTS, hidden=HIDDEN):
    """Deterministic init matching init_weights: W ~ N(0, 0.1), b = 0.1.
    Weights stored as (in, out) (i.e. PyTorch W.T)."""
    k1, k2, k3, k4 = jax.random.split(key, 4)
    std = 0.1
    return dict(
        w1c=std * jax.random.normal(k1, (num_inputs, 256), jnp.float32),
        b1c=jnp.full((1, 256), 0.1, jnp.float32),
        w2c=std * jax.random.normal(k2, (256, 1), jnp.float32),
        b2c=jnp.full((1, 1), 0.1, jnp.float32),
        w1a=std * jax.random.normal(k3, (num_inputs, hidden), jnp.float32),
        b1a=jnp.full((1, hidden), 0.1, jnp.float32),
        w2a=std * jax.random.normal(k4, (hidden, num_outputs), jnp.float32),
        b2a=jnp.full((1, num_outputs), 0.1, jnp.float32),
    )


def prepare_params(params):
    """One-time layout prep, kept resident in HBM:
      * per-head contiguous first-layer slabs, K zero-padded, bf16: (2, K_PAD, 256)
      * second layer padded to 128 lanes: critic pad = 0 (value lane 0, rest 0),
        actor bias pad = -1e30 so padded lanes vanish from the softmax."""
    kpad = ((0, K_PAD - NUM_INPUTS), (0, 0))
    w1 = jnp.stack([jnp.pad(params["w1c"], kpad),
                    jnp.pad(params["w1a"], kpad)], axis=0).astype(jnp.bfloat16)
    b1 = jnp.stack([params["b1c"], params["b1a"]], axis=0)           # (2, 1, 256) f32

    w2c = jnp.pad(params["w2c"], ((0, 0), (0, OUT_LANES - 1)))                  # (256,128)
    b2c = jnp.pad(params["b2c"], ((0, 0), (0, OUT_LANES - 1)))                  # (1,128)
    w2a = jnp.pad(params["w2a"], ((0, 0), (0, OUT_LANES - NUM_OUTPUTS)))        # (256,128)
    b2a = jnp.pad(params["b2a"], ((0, 0), (0, OUT_LANES - NUM_OUTPUTS)),
                  constant_values=-1e30)                                        # (1,128)
    w2 = jnp.stack([w2c, w2a], axis=0)                               # (2, 256, 128) f32
    b2 = jnp.stack([b2c, b2a], axis=0)                               # (2, 1, 128) f32
    return dict(w1=w1, b1=b1, w2=w2, b2=b2)


@jax.jit
def actor_critic_forward(x_nchw, prep):
    """Returns (probs, value): probs = softmax(actor(x).sum(0)), value = critic(x)."""
    B = x_nchw.shape[0]
    x = x_nchw.reshape(B, -1).astype(jnp.float32)            # (B, 21168), like PyTorch
    assert x.shape[1] == NUM_INPUTS
    # Pad K (tiny, activation-only), cast to bf16, split into K-step tiles so the
    # kernel can index x_ref[k] on the leading axis (fetched once as one block).
    x = jnp.pad(x, ((0, 0), (0, K_PAD - NUM_INPUTS))).astype(jnp.bfloat16)
    k_steps = K_PAD // TK
    x = x.reshape(B, k_steps, TK).transpose(1, 0, 2)          # (k_steps, B, TK)

    out = pl.pallas_call(
        actor_critic_kernel,
        out_shape=jax.ShapeDtypeStruct((2, B, OUT_LANES), jnp.float32),
        grid_spec=pltpu.PrefetchScalarGridSpec(
            num_scalar_prefetch=0,
            grid=(2, k_steps),                                            # (head, K)
            in_specs=[
                pl.BlockSpec((k_steps, B, TK), lambda n, k: (0, 0, 0)),   # x, one fetch
                pl.BlockSpec((1, TK, HIDDEN), lambda n, k: (n, k, 0)),    # w1[n] K tile
                pl.BlockSpec((1, 1, HIDDEN), lambda n, k: (n, 0, 0)),     # b1[n]
                pl.BlockSpec((1, HIDDEN, OUT_LANES), lambda n, k: (n, 0, 0)),  # w2[n]
                pl.BlockSpec((1, 1, OUT_LANES), lambda n, k: (n, 0, 0)),       # b2[n]
            ],
            out_specs=pl.BlockSpec((1, B, OUT_LANES), lambda n, k: (n, 0, 0)),
            scratch_shapes=[
                pltpu.VMEM((B, HIDDEN), jnp.float32),                     # f32 accumulator
            ],
        ),
        compiler_params=pltpu.CompilerParams(
            dimension_semantics=("parallel", "arbitrary"),
            vmem_limit_bytes=32 * 1024 * 1024,
        ),
    )(x, prep["w1"], prep["b1"], prep["w2"], prep["b2"])

    value = out[0, :, 0:1]                 # (B, 1)
    probs = out[1, 0, :NUM_OUTPUTS]        # (A,)
    return probs, value


def reference_forward(x_nchw, params):
    """Pure-JAX reference. First-layer weights and x are rounded through bf16 to
    match the kernel's bf16 storage; all accumulation is f32."""
    B = x_nchw.shape[0]
    x = x_nchw.reshape(B, -1).astype(jnp.float32)
    xb = x.astype(jnp.bfloat16).astype(jnp.float32)
    w1c = params["w1c"].astype(jnp.bfloat16).astype(jnp.float32)
    w1a = params["w1a"].astype(jnp.bfloat16).astype(jnp.float32)
    h_c = jnp.maximum(xb @ w1c + params["b1c"], 0.0)
    value = h_c @ params["w2c"] + params["b2c"]
    h_a = jnp.maximum(xb @ w1a + params["b1a"], 0.0)
    logits = h_a @ params["w2a"] + params["b2a"]
    probs = jax.nn.softmax(jnp.sum(logits, axis=0), axis=-1)
    return probs, value


if __name__ == "__main__":
    key = jax.random.PRNGKey(0)
    pkey, xkey = jax.random.split(key)
    params = init_params(pkey)
    prep = prepare_params(params)          # one-time: pad + split + bf16 cast

    B = 2                                  # kernel is B-agnostic; batch more for throughput
    # Spatial shape is dictated by the module (84*84*3); modest input scale so the
    # batch-summed softmax is not degenerate one-hot.
    x = 0.05 * jax.random.normal(xkey, (B, 3, 84, 84), jnp.float32)

    probs, value = actor_critic_forward(x, prep)
    jax.block_until_ready((probs, value))

    ref_probs, ref_value = reference_forward(x, params)
    np.testing.assert_allclose(np.asarray(value), np.asarray(ref_value),
                               rtol=2e-2, atol=2e-2)
    np.testing.assert_allclose(np.asarray(probs), np.asarray(ref_probs),
                               rtol=2e-2, atol=2e-3)

    print("KERNEL_OK")
</pallas_src>

<mosaic_0001>
module attributes {stable_mosaic.version = 11 : i64} {
  func.func @actor_critic_kernel(%arg0: i32, %arg1: i32, %arg2: memref<2x2x10752xbf16, #tpu.memory_space<vmem>>, %arg3: memref<1x10752x256xbf16, #tpu.memory_space<vmem>>, %arg4: memref<1x1x256xf32, #tpu.memory_space<vmem>>, %arg5: memref<1x256x128xf32, #tpu.memory_space<vmem>>, %arg6: memref<1x1x128xf32, #tpu.memory_space<vmem>>, %arg7: memref<1x2x128xf32, #tpu.memory_space<vmem>>, %arg8: memref<2x256xf32, #tpu.memory_space<vmem>>) attributes {dimension_semantics = [#tpu.dimension_semantics<parallel>, #tpu.dimension_semantics<arbitrary>], iteration_bounds = array<i64: 2, 2>, scalar_prefetch = 0 : i64, scratch_operands = 1 : i64, tpu.core_type = #tpu.core_type<tc>, window_params = [{pipeline_mode = #tpu.pipeline_mode<synchronous>, transform_indices = @transform_0, window_bounds = array<i64: 2, 2, 10752>}, {transform_indices = @transform_1, window_bounds = array<i64: 1, 10752, 256>}, {transform_indices = @transform_2, window_bounds = array<i64: 1, 1, 256>}, {transform_indices = @transform_3, window_bounds = array<i64: 1, 256, 128>}, {transform_indices = @transform_4, window_bounds = array<i64: 1, 1, 128>}, {transform_indices = @transform_5, window_bounds = array<i64: 1, 2, 128>}]} {
    %c0_i32 = arith.constant 0 : i32
    %0 = arith.cmpi eq, %arg1, %c0_i32 : i32
    %1 = arith.extui %0 : i1 to i32
    %c0_i32_0 = arith.constant 0 : i32
    %2 = arith.cmpi ne, %1, %c0_i32_0 : i32
    scf.if %2 {
      %cst_10 = arith.constant 0.000000e+00 : f32
      %15 = vector.broadcast %cst_10 : f32 to vector<2x256xf32>
      %c0_11 = arith.constant 0 : index
      %c0_12 = arith.constant 0 : index
      %16 = vector.load %arg8[%c0_11, %c0_12] : memref<2x256xf32, #tpu.memory_space<vmem>>, vector<2x256xf32>
      tpu.vector_store %arg8[%c0_11, %c0_12], %15 {strides = array<i32>} : memref<2x256xf32, #tpu.memory_space<vmem>>, vector<2x256xf32>,
    } else {
    }
    %c0 = arith.constant 0 : index
    %c0_1 = arith.constant 0 : index
    %3 = vector.load %arg8[%c0, %c0_1] : memref<2x256xf32, #tpu.memory_space<vmem>>, vector<2x256xf32>
    %4 = arith.index_cast %arg1 : i32 to index
    %c0_2 = arith.constant 0 : index
    %c0_3 = arith.constant 0 : index
    %5 = vector.load %arg2[%4, %c0_2, %c0_3] : memref<2x2x10752xbf16, #tpu.memory_space<vmem>>, vector<1x2x10752xbf16>
    %6 = vector.shape_cast %5 : vector<1x2x10752xbf16> to vector<2x10752xbf16>
    %c0_4 = arith.constant 0 : index
    %c0_5 = arith.constant 0 : index
    %c0_6 = arith.constant 0 : index
    %7 = vector.load %arg3[%c0_4, %c0_5, %c0_6] : memref<1x10752x256xbf16, #tpu.memory_space<vmem>>, vector<1x10752x256xbf16>
    %8 = vector.shape_cast %7 : vector<1x10752x256xbf16> to vector<10752x256xbf16>
    %cst = arith.constant dense<0.000000e+00> : vector<2x256xf32>
    %9 = tpu.matmul %6, %8, %cst {dimension_numbers = #tpu.dot_dimension_numbers<[1], [0], [0], [1], [0, 0, 1, 1], [], []>} : vector<2x10752xbf16>, vector<10752x256xbf16>, vector<2x256xf32> -> vector<2x256xf32>
    %10 = arith.addf %3, %9 : vector<2x256xf32>
    %c0_7 = arith.constant 0 : index
    %c0_8 = arith.constant 0 : index
    %11 = vector.load %arg8[%c0_7, %c0_8] : memref<2x256xf32, #tpu.memory_space<vmem>>, vector<2x256xf32>
    tpu.vector_store %arg8[%c0_7, %c0_8], %10 {strides = array<i32>} : memref<2x256xf32, #tpu.memory_space<vmem>>, vector<2x256xf32>,
    %c1_i32 = arith.constant 1 : i32
    %12 = arith.cmpi eq, %arg1, %c1_i32 : i32
    %13 = arith.extui %12 : i1 to i32
    %c0_i32_9 = arith.constant 0 : i32
    %14 = arith.cmpi ne, %13, %c0_i32_9 : i32
    scf.if %14 {
      %c0_10 = arith.constant 0 : index
      %c0_11 = arith.constant 0 : index
      %15 = vector.load %arg8[%c0_10, %c0_11] : memref<2x256xf32, #tpu.memory_space<vmem>>, vector<2x256xf32>
      %c0_12 = arith.constant 0 : index
      %c0_13 = arith.constant 0 : index
      %c0_14 = arith.constant 0 : index
      %16 = vector.load %arg4[%c0_12, %c0_13, %c0_14] : memref<1x1x256xf32, #tpu.memory_space<vmem>>, vector<1x1x256xf32>
      %17 = vector.shape_cast %16 : vector<1x1x256xf32> to vector<1x256xf32>
      %18 = vector.broadcast %17 : vector<1x256xf32> to vector<2x256xf32>
      %19 = arith.addf %15, %18 : vector<2x256xf32>
      %cst_15 = arith.constant 0.000000e+00 : f32
      %20 = vector.broadcast %cst_15 : f32 to vector<2x256xf32>
      %21 = arith.maximumf %19, %20 : vector<2x256xf32>
      %c0_16 = arith.constant 0 : index
      %c0_17 = arith.constant 0 : index
      %c0_18 = arith.constant 0 : index
      %22 = vector.load %arg5[%c0_16, %c0_17, %c0_18] : memref<1x256x128xf32, #tpu.memory_space<vmem>>, vector<1x256x128xf32>
      %23 = vector.shape_cast %22 : vector<1x256x128xf32> to vector<256x128xf32>
      %cst_19 = arith.constant dense<0.000000e+00> : vector<2x128xf32>
      %24 = tpu.matmul %21, %23, %cst_19 {dimension_numbers = #tpu.dot_dimension_numbers<[1], [0], [0], [1], [0, 0, 1, 1], [], []>} : vector<2x256xf32>, vector<256x128xf32>, vector<2x128xf32> -> vector<2x128xf32>
      %c0_20 = arith.constant 0 : index
      %c0_21 = arith.constant 0 : index
      %c0_22 = arith.constant 0 : index
      %25 = vector.load %arg6[%c0_20, %c0_21, %c0_22] : memref<1x1x128xf32, #tpu.memory_space<vmem>>, vector<1x1x128xf32>
      %26 = vector.shape_cast %25 : vector<1x1x128xf32> to vector<1x128xf32>
      %27 = vector.broadcast %26 : vector<1x128xf32> to vector<2x128xf32>
      %28 = arith.addf %24, %27 : vector<2x128xf32>
      %c0_i32_23 = arith.constant 0 : i32
      %29 = arith.cmpi eq, %arg0, %c0_i32_23 : i32
      %30 = arith.extui %29 : i1 to i32
      %c0_i32_24 = arith.constant 0 : i32
      %31 = arith.cmpi ne, %30, %c0_i32_24 : i32
      scf.if %31 {
        %c0_27 = arith.constant 0 : index
        %c0_28 = arith.constant 0 : index
        %c0_29 = arith.constant 0 : index
        %35 = vector.load %arg7[%c0_27, %c0_28, %c0_29] : memref<1x2x128xf32, #tpu.memory_space<vmem>>, vector<1x2x128xf32>
        %36 = vector.shape_cast %35 : vector<1x2x128xf32> to vector<2x128xf32>
        %37 = vector.shape_cast %28 : vector<2x128xf32> to vector<1x2x128xf32>
        tpu.vector_store %arg7[%c0_27, %c0_28, %c0_29], %37 {strides = array<i32>} : memref<1x2x128xf32, #tpu.memory_space<vmem>>, vector<1x2x128xf32>,
      } else {
      }
      %c1_i32_25 = arith.constant 1 : i32
      %32 = arith.cmpi eq, %arg0, %c1_i32_25 : i32
      %33 = arith.extui %32 : i1 to i32
      %c0_i32_26 = arith.constant 0 : i32
      %34 = arith.cmpi ne, %33, %c0_i32_26 : i32
      scf.if %34 {
        %cst_27 = arith.constant dense<0.000000e+00> : vector<128xf32>
        %35 = vector.multi_reduction <add>, %28, %cst_27 [0] : vector<2x128xf32> to vector<128xf32>
        %36 = vector.shape_cast %35 : vector<128xf32> to vector<1x128xf32>
        %cst_28 = arith.constant dense<0xFF800000> : vector<1xf32>
        %37 = vector.multi_reduction <maximumf>, %36, %cst_28 [1] : vector<1x128xf32> to vector<1xf32>
        %38 = vector.shape_cast %37 : vector<1xf32> to vector<1x1xf32>
        %39 = vector.broadcast %38 : vector<1x1xf32> to vector<1x128xf32>
        %40 = arith.subf %36, %39 : vector<1x128xf32>
        %41 = math.exp %40 : vector<1x128xf32>
        %cst_29 = arith.constant dense<0.000000e+00> : vector<1xf32>
        %42 = vector.multi_reduction <add>, %41, %cst_29 [1] : vector<1x128xf32> to vector<1xf32>
        %43 = vector.shape_cast %42 : vector<1xf32> to vector<1x1xf32>
        %44 = vector.broadcast %43 : vector<1x1xf32> to vector<1x128xf32>
        %45 = arith.divf %41, %44 : vector<1x128xf32>
        %46 = vector.shape_cast %45 : vector<1x128xf32> to vector<1x128xf32>
        %47 = vector.broadcast %46 : vector<1x128xf32> to vector<2x128xf32>
        %c0_30 = arith.constant 0 : index
        %c0_31 = arith.constant 0 : index
        %c0_32 = arith.constant 0 : index
        %48 = vector.load %arg7[%c0_30, %c0_31, %c0_32] : memref<1x2x128xf32, #tpu.memory_space<vmem>>, vector<1x2x128xf32>
        %49 = vector.shape_cast %48 : vector<1x2x128xf32> to vector<2x128xf32>
        %50 = vector.shape_cast %47 : vector<2x128xf32> to vector<1x2x128xf32>
        tpu.vector_store %arg7[%c0_30, %c0_31, %c0_32], %50 {strides = array<i32>} : memref<1x2x128xf32, #tpu.memory_space<vmem>>, vector<1x2x128xf32>,
      } else {
      }
    } else {
    }
    return
  }
  func.func @transform_0(%arg0: i32, %arg1: i32) -> (i32, i32, i32) {
    %c0_i32 = arith.constant 0 : i32
    %c0_i32_0 = arith.constant 0 : i32
    %c0_i32_1 = arith.constant 0 : i32
    %c0_i32_2 = arith.constant 0 : i32
    return %c0_i32, %c0_i32_0, %c0_i32_1 : i32, i32, i32
  }
  func.func @transform_1(%arg0: i32, %arg1: i32) -> (i32, i32, i32) {
    %c0_i32 = arith.constant 0 : i32
    %c0_i32_0 = arith.constant 0 : i32
    return %arg0, %arg1, %c0_i32 : i32, i32, i32
  }
  func.func @transform_2(%arg0: i32, %arg1: i32) -> (i32, i32, i32) {
    %c0_i32 = arith.constant 0 : i32
    %c0_i32_0 = arith.constant 0 : i32
    %c0_i32_1 = arith.constant 0 : i32
    return %arg0, %c0_i32, %c0_i32_0 : i32, i32, i32
  }
  func.func @transform_3(%arg0: i32, %arg1: i32) -> (i32, i32, i32) {
    %c0_i32 = arith.constant 0 : i32
    %c0_i32_0 = arith.constant 0 : i32
    %c0_i32_1 = arith.constant 0 : i32
    return %arg0, %c0_i32, %c0_i32_0 : i32, i32, i32
  }
  func.func @transform_4(%arg0: i32, %arg1: i32) -> (i32, i32, i32) {
    %c0_i32 = arith.constant 0 : i32
    %c0_i32_0 = arith.constant 0 : i32
    %c0_i32_1 = arith.constant 0 : i32
    return %arg0, %c0_i32, %c0_i32_0 : i32, i32, i32
  }
  func.func @transform_5(%arg0: i32, %arg1: i32) -> (i32, i32, i32) {
    %c0_i32 = arith.constant 0 : i32
    %c0_i32_0 = arith.constant 0 : i32
    %c0_i32_1 = arith.constant 0 : i32
    return %arg0, %c0_i32, %c0_i32_0 : i32, i32, i32
  }
}

</mosaic_0001>

<bundles_post_ra>
// kernel: actor_critic_forward.1
= control target key start
LH: loop header
LB: loop body
LE: loop exit
PB: predicated region body
PF: predicated region fallthrough
CT: control target
= control target key end

     0   :  { %s16876_s0 = inlined_call_operand.vmem [shape: bf16[2,2,10752], index: 0, kind: input, shape index: {}]   ;;  %s16877_s1 = inlined_call_operand.hbm [shape: bf16[2,21504,256], index: 1, kind: input, shape index: {}]   ;;  %s16878_s2 = inlined_call_operand.hbm [shape: f32[2,1,256], index: 2, kind: input, shape index: {}]   ;;  %s16879_s3 = inlined_call_operand.hbm [shape: f32[2,256,128], index: 3, kind: input, shape index: {}]   ;;  %s16880_s4 = inlined_call_operand.hbm [shape: f32[2,1,128], index: 4, kind: input, shape index: {}]   ;;  %s16881_s5 = inlined_call_operand.vmem [shape: f32[2,2,128], index: 5, kind: output, shape index: {}]  }
   0x1   :  { %16894 = sst [smem:[#allocation22_spill]] %s16876_s0 }
   0x2   :  { %16895 = sst [smem:[#allocation23_spill]] %s16878_s2 }
   0x3   :  { %16896 = sst [smem:[#allocation24_spill]] %s16881_s5 }
   0x4   :  { %10 = vsyncpa [#allocation4], 0 }
   0x5   :  { %12 = vsyncpa [#allocation4 + $0x1], 0 }
   0x6   :  { %13 = vsyncpa [#allocation6], 0 }
   0x7   :  { %15 = vsyncpa [#allocation6 + $0x1], 0 }
   0x8   :  { %16 = vsyncpa [#allocation9], 0 }
   0x9   :  { %18 = vsyncpa [#allocation9 + $0x1], 0  ;;  %s14920_s18 = smov 0   ;;  %s14922_s19 = smov 0  }
   0xa   :  { %s14924_s20 = smov 0   ;;  %s14926_s21 = smov 0  }
   0xb   :  { %s14928_s22 = smov 0   ;;  %s14930_s23 = smov 0  }
   0xc   :  { %s14932_s24 = smov 0   ;;  %s14934_s25 = smov 0  }
   0xd   :  { %s14936_s26 = smov 0   ;;  %s14938_s27 = smov 0  }
   0xe   :  { %s14940_s28 = smov 0  }
   0xf LB: > { %16897 = sst [smem:[#allocation13_spill]] %s14843_s19  ;;  %s16882_s29 = sadd.s32 4294967295, %s14879_s28   ;;  %s14879_s28 = sphi %s14940_s28, %s24_s28   ;;  %s14875_s27 = sphi %s14938_s27, %s16938_s27   ;;  %s14871_s26 = sphi %s14936_s26, %s16932_s26   ;;  %s14867_s25 = sphi %s14934_s25, %s16937_s25   ;;  %s14863_s24 = sphi %s14932_s24, %s16931_s24   ;;  %s14859_s23 = sphi %s14930_s23, %s16936_s23   ;;  %s14855_s22 = sphi %s14928_s22, %s16935_s22   ;;  %s14851_s21 = sphi %s14926_s21, %s16929_s21   ;;  %s14847_s20 = sphi %s14924_s20, %s16934_s20   ;;  %s14843_s19 = sphi %s14922_s19, %s16933_s19   ;;  %s14839_s18 = sphi %s14920_s18, %s16928_s18  }
  0x10   : > { %16898 = sst [smem:[#allocation14_spill]] %s14855_s22  ;;  %p73_p0 = scmp.ne.s32.totalorder %s14859_s23, %s14855_s22 }
  0x11   : > { %16899 = sst [smem:[#allocation15_spill]] %s14863_s24  ;;  %p74_p1 = scmp.eq.s32.totalorder %s14879_s28, 0 }
  0x12   : > { %16900 = sst [smem:[#allocation16_spill]] %s14867_s25  ;;  %p79_p2 = scmp.ne.s32.totalorder %s14855_s22, %s14851_s21 }
  0x13   : > { %16901 = sst [smem:[#allocation17_spill]] %s14871_s26  ;;  %p80_p3 = scmp.eq.s32.totalorder %s16882_s29, 0 }
  0x14   : > { %16902 = sst [smem:[#allocation18_spill]] %s14879_s28  ;;  %p75_p4 = por %p74_p1, %p73_p0 }
  0x15   : > { %p99_p5 = scmp.ne.s32.totalorder %s14847_s20, %s14843_s19  ;;  %p14981_p6 = por %p80_p3, %p79_p2 }
  0x16   : > { %p105_p7 = scmp.ne.s32.totalorder %s14843_s19, %s14839_s18  ;;  %p12545_p10 = scmp.lt.s32.totalorder %s14879_s28, 4 }
  0x17   : > { %s16903_s6 = scalar_select %p14981_p6, 1, 0 }
  0x18   : > { %p101_p8 = por %p99_p5, %p74_p1  ;;  %p14986_p9 = por %p105_p7, %p80_p3 }
  0x19   : > { %16904 = sst [smem:[#allocation19_spill]] %s16903_s6  ;;  %s234_s8 = sand.u32 1, %s14879_s28  }
  0x1a   : > { %s16905_s7 = scalar_select %p14986_p9, 1, 0 }
  0x1b   : > { %s14993_s9 = sand.u32 1, %s14847_s20   ;;  %p14995_p11 = pnand %p12545_p10, %p75_p4 }
  0x1c   : > { %16906 = sst [smem:[#allocation20_spill]] %s16905_s7  ;;  %s11120_s11 = sshll.u32 %s14993_s9, 1 }
  0x1d   : > { %s12484_s12 = sshll.u32 %s14875_s27, 5  ;;  %s16908_s2 = sld [smem:[#allocation23_spill]] }
  0x1e   : > { %s238_s16 = scalar_lea.vmem [#allocation5], %s11120_s11  ;;  %p15004_p12 = pnand %p12545_p10, %p101_p8 }
  0x1f   : > { %s246_s17 = sshll.u32 %s238_s16, 4  ;;  %p11127_p13 = scmp.ge.s32.totalorder %s14879_s28, 1  ;;  %s247_s17 = int_to_ptr.vmem [resolvable:$true] %s246_s17 }
  0x20   : > { %p289_p0 = scmp.lt.s32.totalorder %s14879_s28, 5  ;;  %s15011_s29 = scalar_lea.sflag [#allocation6], %s234_s8 }
  0x21   : > { %p14671_p1 = pneg %p15004_p12  ;;  %s14682_s30 = scalar_lea.vmem %s247_s17, 32 }
  0x22   : > { %p14683_p2 = scmp.ne.s32.totalorder %s247_s17, %s14682_s30  ;;  %s14881_s11 = smov [#allocation5]  }
  0x23   : > { %s244_s15 = scalar_lea.hbm %s16908_s2, %s12484_s12  ;;  %s14687_s12 = sshll.u32 %s14881_s11, 4  ;;  %s14688_s12 = int_to_ptr.vmem [resolvable:$false] %s14687_s12 }
  0x24   : > { %p14685_p3 = pnand %p14683_p2, %p14671_p1  ;;  %s14689_s13 = scalar_lea.vmem %s14688_s12, 64 }
  0x25   : > { %p14690_p5 = scmp.lt.s32.totalorder %s247_s17, %s14688_s12  ;;  %p14691_p7 = scmp.lt.s32.totalorder %s14689_s13, %s14682_s30 }
  0x26   : > { %p14686_p4 = pneg %p14685_p3 }
  0x27   : > { %p14692_p8 = por %p14691_p7, %p14690_p5 }
  0x29   : > { %p14693_p10 = pnand %p14692_p8, %p14686_p4 }
  0x2b   : > { %14696 = shalt.err (!%p14693_p10)
}
  0x2c   : > { %12538 = dma.hbm_to_vmem [thread:$0]  (!%p15004_p12), %s244_s15, 32, %s247_s17, %s15011_s29  }
  0x2d   : > { %p15025_p2 = pnand %p11127_p13, %p289_p0  ;;  %s33_s8 = sadd.s32 1, %s14871_s26 }
  0x2e   : > { %p34_p3 = scmp.ge.s32.totalorder %s33_s8, 2  ;;  %s36_s14 = sadd.s32 1, %s14875_s27 }
  0x2f   : > { %s66_s16 = sadd.s32 1, %s14859_s23  ;;  %s210_s11 = sand.u32 1, %s14859_s23  }
  0x30   : > { %s16940_s8 = smov (%p34_p3, %s33_s8), 0  ;;  %s16942_s14 = smov (!%p34_p3, %s36_s14), %s14875_s27 }
  0x31   : > { %16911 = sst [smem:[#allocation21_spill]] %s16940_s8  ;;  %s62_s12 = ssub.s32 %s14871_s26, %s16940_s8 }
  0x32   : > { %p38_p4 = scmp.ge.s32.totalorder %s16942_s14, 2  ;;  %s12521_s15 = smul.u32 10752, %s210_s11 }
  0x33   : > { %s12483_s17 = smul.u32 2688, %s14871_s26  ;;  %s16912_s25 = sadd.s32 1, %s14847_s20 }
  0x34   : > { %s16944_s14 = smov (%p38_p4, %s16942_s14), 0  ;;  %s12522_s13 = smul.u32 5376, %s14875_s27 }
  0x35   : > { %s61_s21 = ssub.s32 %s14875_s27, %s16944_s14  ;;  %s214_s2 = scalar_lea.vmem [#allocation3], %s12521_s15 }
  0x36   : > { %s224_s0 = sshll.u32 %s214_s2, 4  ;;  %s63_s24 = sor.u32 %s62_s12, %s61_s21  ;;  %s225_s0 = int_to_ptr.vmem [resolvable:$true] %s224_s0 }
  0x37   : > { %p90_p13 = scmp.eq.s32.totalorder %s61_s21, 0  ;;  %p64_p0 = scmp.eq.s32.totalorder %s63_s24, 0 }
  0x38   : > { %s221_s5 = sadd.s32 %s12522_s13, %s12483_s17  ;;  %s211_s22 = scalar_lea.sflag [#allocation4], %s210_s11 }
  0x39   : > { %s15047_s7 = scalar_select %p90_p13, %s14847_s20, %s16912_s25  }
  0x3a   : > { %s15050_s19 = scalar_select %p64_p0, %s14859_s23, %s66_s16  }
  0x3b   : > { %s11119_s8 = sshll.u32 %s221_s5, 6  ;;  %p14699_p5 = pneg %p14995_p11 }
  0x3c   : > { %s223_s6 = scalar_lea.hbm %s16877_s1, %s11119_s8  ;;  %s14710_s15 = scalar_lea.vmem %s225_s0, 172032 }
  0x3d   : > { %p14711_p7 = scmp.ne.s32.totalorder %s225_s0, %s14710_s15  ;;  %s14882_s2 = smov [#allocation3]  }
  0x3e   : > { %s14715_s24 = sshll.u32 %s14882_s2, 4  ;;  %s14716_s24 = int_to_ptr.vmem [resolvable:$false] %s14715_s24 }
  0x3f   : > { %p14713_p8 = pnand %p14711_p7, %p14699_p5  ;;  %s14717_s25 = scalar_lea.vmem %s14716_s24, 344064 }
  0x40   : > { %p14718_p3 = scmp.lt.s32.totalorder %s225_s0, %s14716_s24  ;;  %p14719_p4 = scmp.lt.s32.totalorder %s14717_s25, %s14710_s15 }
  0x41   : > { %p14714_p10 = pneg %p14713_p8 }
  0x42   : > { %p14720_p13 = por %p14719_p4, %p14718_p3 }
  0x44   : > { %p14721_p0 = pnand %p14720_p13, %p14714_p10 }
  0x46   : > { %14724 = shalt.err (!%p14721_p0)
}
  0x47   : > { %s14883_s5 = smov 128   ;;  %s14884_s26 = smov 8  }
  0x48   : > { %12535 = dma.hbm_to_vmem [thread:$0]  (!%p14995_p11), %s223_s6, 172032, %s225_s0, %s211_s22, %s14883_s5, %s14883_s5, %s14884_s26  }
  0x49   : > { %s12485_s28 = sshll.u32 %s14875_s27, 12  ;;  %s16913_s11 = sshll.u32 %s14993_s9, 8 }
  0x4a   : > { %s263_s16 = scalar_lea.hbm %s16879_s3, %s12485_s28  ;;  %s257_s12 = scalar_lea.vmem [#allocation7], %s16913_s11 }
  0x4b   : > { %s264_s17 = sshll.u32 %s257_s12, 4  ;;  %s14885_s15 = smov [#allocation7]   ;;  %s265_s17 = int_to_ptr.vmem [resolvable:$true] %s264_s17 }
  0x4c   : > { %s14738_s13 = scalar_lea.vmem %s265_s17, 4096  ;;  %s14743_s2 = sshll.u32 %s14885_s15, 4  ;;  %s14744_s2 = int_to_ptr.vmem [resolvable:$false] %s14743_s2 }
  0x4d   : > { %p14739_p5 = scmp.ne.s32.totalorder %s265_s17, %s14738_s13  ;;  %s14745_s10 = scalar_lea.vmem %s14744_s2, 8192 }
  0x4e   : > { %p14746_p11 = scmp.lt.s32.totalorder %s265_s17, %s14744_s2  ;;  %p14747_p10 = scmp.lt.s32.totalorder %s14745_s10, %s14738_s13 }
  0x4f   : > { %p14741_p7 = pnand %p14739_p5, %p14671_p1 }
  0x50   : > { %p14748_p3 = por %p14747_p10, %p14746_p11 }
  0x51   : > { %p14742_p8 = pneg %p14741_p7 }
  0x53   : > { %p14749_p4 = pnand %p14748_p3, %p14742_p8 }
  0x55   : > { %14752 = shalt.err (!%p14749_p4)
}
  0x56   : > { %12541 = dma.hbm_to_vmem [thread:$0]  (!%p15004_p12), %s263_s16, 4096, %s265_s17, %s15011_s29, %s14883_s5, %s14883_s5, %s14884_s26  }
  0x57   : > { %s11126_s0 = sshll.u32 %s14875_s27, 4  ;;  %s277_s25 = scalar_lea.vmem [#allocation8], %s14993_s9 }
  0x58   : > { %s282_s24 = scalar_lea.hbm %s16880_s4, %s11126_s0  ;;  %s284_s28 = sshll.u32 %s277_s25, 4  ;;  %s285_s28 = int_to_ptr.vmem [resolvable:$true] %s284_s28 }
  0x59   : > { %s275_s21 = scalar_lea.sflag [#allocation9], %s14993_s9  ;;  %s14766_s8 = scalar_lea.vmem %s285_s28, 16 }
  0x5a   : > { %p14767_p13 = scmp.ne.s32.totalorder %s285_s28, %s14766_s8  ;;  %s14886_s11 = smov [#allocation8]  }
  0x5b   : > { %s14771_s12 = sshll.u32 %s14886_s11, 4  ;;  %s14772_s12 = int_to_ptr.vmem [resolvable:$false] %s14771_s12 }
  0x5c   : > { %p14769_p0 = pnand %p14767_p13, %p14671_p1  ;;  %s14773_s13 = scalar_lea.vmem %s14772_s12, 32 }
  0x5d   : > { %p14774_p7 = scmp.lt.s32.totalorder %s285_s28, %s14772_s12  ;;  %p14775_p8 = scmp.lt.s32.totalorder %s14773_s13, %s14766_s8 }
  0x5e   : > { %p14770_p5 = pneg %p14769_p0 }
  0x5f   : > { %p14776_p11 = por %p14775_p8, %p14774_p7 }
  0x61   : > { %p14777_p10 = pnand %p14776_p11, %p14770_p5 }
  0x63   : > { %14780 = shalt.err (!%p14777_p10)
}
  0x64   : > { %12544 = dma.hbm_to_vmem [thread:$0]  (!%p15004_p12), %s282_s24, 16, %s285_s28, %s275_s21  }
  0x65   : > { %293 = sbr.rel (%p15025_p2) target bundleno = 2265 (0x8d9), region = 40  ;;  %s16914_s29 = sld [smem:[#allocation14_spill]] (!%p15025_p2) }
  0x6b   : > { %s295_s5 = sand.u32 1, %s16914_s29  }
  0x6c   : > { %s12523_s26 = smul.u32 10752, %s295_s5  ;;  %s296_s16 = scalar_lea.sflag [#allocation4], %s295_s5 }
  0x6e   : > { %s15085_s17 = scalar_lea.vmem [#allocation3], %s12523_s26 }
  0x6f   : > { %14826 = dma.done.wait (%p14981_p6), %s296_s16, 172032  }
  0x70   : > { %14828 = vsyncadd (%p14981_p6), %s296_s16, 4294795264  ;;  %s16916_s15 = sld [smem:[#allocation18_spill]] }
  0x71   : > { %s16918_s10 = sld [smem:[#allocation13_spill]] }
  0x76   : > { %s16917_s2 = sadd.s32 4294967295, %s16916_s15  }
  0x77   : > { %s304_s0 = sand.u32 1, %s16917_s2   ;;  %s15094_s22 = sand.u32 1, %s16918_s10  }
  0x78   : > { %s11128_s30 = sshll.u32 %s15094_s22, 1  ;;  %s305_s6 = scalar_lea.sflag [#allocation6], %s304_s0 }
  0x79   : > { %s15097_s24 = scalar_lea.vmem [#allocation5], %s11128_s30 }
  0x7a   : > { %14830 = dma.done.wait (%p14986_p9), %s305_s6, 4128  }
  0x7b   : > { %14832 = vsyncadd (%p14986_p9), %s305_s6, 4294963168  ;;  %s11129_s25 = sshll.u32 %s15094_s22, 8  ;;  %s323_s21 = scalar_lea.sflag [#allocation9], %s15094_s22 }
  0x7c   : > { %s15104_s28 = scalar_lea.vmem [#allocation7], %s11129_s25  ;;  %s325_s8 = scalar_lea.vmem [#allocation8], %s15094_s22 }
  0x7d   : > { %14834 = dma.done.wait (%p14986_p9), %s323_s21, 16  }
  0x7e   : > { %14836 = vsyncadd (%p14986_p9), %s323_s21, 4294967280  ;;  %s16920_s11 = sld [smem:[#allocation16_spill]] }
  0x7f   : > { %s16921_s9 = sld [smem:[#allocation24_spill]] }
  0x80   : > { %s16922_s26 = sld [smem:[#allocation15_spill]] }
  0x84   : > { %p366_p6 = scmp.lt.s32.totalorder %s16920_s11, 1 }
  0x86   : > { %s16946_s11 = smov (!%p366_p6, %s16920_s11), 1  ;;  %p11131_p12 = scmp.ne.s32.totalorder %s16922_s26, 0 }
  0x87   : > { %s11130_s12 = sshll.u32 %s16946_s11, 1 }
  0x88   : > { %s15117_s5 = scalar_lea.vmem %s16921_s9, %s11130_s12  ;;  %373 = sbr.rel (%p11131_p12) target bundleno = 143 (0x8f), region = 60 }
  0x8d   : > { %v14887_v0 = vmov 0.0  }
  0x8e   : > { %374 = vst [vmem:[#allocation2] sm:$0xf] %v14887_v0 }
  0x8f PF: > { %v12639_v1 = vld [vmem:[%s15085_s17 + $0x74] ss:$8 sps:$4 sm:$0xff]   ;;  %v12643_v3 = vld [vmem:[%s15085_s17 + $0x70] ss:$8 sps:$4 sm:$0xff]   ;;  %v12645_v5 = vld [vmem:[%s15085_s17 + $0x64] ss:$8 sps:$4 sm:$0xff]   ;;  %v1748_v39 = vlaneseq }
  0x90   : > { %v12641_v2 = vld [vmem:[%s15085_s17 + $0x174] ss:$8 sps:$4 sm:$0xff]   ;;  %9062 = vmatprep.subr.bf16.mxu0 %v12639_v1  ;;  %v12644_v4 = vld [vmem:[%s15085_s17 + $0x170] ss:$8 sps:$4 sm:$0xff]   ;;  %v12647_v6 = vld [vmem:[%s15085_s17 + $0x164] ss:$8 sps:$4 sm:$0xff]  }
  0x91   : > { %9103 = vmatprep.subr.bf16.mxu1 %v12641_v2  ;;  %9063 = vmatpush1.bf16.msra.mxu0 %v12643_v3  ;;  %v12649_v7 = vld [vmem:[%s15085_s17 + $0x60] ss:$8 sps:$4 sm:$0xff]   ;;  %v12651_v9 = vld [vmem:[%s15085_s17 + $0x54] ss:$8 sps:$4 sm:$0xff]   ;;  %v12655_v11 = vld [vmem:[%s15085_s17 + $0x50] ss:$8 sps:$4 sm:$0xff]  }
  0x92   : > { %9104 = vmatpush1.bf16.msra.mxu1 %v12644_v4  ;;  %9064 = vmatprep.subr.bf16.mxu0 %v12645_v5  ;;  %v12650_v8 = vld [vmem:[%s15085_s17 + $0x160] ss:$8 sps:$4 sm:$0xff]   ;;  %v12653_v10 = vld [vmem:[%s15085_s17 + $0x154] ss:$8 sps:$4 sm:$0xff]   ;;  %v12656_v12 = vld [vmem:[%s15085_s17 + $0x150] ss:$8 sps:$4 sm:$0xff]  }
  0x93   : > { %9105 = vmatprep.subr.bf16.mxu1 %v12647_v6  ;;  %v12657_v13 = vld [vmem:[%s15085_s17 + $0x44] ss:$8 sps:$4 sm:$0xff]   ;;  %v12661_v15 = vld [vmem:[%s15085_s17 + $0x40] ss:$8 sps:$4 sm:$0xff]   ;;  %v12663_v17 = vld [vmem:[%s15085_s17 + $0x34] ss:$8 sps:$4 sm:$0xff]  }
  0x94   : > { %v12659_v14 = vld [vmem:[%s15085_s17 + $0x144] ss:$8 sps:$4 sm:$0xff]   ;;  %v12662_v16 = vld [vmem:[%s15085_s17 + $0x140] ss:$8 sps:$4 sm:$0xff]   ;;  %v12665_v18 = vld [vmem:[%s15085_s17 + $0x134] ss:$8 sps:$4 sm:$0xff]  }
  0x95   : > { %9065 = vmatpush1.bf16.msra.mxu0 %v12649_v7  ;;  %v12667_v19 = vld [vmem:[%s15085_s17 + $0x30] ss:$8 sps:$4 sm:$0xff]   ;;  %v12669_v21 = vld [vmem:[%s15085_s17 + $0x24] ss:$8 sps:$4 sm:$0xff]   ;;  %v12673_v23 = vld [vmem:[%s15085_s17 + $0x20] ss:$8 sps:$4 sm:$0xff]  }
  0x96   : > { %9106 = vmatpush1.bf16.msra.mxu1 %v12650_v8  ;;  %9066 = vmatprep.subr.bf16.mxu0 %v12651_v9  ;;  %v12668_v20 = vld [vmem:[%s15085_s17 + $0x130] ss:$8 sps:$4 sm:$0xff]   ;;  %v12671_v22 = vld [vmem:[%s15085_s17 + $0x124] ss:$8 sps:$4 sm:$0xff]   ;;  %v12674_v24 = vld [vmem:[%s15085_s17 + $0x120] ss:$8 sps:$4 sm:$0xff]  }
  0x97   : > { %9107 = vmatprep.subr.bf16.mxu1 %v12653_v10  ;;  %v12675_v25 = vld [vmem:[%s15085_s17 + $0x14] ss:$8 sps:$4 sm:$0xff]   ;;  %v12679_v27 = vld [vmem:[%s15085_s17 + $0x10] ss:$8 sps:$4 sm:$0xff]   ;;  %v12681_v29 = vld [vmem:[%s15085_s17 + $0x4] ss:$8 sps:$4 sm:$0xff]  }
  0x98   : > { %v12677_v26 = vld [vmem:[%s15085_s17 + $0x114] ss:$8 sps:$4 sm:$0xff]   ;;  %v12680_v28 = vld [vmem:[%s15085_s17 + $0x110] ss:$8 sps:$4 sm:$0xff]   ;;  %v12683_v30 = vld [vmem:[%s15085_s17 + $0x104] ss:$8 sps:$4 sm:$0xff]  }
  0x99   : > { %9067 = vmatpush1.bf16.msra.mxu0 %v12655_v11  ;;  %v12685_v31 = vld [vmem:[%s15085_s17] ss:$8 sps:$4 sm:$0xff]   ;;  %v12687_v33 = vld [vmem:[%s15085_s17 + $0xf4] ss:$8 sps:$4 sm:$0xff]   ;;  %s16923_s16 = sld [smem:[#allocation15_spill]]  ;;  %v15160_v44 = vshrl.u32 %v1748_v39, 7 }
  0x9a   : > { %9108 = vmatpush1.bf16.msra.mxu1 %v12656_v12  ;;  %9068 = vmatprep.subr.bf16.mxu0 %v12657_v13  ;;  %v12686_v32 = vld [vmem:[%s15085_s17 + $0x100] ss:$8 sps:$4 sm:$0xff]   ;;  %v12689_v34 = vld [vmem:[%s15085_s17 + $0x1f4] ss:$8 sps:$4 sm:$0xff]   ;;  %v12691_v35 = vld [vmem:[%s15085_s17 + $0xf0] ss:$8 sps:$4 sm:$0xff]  }
  0x9b   : > { %9109 = vmatprep.subr.bf16.mxu1 %v12659_v14  ;;  %v12692_v36 = vld [vmem:[%s15085_s17 + $0x1f0] ss:$8 sps:$4 sm:$0xff]   ;;  %v14888_v37 = vmov 1966171168   ;;  %v12693_v40 = vld [vmem:[%s15085_s17 + $0xe4] ss:$8 sps:$4 sm:$0xff]  }
  0x9c   : > { %v1746_v38 = vunpack.c.l.s4 %v14888_v37  ;;  %v12695_v41 = vld [vmem:[%s15085_s17 + $0x1e4] ss:$8 sps:$4 sm:$0xff]   ;;  %v12697_v42 = vld [vmem:[%s15085_s17 + $0xe0] ss:$8 sps:$4 sm:$0xff]   ;;  %v12699_v46 = vld [vmem:[%s15085_s17 + $0xd4] ss:$8 sps:$4 sm:$0xff]  }
  0x9d   : > { %9069 = vmatpush1.bf16.msra.mxu0 %v12661_v15  ;;  %v12698_v45 = vld [vmem:[%s15085_s17 + $0x1e0] ss:$8 sps:$4 sm:$0xff]   ;;  %v12701_v47 = vld [vmem:[%s15085_s17 + $0x1d4] ss:$8 sps:$4 sm:$0xff]   ;;  %v12703_v48 = vld [vmem:[%s15085_s17 + $0xd0] ss:$8 sps:$4 sm:$0xff]  }
  0x9e   : > { %9110 = vmatpush1.bf16.msra.mxu1 %v12662_v16  ;;  %9070 = vmatprep.subr.bf16.mxu0 %v12663_v17  ;;  %v1747_v43 = vunpack.c.0.s8 %v1746_v38  ;;  %v12704_v49 = vld [vmem:[%s15085_s17 + $0x1d0] ss:$8 sps:$4 sm:$0xff]   ;;  %s16924_s18 = sld [smem:[#allocation22_spill]]  ;;  %v12705_v51 = vld [vmem:[%s15085_s17 + $0xc4] ss:$8 sps:$4 sm:$0xff]  }
  0x9f   : > { %9111 = vmatprep.subr.bf16.mxu1 %v12665_v18  ;;  %s376_s15 = smul.u32 84, %s16923_s16  ;;  %v12707_v52 = vld [vmem:[%s15085_s17 + $0x1c4] ss:$8 sps:$4 sm:$0xff]   ;;  %v12709_v54 = vld [vmem:[%s15085_s17 + $0xc0] ss:$8 sps:$4 sm:$0xff]   ;;  %p12477_p9 = scmp.ne.s32.totalorder %s16923_s16, 1 }
  0xa0   : > { %v15173_v50 = vsub.s32 %v1747_v43, %v15160_v44  ;;  %v12710_v56 = vld [vmem:[%s15085_s17 + $0x1c0] ss:$8 sps:$4 sm:$0xff]   ;;  %v12711_v57 = vld [vmem:[%s15085_s17 + $0xb4] ss:$8 sps:$4 sm:$0xff]   ;;  %v12715_v60 = vld [vmem:[%s15085_s17 + $0xb0] ss:$8 sps:$4 sm:$0xff]  }
  0xa1   : > { %9071 = vmatpush1.bf16.msra.mxu0 %v12667_v19  ;;  %v12713_v58 = vld [vmem:[%s15085_s17 + $0x1b4] ss:$8 sps:$4 sm:$0xff]   ;;  %v12716_v62 = vld [vmem:[%s15085_s17 + $0x1b0] ss:$8 sps:$4 sm:$0xff]   ;;  %v12717_v63 = vld [vmem:[%s15085_s17 + $0xa4] ss:$8 sps:$4 sm:$0xff]  }
  0xa2   : > { %9112 = vmatpush1.bf16.msra.mxu1 %v12668_v20  ;;  %9072 = vmatprep.subr.bf16.mxu0 %v12669_v21  ;;  %v12719_v0 = vld [vmem:[%s15085_s17 + $0x1a4] ss:$8 sps:$4 sm:$0xff]   ;;  %v12721_v3 = vld [vmem:[%s15085_s17 + $0xa0] ss:$8 sps:$4 sm:$0xff]   ;;  %v12723_v5 = vld [vmem:[%s15085_s17 + $0x94] ss:$8 sps:$4 sm:$0xff]  }
  0xa3   : > { %9113 = vmatprep.subr.bf16.mxu1 %v12671_v22  ;;  %v12722_v4 = vld [vmem:[%s15085_s17 + $0x1a0] ss:$8 sps:$4 sm:$0xff]   ;;  %v12725_v6 = vld [vmem:[%s15085_s17 + $0x194] ss:$8 sps:$4 sm:$0xff]   ;;  %v12727_v8 = vld [vmem:[%s15085_s17 + $0x90] ss:$8 sps:$4 sm:$0xff]  }
  0xa4   : > { %s15170_s0 = scalar_lea.vmem %s16924_s18, %s376_s15  ;;  %v12728_v9 = vld [vmem:[%s15085_s17 + $0x190] ss:$8 sps:$4 sm:$0xff]   ;;  %v12729_v10 = vld [vmem:[%s15085_s17 + $0x84] ss:$8 sps:$4 sm:$0xff]   ;;  %v12733_v13 = vld [vmem:[%s15085_s17 + $0x80] ss:$8 sps:$4 sm:$0xff]  }
  0xa5   : > { %9073 = vmatpush1.bf16.msra.mxu0 %v12673_v23  ;;  %v378_v53 = vld [vmem:[%s15170_s0] sm:$0xff]  ;;  %v12731_v11 = vld [vmem:[%s15085_s17 + $0x184] ss:$8 sps:$4 sm:$0xff]   ;;  %v12736_v20 = vld [vmem:[%s15085_s17 + $0x270] ss:$8 sps:$4 sm:$0xff]  }
  0xa6   : > { %9114 = vmatpush1.bf16.msra.mxu1 %v12674_v24  ;;  %9074 = vmatprep.subr.bf16.mxu0 %v12675_v25  ;;  %v1751_v55 = vrot.slane %v378_v53, %v15173_v50  ;;  %v1744_v2 = vcombine.high %v378_v53, %v378_v53  ;;  %v12734_v15 = vld [vmem:[%s15085_s17 + $0x180] ss:$8 sps:$4 sm:$0xff]   ;;  %v12738_v16 = vld [vmem:[%s15085_s17 + $0x274] ss:$8 sps:$4 sm:$0xff]   ;;  %v12739_v21 = vld [vmem:[%s15085_s17 + $0x370] ss:$8 sps:$4 sm:$0xff]  }
  0xa7   : > { %9115 = vmatprep.subr.bf16.mxu1 %v12677_v26  ;;  %v12741_v17 = vld [vmem:[%s15085_s17 + $0x374] ss:$8 sps:$4 sm:$0xff]   ;;  %v12744_v22 = vld [vmem:[%s15085_s17 + $0x264] ss:$8 sps:$4 sm:$0xff]   ;;  %v12742_v25 = vld [vmem:[%s15085_s17 + $0x260] ss:$8 sps:$4 sm:$0xff]  }
  0xa8   : > { %v1759_v59 = vcombine.high %v1751_v55, %v1751_v55  ;;  %v15193_v7 = vrot.slane %v1744_v2, %v15173_v50  ;;  %v1767_v14 = vrot.slane %v1751_v55, %v15173_v50  ;;  %v12747_v23 = vld [vmem:[%s15085_s17 + $0x364] ss:$8 sps:$4 sm:$0xff]   ;;  %v12745_v26 = vld [vmem:[%s15085_s17 + $0x360] ss:$8 sps:$4 sm:$0xff]   ;;  %v12760_v37 = vld [vmem:[%s15085_s17 + $0x230] ss:$8 sps:$4 sm:$0xff]  }
  0xa9   : > { %9075 = vmatpush1.bf16.msra.mxu0 %v12679_v27  ;;  %v12750_v27 = vld [vmem:[%s15085_s17 + $0x254] ss:$8 sps:$4 sm:$0xff]   ;;  %v12763_v38 = vld [vmem:[%s15085_s17 + $0x330] ss:$8 sps:$4 sm:$0xff]   ;;  %v12768_v39 = vld [vmem:[%s15085_s17 + $0x224] ss:$8 sps:$4 sm:$0xff]  }
  0xaa   : > { %9116 = vmatpush1.bf16.msra.mxu1 %v12680_v28  ;;  %9076 = vmatprep.subr.bf16.mxu0 %v12681_v29  ;;  %v1781_v61 = vrot.slane %v1759_v59, %v15173_v50  ;;  %v1760_v12 = vcombine.high %v15193_v7, %v15193_v7  ;;  %v1789_v19 = vcombine.high %v1767_v14, %v1767_v14  ;;  %v12753_v28 = vld [vmem:[%s15085_s17 + $0x354] ss:$8 sps:$4 sm:$0xff]   ;;  %v12748_v29 = vld [vmem:[%s15085_s17 + $0x250] ss:$8 sps:$4 sm:$0xff]   ;;  %v12790_v59 = vld [vmem:[%s15085_s17 + $0x2e0] ss:$8 sps:$4 sm:$0xff]  }
  0xab   : > { %9117 = vmatprep.subr.bf16.mxu1 %v12683_v30  ;;  %v12751_v30 = vld [vmem:[%s15085_s17 + $0x350] ss:$8 sps:$4 sm:$0xff]   ;;  %v12774_v43 = vld [vmem:[%s15085_s17 + $0x214] ss:$8 sps:$4 sm:$0xff]   ;;  %v12807_v2 = vld [vmem:[%s15085_s17 + $0x3c4] ss:$8 sps:$4 sm:$0xff]  }
  0xac   : > { %v1791_v1 = vcombine.high %v1781_v61, %v1781_v61  ;;  %9094 = vmatprep.mubr.bf16.mxu0 %v1781_v61  ;;  %v1788_v18 = vrot.slane %v1760_v12, %v15173_v50  ;;  %v12786_v53 = vld [vmem:[%s15085_s17 + $0x2f4] ss:$8 sps:$4 sm:$0xff]   ;;  %v12784_v55 = vld [vmem:[%s15085_s17 + $0x2f0] ss:$8 sps:$4 sm:$0xff]   ;;  %v12814_v12 = vld [vmem:[%s15085_s17 + $0x2a0] ss:$8 sps:$4 sm:$0xff]  }
  0xad   : > { %9077 = vmatpush1.bf16.msra.mxu0 %v12685_v31  ;;  %v12756_v31 = vld [vmem:[%s15085_s17 + $0x244] ss:$8 sps:$4 sm:$0xff]   ;;  %v12798_v61 = vld [vmem:[%s15085_s17 + $0x2d4] ss:$8 sps:$4 sm:$0xff]  }
  0xae   : > { %9118 = vmatpush1.bf16.msra.mxu1 %v12686_v32  ;;  %9078 = vmatprep.subr.bf16.mxu0 %v12687_v33  ;;  %v1792_v24 = vcombine.high %v1788_v18, %v1788_v18  ;;  %v12759_v32 = vld [vmem:[%s15085_s17 + $0x344] ss:$8 sps:$4 sm:$0xff]   ;;  %v12754_v33 = vld [vmem:[%s15085_s17 + $0x240] ss:$8 sps:$4 sm:$0xff]  }
  0xaf   : > { %9119 = vmatprep.subr.bf16.mxu1 %v12689_v34  ;;  %9135 = vmatprep.mubr.bf16.mxu1 %v1791_v1  ;;  %v12757_v34 = vld [vmem:[%s15085_s17 + $0x340] ss:$8 sps:$4 sm:$0xff]   ;;  %v12804_v1 = vld [vmem:[%s15085_s17 + $0x2c4] ss:$8 sps:$4 sm:$0xff]  }
  0xb1   : > { %9079 = vmatpush2.bf16.msra.mxu0 %v12691_v35  ;;  %v12762_v35 = vld [vmem:[%s15085_s17 + $0x234] ss:$8 sps:$4 sm:$0xff]  }
  0xb2   : > { %9120 = vmatpush2.bf16.msra.mxu1 %v12692_v36  ;;  %9080 = vmatprep.subr.bf16.mxu0 %v12693_v40  ;;  %v12765_v36 = vld [vmem:[%s15085_s17 + $0x334] ss:$8 sps:$4 sm:$0xff]   ;;  %v12771_v40 = vld [vmem:[%s15085_s17 + $0x324] ss:$8 sps:$4 sm:$0xff]  }
  0xb3   : > { %9121 = vmatprep.subr.bf16.mxu1 %v12695_v41  ;;  %v12766_v41 = vld [vmem:[%s15085_s17 + $0x220] ss:$8 sps:$4 sm:$0xff]  }
  0xb5   : > { %9081 = vmatpush2.bf16.msra.mxu0 %v12697_v42  ;;  %v12769_v42 = vld [vmem:[%s15085_s17 + $0x320] ss:$8 sps:$4 sm:$0xff]  }
  0xb6   : > { %9122 = vmatpush2.bf16.msra.mxu1 %v12698_v45  ;;  %9082 = vmatprep.subr.bf16.mxu0 %v12699_v46  ;;  %v12777_v45 = vld [vmem:[%s15085_s17 + $0x314] ss:$8 sps:$4 sm:$0xff]   ;;  %v12772_v46 = vld [vmem:[%s15085_s17 + $0x210] ss:$8 sps:$4 sm:$0xff]  }
  0xb7   : > { %9123 = vmatprep.subr.bf16.mxu1 %v12701_v47  ;;  %v12775_v47 = vld [vmem:[%s15085_s17 + $0x310] ss:$8 sps:$4 sm:$0xff]  }
  0xb9   : > { %9083 = vmatpush2.bf16.msra.mxu0 %v12703_v48  ;;  %v12780_v48 = vld [vmem:[%s15085_s17 + $0x204] ss:$8 sps:$4 sm:$0xff]  }
  0xba   : > { %9124 = vmatpush2.bf16.msra.mxu1 %v12704_v49  ;;  %9084 = vmatprep.subr.bf16.mxu0 %v12705_v51  ;;  %v12783_v49 = vld [vmem:[%s15085_s17 + $0x304] ss:$8 sps:$4 sm:$0xff]   ;;  %v12778_v51 = vld [vmem:[%s15085_s17 + $0x200] ss:$8 sps:$4 sm:$0xff]  }
  0xbb   : > { %9125 = vmatprep.subr.bf16.mxu1 %v12707_v52  ;;  %v12781_v52 = vld [vmem:[%s15085_s17 + $0x300] ss:$8 sps:$4 sm:$0xff]  }
  0xbd   : > { %9085 = vmatpush2.bf16.msra.mxu0 %v12709_v54  ;;  %v12789_v54 = vld [vmem:[%s15085_s17 + $0x3f4] ss:$8 sps:$4 sm:$0xff]  }
  0xbe   : > { %9126 = vmatpush2.bf16.msra.mxu1 %v12710_v56  ;;  %9086 = vmatprep.subr.bf16.mxu0 %v12711_v57  ;;  %v12787_v56 = vld [vmem:[%s15085_s17 + $0x3f0] ss:$8 sps:$4 sm:$0xff]   ;;  %v12792_v57 = vld [vmem:[%s15085_s17 + $0x2e4] ss:$8 sps:$4 sm:$0xff]  }
  0xbf   : > { %9127 = vmatprep.subr.bf16.mxu1 %v12713_v58  ;;  %v12795_v58 = vld [vmem:[%s15085_s17 + $0x3e4] ss:$8 sps:$4 sm:$0xff]  }
  0xc1   : > { %9087 = vmatpush2.bf16.msra.mxu0 %v12715_v60  ;;  %v12793_v60 = vld [vmem:[%s15085_s17 + $0x3e0] ss:$8 sps:$4 sm:$0xff]  }
  0xc2   : > { %9128 = vmatpush2.bf16.msra.mxu1 %v12716_v62  ;;  %9088 = vmatprep.subr.bf16.mxu0 %v12717_v63  ;;  %v12801_v62 = vld [vmem:[%s15085_s17 + $0x3d4] ss:$8 sps:$4 sm:$0xff]   ;;  %v12796_v63 = vld [vmem:[%s15085_s17 + $0x2d0] ss:$8 sps:$4 sm:$0xff]  }
  0xc3   : > { %9129 = vmatprep.subr.bf16.mxu1 %v12719_v0  ;;  %v12799_v0 = vld [vmem:[%s15085_s17 + $0x3d0] ss:$8 sps:$4 sm:$0xff]  }
  0xc5   : > { %9089 = vmatpush2.bf16.msra.mxu0 %v12721_v3  ;;  %v12802_v3 = vld [vmem:[%s15085_s17 + $0x2c0] ss:$8 sps:$4 sm:$0xff]  }
  0xc6   : > { %9130 = vmatpush2.bf16.msra.mxu1 %v12722_v4  ;;  %9090 = vmatprep.subr.bf16.mxu0 %v12723_v5  ;;  %v12805_v4 = vld [vmem:[%s15085_s17 + $0x3c0] ss:$8 sps:$4 sm:$0xff]   ;;  %v12810_v5 = vld [vmem:[%s15085_s17 + $0x2b4] ss:$8 sps:$4 sm:$0xff]  }
  0xc7   : > { %9131 = vmatprep.subr.bf16.mxu1 %v12725_v6  ;;  %v12813_v6 = vld [vmem:[%s15085_s17 + $0x3b4] ss:$8 sps:$4 sm:$0xff]  }
  0xc9   : > { %9091 = vmatpush2.bf16.msra.mxu0 %v12727_v8  ;;  %v12808_v8 = vld [vmem:[%s15085_s17 + $0x2b0] ss:$8 sps:$4 sm:$0xff]  }
  0xca   : > { %9132 = vmatpush2.bf16.msra.mxu1 %v12728_v9  ;;  %9092 = vmatprep.subr.bf16.mxu0 %v12729_v10  ;;  %v12811_v9 = vld [vmem:[%s15085_s17 + $0x3b0] ss:$8 sps:$4 sm:$0xff]   ;;  %v12816_v10 = vld [vmem:[%s15085_s17 + $0x2a4] ss:$8 sps:$4 sm:$0xff]  }
  0xcb   : > { %9133 = vmatprep.subr.bf16.mxu1 %v12731_v11  ;;  %v12819_v11 = vld [vmem:[%s15085_s17 + $0x3a4] ss:$8 sps:$4 sm:$0xff]  }
  0xcd   : > { %9093 = vmatpush2.bf16.msra.mxu0 %v12733_v13  ;;  %v12817_v13 = vld [vmem:[%s15085_s17 + $0x3a0] ss:$8 sps:$4 sm:$0xff]  }
  0xce   : > { %9134 = vmatpush2.bf16.msra.mxu1 %v12734_v15  ;;  %9144 = vmatprep.subr.bf16.mxu0 %v12738_v16  ;;  %v12825_v15 = vld [vmem:[%s15085_s17 + $0x394] ss:$8 sps:$4 sm:$0xff]   ;;  %v12820_v16 = vld [vmem:[%s15085_s17 + $0x290] ss:$8 sps:$4 sm:$0xff]  }
  0xcf   : > { %9185 = vmatprep.subr.bf16.mxu1 %v12741_v17  ;;  %v12823_v17 = vld [vmem:[%s15085_s17 + $0x390] ss:$8 sps:$4 sm:$0xff]  }
  0xd0   : > { %9095 = vmatmul.mubr.bf16.vlgmr.msra.gmra.mxu0 %v1767_v14  ;;  %v12822_v14 = vld [vmem:[%s15085_s17 + $0x294] ss:$8 sps:$4 sm:$0xff]  }
  0xd1   : > { %9136 = vmatmul.mubr.bf16.vlgmr.msra.gmra.mxu1 %v1789_v19  ;;  %9145 = vmatpush1.bf16.msra.mxu0 %v12736_v20  ;;  %v12831_v19 = vld [vmem:[%s15085_s17 + $0x384] ss:$8 sps:$4 sm:$0xff]   ;;  %v12826_v20 = vld [vmem:[%s15085_s17 + $0x280] ss:$8 sps:$4 sm:$0xff]  }
  0xd2   : > { %9186 = vmatpush1.bf16.msra.mxu1 %v12739_v21  ;;  %9146 = vmatprep.subr.bf16.mxu0 %v12744_v22  ;;  %v1774_v21 = vrot.slane %v15193_v7, %v15173_v50  ;;  %v12829_v22 = vld [vmem:[%s15085_s17 + $0x380] ss:$8 sps:$4 sm:$0xff]   ;;  %v12840_v7 = vld [vmem:[%s15085_s17 + $0x464] ss:$8 sps:$4 sm:$0xff]  }
  0xd3   : > { %9187 = vmatprep.subr.bf16.mxu1 %v12747_v23  ;;  %9176 = vmatprep.mubr.bf16.mxu0 %v1788_v18  ;;  %v12828_v18 = vld [vmem:[%s15085_s17 + $0x284] ss:$8 sps:$4 sm:$0xff]   ;;  %v12834_v23 = vld [vmem:[%s15085_s17 + $0x474] ss:$8 sps:$4 sm:$0xff]  }
  0xd4   : > { %9217 = vmatprep.mubr.bf16.mxu1 %v1792_v24  ;;  %v12837_v24 = vld [vmem:[%s15085_s17 + $0x574] ss:$8 sps:$4 sm:$0xff]  }
  0xd5   : > { %9147 = vmatpush1.bf16.msra.mxu0 %v12742_v25  ;;  %v1790_v25 = vcombine.high %v1774_v21, %v1774_v21 }
  0xd6   : > { %9188 = vmatpush1.bf16.msra.mxu1 %v12745_v26  ;;  %9148 = vmatprep.subr.bf16.mxu0 %v12750_v27  ;;  %v12832_v26 = vld [vmem:[%s15085_s17 + $0x470] ss:$8 sps:$4 sm:$0xff]  }
  0xd7   : > { %9189 = vmatprep.subr.bf16.mxu1 %v12753_v28  ;;  %v12835_v27 = vld [vmem:[%s15085_s17 + $0x570] ss:$8 sps:$4 sm:$0xff]   ;;  %v15276_v28 = vld [vmem:[%s15170_s0 + $0x8] sm:$0xff] }
  0xd9   : > { %9149 = vmatpush1.bf16.msra.mxu0 %v12748_v29  ;;  %v12843_v29 = vld [vmem:[%s15085_s17 + $0x564] ss:$8 sps:$4 sm:$0xff]  }
  0xda   : > { %9190 = vmatpush1.bf16.msra.mxu1 %v12751_v30  ;;  %9150 = vmatprep.subr.bf16.mxu0 %v12756_v31  ;;  %v15282_v30 = vrot.slane %v15276_v28, %v15173_v50 }
  0xdb   : > { %9191 = vmatprep.subr.bf16.mxu1 %v12759_v32  ;;  %v12838_v32 = vld [vmem:[%s15085_s17 + $0x460] ss:$8 sps:$4 sm:$0xff]  }
  0xdc   : > { %v1808_v31 = vcombine.high %v15282_v30, %v15282_v30 }
  0xdd   : > { %9151 = vmatpush1.bf16.msra.mxu0 %v12754_v33  ;;  %v12841_v33 = vld [vmem:[%s15085_s17 + $0x560] ss:$8 sps:$4 sm:$0xff]  }
  0xde   : > { %9192 = vmatpush1.bf16.msra.mxu1 %v12757_v34  ;;  %9152 = vmatprep.subr.bf16.mxu0 %v12762_v35  ;;  %v12846_v34 = vld [vmem:[%s15085_s17 + $0x454] ss:$8 sps:$4 sm:$0xff]  }
  0xdf   : > { %9193 = vmatprep.subr.bf16.mxu1 %v12765_v36  ;;  %v12849_v35 = vld [vmem:[%s15085_s17 + $0x554] ss:$8 sps:$4 sm:$0xff]   ;;  %v1830_v36 = vrot.slane %v1808_v31, %v15173_v50 }
  0xe1   : > { %9153 = vmatpush1.bf16.msra.mxu0 %v12760_v37  ;;  %v1840_v37 = vcombine.high %v1830_v36, %v1830_v36 }
  0xe2   : > { %9194 = vmatpush1.bf16.msra.mxu1 %v12763_v38  ;;  %9154 = vmatprep.subr.bf16.mxu0 %v12768_v39  ;;  %v12844_v38 = vld [vmem:[%s15085_s17 + $0x450] ss:$8 sps:$4 sm:$0xff]  }
  0xe3   : > { %9195 = vmatprep.subr.bf16.mxu1 %v12771_v40  ;;  %v12847_v39 = vld [vmem:[%s15085_s17 + $0x550] ss:$8 sps:$4 sm:$0xff]   ;;  %v12852_v40 = vld [vmem:[%s15085_s17 + $0x444] ss:$8 sps:$4 sm:$0xff]  }
  0xe5   : > { %9155 = vmatpush1.bf16.msra.mxu0 %v12766_v41  ;;  %v12855_v41 = vld [vmem:[%s15085_s17 + $0x544] ss:$8 sps:$4 sm:$0xff]  }
  0xe6   : > { %9196 = vmatpush1.bf16.msra.mxu1 %v12769_v42  ;;  %9156 = vmatprep.subr.bf16.mxu0 %v12774_v43  ;;  %v12850_v42 = vld [vmem:[%s15085_s17 + $0x440] ss:$8 sps:$4 sm:$0xff]  }
  0xe7   : > { %9197 = vmatprep.subr.bf16.mxu1 %v12777_v45  ;;  %v12853_v43 = vld [vmem:[%s15085_s17 + $0x540] ss:$8 sps:$4 sm:$0xff]   ;;  %v12858_v45 = vld [vmem:[%s15085_s17 + $0x434] ss:$8 sps:$4 sm:$0xff]  }
  0xe9   : > { %9157 = vmatpush1.bf16.msra.mxu0 %v12772_v46  ;;  %v12861_v46 = vld [vmem:[%s15085_s17 + $0x534] ss:$8 sps:$4 sm:$0xff]  }
  0xea   : > { %9198 = vmatpush1.bf16.msra.mxu1 %v12775_v47  ;;  %9158 = vmatprep.subr.bf16.mxu0 %v12780_v48  ;;  %v12856_v47 = vld [vmem:[%s15085_s17 + $0x430] ss:$8 sps:$4 sm:$0xff]  }
  0xeb   : > { %9199 = vmatprep.subr.bf16.mxu1 %v12783_v49  ;;  %v12859_v48 = vld [vmem:[%s15085_s17 + $0x530] ss:$8 sps:$4 sm:$0xff]   ;;  %v12864_v49 = vld [vmem:[%s15085_s17 + $0x424] ss:$8 sps:$4 sm:$0xff]  }
  0xed   : > { %9159 = vmatpush1.bf16.msra.mxu0 %v12778_v51  ;;  %v12867_v51 = vld [vmem:[%s15085_s17 + $0x524] ss:$8 sps:$4 sm:$0xff]  }
  0xee   : > { %9200 = vmatpush1.bf16.msra.mxu1 %v12781_v52  ;;  %9160 = vmatprep.subr.bf16.mxu0 %v12786_v53  ;;  %v12862_v52 = vld [vmem:[%s15085_s17 + $0x420] ss:$8 sps:$4 sm:$0xff]  }
  0xef   : > { %9201 = vmatprep.subr.bf16.mxu1 %v12789_v54  ;;  %v12865_v53 = vld [vmem:[%s15085_s17 + $0x520] ss:$8 sps:$4 sm:$0xff]   ;;  %v12870_v54 = vld [vmem:[%s15085_s17 + $0x414] ss:$8 sps:$4 sm:$0xff]  }
  0xf1   : > { %9161 = vmatpush2.bf16.msra.mxu0 %v12784_v55  ;;  %v12873_v55 = vld [vmem:[%s15085_s17 + $0x514] ss:$8 sps:$4 sm:$0xff]  }
  0xf2   : > { %9202 = vmatpush2.bf16.msra.mxu1 %v12787_v56  ;;  %9162 = vmatprep.subr.bf16.mxu0 %v12792_v57  ;;  %v12868_v56 = vld [vmem:[%s15085_s17 + $0x410] ss:$8 sps:$4 sm:$0xff]  }
  0xf3   : > { %9203 = vmatprep.subr.bf16.mxu1 %v12795_v58  ;;  %v12871_v57 = vld [vmem:[%s15085_s17 + $0x510] ss:$8 sps:$4 sm:$0xff]   ;;  %v12876_v58 = vld [vmem:[%s15085_s17 + $0x404] ss:$8 sps:$4 sm:$0xff]  }
  0xf5   : > { %9163 = vmatpush2.bf16.msra.mxu0 %v12790_v59  ;;  %v12879_v59 = vld [vmem:[%s15085_s17 + $0x504] ss:$8 sps:$4 sm:$0xff]  }
  0xf6   : > { %9204 = vmatpush2.bf16.msra.mxu1 %v12793_v60  ;;  %9164 = vmatprep.subr.bf16.mxu0 %v12798_v61  ;;  %v12874_v60 = vld [vmem:[%s15085_s17 + $0x400] ss:$8 sps:$4 sm:$0xff]  }
  0xf7   : > { %9205 = vmatprep.subr.bf16.mxu1 %v12801_v62  ;;  %v12877_v61 = vld [vmem:[%s15085_s17 + $0x500] ss:$8 sps:$4 sm:$0xff]   ;;  %v12882_v62 = vld [vmem:[%s15085_s17 + $0x4f4] ss:$8 sps:$4 sm:$0xff]  }
  0xf9   : > { %9165 = vmatpush2.bf16.msra.mxu0 %v12796_v63  ;;  %v12885_v63 = vld [vmem:[%s15085_s17 + $0x5f4] ss:$8 sps:$4 sm:$0xff]  }
  0xfa   : > { %9206 = vmatpush2.bf16.msra.mxu1 %v12799_v0  ;;  %9166 = vmatprep.subr.bf16.mxu0 %v12804_v1  ;;  %v12880_v0 = vld [vmem:[%s15085_s17 + $0x4f0] ss:$8 sps:$4 sm:$0xff]  }
  0xfb   : > { %9207 = vmatprep.subr.bf16.mxu1 %v12807_v2  ;;  %v12883_v1 = vld [vmem:[%s15085_s17 + $0x5f0] ss:$8 sps:$4 sm:$0xff]   ;;  %v12888_v2 = vld [vmem:[%s15085_s17 + $0x4e4] ss:$8 sps:$4 sm:$0xff]  }
  0xfd   : > { %9167 = vmatpush2.bf16.msra.mxu0 %v12802_v3  ;;  %v12891_v3 = vld [vmem:[%s15085_s17 + $0x5e4] ss:$8 sps:$4 sm:$0xff]  }
  0xfe   : > { %9208 = vmatpush2.bf16.msra.mxu1 %v12805_v4  ;;  %9168 = vmatprep.subr.bf16.mxu0 %v12810_v5  ;;  %v12886_v4 = vld [vmem:[%s15085_s17 + $0x4e0] ss:$8 sps:$4 sm:$0xff]  }
  0xff   : > { %9209 = vmatprep.subr.bf16.mxu1 %v12813_v6  ;;  %v12889_v5 = vld [vmem:[%s15085_s17 + $0x5e0] ss:$8 sps:$4 sm:$0xff]   ;;  %v12894_v6 = vld [vmem:[%s15085_s17 + $0x4d4] ss:$8 sps:$4 sm:$0xff]  }
 0x101   : > { %9169 = vmatpush2.bf16.msra.mxu0 %v12808_v8  ;;  %v12897_v8 = vld [vmem:[%s15085_s17 + $0x5d4] ss:$8 sps:$4 sm:$0xff]  }
 0x102   : > { %9210 = vmatpush2.bf16.msra.mxu1 %v12811_v9  ;;  %9170 = vmatprep.subr.bf16.mxu0 %v12816_v10  ;;  %v12892_v9 = vld [vmem:[%s15085_s17 + $0x4d0] ss:$8 sps:$4 sm:$0xff]  }
 0x103   : > { %9211 = vmatprep.subr.bf16.mxu1 %v12819_v11  ;;  %v12895_v10 = vld [vmem:[%s15085_s17 + $0x5d0] ss:$8 sps:$4 sm:$0xff]   ;;  %v12900_v11 = vld [vmem:[%s15085_s17 + $0x4c4] ss:$8 sps:$4 sm:$0xff]  }
 0x105   : > { %9171 = vmatpush2.bf16.msra.mxu0 %v12814_v12  ;;  %v12903_v12 = vld [vmem:[%s15085_s17 + $0x5c4] ss:$8 sps:$4 sm:$0xff]  }
 0x106   : > { %9212 = vmatpush2.bf16.msra.mxu1 %v12817_v13  ;;  %9172 = vmatprep.subr.bf16.mxu0 %v12822_v14  ;;  %v12898_v13 = vld [vmem:[%s15085_s17 + $0x4c0] ss:$8 sps:$4 sm:$0xff]  }
 0x107   : > { %9213 = vmatprep.subr.bf16.mxu1 %v12825_v15  ;;  %v12901_v14 = vld [vmem:[%s15085_s17 + $0x5c0] ss:$8 sps:$4 sm:$0xff]   ;;  %v12906_v15 = vld [vmem:[%s15085_s17 + $0x4b4] ss:$8 sps:$4 sm:$0xff]  }
 0x109   : > { %9173 = vmatpush2.bf16.msra.mxu0 %v12820_v16  ;;  %v12909_v16 = vld [vmem:[%s15085_s17 + $0x5b4] ss:$8 sps:$4 sm:$0xff]  }
 0x10a   : > { %9214 = vmatpush2.bf16.msra.mxu1 %v12823_v17  ;;  %9174 = vmatprep.subr.bf16.mxu0 %v12828_v18  ;;  %v12904_v17 = vld [vmem:[%s15085_s17 + $0x4b0] ss:$8 sps:$4 sm:$0xff]  }
 0x10b   : > { %9215 = vmatprep.subr.bf16.mxu1 %v12831_v19  ;;  %v12907_v18 = vld [vmem:[%s15085_s17 + $0x5b0] ss:$8 sps:$4 sm:$0xff]   ;;  %v12912_v19 = vld [vmem:[%s15085_s17 + $0x4a4] ss:$8 sps:$4 sm:$0xff]  }
 0x10d   : > { %9175 = vmatpush2.bf16.msra.mxu0 %v12826_v20  ;;  %v12915_v20 = vld [vmem:[%s15085_s17 + $0x5a4] ss:$8 sps:$4 sm:$0xff]  }
 0x10e   : > { %9216 = vmatpush2.bf16.msra.mxu1 %v12829_v22  ;;  %9226 = vmatprep.subr.bf16.mxu0 %v12834_v23  ;;  %v12910_v22 = vld [vmem:[%s15085_s17 + $0x4a0] ss:$8 sps:$4 sm:$0xff]  }
 0x10f   : > { %9267 = vmatprep.subr.bf16.mxu1 %v12837_v24  ;;  %v12913_v23 = vld [vmem:[%s15085_s17 + $0x5a0] ss:$8 sps:$4 sm:$0xff]   ;;  %v12918_v24 = vld [vmem:[%s15085_s17 + $0x494] ss:$8 sps:$4 sm:$0xff]  }
 0x110   : > { %9177 = vmatmul.mubr.bf16.vlgmr.msra.gmra.mxu0 %v1774_v21  ;;  %v1793_v21 = vcombine.high %v15276_v28, %v15276_v28  ;;  %v12919_v28 = vld [vmem:[%s15085_s17 + $0x590] ss:$8 sps:$4 sm:$0xff]  }
 0x111   : > { %9218 = vmatmul.mubr.bf16.vlgmr.msra.gmra.mxu1 %v1790_v25  ;;  %9227 = vmatpush1.bf16.msra.mxu0 %v12832_v26  ;;  %v12921_v25 = vld [vmem:[%s15085_s17 + $0x594] ss:$8 sps:$4 sm:$0xff]  }
 0x112   : > { %9268 = vmatpush1.bf16.msra.mxu1 %v12835_v27  ;;  %9228 = vmatprep.subr.bf16.mxu0 %v12840_v7  ;;  %v15342_v26 = vrot.slane %v1793_v21, %v15173_v50  ;;  %v12916_v27 = vld [vmem:[%s15085_s17 + $0x490] ss:$8 sps:$4 sm:$0xff]   ;;  %v12924_v7 = vld [vmem:[%s15085_s17 + $0x484] ss:$8 sps:$4 sm:$0xff]  }
 0x113   : > { %9269 = vmatprep.subr.bf16.mxu1 %v12843_v29  ;;  %9258 = vmatprep.mubr.bf16.mxu0 %v1830_v36  ;;  %v12927_v29 = vld [vmem:[%s15085_s17 + $0x584] ss:$8 sps:$4 sm:$0xff]   ;;  %v12933_v36 = vld [vmem:[%s15085_s17 + $0x774] ss:$8 sps:$4 sm:$0xff]  }
 0x114   : > { %9299 = vmatprep.mubr.bf16.mxu1 %v1840_v37  ;;  %v1809_v31 = vcombine.high %v15342_v26, %v15342_v26  ;;  %v12999_v21 = vld [vmem:[%s15085_s17 + $0x7c4] ss:$8 sps:$4 sm:$0xff]  }
 0x115   : > { %9229 = vmatpush1.bf16.msra.mxu0 %v12838_v32  ;;  %v1816_v32 = vrot.slane %v15282_v30, %v15173_v50  ;;  %v12931_v30 = vld [vmem:[%s15085_s17 + $0x770] ss:$8 sps:$4 sm:$0xff]  }
 0x116   : > { %9270 = vmatpush1.bf16.msra.mxu1 %v12841_v33  ;;  %9230 = vmatprep.subr.bf16.mxu0 %v12846_v34  ;;  %v12922_v33 = vld [vmem:[%s15085_s17 + $0x480] ss:$8 sps:$4 sm:$0xff]   ;;  %v1837_v37 = vrot.slane %v1809_v31, %v15173_v50 }
 0x117   : > { %9271 = vmatprep.subr.bf16.mxu1 %v12849_v35  ;;  %v12925_v34 = vld [vmem:[%s15085_s17 + $0x580] ss:$8 sps:$4 sm:$0xff]   ;;  %v12930_v35 = vld [vmem:[%s15085_s17 + $0x674] ss:$8 sps:$4 sm:$0xff]  }
 0x118   : > { %v13006_v31 = vld [vmem:[%s15085_s17 + $0x6a0] ss:$8 sps:$4 sm:$0xff]  }
 0x119   : > { %9231 = vmatpush1.bf16.msra.mxu0 %v12844_v38  ;;  %v1838_v38 = vcombine.high %v1816_v32, %v1816_v32 }
 0x11a   : > { %9272 = vmatpush1.bf16.msra.mxu1 %v12847_v39  ;;  %9232 = vmatprep.subr.bf16.mxu0 %v12852_v40  ;;  %v12928_v39 = vld [vmem:[%s15085_s17 + $0x670] ss:$8 sps:$4 sm:$0xff]   ;;  %v12936_v40 = vld [vmem:[%s15085_s17 + $0x664] ss:$8 sps:$4 sm:$0xff]  }
 0x11b   : > { %9273 = vmatprep.subr.bf16.mxu1 %v12855_v41  ;;  %v12939_v41 = vld [vmem:[%s15085_s17 + $0x764] ss:$8 sps:$4 sm:$0xff]  }
 0x11d   : > { %9233 = vmatpush1.bf16.msra.mxu0 %v12850_v42  ;;  %v1841_v42 = vcombine.high %v1837_v37, %v1837_v37 }
 0x11e   : > { %9274 = vmatpush1.bf16.msra.mxu1 %v12853_v43  ;;  %9234 = vmatprep.subr.bf16.mxu0 %v12858_v45  ;;  %v12934_v43 = vld [vmem:[%s15085_s17 + $0x660] ss:$8 sps:$4 sm:$0xff]  }
 0x11f   : > { %9275 = vmatprep.subr.bf16.mxu1 %v12861_v46  ;;  %v12937_v45 = vld [vmem:[%s15085_s17 + $0x760] ss:$8 sps:$4 sm:$0xff]   ;;  %v12942_v46 = vld [vmem:[%s15085_s17 + $0x654] ss:$8 sps:$4 sm:$0xff]  }
 0x121   : > { %9235 = vmatpush1.bf16.msra.mxu0 %v12856_v47  ;;  %v12945_v47 = vld [vmem:[%s15085_s17 + $0x754] ss:$8 sps:$4 sm:$0xff]  }
 0x122   : > { %9276 = vmatpush1.bf16.msra.mxu1 %v12859_v48  ;;  %9236 = vmatprep.subr.bf16.mxu0 %v12864_v49  ;;  %v12940_v48 = vld [vmem:[%s15085_s17 + $0x650] ss:$8 sps:$4 sm:$0xff]  }
 0x123   : > { %9277 = vmatprep.subr.bf16.mxu1 %v12867_v51  ;;  %v12943_v49 = vld [vmem:[%s15085_s17 + $0x750] ss:$8 sps:$4 sm:$0xff]   ;;  %v12948_v51 = vld [vmem:[%s15085_s17 + $0x644] ss:$8 sps:$4 sm:$0xff]  }
 0x125   : > { %9237 = vmatpush1.bf16.msra.mxu0 %v12862_v52  ;;  %v12951_v52 = vld [vmem:[%s15085_s17 + $0x744] ss:$8 sps:$4 sm:$0xff]  }
 0x126   : > { %9278 = vmatpush1.bf16.msra.mxu1 %v12865_v53  ;;  %9238 = vmatprep.subr.bf16.mxu0 %v12870_v54  ;;  %v12946_v53 = vld [vmem:[%s15085_s17 + $0x640] ss:$8 sps:$4 sm:$0xff]  }
 0x127   : > { %9279 = vmatprep.subr.bf16.mxu1 %v12873_v55  ;;  %v12949_v54 = vld [vmem:[%s15085_s17 + $0x740] ss:$8 sps:$4 sm:$0xff]   ;;  %v12954_v55 = vld [vmem:[%s15085_s17 + $0x634] ss:$8 sps:$4 sm:$0xff]  }
 0x129   : > { %9239 = vmatpush1.bf16.msra.mxu0 %v12868_v56  ;;  %v12957_v56 = vld [vmem:[%s15085_s17 + $0x734] ss:$8 sps:$4 sm:$0xff]  }
 0x12a   : > { %9280 = vmatpush1.bf16.msra.mxu1 %v12871_v57  ;;  %9240 = vmatprep.subr.bf16.mxu0 %v12876_v58  ;;  %v12952_v57 = vld [vmem:[%s15085_s17 + $0x630] ss:$8 sps:$4 sm:$0xff]  }
 0x12b   : > { %9281 = vmatprep.subr.bf16.mxu1 %v12879_v59  ;;  %v12955_v58 = vld [vmem:[%s15085_s17 + $0x730] ss:$8 sps:$4 sm:$0xff]   ;;  %v12960_v59 = vld [vmem:[%s15085_s17 + $0x624] ss:$8 sps:$4 sm:$0xff]  }
 0x12d   : > { %9241 = vmatpush1.bf16.msra.mxu0 %v12874_v60  ;;  %v12963_v60 = vld [vmem:[%s15085_s17 + $0x724] ss:$8 sps:$4 sm:$0xff]  }
 0x12e   : > { %9282 = vmatpush1.bf16.msra.mxu1 %v12877_v61  ;;  %9242 = vmatprep.subr.bf16.mxu0 %v12882_v62  ;;  %v12958_v61 = vld [vmem:[%s15085_s17 + $0x620] ss:$8 sps:$4 sm:$0xff]  }
 0x12f   : > { %9283 = vmatprep.subr.bf16.mxu1 %v12885_v63  ;;  %v12961_v62 = vld [vmem:[%s15085_s17 + $0x720] ss:$8 sps:$4 sm:$0xff]   ;;  %v12966_v63 = vld [vmem:[%s15085_s17 + $0x614] ss:$8 sps:$4 sm:$0xff]  }
 0x131   : > { %9243 = vmatpush2.bf16.msra.mxu0 %v12880_v0  ;;  %v12969_v0 = vld [vmem:[%s15085_s17 + $0x714] ss:$8 sps:$4 sm:$0xff]  }
 0x132   : > { %9284 = vmatpush2.bf16.msra.mxu1 %v12883_v1  ;;  %9244 = vmatprep.subr.bf16.mxu0 %v12888_v2  ;;  %v12964_v1 = vld [vmem:[%s15085_s17 + $0x610] ss:$8 sps:$4 sm:$0xff]  }
 0x133   : > { %9285 = vmatprep.subr.bf16.mxu1 %v12891_v3  ;;  %v12967_v2 = vld [vmem:[%s15085_s17 + $0x710] ss:$8 sps:$4 sm:$0xff]   ;;  %v12972_v3 = vld [vmem:[%s15085_s17 + $0x604] ss:$8 sps:$4 sm:$0xff]  }
 0x135   : > { %9245 = vmatpush2.bf16.msra.mxu0 %v12886_v4  ;;  %v12975_v4 = vld [vmem:[%s15085_s17 + $0x704] ss:$8 sps:$4 sm:$0xff]  }
 0x136   : > { %9286 = vmatpush2.bf16.msra.mxu1 %v12889_v5  ;;  %9246 = vmatprep.subr.bf16.mxu0 %v12894_v6  ;;  %v12970_v5 = vld [vmem:[%s15085_s17 + $0x600] ss:$8 sps:$4 sm:$0xff]  }
 0x137   : > { %9287 = vmatprep.subr.bf16.mxu1 %v12897_v8  ;;  %v12973_v6 = vld [vmem:[%s15085_s17 + $0x700] ss:$8 sps:$4 sm:$0xff]   ;;  %v12978_v8 = vld [vmem:[%s15085_s17 + $0x6f4] ss:$8 sps:$4 sm:$0xff]  }
 0x139   : > { %9247 = vmatpush2.bf16.msra.mxu0 %v12892_v9  ;;  %v12981_v9 = vld [vmem:[%s15085_s17 + $0x7f4] ss:$8 sps:$4 sm:$0xff]  }
 0x13a   : > { %9288 = vmatpush2.bf16.msra.mxu1 %v12895_v10  ;;  %9248 = vmatprep.subr.bf16.mxu0 %v12900_v11  ;;  %v12976_v10 = vld [vmem:[%s15085_s17 + $0x6f0] ss:$8 sps:$4 sm:$0xff]  }
 0x13b   : > { %9289 = vmatprep.subr.bf16.mxu1 %v12903_v12  ;;  %v12979_v11 = vld [vmem:[%s15085_s17 + $0x7f0] ss:$8 sps:$4 sm:$0xff]   ;;  %v12984_v12 = vld [vmem:[%s15085_s17 + $0x6e4] ss:$8 sps:$4 sm:$0xff]  }
 0x13d   : > { %9249 = vmatpush2.bf16.msra.mxu0 %v12898_v13  ;;  %v12987_v13 = vld [vmem:[%s15085_s17 + $0x7e4] ss:$8 sps:$4 sm:$0xff]  }
 0x13e   : > { %9290 = vmatpush2.bf16.msra.mxu1 %v12901_v14  ;;  %9250 = vmatprep.subr.bf16.mxu0 %v12906_v15  ;;  %v12982_v14 = vld [vmem:[%s15085_s17 + $0x6e0] ss:$8 sps:$4 sm:$0xff]  }
 0x13f   : > { %9291 = vmatprep.subr.bf16.mxu1 %v12909_v16  ;;  %v12985_v15 = vld [vmem:[%s15085_s17 + $0x7e0] ss:$8 sps:$4 sm:$0xff]   ;;  %v12990_v16 = vld [vmem:[%s15085_s17 + $0x6d4] ss:$8 sps:$4 sm:$0xff]  }
 0x141   : > { %9251 = vmatpush2.bf16.msra.mxu0 %v12904_v17  ;;  %v12993_v17 = vld [vmem:[%s15085_s17 + $0x7d4] ss:$8 sps:$4 sm:$0xff]  }
 0x142   : > { %9292 = vmatpush2.bf16.msra.mxu1 %v12907_v18  ;;  %9252 = vmatprep.subr.bf16.mxu0 %v12912_v19  ;;  %v12988_v18 = vld [vmem:[%s15085_s17 + $0x6d0] ss:$8 sps:$4 sm:$0xff]  }
 0x143   : > { %9293 = vmatprep.subr.bf16.mxu1 %v12915_v20  ;;  %v12991_v19 = vld [vmem:[%s15085_s17 + $0x7d0] ss:$8 sps:$4 sm:$0xff]   ;;  %v12996_v20 = vld [vmem:[%s15085_s17 + $0x6c4] ss:$8 sps:$4 sm:$0xff]  }
 0x145   : > { %9253 = vmatpush2.bf16.msra.mxu0 %v12910_v22  ;;  %v12994_v22 = vld [vmem:[%s15085_s17 + $0x6c0] ss:$8 sps:$4 sm:$0xff]  }
 0x146   : > { %9294 = vmatpush2.bf16.msra.mxu1 %v12913_v23  ;;  %9254 = vmatprep.subr.bf16.mxu0 %v12918_v24  ;;  %v12997_v23 = vld [vmem:[%s15085_s17 + $0x7c0] ss:$8 sps:$4 sm:$0xff]   ;;  %v13002_v24 = vld [vmem:[%s15085_s17 + $0x6b4] ss:$8 sps:$4 sm:$0xff]  }
 0x147   : > { %9295 = vmatprep.subr.bf16.mxu1 %v12921_v25  ;;  %v13005_v25 = vld [vmem:[%s15085_s17 + $0x7b4] ss:$8 sps:$4 sm:$0xff]  }
 0x149   : > { %9255 = vmatpush2.bf16.msra.mxu0 %v12916_v27  ;;  %v13000_v27 = vld [vmem:[%s15085_s17 + $0x6b0] ss:$8 sps:$4 sm:$0xff]  }
 0x14a   : > { %9296 = vmatpush2.bf16.msra.mxu1 %v12919_v28  ;;  %9256 = vmatprep.subr.bf16.mxu0 %v12924_v7  ;;  %v13003_v28 = vld [vmem:[%s15085_s17 + $0x7b0] ss:$8 sps:$4 sm:$0xff]   ;;  %v13008_v7 = vld [vmem:[%s15085_s17 + $0x6a4] ss:$8 sps:$4 sm:$0xff]  }
 0x14b   : > { %9297 = vmatprep.subr.bf16.mxu1 %v12927_v29  ;;  %v13011_v29 = vld [vmem:[%s15085_s17 + $0x7a4] ss:$8 sps:$4 sm:$0xff]  }
 0x14d   : > { %9257 = vmatpush2.bf16.msra.mxu0 %v12922_v33  ;;  %v13009_v33 = vld [vmem:[%s15085_s17 + $0x7a0] ss:$8 sps:$4 sm:$0xff]  }
 0x14e   : > { %9298 = vmatpush2.bf16.msra.mxu1 %v12925_v34  ;;  %9308 = vmatprep.subr.bf16.mxu0 %v12930_v35  ;;  %v13014_v34 = vld [vmem:[%s15085_s17 + $0x694] ss:$8 sps:$4 sm:$0xff]  }
 0x14f   : > { %9349 = vmatprep.subr.bf16.mxu1 %v12933_v36  ;;  %v13017_v35 = vld [vmem:[%s15085_s17 + $0x794] ss:$8 sps:$4 sm:$0xff]  }
 0x150   : > { %9259 = vmatmul.mubr.bf16.vlgmr.msra.gmra.mxu0 %v1816_v32  ;;  %v15411_v32 = vld [vmem:[%s15170_s0 + $0x10] sm:$0xff] }
 0x151   : > { %9300 = vmatmul.mubr.bf16.vlgmr.msra.gmra.mxu1 %v1838_v38  ;;  %9309 = vmatpush1.bf16.msra.mxu0 %v12928_v39  ;;  %v15418_v36 = vrot.slane %v15411_v32, %v15173_v50  ;;  %v13015_v38 = vld [vmem:[%s15085_s17 + $0x790] ss:$8 sps:$4 sm:$0xff]   ;;  %v13020_v39 = vld [vmem:[%s15085_s17 + $0x684] ss:$8 sps:$4 sm:$0xff]  }
 0x152   : > { %9350 = vmatpush1.bf16.msra.mxu1 %v12931_v30  ;;  %9310 = vmatprep.subr.bf16.mxu0 %v12936_v40  ;;  %v13023_v30 = vld [vmem:[%s15085_s17 + $0x784] ss:$8 sps:$4 sm:$0xff]  }
 0x153   : > { %9351 = vmatprep.subr.bf16.mxu1 %v12939_v41  ;;  %9340 = vmatprep.mubr.bf16.mxu0 %v1837_v37  ;;  %v13012_v37 = vld [vmem:[%s15085_s17 + $0x690] ss:$8 sps:$4 sm:$0xff]   ;;  %v1857_v40 = vcombine.high %v15418_v36, %v15418_v36  ;;  %v13018_v41 = vld [vmem:[%s15085_s17 + $0x680] ss:$8 sps:$4 sm:$0xff]  }
 0x154   : > { %9381 = vmatprep.mubr.bf16.mxu1 %v1841_v42  ;;  %v1823_v42 = vrot.slane %v15342_v26, %v15173_v50  ;;  %v13036_v26 = vld [vmem:[%s15085_s17 + $0x964] ss:$8 sps:$4 sm:$0xff]  }
 0x155   : > { %9311 = vmatpush1.bf16.msra.mxu0 %v12934_v43  ;;  %v13021_v43 = vld [vmem:[%s15085_s17 + $0x780] ss:$8 sps:$4 sm:$0xff]  }
 0x156   : > { %9352 = vmatpush1.bf16.msra.mxu1 %v12937_v45  ;;  %9312 = vmatprep.subr.bf16.mxu0 %v12942_v46  ;;  %v13027_v45 = vld [vmem:[%s15085_s17 + $0x874] ss:$8 sps:$4 sm:$0xff]  }
 0x157   : > { %9353 = vmatprep.subr.bf16.mxu1 %v12945_v47  ;;  %v13030_v46 = vld [vmem:[%s15085_s17 + $0x974] ss:$8 sps:$4 sm:$0xff]   ;;  %v1879_v47 = vrot.slane %v1857_v40, %v15173_v50  ;;  %v13088_v40 = vld [vmem:[%s15085_s17 + $0x9d0] ss:$8 sps:$4 sm:$0xff]  }
 0x159   : > { %9313 = vmatpush1.bf16.msra.mxu0 %v12940_v48  ;;  %v1839_v48 = vcombine.high %v1823_v42, %v1823_v42 }
 0x15a   : > { %9354 = vmatpush1.bf16.msra.mxu1 %v12943_v49  ;;  %9314 = vmatprep.subr.bf16.mxu0 %v12948_v51  ;;  %v13025_v49 = vld [vmem:[%s15085_s17 + $0x870] ss:$8 sps:$4 sm:$0xff]  }
 0x15b   : > { %9355 = vmatprep.subr.bf16.mxu1 %v12951_v52  ;;  %v13028_v51 = vld [vmem:[%s15085_s17 + $0x970] ss:$8 sps:$4 sm:$0xff]   ;;  %v13033_v52 = vld [vmem:[%s15085_s17 + $0x864] ss:$8 sps:$4 sm:$0xff]  }
 0x15d   : > { %9315 = vmatpush1.bf16.msra.mxu0 %v12946_v53  ;;  %v1889_v53 = vcombine.high %v1879_v47, %v1879_v47 }
 0x15e   : > { %9356 = vmatpush1.bf16.msra.mxu1 %v12949_v54  ;;  %9316 = vmatprep.subr.bf16.mxu0 %v12954_v55 }
 0x15f   : > { %9357 = vmatprep.subr.bf16.mxu1 %v12957_v56  ;;  %v13031_v56 = vld [vmem:[%s15085_s17 + $0x860] ss:$8 sps:$4 sm:$0xff]  }
 0x161   : > { %9317 = vmatpush1.bf16.msra.mxu0 %v12952_v57  ;;  %v13034_v57 = vld [vmem:[%s15085_s17 + $0x960] ss:$8 sps:$4 sm:$0xff]  }
 0x162   : > { %9358 = vmatpush1.bf16.msra.mxu1 %v12955_v58  ;;  %9318 = vmatprep.subr.bf16.mxu0 %v12960_v59 }
 0x163   : > { %9359 = vmatprep.subr.bf16.mxu1 %v12963_v60 }
 0x165   : > { %9319 = vmatpush1.bf16.msra.mxu0 %v12958_v61  ;;  %v13039_v61 = vld [vmem:[%s15085_s17 + $0x854] ss:$8 sps:$4 sm:$0xff]  }
 0x166   : > { %9360 = vmatpush1.bf16.msra.mxu1 %v12961_v62  ;;  %9320 = vmatprep.subr.bf16.mxu0 %v12966_v63  ;;  %v13042_v62 = vld [vmem:[%s15085_s17 + $0x954] ss:$8 sps:$4 sm:$0xff]  }
 0x167   : > { %9361 = vmatprep.subr.bf16.mxu1 %v12969_v0  ;;  %v13037_v0 = vld [vmem:[%s15085_s17 + $0x850] ss:$8 sps:$4 sm:$0xff]  }
 0x169   : > { %9321 = vmatpush1.bf16.msra.mxu0 %v12964_v1  ;;  %v13040_v1 = vld [vmem:[%s15085_s17 + $0x950] ss:$8 sps:$4 sm:$0xff]  }
 0x16a   : > { %9362 = vmatpush1.bf16.msra.mxu1 %v12967_v2  ;;  %9322 = vmatprep.subr.bf16.mxu0 %v12972_v3 }
 0x16b   : > { %9363 = vmatprep.subr.bf16.mxu1 %v12975_v4 }
 0x16d   : > { %9323 = vmatpush1.bf16.msra.mxu0 %v12970_v5 }
 0x16e   : > { %9364 = vmatpush1.bf16.msra.mxu1 %v12973_v6  ;;  %9324 = vmatprep.subr.bf16.mxu0 %v12978_v8  ;;  %v13045_v6 = vld [vmem:[%s15085_s17 + $0x844] ss:$8 sps:$4 sm:$0xff]  }
 0x16f   : > { %9365 = vmatprep.subr.bf16.mxu1 %v12981_v9  ;;  %v13048_v8 = vld [vmem:[%s15085_s17 + $0x944] ss:$8 sps:$4 sm:$0xff]   ;;  %v13043_v9 = vld [vmem:[%s15085_s17 + $0x840] ss:$8 sps:$4 sm:$0xff]  }
 0x171   : > { %9325 = vmatpush2.bf16.msra.mxu0 %v12976_v10  ;;  %v13046_v10 = vld [vmem:[%s15085_s17 + $0x940] ss:$8 sps:$4 sm:$0xff]  }
 0x172   : > { %9366 = vmatpush2.bf16.msra.mxu1 %v12979_v11  ;;  %9326 = vmatprep.subr.bf16.mxu0 %v12984_v12  ;;  %v13051_v11 = vld [vmem:[%s15085_s17 + $0x834] ss:$8 sps:$4 sm:$0xff]  }
 0x173   : > { %9367 = vmatprep.subr.bf16.mxu1 %v12987_v13  ;;  %v13054_v12 = vld [vmem:[%s15085_s17 + $0x934] ss:$8 sps:$4 sm:$0xff]   ;;  %v13049_v13 = vld [vmem:[%s15085_s17 + $0x830] ss:$8 sps:$4 sm:$0xff]  }
 0x175   : > { %9327 = vmatpush2.bf16.msra.mxu0 %v12982_v14  ;;  %v13052_v14 = vld [vmem:[%s15085_s17 + $0x930] ss:$8 sps:$4 sm:$0xff]  }
 0x176   : > { %9368 = vmatpush2.bf16.msra.mxu1 %v12985_v15  ;;  %9328 = vmatprep.subr.bf16.mxu0 %v12990_v16  ;;  %v13057_v15 = vld [vmem:[%s15085_s17 + $0x824] ss:$8 sps:$4 sm:$0xff]  }
 0x177   : > { %9369 = vmatprep.subr.bf16.mxu1 %v12993_v17  ;;  %v13060_v16 = vld [vmem:[%s15085_s17 + $0x924] ss:$8 sps:$4 sm:$0xff]   ;;  %v13055_v17 = vld [vmem:[%s15085_s17 + $0x820] ss:$8 sps:$4 sm:$0xff]  }
 0x179   : > { %9329 = vmatpush2.bf16.msra.mxu0 %v12988_v18  ;;  %v13058_v18 = vld [vmem:[%s15085_s17 + $0x920] ss:$8 sps:$4 sm:$0xff]  }
 0x17a   : > { %9370 = vmatpush2.bf16.msra.mxu1 %v12991_v19  ;;  %9330 = vmatprep.subr.bf16.mxu0 %v12996_v20  ;;  %v13063_v19 = vld [vmem:[%s15085_s17 + $0x814] ss:$8 sps:$4 sm:$0xff]  }
 0x17b   : > { %9371 = vmatprep.subr.bf16.mxu1 %v12999_v21  ;;  %v13066_v20 = vld [vmem:[%s15085_s17 + $0x914] ss:$8 sps:$4 sm:$0xff]   ;;  %v13061_v21 = vld [vmem:[%s15085_s17 + $0x810] ss:$8 sps:$4 sm:$0xff]  }
 0x17d   : > { %9331 = vmatpush2.bf16.msra.mxu0 %v12994_v22  ;;  %v13064_v22 = vld [vmem:[%s15085_s17 + $0x910] ss:$8 sps:$4 sm:$0xff]  }
 0x17e   : > { %9372 = vmatpush2.bf16.msra.mxu1 %v12997_v23  ;;  %9332 = vmatprep.subr.bf16.mxu0 %v13002_v24  ;;  %v13069_v23 = vld [vmem:[%s15085_s17 + $0x804] ss:$8 sps:$4 sm:$0xff]  }
 0x17f   : > { %9373 = vmatprep.subr.bf16.mxu1 %v13005_v25  ;;  %v13072_v24 = vld [vmem:[%s15085_s17 + $0x904] ss:$8 sps:$4 sm:$0xff]   ;;  %v13067_v25 = vld [vmem:[%s15085_s17 + $0x800] ss:$8 sps:$4 sm:$0xff]  }
 0x181   : > { %9333 = vmatpush2.bf16.msra.mxu0 %v13000_v27  ;;  %v13070_v27 = vld [vmem:[%s15085_s17 + $0x900] ss:$8 sps:$4 sm:$0xff]  }
 0x182   : > { %9374 = vmatpush2.bf16.msra.mxu1 %v13003_v28  ;;  %9334 = vmatprep.subr.bf16.mxu0 %v13008_v7  ;;  %v13075_v28 = vld [vmem:[%s15085_s17 + $0x8f4] ss:$8 sps:$4 sm:$0xff]  }
 0x183   : > { %9375 = vmatprep.subr.bf16.mxu1 %v13011_v29  ;;  %v13078_v7 = vld [vmem:[%s15085_s17 + $0x9f4] ss:$8 sps:$4 sm:$0xff]   ;;  %v13073_v29 = vld [vmem:[%s15085_s17 + $0x8f0] ss:$8 sps:$4 sm:$0xff]  }
 0x185   : > { %9335 = vmatpush2.bf16.msra.mxu0 %v13006_v31  ;;  %v13076_v31 = vld [vmem:[%s15085_s17 + $0x9f0] ss:$8 sps:$4 sm:$0xff]  }
 0x186   : > { %9376 = vmatpush2.bf16.msra.mxu1 %v13009_v33  ;;  %9336 = vmatprep.subr.bf16.mxu0 %v13014_v34  ;;  %v13081_v33 = vld [vmem:[%s15085_s17 + $0x8e4] ss:$8 sps:$4 sm:$0xff]  }
 0x187   : > { %9377 = vmatprep.subr.bf16.mxu1 %v13017_v35  ;;  %v13084_v34 = vld [vmem:[%s15085_s17 + $0x9e4] ss:$8 sps:$4 sm:$0xff]   ;;  %v13079_v35 = vld [vmem:[%s15085_s17 + $0x8e0] ss:$8 sps:$4 sm:$0xff]  }
 0x189   : > { %9337 = vmatpush2.bf16.msra.mxu0 %v13012_v37  ;;  %v13082_v37 = vld [vmem:[%s15085_s17 + $0x9e0] ss:$8 sps:$4 sm:$0xff]  }
 0x18a   : > { %9378 = vmatpush2.bf16.msra.mxu1 %v13015_v38  ;;  %9338 = vmatprep.subr.bf16.mxu0 %v13020_v39  ;;  %v13087_v38 = vld [vmem:[%s15085_s17 + $0x8d4] ss:$8 sps:$4 sm:$0xff]  }
 0x18b   : > { %9379 = vmatprep.subr.bf16.mxu1 %v13023_v30  ;;  %v13090_v39 = vld [vmem:[%s15085_s17 + $0x9d4] ss:$8 sps:$4 sm:$0xff]   ;;  %v13085_v30 = vld [vmem:[%s15085_s17 + $0x8d0] ss:$8 sps:$4 sm:$0xff]  }
 0x18d   : > { %9339 = vmatpush2.bf16.msra.mxu0 %v13018_v41  ;;  %v13093_v41 = vld [vmem:[%s15085_s17 + $0x8c4] ss:$8 sps:$4 sm:$0xff]  }
 0x18e   : > { %9380 = vmatpush2.bf16.msra.mxu1 %v13021_v43  ;;  %9390 = vmatprep.subr.bf16.mxu0 %v13027_v45  ;;  %v13091_v43 = vld [vmem:[%s15085_s17 + $0x8c0] ss:$8 sps:$4 sm:$0xff]  }
 0x18f   : > { %9431 = vmatprep.subr.bf16.mxu1 %v13030_v46  ;;  %v13094_v45 = vld [vmem:[%s15085_s17 + $0x9c0] ss:$8 sps:$4 sm:$0xff]   ;;  %v13099_v46 = vld [vmem:[%s15085_s17 + $0x8b4] ss:$8 sps:$4 sm:$0xff]  }
 0x190   : > { %v9096_v54 = vpop.f32.mrf.mxu0  ;;  %9341 = vmatmul.mubr.bf16.vlgmr.msra.gmra.mxu0 %v1823_v42  ;;  %v13096_v42 = vld [vmem:[%s15085_s17 + $0x9c4] ss:$8 sps:$4 sm:$0xff]  }
 0x191   : > { %v9137_v55 = vpop.f32.mrf.mxu1  ;;  %9382 = vmatmul.mubr.bf16.vlgmr.msra.gmra.mxu1 %v1839_v48  ;;  %9391 = vmatpush1.bf16.msra.mxu0 %v13025_v49  ;;  %v13097_v48 = vld [vmem:[%s15085_s17 + $0x8b0] ss:$8 sps:$4 sm:$0xff]  }
 0x192   : > { %v15439_v58 = vadd.f32 %v9137_v55, %v9096_v54  ;;  %9432 = vmatpush1.bf16.msra.mxu1 %v13028_v51  ;;  %v9098_v59 = vpop.f32.mrf.mxu0  ;;  %9392 = vmatprep.subr.bf16.mxu0 %v13033_v52  ;;  %v13100_v49 = vld [vmem:[%s15085_s17 + $0x9b0] ss:$8 sps:$4 sm:$0xff]   ;;  %v13105_v51 = vld [vmem:[%s15085_s17 + $0x8a4] ss:$8 sps:$4 sm:$0xff]   ;;  %v13106_v54 = vld [vmem:[%s15085_s17 + $0x9a0] ss:$8 sps:$4 sm:$0xff]  }
 0x193   : > { %v9139_v60 = vpop.f32.mrf.mxu1  ;;  %9433 = vmatprep.subr.bf16.mxu1 %v13036_v26  ;;  %9422 = vmatprep.mubr.bf16.mxu0 %v1879_v47  ;;  %v13102_v47 = vld [vmem:[%s15085_s17 + $0x9b4] ss:$8 sps:$4 sm:$0xff]   ;;  %v13108_v52 = vld [vmem:[%s15085_s17 + $0x9a4] ss:$8 sps:$4 sm:$0xff]   ;;  %v1842_v26 = vcombine.high %v15411_v32, %v15411_v32  ;;  %v13109_v32 = vld [vmem:[%s15085_s17 + $0x890] ss:$8 sps:$4 sm:$0xff]  }
 0x194   : > { %v15443_v63 = vadd.f32 %v9139_v60, %v9098_v59  ;;  %9463 = vmatprep.mubr.bf16.mxu1 %v1889_v53  ;;  %v9100_v2 = vpop.f32.mrf.mxu0  ;;  %v13103_v53 = vld [vmem:[%s15085_s17 + $0x8a0] ss:$8 sps:$4 sm:$0xff]   ;;  %v13111_v55 = vld [vmem:[%s15085_s17 + $0x894] ss:$8 sps:$4 sm:$0xff]   ;;  %v13112_v59 = vld [vmem:[%s15085_s17 + $0x990] ss:$8 sps:$4 sm:$0xff]  }
 0x195   : > { %v9141_v3 = vpop.f32.mrf.mxu1  ;;  %9393 = vmatpush1.bf16.msra.mxu0 %v13031_v56  ;;  %v13114_v56 = vld [vmem:[%s15085_s17 + $0x994] ss:$8 sps:$4 sm:$0xff]   ;;  %v13117_v60 = vld [vmem:[%s15085_s17 + $0x884] ss:$8 sps:$4 sm:$0xff]   ;;  %v13118_v2 = vld [vmem:[%s15085_s17 + $0x980] ss:$8 sps:$4 sm:$0xff]  }
 0x196   : > { %9434 = vmatpush1.bf16.msra.mxu1 %v13034_v57  ;;  %v9101_v4 = vpop.f32.mrf.mxu0  ;;  %9394 = vmatprep.subr.bf16.mxu0 %v13039_v61  ;;  %v15496_v57 = vrot.slane %v1842_v26, %v15173_v50  ;;  %v13120_v61 = vld [vmem:[%s15085_s17 + $0x984] ss:$8 sps:$4 sm:$0xff]   ;;  %v13123_v3 = vld [vmem:[%s15085_s17 + $0xa74] ss:$8 sps:$4 sm:$0xff]  }
 0x197   : > { %v9142_v5 = vpop.f32.mrf.mxu1  ;;  %9435 = vmatprep.subr.bf16.mxu1 %v13042_v62  ;;  %v13126_v4 = vld [vmem:[%s15085_s17 + $0xb74] ss:$8 sps:$4 sm:$0xff]  }
 0x198   : > { %v1858_v62 = vcombine.high %v15496_v57, %v15496_v57  ;;  %v13121_v5 = vld [vmem:[%s15085_s17 + $0xa70] ss:$8 sps:$4 sm:$0xff]   ;;  %v13174_v26 = vld [vmem:[%s15085_s17 + $0xbf4] ss:$8 sps:$4 sm:$0xff]  }
 0x199   : > { %9395 = vmatpush1.bf16.msra.mxu0 %v13037_v0  ;;  %v1865_v0 = vrot.slane %v15418_v36, %v15173_v50  ;;  %v13129_v36 = vld [vmem:[%s15085_s17 + $0xa64] ss:$8 sps:$4 sm:$0xff]  }
 0x19a   : > { %9436 = vmatpush1.bf16.msra.mxu1 %v13040_v1  ;;  %9396 = vmatprep.subr.bf16.mxu0 %v13045_v6  ;;  %v13115_v1 = vld [vmem:[%s15085_s17 + $0x880] ss:$8 sps:$4 sm:$0xff]   ;;  %v13124_v6 = vld [vmem:[%s15085_s17 + $0xb70] ss:$8 sps:$4 sm:$0xff]  }
 0x19b   : > { %9437 = vmatprep.subr.bf16.mxu1 %v13048_v8  ;;  %v1886_v8 = vrot.slane %v1858_v62, %v15173_v50  ;;  %v13181_v62 = vld [vmem:[%s15085_s17 + $0xad0] ss:$8 sps:$4 sm:$0xff]  }
 0x19d   : > { %9397 = vmatpush1.bf16.msra.mxu0 %v13043_v9  ;;  %v1887_v9 = vcombine.high %v1865_v0, %v1865_v0 }
 0x19e   : > { %9438 = vmatpush1.bf16.msra.mxu1 %v13046_v10  ;;  %9398 = vmatprep.subr.bf16.mxu0 %v13051_v11  ;;  %v13132_v10 = vld [vmem:[%s15085_s17 + $0xb64] ss:$8 sps:$4 sm:$0xff]   ;;  %v13127_v11 = vld [vmem:[%s15085_s17 + $0xa60] ss:$8 sps:$4 sm:$0xff]  }
 0x19f   : > { %9439 = vmatprep.subr.bf16.mxu1 %v13054_v12  ;;  %v13130_v12 = vld [vmem:[%s15085_s17 + $0xb60] ss:$8 sps:$4 sm:$0xff]  }
 0x1a1   : > { %9399 = vmatpush1.bf16.msra.mxu0 %v13049_v13  ;;  %v1890_v13 = vcombine.high %v1886_v8, %v1886_v8 }
 0x1a2   : > { %9440 = vmatpush1.bf16.msra.mxu1 %v13052_v14  ;;  %9400 = vmatprep.subr.bf16.mxu0 %v13057_v15 }
 0x1a3   : > { %9441 = vmatprep.subr.bf16.mxu1 %v13060_v16 }
 0x1a5   : > { %9401 = vmatpush1.bf16.msra.mxu0 %v13055_v17 }
 0x1a6   : > { %9442 = vmatpush1.bf16.msra.mxu1 %v13058_v18  ;;  %9402 = vmatprep.subr.bf16.mxu0 %v13063_v19  ;;  %v13135_v19 = vld [vmem:[%s15085_s17 + $0xa54] ss:$8 sps:$4 sm:$0xff]  }
 0x1a7   : > { %9443 = vmatprep.subr.bf16.mxu1 %v13066_v20  ;;  %v13138_v20 = vld [vmem:[%s15085_s17 + $0xb54] ss:$8 sps:$4 sm:$0xff]  }
 0x1a9   : > { %9403 = vmatpush1.bf16.msra.mxu0 %v13061_v21 }
 0x1aa   : > { %9444 = vmatpush1.bf16.msra.mxu1 %v13064_v22  ;;  %9404 = vmatprep.subr.bf16.mxu0 %v13069_v23  ;;  %v13133_v23 = vld [vmem:[%s15085_s17 + $0xa50] ss:$8 sps:$4 sm:$0xff]  }
 0x1ab   : > { %9445 = vmatprep.subr.bf16.mxu1 %v13072_v24  ;;  %v13136_v24 = vld [vmem:[%s15085_s17 + $0xb50] ss:$8 sps:$4 sm:$0xff]  }
 0x1ad   : > { %9405 = vmatpush1.bf16.msra.mxu0 %v13067_v25 }
 0x1ae   : > { %9446 = vmatpush1.bf16.msra.mxu1 %v13070_v27  ;;  %9406 = vmatprep.subr.bf16.mxu0 %v13075_v28 }
 0x1af   : > { %9447 = vmatprep.subr.bf16.mxu1 %v13078_v7 }
 0x1b1   : > { %9407 = vmatpush2.bf16.msra.mxu0 %v13073_v29  ;;  %v13144_v29 = vld [vmem:[%s15085_s17 + $0xb44] ss:$8 sps:$4 sm:$0xff]  }
 0x1b2   : > { %9448 = vmatpush2.bf16.msra.mxu1 %v13076_v31  ;;  %9408 = vmatprep.subr.bf16.mxu0 %v13081_v33  ;;  %v13139_v31 = vld [vmem:[%s15085_s17 + $0xa40] ss:$8 sps:$4 sm:$0xff]  }
 0x1b3   : > { %9449 = vmatprep.subr.bf16.mxu1 %v13084_v34  ;;  %v13142_v33 = vld [vmem:[%s15085_s17 + $0xb40] ss:$8 sps:$4 sm:$0xff]   ;;  %v13147_v34 = vld [vmem:[%s15085_s17 + $0xa34] ss:$8 sps:$4 sm:$0xff]  }
 0x1b5   : > { %9409 = vmatpush2.bf16.msra.mxu0 %v13079_v35  ;;  %v13150_v35 = vld [vmem:[%s15085_s17 + $0xb34] ss:$8 sps:$4 sm:$0xff]  }
 0x1b6   : > { %9450 = vmatpush2.bf16.msra.mxu1 %v13082_v37  ;;  %9410 = vmatprep.subr.bf16.mxu0 %v13087_v38  ;;  %v13145_v37 = vld [vmem:[%s15085_s17 + $0xa30] ss:$8 sps:$4 sm:$0xff]  }
 0x1b7   : > { %9451 = vmatprep.subr.bf16.mxu1 %v13090_v39  ;;  %v13148_v38 = vld [vmem:[%s15085_s17 + $0xb30] ss:$8 sps:$4 sm:$0xff]   ;;  %v13153_v39 = vld [vmem:[%s15085_s17 + $0xa24] ss:$8 sps:$4 sm:$0xff]  }
 0x1b9   : > { %9411 = vmatpush2.bf16.msra.mxu0 %v13085_v30  ;;  %v13156_v30 = vld [vmem:[%s15085_s17 + $0xb24] ss:$8 sps:$4 sm:$0xff]  }
 0x1ba   : > { %9452 = vmatpush2.bf16.msra.mxu1 %v13088_v40  ;;  %9412 = vmatprep.subr.bf16.mxu0 %v13093_v41  ;;  %v13151_v40 = vld [vmem:[%s15085_s17 + $0xa20] ss:$8 sps:$4 sm:$0xff]  }
 0x1bb   : > { %9453 = vmatprep.subr.bf16.mxu1 %v13096_v42  ;;  %v13154_v41 = vld [vmem:[%s15085_s17 + $0xb20] ss:$8 sps:$4 sm:$0xff]   ;;  %v13159_v42 = vld [vmem:[%s15085_s17 + $0xa14] ss:$8 sps:$4 sm:$0xff]  }
 0x1bd   : > { %9413 = vmatpush2.bf16.msra.mxu0 %v13091_v43  ;;  %v13162_v43 = vld [vmem:[%s15085_s17 + $0xb14] ss:$8 sps:$4 sm:$0xff]  }
 0x1be   : > { %9454 = vmatpush2.bf16.msra.mxu1 %v13094_v45  ;;  %9414 = vmatprep.subr.bf16.mxu0 %v13099_v46  ;;  %v13157_v45 = vld [vmem:[%s15085_s17 + $0xa10] ss:$8 sps:$4 sm:$0xff]  }
 0x1bf   : > { %9455 = vmatprep.subr.bf16.mxu1 %v13102_v47  ;;  %v13160_v46 = vld [vmem:[%s15085_s17 + $0xb10] ss:$8 sps:$4 sm:$0xff]   ;;  %v13165_v47 = vld [vmem:[%s15085_s17 + $0xa04] ss:$8 sps:$4 sm:$0xff]  }
 0x1c1   : > { %9415 = vmatpush2.bf16.msra.mxu0 %v13097_v48  ;;  %v13168_v48 = vld [vmem:[%s15085_s17 + $0xb04] ss:$8 sps:$4 sm:$0xff]  }
 0x1c2   : > { %9456 = vmatpush2.bf16.msra.mxu1 %v13100_v49  ;;  %9416 = vmatprep.subr.bf16.mxu0 %v13105_v51  ;;  %v13163_v49 = vld [vmem:[%s15085_s17 + $0xa00] ss:$8 sps:$4 sm:$0xff]  }
 0x1c3   : > { %9457 = vmatprep.subr.bf16.mxu1 %v13108_v52  ;;  %v13166_v51 = vld [vmem:[%s15085_s17 + $0xb00] ss:$8 sps:$4 sm:$0xff]   ;;  %v13171_v52 = vld [vmem:[%s15085_s17 + $0xaf4] ss:$8 sps:$4 sm:$0xff]  }
 0x1c5   : > { %9417 = vmatpush2.bf16.msra.mxu0 %v13103_v53  ;;  %v13169_v53 = vld [vmem:[%s15085_s17 + $0xaf0] ss:$8 sps:$4 sm:$0xff]  }
 0x1c6   : > { %9458 = vmatpush2.bf16.msra.mxu1 %v13106_v54  ;;  %9418 = vmatprep.subr.bf16.mxu0 %v13111_v55  ;;  %v13172_v54 = vld [vmem:[%s15085_s17 + $0xbf0] ss:$8 sps:$4 sm:$0xff]   ;;  %v13177_v55 = vld [vmem:[%s15085_s17 + $0xae4] ss:$8 sps:$4 sm:$0xff]  }
 0x1c7   : > { %9459 = vmatprep.subr.bf16.mxu1 %v13114_v56  ;;  %v13180_v56 = vld [vmem:[%s15085_s17 + $0xbe4] ss:$8 sps:$4 sm:$0xff]  }
 0x1c9   : > { %9419 = vmatpush2.bf16.msra.mxu0 %v13109_v32  ;;  %v13175_v32 = vld [vmem:[%s15085_s17 + $0xae0] ss:$8 sps:$4 sm:$0xff]  }
 0x1ca   : > { %9460 = vmatpush2.bf16.msra.mxu1 %v13112_v59  ;;  %9420 = vmatprep.subr.bf16.mxu0 %v13117_v60  ;;  %v13178_v59 = vld [vmem:[%s15085_s17 + $0xbe0] ss:$8 sps:$4 sm:$0xff]   ;;  %v13183_v60 = vld [vmem:[%s15085_s17 + $0xad4] ss:$8 sps:$4 sm:$0xff]  }
 0x1cb   : > { %9461 = vmatprep.subr.bf16.mxu1 %v13120_v61  ;;  %v13186_v61 = vld [vmem:[%s15085_s17 + $0xbd4] ss:$8 sps:$4 sm:$0xff]  }
 0x1cd   : > { %9421 = vmatpush2.bf16.msra.mxu0 %v13115_v1  ;;  %v13189_v1 = vld [vmem:[%s15085_s17 + $0xac4] ss:$8 sps:$4 sm:$0xff]  }
 0x1ce   : > { %9462 = vmatpush2.bf16.msra.mxu1 %v13118_v2  ;;  %9472 = vmatprep.subr.bf16.mxu0 %v13123_v3  ;;  %v13192_v2 = vld [vmem:[%s15085_s17 + $0xbc4] ss:$8 sps:$4 sm:$0xff]   ;;  %v13187_v3 = vld [vmem:[%s15085_s17 + $0xac0] ss:$8 sps:$4 sm:$0xff]  }
 0x1cf   : > { %9513 = vmatprep.subr.bf16.mxu1 %v13126_v4  ;;  %v13190_v4 = vld [vmem:[%s15085_s17 + $0xbc0] ss:$8 sps:$4 sm:$0xff]  }
 0x1d0   : > { %v9178_v14 = vpop.f32.mrf.mxu0  ;;  %9423 = vmatmul.mubr.bf16.vlgmr.msra.gmra.mxu0 %v1865_v0  ;;  %v13184_v0 = vld [vmem:[%s15085_s17 + $0xbd0] ss:$8 sps:$4 sm:$0xff]  }
 0x1d1   : > { %v9219_v15 = vpop.f32.mrf.mxu1  ;;  %9464 = vmatmul.mubr.bf16.vlgmr.msra.gmra.mxu1 %v1887_v9  ;;  %v9179_v16 = vadd.f32 %v9178_v14, %v15439_v58  ;;  %9473 = vmatpush1.bf16.msra.mxu0 %v13121_v5  ;;  %v13195_v5 = vld [vmem:[%s15085_s17 + $0xab4] ss:$8 sps:$4 sm:$0xff]   ;;  %v13196_v9 = vld [vmem:[%s15085_s17 + $0xbb0] ss:$8 sps:$4 sm:$0xff]  }
 0x1d2   : > { %9514 = vmatpush1.bf16.msra.mxu1 %v13124_v6  ;;  %v9180_v17 = vpop.f32.mrf.mxu0  ;;  %9474 = vmatprep.subr.bf16.mxu0 %v13129_v36  ;;  %v13198_v6 = vld [vmem:[%s15085_s17 + $0xbb4] ss:$8 sps:$4 sm:$0xff]   ;;  %v13201_v36 = vld [vmem:[%s15085_s17 + $0xaa4] ss:$8 sps:$4 sm:$0xff]  }
 0x1d3   : > { %v9221_v18 = vpop.f32.mrf.mxu1  ;;  %9515 = vmatprep.subr.bf16.mxu1 %v13132_v10  ;;  %v15520_v21 = vadd.f32 %v9219_v15, %v9179_v16  ;;  %v9181_v22 = vadd.f32 %v9180_v17, %v15443_v63  ;;  %9504 = vmatprep.mubr.bf16.mxu0 %v1886_v8  ;;  %v13141_v63 = vld [vmem:[%s15085_s17 + $0xa44] ss:$8 sps:$4 sm:$0xff]   ;;  %v13193_v8 = vld [vmem:[%s15085_s17 + $0xab0] ss:$8 sps:$4 sm:$0xff]   ;;  %v13207_v14 = vld [vmem:[%s15085_s17 + $0xa94] ss:$8 sps:$4 sm:$0xff]  }
 0x1d4   : > { %9545 = vmatprep.mubr.bf16.mxu1 %v1890_v13  ;;  %v9182_v58 = vpop.f32.mrf.mxu0  ;;  %v13204_v10 = vld [vmem:[%s15085_s17 + $0xba4] ss:$8 sps:$4 sm:$0xff]   ;;  %v13202_v13 = vld [vmem:[%s15085_s17 + $0xba0] ss:$8 sps:$4 sm:$0xff]   ;;  %v13210_v15 = vld [vmem:[%s15085_s17 + $0xb94] ss:$8 sps:$4 sm:$0xff]  }
 0x1d5   : > { %v9223_v25 = vpop.f32.mrf.mxu1  ;;  %v15525_v27 = vadd.f32 %v9221_v18, %v9181_v22  ;;  %9475 = vmatpush1.bf16.msra.mxu0 %v13127_v11  ;;  %v15570_v11 = vld [vmem:[%s15170_s0 + $0x18] sm:$0xff]  ;;  %v13214_v58 = vld [vmem:[%s15085_s17 + $0xb80] ss:$8 sps:$4 sm:$0xff]  }
 0x1d6   : > { %9516 = vmatpush1.bf16.msra.mxu1 %v13130_v12  ;;  %v9183_v28 = vpop.f32.mrf.mxu0  ;;  %9476 = vmatprep.subr.bf16.mxu0 %v13135_v19  ;;  %v13199_v12 = vld [vmem:[%s15085_s17 + $0xaa0] ss:$8 sps:$4 sm:$0xff]   ;;  %v15578_v16 = vrot.slane %v15570_v11, %v15173_v50  ;;  %v13205_v17 = vld [vmem:[%s15085_s17 + $0xa90] ss:$8 sps:$4 sm:$0xff]   ;;  %v13213_v19 = vld [vmem:[%s15085_s17 + $0xa84] ss:$8 sps:$4 sm:$0xff]  }
 0x1d7   : > { %v9224_v7 = vpop.f32.mrf.mxu1  ;;  %9517 = vmatprep.subr.bf16.mxu1 %v13138_v20  ;;  %v13208_v18 = vld [vmem:[%s15085_s17 + $0xb90] ss:$8 sps:$4 sm:$0xff]   ;;  %v13216_v20 = vld [vmem:[%s15085_s17 + $0xb84] ss:$8 sps:$4 sm:$0xff]   ;;  %v13220_v25 = vld [vmem:[%s15085_s17 + $0xc74] ss:$8 sps:$4 sm:$0xff]  }
 0x1d8   : > { %v1906_v22 = vcombine.high %v15578_v16, %v15578_v16  ;;  %v13223_v28 = vld [vmem:[%s15085_s17 + $0xd74] ss:$8 sps:$4 sm:$0xff]   ;;  %v13218_v7 = vld [vmem:[%s15085_s17 + $0xc70] ss:$8 sps:$4 sm:$0xff]  }
 0x1d9   : > { %9477 = vmatpush1.bf16.msra.mxu0 %v13133_v23  ;;  %v1872_v23 = vrot.slane %v15496_v57, %v15173_v50  ;;  %v13226_v57 = vld [vmem:[%s15085_s17 + $0xc64] ss:$8 sps:$4 sm:$0xff]  }
 0x1da   : > { %9518 = vmatpush1.bf16.msra.mxu1 %v13136_v24  ;;  %9478 = vmatprep.subr.bf16.mxu0 %v13141_v63  ;;  %v13211_v24 = vld [vmem:[%s15085_s17 + $0xa80] ss:$8 sps:$4 sm:$0xff]   ;;  %v13221_v63 = vld [vmem:[%s15085_s17 + $0xd70] ss:$8 sps:$4 sm:$0xff]  }
 0x1db   : > { %9519 = vmatprep.subr.bf16.mxu1 %v13144_v29  ;;  %v1928_v29 = vrot.slane %v1906_v22, %v15173_v50  ;;  %v13283_v22 = vld [vmem:[%s15085_s17 + $0xdd4] ss:$8 sps:$4 sm:$0xff]  }
 0x1dd   : > { %9479 = vmatpush1.bf16.msra.mxu0 %v13139_v31  ;;  %v1888_v31 = vcombine.high %v1872_v23, %v1872_v23 }
 0x1de   : > { %9520 = vmatpush1.bf16.msra.mxu1 %v13142_v33  ;;  %9480 = vmatprep.subr.bf16.mxu0 %v13147_v34  ;;  %v13229_v33 = vld [vmem:[%s15085_s17 + $0xd64] ss:$8 sps:$4 sm:$0xff]   ;;  %v13224_v34 = vld [vmem:[%s15085_s17 + $0xc60] ss:$8 sps:$4 sm:$0xff]  }
 0x1df   : > { %9521 = vmatprep.subr.bf16.mxu1 %v13150_v35  ;;  %v13227_v35 = vld [vmem:[%s15085_s17 + $0xd60] ss:$8 sps:$4 sm:$0xff]  }
 0x1e1   : > { %9481 = vmatpush1.bf16.msra.mxu0 %v13145_v37  ;;  %v1938_v37 = vcombine.high %v1928_v29, %v1928_v29 }
 0x1e2   : > { %9522 = vmatpush1.bf16.msra.mxu1 %v13148_v38  ;;  %9482 = vmatprep.subr.bf16.mxu0 %v13153_v39 }
 0x1e3   : > { %9523 = vmatprep.subr.bf16.mxu1 %v13156_v30 }
 0x1e5   : > { %9483 = vmatpush1.bf16.msra.mxu0 %v13151_v40 }
 0x1e6   : > { %9524 = vmatpush1.bf16.msra.mxu1 %v13154_v41  ;;  %9484 = vmatprep.subr.bf16.mxu0 %v13159_v42  ;;  %v13232_v42 = vld [vmem:[%s15085_s17 + $0xc54] ss:$8 sps:$4 sm:$0xff]  }
 0x1e7   : > { %9525 = vmatprep.subr.bf16.mxu1 %v13162_v43  ;;  %v13235_v43 = vld [vmem:[%s15085_s17 + $0xd54] ss:$8 sps:$4 sm:$0xff]  }
 0x1e9   : > { %9485 = vmatpush1.bf16.msra.mxu0 %v13157_v45 }
 0x1ea   : > { %9526 = vmatpush1.bf16.msra.mxu1 %v13160_v46  ;;  %9486 = vmatprep.subr.bf16.mxu0 %v13165_v47  ;;  %v13230_v47 = vld [vmem:[%s15085_s17 + $0xc50] ss:$8 sps:$4 sm:$0xff]  }
 0x1eb   : > { %9527 = vmatprep.subr.bf16.mxu1 %v13168_v48  ;;  %v13233_v48 = vld [vmem:[%s15085_s17 + $0xd50] ss:$8 sps:$4 sm:$0xff]  }
 0x1ed   : > { %9487 = vmatpush1.bf16.msra.mxu0 %v13163_v49 }
 0x1ee   : > { %9528 = vmatpush1.bf16.msra.mxu1 %v13166_v51  ;;  %9488 = vmatprep.subr.bf16.mxu0 %v13171_v52 }
 0x1ef   : > { %9529 = vmatprep.subr.bf16.mxu1 %v13174_v26 }
 0x1f1   : > { %9489 = vmatpush2.bf16.msra.mxu0 %v13169_v53  ;;  %v13241_v53 = vld [vmem:[%s15085_s17 + $0xd44] ss:$8 sps:$4 sm:$0xff]  }
 0x1f2   : > { %9530 = vmatpush2.bf16.msra.mxu1 %v13172_v54  ;;  %9490 = vmatprep.subr.bf16.mxu0 %v13177_v55  ;;  %v13236_v54 = vld [vmem:[%s15085_s17 + $0xc40] ss:$8 sps:$4 sm:$0xff]  }
 0x1f3   : > { %9531 = vmatprep.subr.bf16.mxu1 %v13180_v56  ;;  %v13239_v55 = vld [vmem:[%s15085_s17 + $0xd40] ss:$8 sps:$4 sm:$0xff]   ;;  %v13244_v56 = vld [vmem:[%s15085_s17 + $0xc34] ss:$8 sps:$4 sm:$0xff]  }
 0x1f5   : > { %9491 = vmatpush2.bf16.msra.mxu0 %v13175_v32  ;;  %v13247_v32 = vld [vmem:[%s15085_s17 + $0xd34] ss:$8 sps:$4 sm:$0xff]  }
 0x1f6   : > { %9532 = vmatpush2.bf16.msra.mxu1 %v13178_v59  ;;  %9492 = vmatprep.subr.bf16.mxu0 %v13183_v60  ;;  %v13242_v59 = vld [vmem:[%s15085_s17 + $0xc30] ss:$8 sps:$4 sm:$0xff]  }
 0x1f7   : > { %9533 = vmatprep.subr.bf16.mxu1 %v13186_v61  ;;  %v13245_v60 = vld [vmem:[%s15085_s17 + $0xd30] ss:$8 sps:$4 sm:$0xff]   ;;  %v13250_v61 = vld [vmem:[%s15085_s17 + $0xc24] ss:$8 sps:$4 sm:$0xff]  }
 0x1f9   : > { %9493 = vmatpush2.bf16.msra.mxu0 %v13181_v62  ;;  %v13253_v62 = vld [vmem:[%s15085_s17 + $0xd24] ss:$8 sps:$4 sm:$0xff]  }
 0x1fa   : > { %9534 = vmatpush2.bf16.msra.mxu1 %v13184_v0  ;;  %9494 = vmatprep.subr.bf16.mxu0 %v13189_v1  ;;  %v13248_v0 = vld [vmem:[%s15085_s17 + $0xc20] ss:$8 sps:$4 sm:$0xff]  }
 0x1fb   : > { %9535 = vmatprep.subr.bf16.mxu1 %v13192_v2  ;;  %v13251_v1 = vld [vmem:[%s15085_s17 + $0xd20] ss:$8 sps:$4 sm:$0xff]   ;;  %v13256_v2 = vld [vmem:[%s15085_s17 + $0xc14] ss:$8 sps:$4 sm:$0xff]  }
 0x1fd   : > { %9495 = vmatpush2.bf16.msra.mxu0 %v13187_v3  ;;  %v13259_v3 = vld [vmem:[%s15085_s17 + $0xd14] ss:$8 sps:$4 sm:$0xff]  }
 0x1fe   : > { %9536 = vmatpush2.bf16.msra.mxu1 %v13190_v4  ;;  %9496 = vmatprep.subr.bf16.mxu0 %v13195_v5  ;;  %v13254_v4 = vld [vmem:[%s15085_s17 + $0xc10] ss:$8 sps:$4 sm:$0xff]  }
 0x1ff   : > { %9537 = vmatprep.subr.bf16.mxu1 %v13198_v6  ;;  %v13257_v5 = vld [vmem:[%s15085_s17 + $0xd10] ss:$8 sps:$4 sm:$0xff]   ;;  %v13262_v6 = vld [vmem:[%s15085_s17 + $0xc04] ss:$8 sps:$4 sm:$0xff]  }
 0x201   : > { %9497 = vmatpush2.bf16.msra.mxu0 %v13193_v8  ;;  %v13265_v8 = vld [vmem:[%s15085_s17 + $0xd04] ss:$8 sps:$4 sm:$0xff]  }
 0x202   : > { %9538 = vmatpush2.bf16.msra.mxu1 %v13196_v9  ;;  %9498 = vmatprep.subr.bf16.mxu0 %v13201_v36  ;;  %v13260_v9 = vld [vmem:[%s15085_s17 + $0xc00] ss:$8 sps:$4 sm:$0xff]  }
 0x203   : > { %9539 = vmatprep.subr.bf16.mxu1 %v13204_v10  ;;  %v13263_v36 = vld [vmem:[%s15085_s17 + $0xd00] ss:$8 sps:$4 sm:$0xff]   ;;  %v13268_v10 = vld [vmem:[%s15085_s17 + $0xcf4] ss:$8 sps:$4 sm:$0xff]  }
 0x205   : > { %9499 = vmatpush2.bf16.msra.mxu0 %v13199_v12  ;;  %v13271_v12 = vld [vmem:[%s15085_s17 + $0xdf4] ss:$8 sps:$4 sm:$0xff]  }
 0x206   : > { %9540 = vmatpush2.bf16.msra.mxu1 %v13202_v13  ;;  %9500 = vmatprep.subr.bf16.mxu0 %v13207_v14  ;;  %v13266_v13 = vld [vmem:[%s15085_s17 + $0xcf0] ss:$8 sps:$4 sm:$0xff]  }
 0x207   : > { %9541 = vmatprep.subr.bf16.mxu1 %v13210_v15  ;;  %v13269_v14 = vld [vmem:[%s15085_s17 + $0xdf0] ss:$8 sps:$4 sm:$0xff]   ;;  %v13274_v15 = vld [vmem:[%s15085_s17 + $0xce4] ss:$8 sps:$4 sm:$0xff]  }
 0x209   : > { %9501 = vmatpush2.bf16.msra.mxu0 %v13205_v17  ;;  %v13277_v17 = vld [vmem:[%s15085_s17 + $0xde4] ss:$8 sps:$4 sm:$0xff]  }
 0x20a   : > { %9542 = vmatpush2.bf16.msra.mxu1 %v13208_v18  ;;  %9502 = vmatprep.subr.bf16.mxu0 %v13213_v19  ;;  %v13272_v18 = vld [vmem:[%s15085_s17 + $0xce0] ss:$8 sps:$4 sm:$0xff]  }
 0x20b   : > { %9543 = vmatprep.subr.bf16.mxu1 %v13216_v20  ;;  %v13275_v19 = vld [vmem:[%s15085_s17 + $0xde0] ss:$8 sps:$4 sm:$0xff]   ;;  %v13280_v20 = vld [vmem:[%s15085_s17 + $0xcd4] ss:$8 sps:$4 sm:$0xff]  }
 0x20d   : > { %9503 = vmatpush2.bf16.msra.mxu0 %v13211_v24  ;;  %v13281_v24 = vld [vmem:[%s15085_s17 + $0xdd0] ss:$8 sps:$4 sm:$0xff]  }
 0x20e   : > { %9544 = vmatpush2.bf16.msra.mxu1 %v13214_v58  ;;  %9554 = vmatprep.subr.bf16.mxu0 %v13220_v25  ;;  %v13286_v58 = vld [vmem:[%s15085_s17 + $0xcc4] ss:$8 sps:$4 sm:$0xff]  }
 0x20f   : > { %9595 = vmatprep.subr.bf16.mxu1 %v13223_v28  ;;  %v13289_v25 = vld [vmem:[%s15085_s17 + $0xdc4] ss:$8 sps:$4 sm:$0xff]   ;;  %v13284_v28 = vld [vmem:[%s15085_s17 + $0xcc0] ss:$8 sps:$4 sm:$0xff]  }
 0x210   : > { %v9260_v38 = vpop.f32.mrf.mxu0  ;;  %9505 = vmatmul.mubr.bf16.vlgmr.msra.gmra.mxu0 %v1872_v23  ;;  %v13278_v23 = vld [vmem:[%s15085_s17 + $0xcd0] ss:$8 sps:$4 sm:$0xff]  }
 0x211   : > { %v9301_v39 = vpop.f32.mrf.mxu1  ;;  %9546 = vmatmul.mubr.bf16.vlgmr.msra.gmra.mxu1 %v1888_v31  ;;  %v9261_v30 = vadd.f32 %v9260_v38, %v15520_v21  ;;  %9555 = vmatpush1.bf16.msra.mxu0 %v13218_v7  ;;  %v13287_v7 = vld [vmem:[%s15085_s17 + $0xdc0] ss:$8 sps:$4 sm:$0xff]   ;;  %v13290_v31 = vld [vmem:[%s15085_s17 + $0xcb0] ss:$8 sps:$4 sm:$0xff]  }
 0x212   : > { %9596 = vmatpush1.bf16.msra.mxu1 %v13221_v63  ;;  %v9262_v40 = vpop.f32.mrf.mxu0  ;;  %9556 = vmatprep.subr.bf16.mxu0 %v13226_v57  ;;  %v13292_v63 = vld [vmem:[%s15085_s17 + $0xcb4] ss:$8 sps:$4 sm:$0xff]   ;;  %v13293_v57 = vld [vmem:[%s15085_s17 + $0xdb0] ss:$8 sps:$4 sm:$0xff]   ;;  %v13299_v38 = vld [vmem:[%s15085_s17 + $0xda0] ss:$8 sps:$4 sm:$0xff]  }
 0x213   : > { %v9303_v41 = vpop.f32.mrf.mxu1  ;;  %9597 = vmatprep.subr.bf16.mxu1 %v13229_v33  ;;  %v15602_v45 = vadd.f32 %v9301_v39, %v9261_v30  ;;  %v9263_v46 = vadd.f32 %v9262_v40, %v15525_v27  ;;  %9586 = vmatprep.mubr.bf16.mxu0 %v1928_v29  ;;  %v13238_v27 = vld [vmem:[%s15085_s17 + $0xc44] ss:$8 sps:$4 sm:$0xff]   ;;  %v13295_v29 = vld [vmem:[%s15085_s17 + $0xdb4] ss:$8 sps:$4 sm:$0xff]  }
 0x214   : > { %9627 = vmatprep.mubr.bf16.mxu1 %v1938_v37  ;;  %v9264_v21 = vpop.f32.mrf.mxu0  ;;  %v13298_v33 = vld [vmem:[%s15085_s17 + $0xca4] ss:$8 sps:$4 sm:$0xff]   ;;  %v13296_v37 = vld [vmem:[%s15085_s17 + $0xca0] ss:$8 sps:$4 sm:$0xff]   ;;  %v13304_v39 = vld [vmem:[%s15085_s17 + $0xc94] ss:$8 sps:$4 sm:$0xff]  }
 0x215   : > { %v9305_v49 = vpop.f32.mrf.mxu1  ;;  %v15607_v51 = vadd.f32 %v9303_v41, %v9263_v46  ;;  %9557 = vmatpush1.bf16.msra.mxu0 %v13224_v34  ;;  %v13301_v34 = vld [vmem:[%s15085_s17 + $0xda4] ss:$8 sps:$4 sm:$0xff]   ;;  %v13307_v30 = vld [vmem:[%s15085_s17 + $0xd94] ss:$8 sps:$4 sm:$0xff]   ;;  %v13305_v41 = vld [vmem:[%s15085_s17 + $0xd90] ss:$8 sps:$4 sm:$0xff]  }
 0x216   : > { %9598 = vmatpush1.bf16.msra.mxu1 %v13227_v35  ;;  %v9265_v52 = vpop.f32.mrf.mxu0  ;;  %9558 = vmatprep.subr.bf16.mxu0 %v13232_v42  ;;  %v1891_v35 = vcombine.high %v15570_v11, %v15570_v11  ;;  %v13302_v11 = vld [vmem:[%s15085_s17 + $0xc90] ss:$8 sps:$4 sm:$0xff]   ;;  %v13310_v42 = vld [vmem:[%s15085_s17 + $0xc84] ss:$8 sps:$4 sm:$0xff]   ;;  %v13311_v21 = vld [vmem:[%s15085_s17 + $0xd80] ss:$8 sps:$4 sm:$0xff]  }
 0x217   : > { %v9306_v26 = vpop.f32.mrf.mxu1  ;;  %9599 = vmatprep.subr.bf16.mxu1 %v13235_v43  ;;  %v13313_v43 = vld [vmem:[%s15085_s17 + $0xd84] ss:$8 sps:$4 sm:$0xff]   ;;  %v13316_v49 = vld [vmem:[%s15085_s17 + $0xe74] ss:$8 sps:$4 sm:$0xff]  }
 0x218   : > { %v15658_v40 = vrot.slane %v1891_v35, %v15173_v50  ;;  %v13319_v52 = vld [vmem:[%s15085_s17 + $0xf74] ss:$8 sps:$4 sm:$0xff]   ;;  %v13314_v26 = vld [vmem:[%s15085_s17 + $0xe70] ss:$8 sps:$4 sm:$0xff]  }
 0x219   : > { %9559 = vmatpush1.bf16.msra.mxu0 %v13230_v47  ;;  %v1914_v47 = vrot.slane %v15578_v16, %v15173_v50  ;;  %v13322_v16 = vld [vmem:[%s15085_s17 + $0xe64] ss:$8 sps:$4 sm:$0xff]   ;;  %v13367_v35 = vld [vmem:[%s15085_s17 + $0xff4] ss:$8 sps:$4 sm:$0xff]  }
 0x21a   : > { %9600 = vmatpush1.bf16.msra.mxu1 %v13233_v48  ;;  %9560 = vmatprep.subr.bf16.mxu0 %v13238_v27  ;;  %v1907_v46 = vcombine.high %v15658_v40, %v15658_v40  ;;  %v13308_v48 = vld [vmem:[%s15085_s17 + $0xc80] ss:$8 sps:$4 sm:$0xff]   ;;  %v13317_v27 = vld [vmem:[%s15085_s17 + $0xf70] ss:$8 sps:$4 sm:$0xff]  }
 0x21b   : > { %9601 = vmatprep.subr.bf16.mxu1 %v13241_v53 }
 0x21c   : > { %v1935_v53 = vrot.slane %v1907_v46, %v15173_v50  ;;  %v13374_v46 = vld [vmem:[%s15085_s17 + $0xed0] ss:$8 sps:$4 sm:$0xff]  }
 0x21d   : > { %9561 = vmatpush1.bf16.msra.mxu0 %v13236_v54  ;;  %v1936_v54 = vcombine.high %v1914_v47, %v1914_v47 }
 0x21e   : > { %9602 = vmatpush1.bf16.msra.mxu1 %v13239_v55  ;;  %9562 = vmatprep.subr.bf16.mxu0 %v13244_v56  ;;  %v13325_v55 = vld [vmem:[%s15085_s17 + $0xf64] ss:$8 sps:$4 sm:$0xff]   ;;  %v13320_v56 = vld [vmem:[%s15085_s17 + $0xe60] ss:$8 sps:$4 sm:$0xff]  }
 0x21f   : > { %9603 = vmatprep.subr.bf16.mxu1 %v13247_v32  ;;  %v13323_v32 = vld [vmem:[%s15085_s17 + $0xf60] ss:$8 sps:$4 sm:$0xff]  }
 0x221   : > { %9563 = vmatpush1.bf16.msra.mxu0 %v13242_v59  ;;  %v1939_v59 = vcombine.high %v1935_v53, %v1935_v53 }
 0x222   : > { %9604 = vmatpush1.bf16.msra.mxu1 %v13245_v60  ;;  %9564 = vmatprep.subr.bf16.mxu0 %v13250_v61 }
 0x223   : > { %9605 = vmatprep.subr.bf16.mxu1 %v13253_v62 }
 0x225   : > { %9565 = vmatpush1.bf16.msra.mxu0 %v13248_v0 }
 0x226   : > { %9606 = vmatpush1.bf16.msra.mxu1 %v13251_v1  ;;  %9566 = vmatprep.subr.bf16.mxu0 %v13256_v2  ;;  %v13328_v2 = vld [vmem:[%s15085_s17 + $0xe54] ss:$8 sps:$4 sm:$0xff]  }
 0x227   : > { %9607 = vmatprep.subr.bf16.mxu1 %v13259_v3  ;;  %v13331_v3 = vld [vmem:[%s15085_s17 + $0xf54] ss:$8 sps:$4 sm:$0xff]  }
 0x229   : > { %9567 = vmatpush1.bf16.msra.mxu0 %v13254_v4 }
 0x22a   : > { %9608 = vmatpush1.bf16.msra.mxu1 %v13257_v5  ;;  %9568 = vmatprep.subr.bf16.mxu0 %v13262_v6  ;;  %v13326_v6 = vld [vmem:[%s15085_s17 + $0xe50] ss:$8 sps:$4 sm:$0xff]  }
 0x22b   : > { %9609 = vmatprep.subr.bf16.mxu1 %v13265_v8  ;;  %v13329_v8 = vld [vmem:[%s15085_s17 + $0xf50] ss:$8 sps:$4 sm:$0xff]  }
 0x22d   : > { %9569 = vmatpush1.bf16.msra.mxu0 %v13260_v9 }
 0x22e   : > { %9610 = vmatpush1.bf16.msra.mxu1 %v13263_v36  ;;  %9570 = vmatprep.subr.bf16.mxu0 %v13268_v10 }
 0x22f   : > { %9611 = vmatprep.subr.bf16.mxu1 %v13271_v12 }
 0x231   : > { %9571 = vmatpush2.bf16.msra.mxu0 %v13266_v13  ;;  %v13337_v13 = vld [vmem:[%s15085_s17 + $0xf44] ss:$8 sps:$4 sm:$0xff]  }
 0x232   : > { %9612 = vmatpush2.bf16.msra.mxu1 %v13269_v14  ;;  %9572 = vmatprep.subr.bf16.mxu0 %v13274_v15  ;;  %v13332_v14 = vld [vmem:[%s15085_s17 + $0xe40] ss:$8 sps:$4 sm:$0xff]  }
 0x233   : > { %9613 = vmatprep.subr.bf16.mxu1 %v13277_v17  ;;  %v13335_v15 = vld [vmem:[%s15085_s17 + $0xf40] ss:$8 sps:$4 sm:$0xff]   ;;  %v13340_v17 = vld [vmem:[%s15085_s17 + $0xe34] ss:$8 sps:$4 sm:$0xff]  }
 0x235   : > { %9573 = vmatpush2.bf16.msra.mxu0 %v13272_v18  ;;  %v13343_v18 = vld [vmem:[%s15085_s17 + $0xf34] ss:$8 sps:$4 sm:$0xff]  }
 0x236   : > { %9614 = vmatpush2.bf16.msra.mxu1 %v13275_v19  ;;  %9574 = vmatprep.subr.bf16.mxu0 %v13280_v20  ;;  %v13338_v19 = vld [vmem:[%s15085_s17 + $0xe30] ss:$8 sps:$4 sm:$0xff]  }
 0x237   : > { %9615 = vmatprep.subr.bf16.mxu1 %v13283_v22  ;;  %v13341_v20 = vld [vmem:[%s15085_s17 + $0xf30] ss:$8 sps:$4 sm:$0xff]   ;;  %v13346_v22 = vld [vmem:[%s15085_s17 + $0xe24] ss:$8 sps:$4 sm:$0xff]  }
 0x239   : > { %9575 = vmatpush2.bf16.msra.mxu0 %v13278_v23  ;;  %v13349_v23 = vld [vmem:[%s15085_s17 + $0xf24] ss:$8 sps:$4 sm:$0xff]  }
 0x23a   : > { %9616 = vmatpush2.bf16.msra.mxu1 %v13281_v24  ;;  %9576 = vmatprep.subr.bf16.mxu0 %v13286_v58  ;;  %v13344_v24 = vld [vmem:[%s15085_s17 + $0xe20] ss:$8 sps:$4 sm:$0xff]  }
 0x23b   : > { %9617 = vmatprep.subr.bf16.mxu1 %v13289_v25  ;;  %v13347_v58 = vld [vmem:[%s15085_s17 + $0xf20] ss:$8 sps:$4 sm:$0xff]   ;;  %v13352_v25 = vld [vmem:[%s15085_s17 + $0xe14] ss:$8 sps:$4 sm:$0xff]  }
 0x23d   : > { %9577 = vmatpush2.bf16.msra.mxu0 %v13284_v28  ;;  %v13355_v28 = vld [vmem:[%s15085_s17 + $0xf14] ss:$8 sps:$4 sm:$0xff]  }
 0x23e   : > { %9618 = vmatpush2.bf16.msra.mxu1 %v13287_v7  ;;  %9578 = vmatprep.subr.bf16.mxu0 %v13292_v63  ;;  %v13350_v7 = vld [vmem:[%s15085_s17 + $0xe10] ss:$8 sps:$4 sm:$0xff]  }
 0x23f   : > { %9619 = vmatprep.subr.bf16.mxu1 %v13295_v29  ;;  %v13353_v63 = vld [vmem:[%s15085_s17 + $0xf10] ss:$8 sps:$4 sm:$0xff]   ;;  %v13358_v29 = vld [vmem:[%s15085_s17 + $0xe04] ss:$8 sps:$4 sm:$0xff]  }
 0x241   : > { %9579 = vmatpush2.bf16.msra.mxu0 %v13290_v31  ;;  %v13361_v31 = vld [vmem:[%s15085_s17 + $0xf04] ss:$8 sps:$4 sm:$0xff]  }
 0x242   : > { %9620 = vmatpush2.bf16.msra.mxu1 %v13293_v57  ;;  %9580 = vmatprep.subr.bf16.mxu0 %v13298_v33  ;;  %v13356_v57 = vld [vmem:[%s15085_s17 + $0xe00] ss:$8 sps:$4 sm:$0xff]  }
 0x243   : > { %9621 = vmatprep.subr.bf16.mxu1 %v13301_v34  ;;  %v13359_v33 = vld [vmem:[%s15085_s17 + $0xf00] ss:$8 sps:$4 sm:$0xff]   ;;  %v13364_v34 = vld [vmem:[%s15085_s17 + $0xef4] ss:$8 sps:$4 sm:$0xff]  }
 0x245   : > { %9581 = vmatpush2.bf16.msra.mxu0 %v13296_v37  ;;  %v13362_v37 = vld [vmem:[%s15085_s17 + $0xef0] ss:$8 sps:$4 sm:$0xff]  }
 0x246   : > { %9622 = vmatpush2.bf16.msra.mxu1 %v13299_v38  ;;  %9582 = vmatprep.subr.bf16.mxu0 %v13304_v39  ;;  %v13365_v38 = vld [vmem:[%s15085_s17 + $0xff0] ss:$8 sps:$4 sm:$0xff]   ;;  %v13370_v39 = vld [vmem:[%s15085_s17 + $0xee4] ss:$8 sps:$4 sm:$0xff]  }
 0x247   : > { %9623 = vmatprep.subr.bf16.mxu1 %v13307_v30  ;;  %v13373_v30 = vld [vmem:[%s15085_s17 + $0xfe4] ss:$8 sps:$4 sm:$0xff]  }
 0x249   : > { %9583 = vmatpush2.bf16.msra.mxu0 %v13302_v11  ;;  %v13368_v11 = vld [vmem:[%s15085_s17 + $0xee0] ss:$8 sps:$4 sm:$0xff]  }
 0x24a   : > { %9624 = vmatpush2.bf16.msra.mxu1 %v13305_v41  ;;  %9584 = vmatprep.subr.bf16.mxu0 %v13310_v42  ;;  %v13371_v41 = vld [vmem:[%s15085_s17 + $0xfe0] ss:$8 sps:$4 sm:$0xff]   ;;  %v13376_v42 = vld [vmem:[%s15085_s17 + $0xed4] ss:$8 sps:$4 sm:$0xff]  }
 0x24b   : > { %9625 = vmatprep.subr.bf16.mxu1 %v13313_v43  ;;  %v13379_v43 = vld [vmem:[%s15085_s17 + $0xfd4] ss:$8 sps:$4 sm:$0xff]  }
 0x24d   : > { %9585 = vmatpush2.bf16.msra.mxu0 %v13308_v48  ;;  %v13382_v48 = vld [vmem:[%s15085_s17 + $0xec4] ss:$8 sps:$4 sm:$0xff]  }
 0x24e   : > { %9626 = vmatpush2.bf16.msra.mxu1 %v13311_v21  ;;  %9636 = vmatprep.subr.bf16.mxu0 %v13316_v49  ;;  %v13385_v21 = vld [vmem:[%s15085_s17 + $0xfc4] ss:$8 sps:$4 sm:$0xff]   ;;  %v13380_v49 = vld [vmem:[%s15085_s17 + $0xec0] ss:$8 sps:$4 sm:$0xff]  }
 0x24f   : > { %9677 = vmatprep.subr.bf16.mxu1 %v13319_v52  ;;  %v13383_v52 = vld [vmem:[%s15085_s17 + $0xfc0] ss:$8 sps:$4 sm:$0xff]  }
 0x250   : > { %v9342_v60 = vpop.f32.mrf.mxu0  ;;  %9587 = vmatmul.mubr.bf16.vlgmr.msra.gmra.mxu0 %v1914_v47  ;;  %v13377_v47 = vld [vmem:[%s15085_s17 + $0xfd0] ss:$8 sps:$4 sm:$0xff]  }
 0x251   : > { %v9383_v61 = vpop.f32.mrf.mxu1  ;;  %9628 = vmatmul.mubr.bf16.vlgmr.msra.gmra.mxu1 %v1936_v54  ;;  %v9343_v62 = vadd.f32 %v9342_v60, %v15602_v45  ;;  %9637 = vmatpush1.bf16.msra.mxu0 %v13314_v26  ;;  %v13388_v26 = vld [vmem:[%s15085_s17 + $0xeb4] ss:$8 sps:$4 sm:$0xff]   ;;  %v13389_v54 = vld [vmem:[%s15085_s17 + $0xfb0] ss:$8 sps:$4 sm:$0xff]  }
 0x252   : > { %9678 = vmatpush1.bf16.msra.mxu1 %v13317_v27  ;;  %v9344_v0 = vpop.f32.mrf.mxu0  ;;  %9638 = vmatprep.subr.bf16.mxu0 %v13322_v16  ;;  %v13391_v27 = vld [vmem:[%s15085_s17 + $0xfb4] ss:$8 sps:$4 sm:$0xff]   ;;  %v13394_v16 = vld [vmem:[%s15085_s17 + $0xea4] ss:$8 sps:$4 sm:$0xff]  }
 0x253   : > { %v9385_v1 = vpop.f32.mrf.mxu1  ;;  %9679 = vmatprep.subr.bf16.mxu1 %v13325_v55  ;;  %v15682_v4 = vadd.f32 %v9383_v61, %v9343_v62  ;;  %v9345_v5 = vadd.f32 %v9344_v0, %v15607_v51  ;;  %9668 = vmatprep.mubr.bf16.mxu0 %v1935_v53  ;;  %v13334_v51 = vld [vmem:[%s15085_s17 + $0xe44] ss:$8 sps:$4 sm:$0xff]   ;;  %v13386_v53 = vld [vmem:[%s15085_s17 + $0xeb0] ss:$8 sps:$4 sm:$0xff]   ;;  %v13400_v60 = vld [vmem:[%s15085_s17 + $0xe94] ss:$8 sps:$4 sm:$0xff]  }
 0x254   : > { %9709 = vmatprep.mubr.bf16.mxu1 %v1939_v59  ;;  %v9346_v45 = vpop.f32.mrf.mxu0  ;;  %v13397_v55 = vld [vmem:[%s15085_s17 + $0xfa4] ss:$8 sps:$4 sm:$0xff]   ;;  %v13395_v59 = vld [vmem:[%s15085_s17 + $0xfa0] ss:$8 sps:$4 sm:$0xff]   ;;  %v13403_v61 = vld [vmem:[%s15085_s17 + $0xf94] ss:$8 sps:$4 sm:$0xff]  }
 0x255   : > { %v9387_v9 = vpop.f32.mrf.mxu1  ;;  %v15687_v36 = vadd.f32 %v9385_v1, %v9345_v5  ;;  %9639 = vmatpush1.bf16.msra.mxu0 %v13320_v56  ;;  %v15732_v56 = vld [vmem:[%s15170_s0 + $0x20] sm:$0xff]  ;;  %v13398_v0 = vld [vmem:[%s15085_s17 + $0xe90] ss:$8 sps:$4 sm:$0xff]  }
 0x256   : > { %9680 = vmatpush1.bf16.msra.mxu1 %v13323_v32  ;;  %v9347_v10 = vpop.f32.mrf.mxu0  ;;  %9640 = vmatprep.subr.bf16.mxu0 %v13328_v2  ;;  %v13392_v32 = vld [vmem:[%s15085_s17 + $0xea0] ss:$8 sps:$4 sm:$0xff]   ;;  %v15740_v62 = vrot.slane %v15732_v56, %v15173_v50  ;;  %v13401_v1 = vld [vmem:[%s15085_s17 + $0xf90] ss:$8 sps:$4 sm:$0xff]   ;;  %v13406_v2 = vld [vmem:[%s15085_s17 + $0xe84] ss:$8 sps:$4 sm:$0xff]  }
 0x257   : > { %v9388_v12 = vpop.f32.mrf.mxu1  ;;  %9681 = vmatprep.subr.bf16.mxu1 %v13331_v3  ;;  %v13409_v3 = vld [vmem:[%s15085_s17 + $0xf84] ss:$8 sps:$4 sm:$0xff]   ;;  %v13407_v45 = vld [vmem:[%s15085_s17 + $0xf80] ss:$8 sps:$4 sm:$0xff]   ;;  %v13413_v9 = vld [vmem:[%s15085_s17 + $0x1074] ss:$8 sps:$4 sm:$0xff]  }
 0x258   : > { %v1955_v5 = vcombine.high %v15740_v62, %v15740_v62  ;;  %v13416_v10 = vld [vmem:[%s15085_s17 + $0x1174] ss:$8 sps:$4 sm:$0xff]   ;;  %v13411_v12 = vld [vmem:[%s15085_s17 + $0x1070] ss:$8 sps:$4 sm:$0xff]  }
 0x259   : > { %9641 = vmatpush1.bf16.msra.mxu0 %v13326_v6  ;;  %v1921_v6 = vrot.slane %v15658_v40, %v15173_v50  ;;  %v13419_v40 = vld [vmem:[%s15085_s17 + $0x1064] ss:$8 sps:$4 sm:$0xff]  }
 0x25a   : > { %9682 = vmatpush1.bf16.msra.mxu1 %v13329_v8  ;;  %9642 = vmatprep.subr.bf16.mxu0 %v13334_v51  ;;  %v13404_v8 = vld [vmem:[%s15085_s17 + $0xe80] ss:$8 sps:$4 sm:$0xff]   ;;  %v13414_v51 = vld [vmem:[%s15085_s17 + $0x1170] ss:$8 sps:$4 sm:$0xff]  }
 0x25b   : > { %9683 = vmatprep.subr.bf16.mxu1 %v13337_v13  ;;  %v1977_v13 = vrot.slane %v1955_v5, %v15173_v50  ;;  %v13476_v5 = vld [vmem:[%s15085_s17 + $0x11d4] ss:$8 sps:$4 sm:$0xff]  }
 0x25d   : > { %9643 = vmatpush1.bf16.msra.mxu0 %v13332_v14  ;;  %v1937_v14 = vcombine.high %v1921_v6, %v1921_v6 }
 0x25e   : > { %9684 = vmatpush1.bf16.msra.mxu1 %v13335_v15  ;;  %9644 = vmatprep.subr.bf16.mxu0 %v13340_v17  ;;  %v13422_v15 = vld [vmem:[%s15085_s17 + $0x1164] ss:$8 sps:$4 sm:$0xff]   ;;  %v13417_v17 = vld [vmem:[%s15085_s17 + $0x1060] ss:$8 sps:$4 sm:$0xff]  }
 0x25f   : > { %9685 = vmatprep.subr.bf16.mxu1 %v13343_v18  ;;  %v13420_v18 = vld [vmem:[%s15085_s17 + $0x1160] ss:$8 sps:$4 sm:$0xff]  }
 0x261   : > { %9645 = vmatpush1.bf16.msra.mxu0 %v13338_v19  ;;  %v1987_v19 = vcombine.high %v1977_v13, %v1977_v13 }
 0x262   : > { %9686 = vmatpush1.bf16.msra.mxu1 %v13341_v20  ;;  %9646 = vmatprep.subr.bf16.mxu0 %v13346_v22 }
 0x263   : > { %9687 = vmatprep.subr.bf16.mxu1 %v13349_v23 }
 0x265   : > { %9647 = vmatpush1.bf16.msra.mxu0 %v13344_v24 }
 0x266   : > { %9688 = vmatpush1.bf16.msra.mxu1 %v13347_v58  ;;  %9648 = vmatprep.subr.bf16.mxu0 %v13352_v25  ;;  %v13425_v25 = vld [vmem:[%s15085_s17 + $0x1054] ss:$8 sps:$4 sm:$0xff]  }
 0x267   : > { %9689 = vmatprep.subr.bf16.mxu1 %v13355_v28  ;;  %v13428_v28 = vld [vmem:[%s15085_s17 + $0x1154] ss:$8 sps:$4 sm:$0xff]  }
 0x269   : > { %9649 = vmatpush1.bf16.msra.mxu0 %v13350_v7 }
 0x26a   : > { %9690 = vmatpush1.bf16.msra.mxu1 %v13353_v63  ;;  %9650 = vmatprep.subr.bf16.mxu0 %v13358_v29  ;;  %v13423_v29 = vld [vmem:[%s15085_s17 + $0x1050] ss:$8 sps:$4 sm:$0xff]  }
 0x26b   : > { %9691 = vmatprep.subr.bf16.mxu1 %v13361_v31  ;;  %v13426_v31 = vld [vmem:[%s15085_s17 + $0x1150] ss:$8 sps:$4 sm:$0xff]  }
 0x26d   : > { %9651 = vmatpush1.bf16.msra.mxu0 %v13356_v57 }
 0x26e   : > { %9692 = vmatpush1.bf16.msra.mxu1 %v13359_v33  ;;  %9652 = vmatprep.subr.bf16.mxu0 %v13364_v34 }
 0x26f   : > { %9693 = vmatprep.subr.bf16.mxu1 %v13367_v35 }
 0x271   : > { %9653 = vmatpush2.bf16.msra.mxu0 %v13362_v37  ;;  %v13434_v37 = vld [vmem:[%s15085_s17 + $0x1144] ss:$8 sps:$4 sm:$0xff]  }
 0x272   : > { %9694 = vmatpush2.bf16.msra.mxu1 %v13365_v38  ;;  %9654 = vmatprep.subr.bf16.mxu0 %v13370_v39  ;;  %v13429_v38 = vld [vmem:[%s15085_s17 + $0x1040] ss:$8 sps:$4 sm:$0xff]  }
 0x273   : > { %9695 = vmatprep.subr.bf16.mxu1 %v13373_v30  ;;  %v13432_v39 = vld [vmem:[%s15085_s17 + $0x1140] ss:$8 sps:$4 sm:$0xff]   ;;  %v13437_v30 = vld [vmem:[%s15085_s17 + $0x1034] ss:$8 sps:$4 sm:$0xff]  }
 0x275   : > { %9655 = vmatpush2.bf16.msra.mxu0 %v13368_v11  ;;  %v13440_v11 = vld [vmem:[%s15085_s17 + $0x1134] ss:$8 sps:$4 sm:$0xff]  }
 0x276   : > { %9696 = vmatpush2.bf16.msra.mxu1 %v13371_v41  ;;  %9656 = vmatprep.subr.bf16.mxu0 %v13376_v42  ;;  %v13435_v41 = vld [vmem:[%s15085_s17 + $0x1030] ss:$8 sps:$4 sm:$0xff]  }
 0x277   : > { %9697 = vmatprep.subr.bf16.mxu1 %v13379_v43  ;;  %v13438_v42 = vld [vmem:[%s15085_s17 + $0x1130] ss:$8 sps:$4 sm:$0xff]   ;;  %v13443_v43 = vld [vmem:[%s15085_s17 + $0x1024] ss:$8 sps:$4 sm:$0xff]  }
 0x279   : > { %9657 = vmatpush2.bf16.msra.mxu0 %v13374_v46  ;;  %v13446_v46 = vld [vmem:[%s15085_s17 + $0x1124] ss:$8 sps:$4 sm:$0xff]  }
 0x27a   : > { %9698 = vmatpush2.bf16.msra.mxu1 %v13377_v47  ;;  %9658 = vmatprep.subr.bf16.mxu0 %v13382_v48  ;;  %v13441_v47 = vld [vmem:[%s15085_s17 + $0x1020] ss:$8 sps:$4 sm:$0xff]  }
 0x27b   : > { %9699 = vmatprep.subr.bf16.mxu1 %v13385_v21  ;;  %v13444_v48 = vld [vmem:[%s15085_s17 + $0x1120] ss:$8 sps:$4 sm:$0xff]   ;;  %v13449_v21 = vld [vmem:[%s15085_s17 + $0x1014] ss:$8 sps:$4 sm:$0xff]  }
 0x27d   : > { %9659 = vmatpush2.bf16.msra.mxu0 %v13380_v49  ;;  %v13452_v49 = vld [vmem:[%s15085_s17 + $0x1114] ss:$8 sps:$4 sm:$0xff]  }
 0x27e   : > { %9700 = vmatpush2.bf16.msra.mxu1 %v13383_v52  ;;  %9660 = vmatprep.subr.bf16.mxu0 %v13388_v26  ;;  %v13447_v52 = vld [vmem:[%s15085_s17 + $0x1010] ss:$8 sps:$4 sm:$0xff]  }
 0x27f   : > { %9701 = vmatprep.subr.bf16.mxu1 %v13391_v27  ;;  %v13450_v26 = vld [vmem:[%s15085_s17 + $0x1110] ss:$8 sps:$4 sm:$0xff]   ;;  %v13455_v27 = vld [vmem:[%s15085_s17 + $0x1004] ss:$8 sps:$4 sm:$0xff]  }
 0x281   : > { %9661 = vmatpush2.bf16.msra.mxu0 %v13386_v53  ;;  %v13458_v53 = vld [vmem:[%s15085_s17 + $0x1104] ss:$8 sps:$4 sm:$0xff]  }
 0x282   : > { %9702 = vmatpush2.bf16.msra.mxu1 %v13389_v54  ;;  %9662 = vmatprep.subr.bf16.mxu0 %v13394_v16  ;;  %v13453_v54 = vld [vmem:[%s15085_s17 + $0x1000] ss:$8 sps:$4 sm:$0xff]  }
 0x283   : > { %9703 = vmatprep.subr.bf16.mxu1 %v13397_v55  ;;  %v13456_v16 = vld [vmem:[%s15085_s17 + $0x1100] ss:$8 sps:$4 sm:$0xff]   ;;  %v13461_v55 = vld [vmem:[%s15085_s17 + $0x10f4] ss:$8 sps:$4 sm:$0xff]  }
 0x285   : > { %9663 = vmatpush2.bf16.msra.mxu0 %v13392_v32  ;;  %v13464_v32 = vld [vmem:[%s15085_s17 + $0x11f4] ss:$8 sps:$4 sm:$0xff]  }
 0x286   : > { %9704 = vmatpush2.bf16.msra.mxu1 %v13395_v59  ;;  %9664 = vmatprep.subr.bf16.mxu0 %v13400_v60  ;;  %v13459_v59 = vld [vmem:[%s15085_s17 + $0x10f0] ss:$8 sps:$4 sm:$0xff]  }
 0x287   : > { %9705 = vmatprep.subr.bf16.mxu1 %v13403_v61  ;;  %v13462_v60 = vld [vmem:[%s15085_s17 + $0x11f0] ss:$8 sps:$4 sm:$0xff]   ;;  %v13467_v61 = vld [vmem:[%s15085_s17 + $0x10e4] ss:$8 sps:$4 sm:$0xff]  }
 0x289   : > { %9665 = vmatpush2.bf16.msra.mxu0 %v13398_v0  ;;  %v13470_v0 = vld [vmem:[%s15085_s17 + $0x11e4] ss:$8 sps:$4 sm:$0xff]  }
 0x28a   : > { %9706 = vmatpush2.bf16.msra.mxu1 %v13401_v1  ;;  %9666 = vmatprep.subr.bf16.mxu0 %v13406_v2  ;;  %v13465_v1 = vld [vmem:[%s15085_s17 + $0x10e0] ss:$8 sps:$4 sm:$0xff]  }
 0x28b   : > { %9707 = vmatprep.subr.bf16.mxu1 %v13409_v3  ;;  %v13468_v2 = vld [vmem:[%s15085_s17 + $0x11e0] ss:$8 sps:$4 sm:$0xff]   ;;  %v13473_v3 = vld [vmem:[%s15085_s17 + $0x10d4] ss:$8 sps:$4 sm:$0xff]  }
 0x28d   : > { %9667 = vmatpush2.bf16.msra.mxu0 %v13404_v8  ;;  %v13474_v8 = vld [vmem:[%s15085_s17 + $0x11d0] ss:$8 sps:$4 sm:$0xff]  }
 0x28e   : > { %9708 = vmatpush2.bf16.msra.mxu1 %v13407_v45  ;;  %9718 = vmatprep.subr.bf16.mxu0 %v13413_v9  ;;  %v13479_v45 = vld [vmem:[%s15085_s17 + $0x10c4] ss:$8 sps:$4 sm:$0xff]  }
 0x28f   : > { %9759 = vmatprep.subr.bf16.mxu1 %v13416_v10  ;;  %v13482_v9 = vld [vmem:[%s15085_s17 + $0x11c4] ss:$8 sps:$4 sm:$0xff]   ;;  %v13477_v10 = vld [vmem:[%s15085_s17 + $0x10c0] ss:$8 sps:$4 sm:$0xff]  }
 0x290   : > { %v9424_v20 = vpop.f32.mrf.mxu0  ;;  %9669 = vmatmul.mubr.bf16.vlgmr.msra.gmra.mxu0 %v1921_v6  ;;  %v13471_v6 = vld [vmem:[%s15085_s17 + $0x10d0] ss:$8 sps:$4 sm:$0xff]  }
 0x291   : > { %v9465_v22 = vpop.f32.mrf.mxu1  ;;  %9710 = vmatmul.mubr.bf16.vlgmr.msra.gmra.mxu1 %v1937_v14  ;;  %v9425_v23 = vadd.f32 %v9424_v20, %v15682_v4  ;;  %9719 = vmatpush1.bf16.msra.mxu0 %v13411_v12  ;;  %v13480_v12 = vld [vmem:[%s15085_s17 + $0x11c0] ss:$8 sps:$4 sm:$0xff]   ;;  %v13483_v14 = vld [vmem:[%s15085_s17 + $0x10b0] ss:$8 sps:$4 sm:$0xff]  }
 0x292   : > { %9760 = vmatpush1.bf16.msra.mxu1 %v13414_v51  ;;  %v9426_v24 = vpop.f32.mrf.mxu0  ;;  %9720 = vmatprep.subr.bf16.mxu0 %v13419_v40  ;;  %v13485_v51 = vld [vmem:[%s15085_s17 + $0x10b4] ss:$8 sps:$4 sm:$0xff]   ;;  %v13486_v40 = vld [vmem:[%s15085_s17 + $0x11b0] ss:$8 sps:$4 sm:$0xff]   ;;  %v13492_v20 = vld [vmem:[%s15085_s17 + $0x11a0] ss:$8 sps:$4 sm:$0xff]  }
 0x293   : > { %v9467_v58 = vpop.f32.mrf.mxu1  ;;  %9761 = vmatprep.subr.bf16.mxu1 %v13422_v15  ;;  %v15764_v7 = vadd.f32 %v9465_v22, %v9425_v23  ;;  %v9427_v63 = vadd.f32 %v9426_v24, %v15687_v36  ;;  %9750 = vmatprep.mubr.bf16.mxu0 %v1977_v13  ;;  %v13431_v36 = vld [vmem:[%s15085_s17 + $0x1044] ss:$8 sps:$4 sm:$0xff]   ;;  %v13488_v13 = vld [vmem:[%s15085_s17 + $0x11b4] ss:$8 sps:$4 sm:$0xff]  }
 0x294   : > { %9791 = vmatprep.mubr.bf16.mxu1 %v1987_v19  ;;  %v9428_v4 = vpop.f32.mrf.mxu0  ;;  %v13491_v15 = vld [vmem:[%s15085_s17 + $0x10a4] ss:$8 sps:$4 sm:$0xff]   ;;  %v13489_v19 = vld [vmem:[%s15085_s17 + $0x10a0] ss:$8 sps:$4 sm:$0xff]   ;;  %v13497_v22 = vld [vmem:[%s15085_s17 + $0x1094] ss:$8 sps:$4 sm:$0xff]  }
 0x295   : > { %v9469_v57 = vpop.f32.mrf.mxu1  ;;  %v15769_v33 = vadd.f32 %v9467_v58, %v9427_v63  ;;  %9721 = vmatpush1.bf16.msra.mxu0 %v13417_v17  ;;  %v13494_v17 = vld [vmem:[%s15085_s17 + $0x11a4] ss:$8 sps:$4 sm:$0xff]   ;;  %v13500_v23 = vld [vmem:[%s15085_s17 + $0x1194] ss:$8 sps:$4 sm:$0xff]   ;;  %v13498_v58 = vld [vmem:[%s15085_s17 + $0x1190] ss:$8 sps:$4 sm:$0xff]  }
 0x296   : > { %9762 = vmatpush1.bf16.msra.mxu1 %v13420_v18  ;;  %v9429_v34 = vpop.f32.mrf.mxu0  ;;  %9722 = vmatprep.subr.bf16.mxu0 %v13425_v25  ;;  %v1940_v18 = vcombine.high %v15732_v56, %v15732_v56  ;;  %v13495_v56 = vld [vmem:[%s15085_s17 + $0x1090] ss:$8 sps:$4 sm:$0xff]   ;;  %v13503_v25 = vld [vmem:[%s15085_s17 + $0x1084] ss:$8 sps:$4 sm:$0xff]   ;;  %v13504_v4 = vld [vmem:[%s15085_s17 + $0x1180] ss:$8 sps:$4 sm:$0xff]  }
 0x297   : > { %v9470_v35 = vpop.f32.mrf.mxu1  ;;  %9763 = vmatprep.subr.bf16.mxu1 %v13428_v28  ;;  %v13506_v28 = vld [vmem:[%s15085_s17 + $0x1184] ss:$8 sps:$4 sm:$0xff]   ;;  %v13509_v57 = vld [vmem:[%s15085_s17 + $0x1274] ss:$8 sps:$4 sm:$0xff]  }
 0x298   : > { %v15820_v24 = vrot.slane %v1940_v18, %v15173_v50  ;;  %v13512_v34 = vld [vmem:[%s15085_s17 + $0x1374] ss:$8 sps:$4 sm:$0xff]   ;;  %v13507_v35 = vld [vmem:[%s15085_s17 + $0x1270] ss:$8 sps:$4 sm:$0xff]  }
 0x299   : > { %9723 = vmatpush1.bf16.msra.mxu0 %v13423_v29  ;;  %v1963_v29 = vrot.slane %v15740_v62, %v15173_v50  ;;  %v13515_v62 = vld [vmem:[%s15085_s17 + $0x1264] ss:$8 sps:$4 sm:$0xff]   ;;  %v13560_v18 = vld [vmem:[%s15085_s17 + $0x13f4] ss:$8 sps:$4 sm:$0xff]  }
 0x29a   : > { %9764 = vmatpush1.bf16.msra.mxu1 %v13426_v31  ;;  %9724 = vmatprep.subr.bf16.mxu0 %v13431_v36  ;;  %v1956_v63 = vcombine.high %v15820_v24, %v15820_v24  ;;  %v13501_v31 = vld [vmem:[%s15085_s17 + $0x1080] ss:$8 sps:$4 sm:$0xff]   ;;  %v13510_v36 = vld [vmem:[%s15085_s17 + $0x1370] ss:$8 sps:$4 sm:$0xff]  }
 0x29b   : > { %9765 = vmatprep.subr.bf16.mxu1 %v13434_v37 }
 0x29c   : > { %v1984_v37 = vrot.slane %v1956_v63, %v15173_v50  ;;  %v13567_v63 = vld [vmem:[%s15085_s17 + $0x12d0] ss:$8 sps:$4 sm:$0xff]  }
 0x29d   : > { %9725 = vmatpush1.bf16.msra.mxu0 %v13429_v38  ;;  %v1985_v38 = vcombine.high %v1963_v29, %v1963_v29 }
 0x29e   : > { %9766 = vmatpush1.bf16.msra.mxu1 %v13432_v39  ;;  %9726 = vmatprep.subr.bf16.mxu0 %v13437_v30  ;;  %v13518_v39 = vld [vmem:[%s15085_s17 + $0x1364] ss:$8 sps:$4 sm:$0xff]   ;;  %v13513_v30 = vld [vmem:[%s15085_s17 + $0x1260] ss:$8 sps:$4 sm:$0xff]  }
 0x29f   : > { %9767 = vmatprep.subr.bf16.mxu1 %v13440_v11  ;;  %v13516_v11 = vld [vmem:[%s15085_s17 + $0x1360] ss:$8 sps:$4 sm:$0xff]  }
 0x2a1   : > { %9727 = vmatpush1.bf16.msra.mxu0 %v13435_v41  ;;  %v1988_v41 = vcombine.high %v1984_v37, %v1984_v37 }
 0x2a2   : > { %9768 = vmatpush1.bf16.msra.mxu1 %v13438_v42  ;;  %9728 = vmatprep.subr.bf16.mxu0 %v13443_v43 }
 0x2a3   : > { %9769 = vmatprep.subr.bf16.mxu1 %v13446_v46 }
 0x2a5   : > { %9729 = vmatpush1.bf16.msra.mxu0 %v13441_v47 }
 0x2a6   : > { %9770 = vmatpush1.bf16.msra.mxu1 %v13444_v48  ;;  %9730 = vmatprep.subr.bf16.mxu0 %v13449_v21  ;;  %v13521_v21 = vld [vmem:[%s15085_s17 + $0x1254] ss:$8 sps:$4 sm:$0xff]  }
 0x2a7   : > { %9771 = vmatprep.subr.bf16.mxu1 %v13452_v49  ;;  %v13524_v49 = vld [vmem:[%s15085_s17 + $0x1354] ss:$8 sps:$4 sm:$0xff]  }
 0x2a9   : > { %9731 = vmatpush1.bf16.msra.mxu0 %v13447_v52 }
 0x2aa   : > { %9772 = vmatpush1.bf16.msra.mxu1 %v13450_v26  ;;  %9732 = vmatprep.subr.bf16.mxu0 %v13455_v27  ;;  %v13519_v27 = vld [vmem:[%s15085_s17 + $0x1250] ss:$8 sps:$4 sm:$0xff]  }
 0x2ab   : > { %9773 = vmatprep.subr.bf16.mxu1 %v13458_v53  ;;  %v13522_v53 = vld [vmem:[%s15085_s17 + $0x1350] ss:$8 sps:$4 sm:$0xff]  }
 0x2ad   : > { %9733 = vmatpush1.bf16.msra.mxu0 %v13453_v54 }
 0x2ae   : > { %9774 = vmatpush1.bf16.msra.mxu1 %v13456_v16  ;;  %9734 = vmatprep.subr.bf16.mxu0 %v13461_v55 }
 0x2af   : > { %9775 = vmatprep.subr.bf16.mxu1 %v13464_v32 }
 0x2b1   : > { %9735 = vmatpush2.bf16.msra.mxu0 %v13459_v59  ;;  %v13530_v59 = vld [vmem:[%s15085_s17 + $0x1344] ss:$8 sps:$4 sm:$0xff]  }
 0x2b2   : > { %9776 = vmatpush2.bf16.msra.mxu1 %v13462_v60  ;;  %9736 = vmatprep.subr.bf16.mxu0 %v13467_v61  ;;  %v13525_v60 = vld [vmem:[%s15085_s17 + $0x1240] ss:$8 sps:$4 sm:$0xff]  }
 0x2b3   : > { %9777 = vmatprep.subr.bf16.mxu1 %v13470_v0  ;;  %v13528_v61 = vld [vmem:[%s15085_s17 + $0x1340] ss:$8 sps:$4 sm:$0xff]   ;;  %v13533_v0 = vld [vmem:[%s15085_s17 + $0x1234] ss:$8 sps:$4 sm:$0xff]  }
 0x2b5   : > { %9737 = vmatpush2.bf16.msra.mxu0 %v13465_v1  ;;  %v13536_v1 = vld [vmem:[%s15085_s17 + $0x1334] ss:$8 sps:$4 sm:$0xff]  }
 0x2b6   : > { %9778 = vmatpush2.bf16.msra.mxu1 %v13468_v2  ;;  %9738 = vmatprep.subr.bf16.mxu0 %v13473_v3  ;;  %v13531_v2 = vld [vmem:[%s15085_s17 + $0x1230] ss:$8 sps:$4 sm:$0xff]  }
 0x2b7   : > { %9779 = vmatprep.subr.bf16.mxu1 %v13476_v5  ;;  %v13534_v3 = vld [vmem:[%s15085_s17 + $0x1330] ss:$8 sps:$4 sm:$0xff]   ;;  %v13539_v5 = vld [vmem:[%s15085_s17 + $0x1224] ss:$8 sps:$4 sm:$0xff]  }
 0x2b9   : > { %9739 = vmatpush2.bf16.msra.mxu0 %v13471_v6  ;;  %v13542_v6 = vld [vmem:[%s15085_s17 + $0x1324] ss:$8 sps:$4 sm:$0xff]  }
 0x2ba   : > { %9780 = vmatpush2.bf16.msra.mxu1 %v13474_v8  ;;  %9740 = vmatprep.subr.bf16.mxu0 %v13479_v45  ;;  %v13537_v8 = vld [vmem:[%s15085_s17 + $0x1220] ss:$8 sps:$4 sm:$0xff]  }
 0x2bb   : > { %9781 = vmatprep.subr.bf16.mxu1 %v13482_v9  ;;  %v13540_v45 = vld [vmem:[%s15085_s17 + $0x1320] ss:$8 sps:$4 sm:$0xff]   ;;  %v13545_v9 = vld [vmem:[%s15085_s17 + $0x1214] ss:$8 sps:$4 sm:$0xff]  }
 0x2bd   : > { %9741 = vmatpush2.bf16.msra.mxu0 %v13477_v10  ;;  %v13548_v10 = vld [vmem:[%s15085_s17 + $0x1314] ss:$8 sps:$4 sm:$0xff]  }
 0x2be   : > { %9782 = vmatpush2.bf16.msra.mxu1 %v13480_v12  ;;  %9742 = vmatprep.subr.bf16.mxu0 %v13485_v51  ;;  %v13543_v12 = vld [vmem:[%s15085_s17 + $0x1210] ss:$8 sps:$4 sm:$0xff]  }
 0x2bf   : > { %9783 = vmatprep.subr.bf16.mxu1 %v13488_v13  ;;  %v13546_v51 = vld [vmem:[%s15085_s17 + $0x1310] ss:$8 sps:$4 sm:$0xff]   ;;  %v13551_v13 = vld [vmem:[%s15085_s17 + $0x1204] ss:$8 sps:$4 sm:$0xff]  }
 0x2c1   : > { %9743 = vmatpush2.bf16.msra.mxu0 %v13483_v14  ;;  %v13554_v14 = vld [vmem:[%s15085_s17 + $0x1304] ss:$8 sps:$4 sm:$0xff]  }
 0x2c2   : > { %9784 = vmatpush2.bf16.msra.mxu1 %v13486_v40  ;;  %9744 = vmatprep.subr.bf16.mxu0 %v13491_v15  ;;  %v13549_v40 = vld [vmem:[%s15085_s17 + $0x1200] ss:$8 sps:$4 sm:$0xff]  }
 0x2c3   : > { %9785 = vmatprep.subr.bf16.mxu1 %v13494_v17  ;;  %v13552_v15 = vld [vmem:[%s15085_s17 + $0x1300] ss:$8 sps:$4 sm:$0xff]   ;;  %v13557_v17 = vld [vmem:[%s15085_s17 + $0x12f4] ss:$8 sps:$4 sm:$0xff]  }
 0x2c5   : > { %9745 = vmatpush2.bf16.msra.mxu0 %v13489_v19  ;;  %v13555_v19 = vld [vmem:[%s15085_s17 + $0x12f0] ss:$8 sps:$4 sm:$0xff]  }
 0x2c6   : > { %9786 = vmatpush2.bf16.msra.mxu1 %v13492_v20  ;;  %9746 = vmatprep.subr.bf16.mxu0 %v13497_v22  ;;  %v13558_v20 = vld [vmem:[%s15085_s17 + $0x13f0] ss:$8 sps:$4 sm:$0xff]   ;;  %v13563_v22 = vld [vmem:[%s15085_s17 + $0x12e4] ss:$8 sps:$4 sm:$0xff]  }
 0x2c7   : > { %9787 = vmatprep.subr.bf16.mxu1 %v13500_v23  ;;  %v13566_v23 = vld [vmem:[%s15085_s17 + $0x13e4] ss:$8 sps:$4 sm:$0xff]  }
 0x2c9   : > { %9747 = vmatpush2.bf16.msra.mxu0 %v13495_v56  ;;  %v13561_v56 = vld [vmem:[%s15085_s17 + $0x12e0] ss:$8 sps:$4 sm:$0xff]  }
 0x2ca   : > { %9788 = vmatpush2.bf16.msra.mxu1 %v13498_v58  ;;  %9748 = vmatprep.subr.bf16.mxu0 %v13503_v25  ;;  %v13564_v58 = vld [vmem:[%s15085_s17 + $0x13e0] ss:$8 sps:$4 sm:$0xff]   ;;  %v13569_v25 = vld [vmem:[%s15085_s17 + $0x12d4] ss:$8 sps:$4 sm:$0xff]  }
 0x2cb   : > { %9789 = vmatprep.subr.bf16.mxu1 %v13506_v28  ;;  %v13572_v28 = vld [vmem:[%s15085_s17 + $0x13d4] ss:$8 sps:$4 sm:$0xff]  }
 0x2cd   : > { %9749 = vmatpush2.bf16.msra.mxu0 %v13501_v31  ;;  %v13575_v31 = vld [vmem:[%s15085_s17 + $0x12c4] ss:$8 sps:$4 sm:$0xff]  }
 0x2ce   : > { %9790 = vmatpush2.bf16.msra.mxu1 %v13504_v4  ;;  %9800 = vmatprep.subr.bf16.mxu0 %v13509_v57  ;;  %v13578_v4 = vld [vmem:[%s15085_s17 + $0x13c4] ss:$8 sps:$4 sm:$0xff]   ;;  %v13573_v57 = vld [vmem:[%s15085_s17 + $0x12c0] ss:$8 sps:$4 sm:$0xff]  }
 0x2cf   : > { %9841 = vmatprep.subr.bf16.mxu1 %v13512_v34  ;;  %v13576_v34 = vld [vmem:[%s15085_s17 + $0x13c0] ss:$8 sps:$4 sm:$0xff]  }
 0x2d0   : > { %v9506_v42 = vpop.f32.mrf.mxu0  ;;  %9751 = vmatmul.mubr.bf16.vlgmr.msra.gmra.mxu0 %v1963_v29  ;;  %v13570_v29 = vld [vmem:[%s15085_s17 + $0x13d0] ss:$8 sps:$4 sm:$0xff]  }
 0x2d1   : > { %v9547_v43 = vpop.f32.mrf.mxu1  ;;  %9792 = vmatmul.mubr.bf16.vlgmr.msra.gmra.mxu1 %v1985_v38  ;;  %v9507_v46 = vadd.f32 %v9506_v42, %v15764_v7  ;;  %9801 = vmatpush1.bf16.msra.mxu0 %v13507_v35  ;;  %v13581_v35 = vld [vmem:[%s15085_s17 + $0x12b4] ss:$8 sps:$4 sm:$0xff]   ;;  %v13582_v38 = vld [vmem:[%s15085_s17 + $0x13b0] ss:$8 sps:$4 sm:$0xff]  }
 0x2d2   : > { %9842 = vmatpush1.bf16.msra.mxu1 %v13510_v36  ;;  %v9508_v47 = vpop.f32.mrf.mxu0  ;;  %9802 = vmatprep.subr.bf16.mxu0 %v13515_v62  ;;  %v13584_v36 = vld [vmem:[%s15085_s17 + $0x13b4] ss:$8 sps:$4 sm:$0xff]   ;;  %v13587_v62 = vld [vmem:[%s15085_s17 + $0x12a4] ss:$8 sps:$4 sm:$0xff]  }
 0x2d3   : > { %v9549_v48 = vpop.f32.mrf.mxu1  ;;  %9843 = vmatprep.subr.bf16.mxu1 %v13518_v39  ;;  %v15844_v52 = vadd.f32 %v9547_v43, %v9507_v46  ;;  %v9509_v26 = vadd.f32 %v9508_v47, %v15769_v33  ;;  %9832 = vmatprep.mubr.bf16.mxu0 %v1984_v37  ;;  %v13527_v33 = vld [vmem:[%s15085_s17 + $0x1244] ss:$8 sps:$4 sm:$0xff]   ;;  %v13579_v37 = vld [vmem:[%s15085_s17 + $0x12b0] ss:$8 sps:$4 sm:$0xff]   ;;  %v13593_v42 = vld [vmem:[%s15085_s17 + $0x1294] ss:$8 sps:$4 sm:$0xff]  }
 0x2d4   : > { %9873 = vmatprep.mubr.bf16.mxu1 %v1988_v41  ;;  %v9510_v7 = vpop.f32.mrf.mxu0  ;;  %v13590_v39 = vld [vmem:[%s15085_s17 + $0x13a4] ss:$8 sps:$4 sm:$0xff]   ;;  %v13588_v41 = vld [vmem:[%s15085_s17 + $0x13a0] ss:$8 sps:$4 sm:$0xff]   ;;  %v13596_v43 = vld [vmem:[%s15085_s17 + $0x1394] ss:$8 sps:$4 sm:$0xff]  }
 0x2d5   : > { %v9551_v54 = vpop.f32.mrf.mxu1  ;;  %v15849_v16 = vadd.f32 %v9549_v48, %v9509_v26  ;;  %9803 = vmatpush1.bf16.msra.mxu0 %v13513_v30  ;;  %v15894_v30 = vld [vmem:[%s15170_s0 + $0x28] sm:$0xff]  ;;  %v13591_v47 = vld [vmem:[%s15085_s17 + $0x1290] ss:$8 sps:$4 sm:$0xff]  }
 0x2d6   : > { %9844 = vmatpush1.bf16.msra.mxu1 %v13516_v11  ;;  %v9511_v55 = vpop.f32.mrf.mxu0  ;;  %9804 = vmatprep.subr.bf16.mxu0 %v13521_v21  ;;  %v13585_v11 = vld [vmem:[%s15085_s17 + $0x12a0] ss:$8 sps:$4 sm:$0xff]   ;;  %v15902_v46 = vrot.slane %v15894_v30, %v15173_v50  ;;  %v13594_v48 = vld [vmem:[%s15085_s17 + $0x1390] ss:$8 sps:$4 sm:$0xff]   ;;  %v13599_v21 = vld [vmem:[%s15085_s17 + $0x1284] ss:$8 sps:$4 sm:$0xff]  }
 0x2d7   : > { %v9552_v32 = vpop.f32.mrf.mxu1  ;;  %9845 = vmatprep.subr.bf16.mxu1 %v13524_v49  ;;  %v13602_v49 = vld [vmem:[%s15085_s17 + $0x1384] ss:$8 sps:$4 sm:$0xff]   ;;  %v13600_v7 = vld [vmem:[%s15085_s17 + $0x1380] ss:$8 sps:$4 sm:$0xff]   ;;  %v13606_v54 = vld [vmem:[%s15085_s17 + $0x1474] ss:$8 sps:$4 sm:$0xff]  }
 0x2d8   : > { %v2004_v26 = vcombine.high %v15902_v46, %v15902_v46  ;;  %v13609_v55 = vld [vmem:[%s15085_s17 + $0x1574] ss:$8 sps:$4 sm:$0xff]   ;;  %v13604_v32 = vld [vmem:[%s15085_s17 + $0x1470] ss:$8 sps:$4 sm:$0xff]  }
 0x2d9   : > { %9805 = vmatpush1.bf16.msra.mxu0 %v13519_v27  ;;  %v1970_v27 = vrot.slane %v15820_v24, %v15173_v50  ;;  %v13612_v24 = vld [vmem:[%s15085_s17 + $0x1464] ss:$8 sps:$4 sm:$0xff]  }
 0x2da   : > { %9846 = vmatpush1.bf16.msra.mxu1 %v13522_v53  ;;  %9806 = vmatprep.subr.bf16.mxu0 %v13527_v33  ;;  %v13597_v53 = vld [vmem:[%s15085_s17 + $0x1280] ss:$8 sps:$4 sm:$0xff]   ;;  %v13607_v33 = vld [vmem:[%s15085_s17 + $0x1570] ss:$8 sps:$4 sm:$0xff]  }
 0x2db   : > { %9847 = vmatprep.subr.bf16.mxu1 %v13530_v59  ;;  %v2026_v59 = vrot.slane %v2004_v26, %v15173_v50  ;;  %v13669_v26 = vld [vmem:[%s15085_s17 + $0x15d4] ss:$8 sps:$4 sm:$0xff]  }
 0x2dd   : > { %9807 = vmatpush1.bf16.msra.mxu0 %v13525_v60  ;;  %v1986_v60 = vcombine.high %v1970_v27, %v1970_v27 }
 0x2de   : > { %9848 = vmatpush1.bf16.msra.mxu1 %v13528_v61  ;;  %9808 = vmatprep.subr.bf16.mxu0 %v13533_v0  ;;  %v13615_v61 = vld [vmem:[%s15085_s17 + $0x1564] ss:$8 sps:$4 sm:$0xff]   ;;  %v13610_v0 = vld [vmem:[%s15085_s17 + $0x1460] ss:$8 sps:$4 sm:$0xff]  }
 0x2df   : > { %9849 = vmatprep.subr.bf16.mxu1 %v13536_v1  ;;  %v13613_v1 = vld [vmem:[%s15085_s17 + $0x1560] ss:$8 sps:$4 sm:$0xff]  }
 0x2e1   : > { %9809 = vmatpush1.bf16.msra.mxu0 %v13531_v2  ;;  %v2036_v2 = vcombine.high %v2026_v59, %v2026_v59 }
 0x2e2   : > { %9850 = vmatpush1.bf16.msra.mxu1 %v13534_v3  ;;  %9810 = vmatprep.subr.bf16.mxu0 %v13539_v5 }
 0x2e3   : > { %9851 = vmatprep.subr.bf16.mxu1 %v13542_v6 }
 0x2e5   : > { %9811 = vmatpush1.bf16.msra.mxu0 %v13537_v8 }
 0x2e6   : > { %9852 = vmatpush1.bf16.msra.mxu1 %v13540_v45  ;;  %9812 = vmatprep.subr.bf16.mxu0 %v13545_v9  ;;  %v13618_v9 = vld [vmem:[%s15085_s17 + $0x1454] ss:$8 sps:$4 sm:$0xff]  }
 0x2e7   : > { %9853 = vmatprep.subr.bf16.mxu1 %v13548_v10  ;;  %v13621_v10 = vld [vmem:[%s15085_s17 + $0x1554] ss:$8 sps:$4 sm:$0xff]  }
 0x2e9   : > { %9813 = vmatpush1.bf16.msra.mxu0 %v13543_v12 }
 0x2ea   : > { %9854 = vmatpush1.bf16.msra.mxu1 %v13546_v51  ;;  %9814 = vmatprep.subr.bf16.mxu0 %v13551_v13  ;;  %v13616_v13 = vld [vmem:[%s15085_s17 + $0x1450] ss:$8 sps:$4 sm:$0xff]  }
 0x2eb   : > { %9855 = vmatprep.subr.bf16.mxu1 %v13554_v14  ;;  %v13619_v14 = vld [vmem:[%s15085_s17 + $0x1550] ss:$8 sps:$4 sm:$0xff]  }
 0x2ed   : > { %9815 = vmatpush1.bf16.msra.mxu0 %v13549_v40 }
 0x2ee   : > { %9856 = vmatpush1.bf16.msra.mxu1 %v13552_v15  ;;  %9816 = vmatprep.subr.bf16.mxu0 %v13557_v17 }
 0x2ef   : > { %9857 = vmatprep.subr.bf16.mxu1 %v13560_v18 }
 0x2f1   : > { %9817 = vmatpush2.bf16.msra.mxu0 %v13555_v19  ;;  %v13627_v19 = vld [vmem:[%s15085_s17 + $0x1544] ss:$8 sps:$4 sm:$0xff]  }
 0x2f2   : > { %9858 = vmatpush2.bf16.msra.mxu1 %v13558_v20  ;;  %9818 = vmatprep.subr.bf16.mxu0 %v13563_v22  ;;  %v13622_v20 = vld [vmem:[%s15085_s17 + $0x1440] ss:$8 sps:$4 sm:$0xff]  }
 0x2f3   : > { %9859 = vmatprep.subr.bf16.mxu1 %v13566_v23  ;;  %v13625_v22 = vld [vmem:[%s15085_s17 + $0x1540] ss:$8 sps:$4 sm:$0xff]   ;;  %v13630_v23 = vld [vmem:[%s15085_s17 + $0x1434] ss:$8 sps:$4 sm:$0xff]  }
 0x2f5   : > { %9819 = vmatpush2.bf16.msra.mxu0 %v13561_v56  ;;  %v13633_v56 = vld [vmem:[%s15085_s17 + $0x1534] ss:$8 sps:$4 sm:$0xff]  }
 0x2f6   : > { %9860 = vmatpush2.bf16.msra.mxu1 %v13564_v58  ;;  %9820 = vmatprep.subr.bf16.mxu0 %v13569_v25  ;;  %v13628_v58 = vld [vmem:[%s15085_s17 + $0x1430] ss:$8 sps:$4 sm:$0xff]  }
 0x2f7   : > { %9861 = vmatprep.subr.bf16.mxu1 %v13572_v28  ;;  %v13631_v25 = vld [vmem:[%s15085_s17 + $0x1530] ss:$8 sps:$4 sm:$0xff]   ;;  %v13636_v28 = vld [vmem:[%s15085_s17 + $0x1424] ss:$8 sps:$4 sm:$0xff]  }
 0x2f9   : > { %9821 = vmatpush2.bf16.msra.mxu0 %v13567_v63  ;;  %v13639_v63 = vld [vmem:[%s15085_s17 + $0x1524] ss:$8 sps:$4 sm:$0xff]  }
 0x2fa   : > { %9862 = vmatpush2.bf16.msra.mxu1 %v13570_v29  ;;  %9822 = vmatprep.subr.bf16.mxu0 %v13575_v31  ;;  %v13634_v29 = vld [vmem:[%s15085_s17 + $0x1420] ss:$8 sps:$4 sm:$0xff]  }
 0x2fb   : > { %9863 = vmatprep.subr.bf16.mxu1 %v13578_v4  ;;  %v13637_v31 = vld [vmem:[%s15085_s17 + $0x1520] ss:$8 sps:$4 sm:$0xff]   ;;  %v13642_v4 = vld [vmem:[%s15085_s17 + $0x1414] ss:$8 sps:$4 sm:$0xff]  }
 0x2fd   : > { %9823 = vmatpush2.bf16.msra.mxu0 %v13573_v57  ;;  %v13645_v57 = vld [vmem:[%s15085_s17 + $0x1514] ss:$8 sps:$4 sm:$0xff]  }
 0x2fe   : > { %9864 = vmatpush2.bf16.msra.mxu1 %v13576_v34  ;;  %9824 = vmatprep.subr.bf16.mxu0 %v13581_v35  ;;  %v13640_v34 = vld [vmem:[%s15085_s17 + $0x1410] ss:$8 sps:$4 sm:$0xff]  }
 0x2ff   : > { %9865 = vmatprep.subr.bf16.mxu1 %v13584_v36  ;;  %v13643_v35 = vld [vmem:[%s15085_s17 + $0x1510] ss:$8 sps:$4 sm:$0xff]   ;;  %v13648_v36 = vld [vmem:[%s15085_s17 + $0x1404] ss:$8 sps:$4 sm:$0xff]  }
 0x301   : > { %9825 = vmatpush2.bf16.msra.mxu0 %v13579_v37  ;;  %v13651_v37 = vld [vmem:[%s15085_s17 + $0x1504] ss:$8 sps:$4 sm:$0xff]  }
 0x302   : > { %9866 = vmatpush2.bf16.msra.mxu1 %v13582_v38  ;;  %9826 = vmatprep.subr.bf16.mxu0 %v13587_v62  ;;  %v13646_v38 = vld [vmem:[%s15085_s17 + $0x1400] ss:$8 sps:$4 sm:$0xff]  }
 0x303   : > { %9867 = vmatprep.subr.bf16.mxu1 %v13590_v39  ;;  %v13649_v62 = vld [vmem:[%s15085_s17 + $0x1500] ss:$8 sps:$4 sm:$0xff]   ;;  %v13654_v39 = vld [vmem:[%s15085_s17 + $0x14f4] ss:$8 sps:$4 sm:$0xff]  }
 0x305   : > { %9827 = vmatpush2.bf16.msra.mxu0 %v13585_v11  ;;  %v13657_v11 = vld [vmem:[%s15085_s17 + $0x15f4] ss:$8 sps:$4 sm:$0xff]  }
 0x306   : > { %9868 = vmatpush2.bf16.msra.mxu1 %v13588_v41  ;;  %9828 = vmatprep.subr.bf16.mxu0 %v13593_v42  ;;  %v13652_v41 = vld [vmem:[%s15085_s17 + $0x14f0] ss:$8 sps:$4 sm:$0xff]  }
 0x307   : > { %9869 = vmatprep.subr.bf16.mxu1 %v13596_v43  ;;  %v13655_v42 = vld [vmem:[%s15085_s17 + $0x15f0] ss:$8 sps:$4 sm:$0xff]   ;;  %v13660_v43 = vld [vmem:[%s15085_s17 + $0x14e4] ss:$8 sps:$4 sm:$0xff]  }
 0x309   : > { %9829 = vmatpush2.bf16.msra.mxu0 %v13591_v47  ;;  %v13663_v47 = vld [vmem:[%s15085_s17 + $0x15e4] ss:$8 sps:$4 sm:$0xff]  }
 0x30a   : > { %9870 = vmatpush2.bf16.msra.mxu1 %v13594_v48  ;;  %9830 = vmatprep.subr.bf16.mxu0 %v13599_v21  ;;  %v13658_v48 = vld [vmem:[%s15085_s17 + $0x14e0] ss:$8 sps:$4 sm:$0xff]  }
 0x30b   : > { %9871 = vmatprep.subr.bf16.mxu1 %v13602_v49  ;;  %v13661_v21 = vld [vmem:[%s15085_s17 + $0x15e0] ss:$8 sps:$4 sm:$0xff]   ;;  %v13666_v49 = vld [vmem:[%s15085_s17 + $0x14d4] ss:$8 sps:$4 sm:$0xff]  }
 0x30d   : > { %9831 = vmatpush2.bf16.msra.mxu0 %v13597_v53  ;;  %v13667_v53 = vld [vmem:[%s15085_s17 + $0x15d0] ss:$8 sps:$4 sm:$0xff]  }
 0x30e   : > { %9872 = vmatpush2.bf16.msra.mxu1 %v13600_v7  ;;  %9882 = vmatprep.subr.bf16.mxu0 %v13606_v54  ;;  %v13672_v7 = vld [vmem:[%s15085_s17 + $0x14c4] ss:$8 sps:$4 sm:$0xff]  }
 0x30f   : > { %9923 = vmatprep.subr.bf16.mxu1 %v13609_v55  ;;  %v13675_v54 = vld [vmem:[%s15085_s17 + $0x15c4] ss:$8 sps:$4 sm:$0xff]   ;;  %v13670_v55 = vld [vmem:[%s15085_s17 + $0x14c0] ss:$8 sps:$4 sm:$0xff]  }
 0x310   : > { %v9588_v3 = vpop.f32.mrf.mxu0  ;;  %9833 = vmatmul.mubr.bf16.vlgmr.msra.gmra.mxu0 %v1970_v27  ;;  %v13664_v27 = vld [vmem:[%s15085_s17 + $0x14d0] ss:$8 sps:$4 sm:$0xff]  }
 0x311   : > { %v9629_v5 = vpop.f32.mrf.mxu1  ;;  %9874 = vmatmul.mubr.bf16.vlgmr.msra.gmra.mxu1 %v1986_v60  ;;  %v9589_v6 = vadd.f32 %v9588_v3, %v15844_v52  ;;  %9883 = vmatpush1.bf16.msra.mxu0 %v13604_v32  ;;  %v13673_v32 = vld [vmem:[%s15085_s17 + $0x15c0] ss:$8 sps:$4 sm:$0xff]   ;;  %v13676_v60 = vld [vmem:[%s15085_s17 + $0x14b0] ss:$8 sps:$4 sm:$0xff]  }
 0x312   : > { %9924 = vmatpush1.bf16.msra.mxu1 %v13607_v33  ;;  %v9590_v8 = vpop.f32.mrf.mxu0  ;;  %9884 = vmatprep.subr.bf16.mxu0 %v13612_v24  ;;  %v13678_v33 = vld [vmem:[%s15085_s17 + $0x14b4] ss:$8 sps:$4 sm:$0xff]   ;;  %v13679_v24 = vld [vmem:[%s15085_s17 + $0x15b0] ss:$8 sps:$4 sm:$0xff]   ;;  %v13685_v3 = vld [vmem:[%s15085_s17 + $0x15a0] ss:$8 sps:$4 sm:$0xff]  }
 0x313   : > { %v9631_v45 = vpop.f32.mrf.mxu1  ;;  %9925 = vmatprep.subr.bf16.mxu1 %v13615_v61  ;;  %v15926_v12 = vadd.f32 %v9629_v5, %v9589_v6  ;;  %v9591_v51 = vadd.f32 %v9590_v8, %v15849_v16  ;;  %9914 = vmatprep.mubr.bf16.mxu0 %v2026_v59  ;;  %v13624_v16 = vld [vmem:[%s15085_s17 + $0x1444] ss:$8 sps:$4 sm:$0xff]   ;;  %v13681_v59 = vld [vmem:[%s15085_s17 + $0x15b4] ss:$8 sps:$4 sm:$0xff]  }
 0x314   : > { %9955 = vmatprep.mubr.bf16.mxu1 %v2036_v2  ;;  %v9592_v52 = vpop.f32.mrf.mxu0  ;;  %v13684_v61 = vld [vmem:[%s15085_s17 + $0x14a4] ss:$8 sps:$4 sm:$0xff]   ;;  %v13682_v2 = vld [vmem:[%s15085_s17 + $0x14a0] ss:$8 sps:$4 sm:$0xff]   ;;  %v13690_v5 = vld [vmem:[%s15085_s17 + $0x1494] ss:$8 sps:$4 sm:$0xff]  }
 0x315   : > { %v9633_v40 = vpop.f32.mrf.mxu1  ;;  %v15931_v15 = vadd.f32 %v9631_v45, %v9591_v51  ;;  %9885 = vmatpush1.bf16.msra.mxu0 %v13610_v0  ;;  %v13687_v0 = vld [vmem:[%s15085_s17 + $0x15a4] ss:$8 sps:$4 sm:$0xff]   ;;  %v13693_v6 = vld [vmem:[%s15085_s17 + $0x1594] ss:$8 sps:$4 sm:$0xff]   ;;  %v13691_v45 = vld [vmem:[%s15085_s17 + $0x1590] ss:$8 sps:$4 sm:$0xff]  }
 0x316   : > { %9926 = vmatpush1.bf16.msra.mxu1 %v13613_v1  ;;  %v9593_v17 = vpop.f32.mrf.mxu0  ;;  %9886 = vmatprep.subr.bf16.mxu0 %v13618_v9  ;;  %v1989_v1 = vcombine.high %v15894_v30, %v15894_v30  ;;  %v13688_v30 = vld [vmem:[%s15085_s17 + $0x1490] ss:$8 sps:$4 sm:$0xff]   ;;  %v13696_v9 = vld [vmem:[%s15085_s17 + $0x1484] ss:$8 sps:$4 sm:$0xff]   ;;  %v13697_v52 = vld [vmem:[%s15085_s17 + $0x1580] ss:$8 sps:$4 sm:$0xff]  }
 0x317   : > { %v9634_v18 = vpop.f32.mrf.mxu1  ;;  %9927 = vmatprep.subr.bf16.mxu1 %v13621_v10  ;;  %v13699_v10 = vld [vmem:[%s15085_s17 + $0x1584] ss:$8 sps:$4 sm:$0xff]   ;;  %v13702_v40 = vld [vmem:[%s15085_s17 + $0x1674] ss:$8 sps:$4 sm:$0xff]  }
 0x318   : > { %v15982_v8 = vrot.slane %v1989_v1, %v15173_v50  ;;  %v13705_v17 = vld [vmem:[%s15085_s17 + $0x1774] ss:$8 sps:$4 sm:$0xff]   ;;  %v13700_v18 = vld [vmem:[%s15085_s17 + $0x1670] ss:$8 sps:$4 sm:$0xff]  }
 0x319   : > { %9887 = vmatpush1.bf16.msra.mxu0 %v13616_v13  ;;  %v2012_v13 = vrot.slane %v15902_v46, %v15173_v50  ;;  %v13708_v46 = vld [vmem:[%s15085_s17 + $0x1664] ss:$8 sps:$4 sm:$0xff]   ;;  %v13753_v1 = vld [vmem:[%s15085_s17 + $0x17f4] ss:$8 sps:$4 sm:$0xff]  }
 0x31a   : > { %9928 = vmatpush1.bf16.msra.mxu1 %v13619_v14  ;;  %9888 = vmatprep.subr.bf16.mxu0 %v13624_v16  ;;  %v2005_v51 = vcombine.high %v15982_v8, %v15982_v8  ;;  %v13694_v14 = vld [vmem:[%s15085_s17 + $0x1480] ss:$8 sps:$4 sm:$0xff]   ;;  %v13703_v16 = vld [vmem:[%s15085_s17 + $0x1770] ss:$8 sps:$4 sm:$0xff]  }
 0x31b   : > { %9929 = vmatprep.subr.bf16.mxu1 %v13627_v19 }
 0x31c   : > { %v2033_v19 = vrot.slane %v2005_v51, %v15173_v50  ;;  %v13760_v51 = vld [vmem:[%s15085_s17 + $0x16d0] ss:$8 sps:$4 sm:$0xff]  }
 0x31d   : > { %9889 = vmatpush1.bf16.msra.mxu0 %v13622_v20  ;;  %v2034_v20 = vcombine.high %v2012_v13, %v2012_v13 }
 0x31e   : > { %9930 = vmatpush1.bf16.msra.mxu1 %v13625_v22  ;;  %9890 = vmatprep.subr.bf16.mxu0 %v13630_v23  ;;  %v13711_v22 = vld [vmem:[%s15085_s17 + $0x1764] ss:$8 sps:$4 sm:$0xff]   ;;  %v13706_v23 = vld [vmem:[%s15085_s17 + $0x1660] ss:$8 sps:$4 sm:$0xff]  }
 0x31f   : > { %9931 = vmatprep.subr.bf16.mxu1 %v13633_v56  ;;  %v13709_v56 = vld [vmem:[%s15085_s17 + $0x1760] ss:$8 sps:$4 sm:$0xff]  }
 0x321   : > { %9891 = vmatpush1.bf16.msra.mxu0 %v13628_v58  ;;  %v2037_v58 = vcombine.high %v2033_v19, %v2033_v19 }
 0x322   : > { %9932 = vmatpush1.bf16.msra.mxu1 %v13631_v25  ;;  %9892 = vmatprep.subr.bf16.mxu0 %v13636_v28 }
 0x323   : > { %9933 = vmatprep.subr.bf16.mxu1 %v13639_v63 }
 0x325   : > { %9893 = vmatpush1.bf16.msra.mxu0 %v13634_v29 }
 0x326   : > { %9934 = vmatpush1.bf16.msra.mxu1 %v13637_v31  ;;  %9894 = vmatprep.subr.bf16.mxu0 %v13642_v4  ;;  %v13714_v4 = vld [vmem:[%s15085_s17 + $0x1654] ss:$8 sps:$4 sm:$0xff]  }
 0x327   : > { %9935 = vmatprep.subr.bf16.mxu1 %v13645_v57  ;;  %v13717_v57 = vld [vmem:[%s15085_s17 + $0x1754] ss:$8 sps:$4 sm:$0xff]  }
 0x329   : > { %9895 = vmatpush1.bf16.msra.mxu0 %v13640_v34 }
 0x32a   : > { %9936 = vmatpush1.bf16.msra.mxu1 %v13643_v35  ;;  %9896 = vmatprep.subr.bf16.mxu0 %v13648_v36  ;;  %v13712_v36 = vld [vmem:[%s15085_s17 + $0x1650] ss:$8 sps:$4 sm:$0xff]  }
 0x32b   : > { %9937 = vmatprep.subr.bf16.mxu1 %v13651_v37  ;;  %v13715_v37 = vld [vmem:[%s15085_s17 + $0x1750] ss:$8 sps:$4 sm:$0xff]  }
 0x32d   : > { %9897 = vmatpush1.bf16.msra.mxu0 %v13646_v38 }
 0x32e   : > { %9938 = vmatpush1.bf16.msra.mxu1 %v13649_v62  ;;  %9898 = vmatprep.subr.bf16.mxu0 %v13654_v39 }
 0x32f   : > { %9939 = vmatprep.subr.bf16.mxu1 %v13657_v11 }
 0x331   : > { %9899 = vmatpush2.bf16.msra.mxu0 %v13652_v41  ;;  %v13723_v41 = vld [vmem:[%s15085_s17 + $0x1744] ss:$8 sps:$4 sm:$0xff]  }
 0x332   : > { %9940 = vmatpush2.bf16.msra.mxu1 %v13655_v42  ;;  %9900 = vmatprep.subr.bf16.mxu0 %v13660_v43  ;;  %v13718_v42 = vld [vmem:[%s15085_s17 + $0x1640] ss:$8 sps:$4 sm:$0xff]  }
 0x333   : > { %9941 = vmatprep.subr.bf16.mxu1 %v13663_v47  ;;  %v13721_v43 = vld [vmem:[%s15085_s17 + $0x1740] ss:$8 sps:$4 sm:$0xff]   ;;  %v13726_v47 = vld [vmem:[%s15085_s17 + $0x1634] ss:$8 sps:$4 sm:$0xff]  }
 0x335   : > { %9901 = vmatpush2.bf16.msra.mxu0 %v13658_v48  ;;  %v13729_v48 = vld [vmem:[%s15085_s17 + $0x1734] ss:$8 sps:$4 sm:$0xff]  }
 0x336   : > { %9942 = vmatpush2.bf16.msra.mxu1 %v13661_v21  ;;  %9902 = vmatprep.subr.bf16.mxu0 %v13666_v49  ;;  %v13724_v21 = vld [vmem:[%s15085_s17 + $0x1630] ss:$8 sps:$4 sm:$0xff]  }
 0x337   : > { %9943 = vmatprep.subr.bf16.mxu1 %v13669_v26  ;;  %v13727_v49 = vld [vmem:[%s15085_s17 + $0x1730] ss:$8 sps:$4 sm:$0xff]   ;;  %v13732_v26 = vld [vmem:[%s15085_s17 + $0x1624] ss:$8 sps:$4 sm:$0xff]  }
 0x339   : > { %9903 = vmatpush2.bf16.msra.mxu0 %v13664_v27  ;;  %v13735_v27 = vld [vmem:[%s15085_s17 + $0x1724] ss:$8 sps:$4 sm:$0xff]  }
 0x33a   : > { %9944 = vmatpush2.bf16.msra.mxu1 %v13667_v53  ;;  %9904 = vmatprep.subr.bf16.mxu0 %v13672_v7  ;;  %v13730_v53 = vld [vmem:[%s15085_s17 + $0x1620] ss:$8 sps:$4 sm:$0xff]  }
 0x33b   : > { %9945 = vmatprep.subr.bf16.mxu1 %v13675_v54  ;;  %v13733_v7 = vld [vmem:[%s15085_s17 + $0x1720] ss:$8 sps:$4 sm:$0xff]   ;;  %v13738_v54 = vld [vmem:[%s15085_s17 + $0x1614] ss:$8 sps:$4 sm:$0xff]  }
 0x33d   : > { %9905 = vmatpush2.bf16.msra.mxu0 %v13670_v55  ;;  %v13741_v55 = vld [vmem:[%s15085_s17 + $0x1714] ss:$8 sps:$4 sm:$0xff]  }
 0x33e   : > { %9946 = vmatpush2.bf16.msra.mxu1 %v13673_v32  ;;  %9906 = vmatprep.subr.bf16.mxu0 %v13678_v33  ;;  %v13736_v32 = vld [vmem:[%s15085_s17 + $0x1610] ss:$8 sps:$4 sm:$0xff]  }
 0x33f   : > { %9947 = vmatprep.subr.bf16.mxu1 %v13681_v59  ;;  %v13739_v33 = vld [vmem:[%s15085_s17 + $0x1710] ss:$8 sps:$4 sm:$0xff]   ;;  %v13744_v59 = vld [vmem:[%s15085_s17 + $0x1604] ss:$8 sps:$4 sm:$0xff]  }
 0x341   : > { %9907 = vmatpush2.bf16.msra.mxu0 %v13676_v60  ;;  %v13747_v60 = vld [vmem:[%s15085_s17 + $0x1704] ss:$8 sps:$4 sm:$0xff]  }
 0x342   : > { %9948 = vmatpush2.bf16.msra.mxu1 %v13679_v24  ;;  %9908 = vmatprep.subr.bf16.mxu0 %v13684_v61  ;;  %v13742_v24 = vld [vmem:[%s15085_s17 + $0x1600] ss:$8 sps:$4 sm:$0xff]  }
 0x343   : > { %9949 = vmatprep.subr.bf16.mxu1 %v13687_v0  ;;  %v13745_v61 = vld [vmem:[%s15085_s17 + $0x1700] ss:$8 sps:$4 sm:$0xff]   ;;  %v13750_v0 = vld [vmem:[%s15085_s17 + $0x16f4] ss:$8 sps:$4 sm:$0xff]  }
 0x345   : > { %9909 = vmatpush2.bf16.msra.mxu0 %v13682_v2  ;;  %v13748_v2 = vld [vmem:[%s15085_s17 + $0x16f0] ss:$8 sps:$4 sm:$0xff]  }
 0x346   : > { %9950 = vmatpush2.bf16.msra.mxu1 %v13685_v3  ;;  %9910 = vmatprep.subr.bf16.mxu0 %v13690_v5  ;;  %v13751_v3 = vld [vmem:[%s15085_s17 + $0x17f0] ss:$8 sps:$4 sm:$0xff]   ;;  %v13756_v5 = vld [vmem:[%s15085_s17 + $0x16e4] ss:$8 sps:$4 sm:$0xff]  }
 0x347   : > { %9951 = vmatprep.subr.bf16.mxu1 %v13693_v6  ;;  %v13759_v6 = vld [vmem:[%s15085_s17 + $0x17e4] ss:$8 sps:$4 sm:$0xff]  }
 0x349   : > { %9911 = vmatpush2.bf16.msra.mxu0 %v13688_v30  ;;  %v13754_v30 = vld [vmem:[%s15085_s17 + $0x16e0] ss:$8 sps:$4 sm:$0xff]  }
 0x34a   : > { %9952 = vmatpush2.bf16.msra.mxu1 %v13691_v45  ;;  %9912 = vmatprep.subr.bf16.mxu0 %v13696_v9  ;;  %v13757_v45 = vld [vmem:[%s15085_s17 + $0x17e0] ss:$8 sps:$4 sm:$0xff]   ;;  %v13762_v9 = vld [vmem:[%s15085_s17 + $0x16d4] ss:$8 sps:$4 sm:$0xff]  }
 0x34b   : > { %9953 = vmatprep.subr.bf16.mxu1 %v13699_v10  ;;  %v13765_v10 = vld [vmem:[%s15085_s17 + $0x17d4] ss:$8 sps:$4 sm:$0xff]  }
 0x34d   : > { %9913 = vmatpush2.bf16.msra.mxu0 %v13694_v14  ;;  %v13768_v14 = vld [vmem:[%s15085_s17 + $0x16c4] ss:$8 sps:$4 sm:$0xff]  }
 0x34e   : > { %9954 = vmatpush2.bf16.msra.mxu1 %v13697_v52  ;;  %9964 = vmatprep.subr.bf16.mxu0 %v13702_v40  ;;  %v13771_v52 = vld [vmem:[%s15085_s17 + $0x17c4] ss:$8 sps:$4 sm:$0xff]   ;;  %v13766_v40 = vld [vmem:[%s15085_s17 + $0x16c0] ss:$8 sps:$4 sm:$0xff]  }
 0x34f   : > { %10005 = vmatprep.subr.bf16.mxu1 %v13705_v17  ;;  %v13769_v17 = vld [vmem:[%s15085_s17 + $0x17c0] ss:$8 sps:$4 sm:$0xff]  }
 0x350   : > { %v9670_v25 = vpop.f32.mrf.mxu0  ;;  %9915 = vmatmul.mubr.bf16.vlgmr.msra.gmra.mxu0 %v2012_v13  ;;  %v13763_v13 = vld [vmem:[%s15085_s17 + $0x17d0] ss:$8 sps:$4 sm:$0xff]  }
 0x351   : > { %v9711_v28 = vpop.f32.mrf.mxu1  ;;  %9956 = vmatmul.mubr.bf16.vlgmr.msra.gmra.mxu1 %v2034_v20  ;;  %v9671_v63 = vadd.f32 %v9670_v25, %v15926_v12  ;;  %9965 = vmatpush1.bf16.msra.mxu0 %v13700_v18  ;;  %v13774_v18 = vld [vmem:[%s15085_s17 + $0x16b4] ss:$8 sps:$4 sm:$0xff]   ;;  %v13775_v20 = vld [vmem:[%s15085_s17 + $0x17b0] ss:$8 sps:$4 sm:$0xff]  }
 0x352   : > { %10006 = vmatpush1.bf16.msra.mxu1 %v13703_v16  ;;  %v9672_v29 = vpop.f32.mrf.mxu0  ;;  %9966 = vmatprep.subr.bf16.mxu0 %v13708_v46  ;;  %v13777_v16 = vld [vmem:[%s15085_s17 + $0x17b4] ss:$8 sps:$4 sm:$0xff]   ;;  %v13780_v46 = vld [vmem:[%s15085_s17 + $0x16a4] ss:$8 sps:$4 sm:$0xff]  }
 0x353   : > { %v9713_v31 = vpop.f32.mrf.mxu1  ;;  %10007 = vmatprep.subr.bf16.mxu1 %v13711_v22  ;;  %v16006_v34 = vadd.f32 %v9711_v28, %v9671_v63  ;;  %v9673_v35 = vadd.f32 %v9672_v29, %v15931_v15  ;;  %9996 = vmatprep.mubr.bf16.mxu0 %v2033_v19  ;;  %v13720_v15 = vld [vmem:[%s15085_s17 + $0x1644] ss:$8 sps:$4 sm:$0xff]   ;;  %v13772_v19 = vld [vmem:[%s15085_s17 + $0x16b0] ss:$8 sps:$4 sm:$0xff]   ;;  %v13786_v25 = vld [vmem:[%s15085_s17 + $0x1694] ss:$8 sps:$4 sm:$0xff]  }
 0x354   : > { %10037 = vmatprep.mubr.bf16.mxu1 %v2037_v58  ;;  %v9674_v12 = vpop.f32.mrf.mxu0  ;;  %v13783_v22 = vld [vmem:[%s15085_s17 + $0x17a4] ss:$8 sps:$4 sm:$0xff]   ;;  %v13781_v58 = vld [vmem:[%s15085_s17 + $0x17a0] ss:$8 sps:$4 sm:$0xff]   ;;  %v13789_v28 = vld [vmem:[%s15085_s17 + $0x1794] ss:$8 sps:$4 sm:$0xff]  }
 0x355   : > { %v9715_v38 = vpop.f32.mrf.mxu1  ;;  %v16011_v62 = vadd.f32 %v9713_v31, %v9673_v35  ;;  %9967 = vmatpush1.bf16.msra.mxu0 %v13706_v23  ;;  %v16056_v23 = vld [vmem:[%s15170_s0 + $0x30] sm:$0xff]  ;;  %v13793_v12 = vld [vmem:[%s15085_s17 + $0x1780] ss:$8 sps:$4 sm:$0xff]  }
 0x356   : > { %10008 = vmatpush1.bf16.msra.mxu1 %v13709_v56  ;;  %v9675_v39 = vpop.f32.mrf.mxu0  ;;  %9968 = vmatprep.subr.bf16.mxu0 %v13714_v4  ;;  %v13778_v56 = vld [vmem:[%s15085_s17 + $0x16a0] ss:$8 sps:$4 sm:$0xff]   ;;  %v16064_v63 = vrot.slane %v16056_v23, %v15173_v50  ;;  %v13784_v29 = vld [vmem:[%s15085_s17 + $0x1690] ss:$8 sps:$4 sm:$0xff]   ;;  %v13792_v4 = vld [vmem:[%s15085_s17 + $0x1684] ss:$8 sps:$4 sm:$0xff]  }
 0x357   : > { %v9716_v11 = vpop.f32.mrf.mxu1  ;;  %10009 = vmatprep.subr.bf16.mxu1 %v13717_v57  ;;  %v13787_v31 = vld [vmem:[%s15085_s17 + $0x1790] ss:$8 sps:$4 sm:$0xff]   ;;  %v13795_v57 = vld [vmem:[%s15085_s17 + $0x1784] ss:$8 sps:$4 sm:$0xff]   ;;  %v13799_v38 = vld [vmem:[%s15085_s17 + $0x1874] ss:$8 sps:$4 sm:$0xff]  }
 0x358   : > { %v2053_v35 = vcombine.high %v16064_v63, %v16064_v63  ;;  %v13802_v39 = vld [vmem:[%s15085_s17 + $0x1974] ss:$8 sps:$4 sm:$0xff]  }
 0x359   : > { %9969 = vmatpush1.bf16.msra.mxu0 %v13712_v36  ;;  %v2019_v36 = vrot.slane %v15982_v8, %v15173_v50  ;;  %v13805_v8 = vld [vmem:[%s15085_s17 + $0x1864] ss:$8 sps:$4 sm:$0xff]  }
 0x35a   : > { %10010 = vmatpush1.bf16.msra.mxu1 %v13715_v37  ;;  %9970 = vmatprep.subr.bf16.mxu0 %v13720_v15  ;;  %v13790_v37 = vld [vmem:[%s15085_s17 + $0x1680] ss:$8 sps:$4 sm:$0xff]   ;;  %v2075_v11 = vrot.slane %v2053_v35, %v15173_v50  ;;  %v13862_v35 = vld [vmem:[%s15085_s17 + $0x19d4] ss:$8 sps:$4 sm:$0xff]  }
 0x35b   : > { %10011 = vmatprep.subr.bf16.mxu1 %v13723_v41  ;;  %v2035_v15 = vcombine.high %v2019_v36, %v2019_v36  ;;  %v13797_v41 = vld [vmem:[%s15085_s17 + $0x1870] ss:$8 sps:$4 sm:$0xff]  }
 0x35d   : > { %9971 = vmatpush1.bf16.msra.mxu0 %v13718_v42  ;;  %v13800_v42 = vld [vmem:[%s15085_s17 + $0x1970] ss:$8 sps:$4 sm:$0xff]  }
 0x35e   : > { %10012 = vmatpush1.bf16.msra.mxu1 %v13721_v43  ;;  %9972 = vmatprep.subr.bf16.mxu0 %v13726_v47  ;;  %v13808_v43 = vld [vmem:[%s15085_s17 + $0x1964] ss:$8 sps:$4 sm:$0xff]   ;;  %v2085_v47 = vcombine.high %v2075_v11, %v2075_v11 }
 0x35f   : > { %10013 = vmatprep.subr.bf16.mxu1 %v13729_v48 }
 0x361   : > { %9973 = vmatpush1.bf16.msra.mxu0 %v13724_v21 }
 0x362   : > { %10014 = vmatpush1.bf16.msra.mxu1 %v13727_v49  ;;  %9974 = vmatprep.subr.bf16.mxu0 %v13732_v26  ;;  %v13803_v26 = vld [vmem:[%s15085_s17 + $0x1860] ss:$8 sps:$4 sm:$0xff]  }
 0x363   : > { %10015 = vmatprep.subr.bf16.mxu1 %v13735_v27  ;;  %v13806_v27 = vld [vmem:[%s15085_s17 + $0x1960] ss:$8 sps:$4 sm:$0xff]  }
 0x365   : > { %9975 = vmatpush1.bf16.msra.mxu0 %v13730_v53 }
 0x366   : > { %10016 = vmatpush1.bf16.msra.mxu1 %v13733_v7  ;;  %9976 = vmatprep.subr.bf16.mxu0 %v13738_v54  ;;  %v13811_v54 = vld [vmem:[%s15085_s17 + $0x1854] ss:$8 sps:$4 sm:$0xff]  }
 0x367   : > { %10017 = vmatprep.subr.bf16.mxu1 %v13741_v55  ;;  %v13814_v55 = vld [vmem:[%s15085_s17 + $0x1954] ss:$8 sps:$4 sm:$0xff]  }
 0x369   : > { %9977 = vmatpush1.bf16.msra.mxu0 %v13736_v32 }
 0x36a   : > { %10018 = vmatpush1.bf16.msra.mxu1 %v13739_v33  ;;  %9978 = vmatprep.subr.bf16.mxu0 %v13744_v59 }
 0x36b   : > { %10019 = vmatprep.subr.bf16.mxu1 %v13747_v60 }
 0x36d   : > { %9979 = vmatpush1.bf16.msra.mxu0 %v13742_v24  ;;  %v13809_v24 = vld [vmem:[%s15085_s17 + $0x1850] ss:$8 sps:$4 sm:$0xff]  }
 0x36e   : > { %10020 = vmatpush1.bf16.msra.mxu1 %v13745_v61  ;;  %9980 = vmatprep.subr.bf16.mxu0 %v13750_v0  ;;  %v13812_v61 = vld [vmem:[%s15085_s17 + $0x1950] ss:$8 sps:$4 sm:$0xff]  }
 0x36f   : > { %10021 = vmatprep.subr.bf16.mxu1 %v13753_v1 }
 0x371   : > { %9981 = vmatpush2.bf16.msra.mxu0 %v13748_v2  ;;  %v13820_v2 = vld [vmem:[%s15085_s17 + $0x1944] ss:$8 sps:$4 sm:$0xff]  }
 0x372   : > { %10022 = vmatpush2.bf16.msra.mxu1 %v13751_v3  ;;  %9982 = vmatprep.subr.bf16.mxu0 %v13756_v5  ;;  %v13815_v3 = vld [vmem:[%s15085_s17 + $0x1840] ss:$8 sps:$4 sm:$0xff]  }
 0x373   : > { %10023 = vmatprep.subr.bf16.mxu1 %v13759_v6  ;;  %v13818_v5 = vld [vmem:[%s15085_s17 + $0x1940] ss:$8 sps:$4 sm:$0xff]   ;;  %v13823_v6 = vld [vmem:[%s15085_s17 + $0x1834] ss:$8 sps:$4 sm:$0xff]  }
 0x375   : > { %9983 = vmatpush2.bf16.msra.mxu0 %v13754_v30  ;;  %v13826_v30 = vld [vmem:[%s15085_s17 + $0x1934] ss:$8 sps:$4 sm:$0xff]  }
 0x376   : > { %10024 = vmatpush2.bf16.msra.mxu1 %v13757_v45  ;;  %9984 = vmatprep.subr.bf16.mxu0 %v13762_v9  ;;  %v13821_v45 = vld [vmem:[%s15085_s17 + $0x1830] ss:$8 sps:$4 sm:$0xff]  }
 0x377   : > { %10025 = vmatprep.subr.bf16.mxu1 %v13765_v10  ;;  %v13824_v9 = vld [vmem:[%s15085_s17 + $0x1930] ss:$8 sps:$4 sm:$0xff]   ;;  %v13829_v10 = vld [vmem:[%s15085_s17 + $0x1824] ss:$8 sps:$4 sm:$0xff]  }
 0x379   : > { %9985 = vmatpush2.bf16.msra.mxu0 %v13760_v51  ;;  %v13832_v51 = vld [vmem:[%s15085_s17 + $0x1924] ss:$8 sps:$4 sm:$0xff]  }
 0x37a   : > { %10026 = vmatpush2.bf16.msra.mxu1 %v13763_v13  ;;  %9986 = vmatprep.subr.bf16.mxu0 %v13768_v14  ;;  %v13827_v13 = vld [vmem:[%s15085_s17 + $0x1820] ss:$8 sps:$4 sm:$0xff]  }
 0x37b   : > { %10027 = vmatprep.subr.bf16.mxu1 %v13771_v52  ;;  %v13830_v14 = vld [vmem:[%s15085_s17 + $0x1920] ss:$8 sps:$4 sm:$0xff]   ;;  %v13835_v52 = vld [vmem:[%s15085_s17 + $0x1814] ss:$8 sps:$4 sm:$0xff]  }
 0x37d   : > { %9987 = vmatpush2.bf16.msra.mxu0 %v13766_v40  ;;  %v13838_v40 = vld [vmem:[%s15085_s17 + $0x1914] ss:$8 sps:$4 sm:$0xff]  }
 0x37e   : > { %10028 = vmatpush2.bf16.msra.mxu1 %v13769_v17  ;;  %9988 = vmatprep.subr.bf16.mxu0 %v13774_v18  ;;  %v13833_v17 = vld [vmem:[%s15085_s17 + $0x1810] ss:$8 sps:$4 sm:$0xff]  }
 0x37f   : > { %10029 = vmatprep.subr.bf16.mxu1 %v13777_v16  ;;  %v13836_v18 = vld [vmem:[%s15085_s17 + $0x1910] ss:$8 sps:$4 sm:$0xff]   ;;  %v13841_v16 = vld [vmem:[%s15085_s17 + $0x1804] ss:$8 sps:$4 sm:$0xff]  }
 0x381   : > { %9989 = vmatpush2.bf16.msra.mxu0 %v13772_v19  ;;  %v13844_v19 = vld [vmem:[%s15085_s17 + $0x1904] ss:$8 sps:$4 sm:$0xff]  }
 0x382   : > { %10030 = vmatpush2.bf16.msra.mxu1 %v13775_v20  ;;  %9990 = vmatprep.subr.bf16.mxu0 %v13780_v46  ;;  %v13839_v20 = vld [vmem:[%s15085_s17 + $0x1800] ss:$8 sps:$4 sm:$0xff]  }
 0x383   : > { %10031 = vmatprep.subr.bf16.mxu1 %v13783_v22  ;;  %v13842_v46 = vld [vmem:[%s15085_s17 + $0x1900] ss:$8 sps:$4 sm:$0xff]   ;;  %v13847_v22 = vld [vmem:[%s15085_s17 + $0x18f4] ss:$8 sps:$4 sm:$0xff]  }
 0x385   : > { %9991 = vmatpush2.bf16.msra.mxu0 %v13778_v56  ;;  %v13850_v56 = vld [vmem:[%s15085_s17 + $0x19f4] ss:$8 sps:$4 sm:$0xff]  }
 0x386   : > { %10032 = vmatpush2.bf16.msra.mxu1 %v13781_v58  ;;  %9992 = vmatprep.subr.bf16.mxu0 %v13786_v25  ;;  %v13845_v58 = vld [vmem:[%s15085_s17 + $0x18f0] ss:$8 sps:$4 sm:$0xff]  }
 0x387   : > { %10033 = vmatprep.subr.bf16.mxu1 %v13789_v28  ;;  %v13848_v25 = vld [vmem:[%s15085_s17 + $0x19f0] ss:$8 sps:$4 sm:$0xff]   ;;  %v13853_v28 = vld [vmem:[%s15085_s17 + $0x18e4] ss:$8 sps:$4 sm:$0xff]  }
 0x389   : > { %9993 = vmatpush2.bf16.msra.mxu0 %v13784_v29  ;;  %v13856_v29 = vld [vmem:[%s15085_s17 + $0x19e4] ss:$8 sps:$4 sm:$0xff]  }
 0x38a   : > { %10034 = vmatpush2.bf16.msra.mxu1 %v13787_v31  ;;  %9994 = vmatprep.subr.bf16.mxu0 %v13792_v4  ;;  %v13851_v31 = vld [vmem:[%s15085_s17 + $0x18e0] ss:$8 sps:$4 sm:$0xff]  }
 0x38b   : > { %10035 = vmatprep.subr.bf16.mxu1 %v13795_v57  ;;  %v13854_v4 = vld [vmem:[%s15085_s17 + $0x19e0] ss:$8 sps:$4 sm:$0xff]   ;;  %v13859_v57 = vld [vmem:[%s15085_s17 + $0x18d4] ss:$8 sps:$4 sm:$0xff]  }
 0x38d   : > { %9995 = vmatpush2.bf16.msra.mxu0 %v13790_v37  ;;  %v13860_v37 = vld [vmem:[%s15085_s17 + $0x19d0] ss:$8 sps:$4 sm:$0xff]  }
 0x38e   : > { %10036 = vmatpush2.bf16.msra.mxu1 %v13793_v12  ;;  %10046 = vmatprep.subr.bf16.mxu0 %v13799_v38  ;;  %v13865_v12 = vld [vmem:[%s15085_s17 + $0x18c4] ss:$8 sps:$4 sm:$0xff]  }
 0x38f   : > { %10087 = vmatprep.subr.bf16.mxu1 %v13802_v39  ;;  %v13868_v38 = vld [vmem:[%s15085_s17 + $0x19c4] ss:$8 sps:$4 sm:$0xff]   ;;  %v13863_v39 = vld [vmem:[%s15085_s17 + $0x18c0] ss:$8 sps:$4 sm:$0xff]  }
 0x390   : > { %v9752_v48 = vpop.f32.mrf.mxu0  ;;  %9997 = vmatmul.mubr.bf16.vlgmr.msra.gmra.mxu0 %v2019_v36  ;;  %v13857_v36 = vld [vmem:[%s15085_s17 + $0x18d0] ss:$8 sps:$4 sm:$0xff]  }
 0x391   : > { %v9793_v21 = vpop.f32.mrf.mxu1  ;;  %10038 = vmatmul.mubr.bf16.vlgmr.msra.gmra.mxu1 %v2035_v15  ;;  %v9753_v49 = vadd.f32 %v9752_v48, %v16006_v34  ;;  %10047 = vmatpush1.bf16.msra.mxu0 %v13797_v41  ;;  %v13871_v15 = vld [vmem:[%s15085_s17 + $0x18b4] ss:$8 sps:$4 sm:$0xff]   ;;  %v2038_v48 = vcombine.high %v16056_v23, %v16056_v23  ;;  %v13881_v23 = vld [vmem:[%s15085_s17 + $0x1890] ss:$8 sps:$4 sm:$0xff]  }
 0x392   : > { %10088 = vmatpush1.bf16.msra.mxu1 %v13800_v42  ;;  %v9754_v53 = vpop.f32.mrf.mxu0  ;;  %10048 = vmatprep.subr.bf16.mxu0 %v13805_v8  ;;  %v13874_v41 = vld [vmem:[%s15085_s17 + $0x19b4] ss:$8 sps:$4 sm:$0xff]   ;;  %v13869_v42 = vld [vmem:[%s15085_s17 + $0x18b0] ss:$8 sps:$4 sm:$0xff]  }
 0x393   : > { %v9795_v7 = vpop.f32.mrf.mxu1  ;;  %10089 = vmatprep.subr.bf16.mxu1 %v13808_v43  ;;  %v16088_v32 = vadd.f32 %v9793_v21, %v9753_v49  ;;  %v9755_v33 = vadd.f32 %v9754_v53, %v16011_v62  ;;  %10078 = vmatprep.mubr.bf16.mxu0 %v2075_v11  ;;  %v13817_v62 = vld [vmem:[%s15085_s17 + $0x1844] ss:$8 sps:$4 sm:$0xff]   ;;  %v13866_v11 = vld [vmem:[%s15085_s17 + $0x19c0] ss:$8 sps:$4 sm:$0xff]   ;;  %v13872_v8 = vld [vmem:[%s15085_s17 + $0x19b0] ss:$8 sps:$4 sm:$0xff]   ;;  %v16144_v53 = vrot.slane %v2038_v48, %v15173_v50 }
 0x394   : > { %10119 = vmatprep.mubr.bf16.mxu1 %v2085_v47  ;;  %v9756_v34 = vpop.f32.mrf.mxu0  ;;  %v13877_v43 = vld [vmem:[%s15085_s17 + $0x18a4] ss:$8 sps:$4 sm:$0xff]   ;;  %v13875_v21 = vld [vmem:[%s15085_s17 + $0x18a0] ss:$8 sps:$4 sm:$0xff]   ;;  %v13946_v48 = vld [vmem:[%s15085_s17 + $0x1bf4] ss:$8 sps:$4 sm:$0xff]  }
 0x395   : > { %v9797_v59 = vpop.f32.mrf.mxu1  ;;  %v16091_v60 = vadd.f32 %v9795_v7, %v9755_v33  ;;  %10049 = vmatpush1.bf16.msra.mxu0 %v13803_v26  ;;  %v13880_v47 = vld [vmem:[%s15085_s17 + $0x19a4] ss:$8 sps:$4 sm:$0xff]   ;;  %v13878_v49 = vld [vmem:[%s15085_s17 + $0x19a0] ss:$8 sps:$4 sm:$0xff]   ;;  %v13883_v26 = vld [vmem:[%s15085_s17 + $0x1894] ss:$8 sps:$4 sm:$0xff]   ;;  %v2054_v33 = vcombine.high %v16144_v53, %v16144_v53  ;;  %v2061_v34 = vrot.slane %v16064_v63, %v15173_v50 }
 0x396   : > { %10090 = vmatpush1.bf16.msra.mxu1 %v13806_v27  ;;  %v9757_v0 = vpop.f32.mrf.mxu0  ;;  %10050 = vmatprep.subr.bf16.mxu0 %v13811_v54  ;;  %v13886_v27 = vld [vmem:[%s15085_s17 + $0x1994] ss:$8 sps:$4 sm:$0xff]   ;;  %v13884_v7 = vld [vmem:[%s15085_s17 + $0x1990] ss:$8 sps:$4 sm:$0xff]   ;;  %v13889_v54 = vld [vmem:[%s15085_s17 + $0x1884] ss:$8 sps:$4 sm:$0xff]  }
 0x397   : > { %v9798_v1 = vpop.f32.mrf.mxu1  ;;  %10091 = vmatprep.subr.bf16.mxu1 %v13814_v55  ;;  %v13892_v55 = vld [vmem:[%s15085_s17 + $0x1984] ss:$8 sps:$4 sm:$0xff]   ;;  %v13887_v59 = vld [vmem:[%s15085_s17 + $0x1880] ss:$8 sps:$4 sm:$0xff]   ;;  %v13898_v0 = vld [vmem:[%s15085_s17 + $0x1b74] ss:$8 sps:$4 sm:$0xff]  }
 0x398   : > { %v2082_v1 = vrot.slane %v2054_v33, %v15173_v50  ;;  %v13901_v63 = vld [vmem:[%s15085_s17 + $0x1a64] ss:$8 sps:$4 sm:$0xff]   ;;  %v13953_v33 = vld [vmem:[%s15085_s17 + $0x1ad0] ss:$8 sps:$4 sm:$0xff]  }
 0x399   : > { %10051 = vmatpush1.bf16.msra.mxu0 %v13809_v24  ;;  %v13890_v24 = vld [vmem:[%s15085_s17 + $0x1980] ss:$8 sps:$4 sm:$0xff]  }
 0x39a   : > { %10092 = vmatpush1.bf16.msra.mxu1 %v13812_v61  ;;  %10052 = vmatprep.subr.bf16.mxu0 %v13817_v62  ;;  %v13895_v61 = vld [vmem:[%s15085_s17 + $0x1a74] ss:$8 sps:$4 sm:$0xff]   ;;  %v2083_v62 = vcombine.high %v2061_v34, %v2061_v34 }
 0x39b   : > { %10093 = vmatprep.subr.bf16.mxu1 %v13820_v2  ;;  %v13893_v2 = vld [vmem:[%s15085_s17 + $0x1a70] ss:$8 sps:$4 sm:$0xff]  }
 0x39d   : > { %10053 = vmatpush1.bf16.msra.mxu0 %v13815_v3  ;;  %v13896_v3 = vld [vmem:[%s15085_s17 + $0x1b70] ss:$8 sps:$4 sm:$0xff]  }
 0x39e   : > { %10094 = vmatpush1.bf16.msra.mxu1 %v13818_v5  ;;  %10054 = vmatprep.subr.bf16.mxu0 %v13823_v6  ;;  %v13904_v5 = vld [vmem:[%s15085_s17 + $0x1b64] ss:$8 sps:$4 sm:$0xff]   ;;  %v2086_v6 = vcombine.high %v2082_v1, %v2082_v1 }
 0x39f   : > { %10095 = vmatprep.subr.bf16.mxu1 %v13826_v30 }
 0x3a1   : > { %10055 = vmatpush1.bf16.msra.mxu0 %v13821_v45 }
 0x3a2   : > { %10096 = vmatpush1.bf16.msra.mxu1 %v13824_v9  ;;  %10056 = vmatprep.subr.bf16.mxu0 %v13829_v10  ;;  %v13899_v10 = vld [vmem:[%s15085_s17 + $0x1a60] ss:$8 sps:$4 sm:$0xff]  }
 0x3a3   : > { %10097 = vmatprep.subr.bf16.mxu1 %v13832_v51  ;;  %v13902_v51 = vld [vmem:[%s15085_s17 + $0x1b60] ss:$8 sps:$4 sm:$0xff]  }
 0x3a5   : > { %10057 = vmatpush1.bf16.msra.mxu0 %v13827_v13 }
 0x3a6   : > { %10098 = vmatpush1.bf16.msra.mxu1 %v13830_v14  ;;  %10058 = vmatprep.subr.bf16.mxu0 %v13835_v52  ;;  %v13907_v52 = vld [vmem:[%s15085_s17 + $0x1a54] ss:$8 sps:$4 sm:$0xff]  }
 0x3a7   : > { %10099 = vmatprep.subr.bf16.mxu1 %v13838_v40  ;;  %v13910_v40 = vld [vmem:[%s15085_s17 + $0x1b54] ss:$8 sps:$4 sm:$0xff]  }
 0x3a9   : > { %10059 = vmatpush1.bf16.msra.mxu0 %v13833_v17 }
 0x3aa   : > { %10100 = vmatpush1.bf16.msra.mxu1 %v13836_v18  ;;  %10060 = vmatprep.subr.bf16.mxu0 %v13841_v16 }
 0x3ab   : > { %10101 = vmatprep.subr.bf16.mxu1 %v13844_v19 }
 0x3ad   : > { %10061 = vmatpush1.bf16.msra.mxu0 %v13839_v20  ;;  %v13905_v20 = vld [vmem:[%s15085_s17 + $0x1a50] ss:$8 sps:$4 sm:$0xff]  }
 0x3ae   : > { %10102 = vmatpush1.bf16.msra.mxu1 %v13842_v46  ;;  %10062 = vmatprep.subr.bf16.mxu0 %v13847_v22  ;;  %v13908_v46 = vld [vmem:[%s15085_s17 + $0x1b50] ss:$8 sps:$4 sm:$0xff]  }
 0x3af   : > { %10103 = vmatprep.subr.bf16.mxu1 %v13850_v56 }
 0x3b1   : > { %10063 = vmatpush2.bf16.msra.mxu0 %v13845_v58  ;;  %v13916_v58 = vld [vmem:[%s15085_s17 + $0x1b44] ss:$8 sps:$4 sm:$0xff]  }
 0x3b2   : > { %10104 = vmatpush2.bf16.msra.mxu1 %v13848_v25  ;;  %10064 = vmatprep.subr.bf16.mxu0 %v13853_v28  ;;  %v13911_v25 = vld [vmem:[%s15085_s17 + $0x1a40] ss:$8 sps:$4 sm:$0xff]  }
 0x3b3   : > { %10105 = vmatprep.subr.bf16.mxu1 %v13856_v29  ;;  %v13914_v28 = vld [vmem:[%s15085_s17 + $0x1b40] ss:$8 sps:$4 sm:$0xff]   ;;  %v13919_v29 = vld [vmem:[%s15085_s17 + $0x1a34] ss:$8 sps:$4 sm:$0xff]  }
 0x3b5   : > { %10065 = vmatpush2.bf16.msra.mxu0 %v13851_v31  ;;  %v13922_v31 = vld [vmem:[%s15085_s17 + $0x1b34] ss:$8 sps:$4 sm:$0xff]  }
 0x3b6   : > { %10106 = vmatpush2.bf16.msra.mxu1 %v13854_v4  ;;  %10066 = vmatprep.subr.bf16.mxu0 %v13859_v57  ;;  %v13917_v4 = vld [vmem:[%s15085_s17 + $0x1a30] ss:$8 sps:$4 sm:$0xff]  }
 0x3b7   : > { %10107 = vmatprep.subr.bf16.mxu1 %v13862_v35  ;;  %v13920_v57 = vld [vmem:[%s15085_s17 + $0x1b30] ss:$8 sps:$4 sm:$0xff]   ;;  %v13925_v35 = vld [vmem:[%s15085_s17 + $0x1a24] ss:$8 sps:$4 sm:$0xff]  }
 0x3b9   : > { %10067 = vmatpush2.bf16.msra.mxu0 %v13857_v36  ;;  %v13928_v36 = vld [vmem:[%s15085_s17 + $0x1b24] ss:$8 sps:$4 sm:$0xff]  }
 0x3ba   : > { %10108 = vmatpush2.bf16.msra.mxu1 %v13860_v37  ;;  %10068 = vmatprep.subr.bf16.mxu0 %v13865_v12  ;;  %v13923_v37 = vld [vmem:[%s15085_s17 + $0x1a20] ss:$8 sps:$4 sm:$0xff]  }
 0x3bb   : > { %10109 = vmatprep.subr.bf16.mxu1 %v13868_v38  ;;  %v13926_v12 = vld [vmem:[%s15085_s17 + $0x1b20] ss:$8 sps:$4 sm:$0xff]   ;;  %v13931_v38 = vld [vmem:[%s15085_s17 + $0x1a14] ss:$8 sps:$4 sm:$0xff]  }
 0x3bd   : > { %10069 = vmatpush2.bf16.msra.mxu0 %v13863_v39  ;;  %v13934_v39 = vld [vmem:[%s15085_s17 + $0x1b14] ss:$8 sps:$4 sm:$0xff]  }
 0x3be   : > { %10110 = vmatpush2.bf16.msra.mxu1 %v13866_v11  ;;  %10070 = vmatprep.subr.bf16.mxu0 %v13871_v15  ;;  %v13929_v11 = vld [vmem:[%s15085_s17 + $0x1a10] ss:$8 sps:$4 sm:$0xff]  }
 0x3bf   : > { %10111 = vmatprep.subr.bf16.mxu1 %v13874_v41  ;;  %v13932_v15 = vld [vmem:[%s15085_s17 + $0x1b10] ss:$8 sps:$4 sm:$0xff]   ;;  %v13937_v41 = vld [vmem:[%s15085_s17 + $0x1a04] ss:$8 sps:$4 sm:$0xff]  }
 0x3c1   : > { %10071 = vmatpush2.bf16.msra.mxu0 %v13869_v42  ;;  %v13940_v42 = vld [vmem:[%s15085_s17 + $0x1b04] ss:$8 sps:$4 sm:$0xff]  }
 0x3c2   : > { %10112 = vmatpush2.bf16.msra.mxu1 %v13872_v8  ;;  %10072 = vmatprep.subr.bf16.mxu0 %v13877_v43  ;;  %v13935_v8 = vld [vmem:[%s15085_s17 + $0x1a00] ss:$8 sps:$4 sm:$0xff]  }
 0x3c3   : > { %10113 = vmatprep.subr.bf16.mxu1 %v13880_v47  ;;  %v13938_v43 = vld [vmem:[%s15085_s17 + $0x1b00] ss:$8 sps:$4 sm:$0xff]   ;;  %v13943_v47 = vld [vmem:[%s15085_s17 + $0x1af4] ss:$8 sps:$4 sm:$0xff]  }
 0x3c5   : > { %10073 = vmatpush2.bf16.msra.mxu0 %v13875_v21  ;;  %v13941_v21 = vld [vmem:[%s15085_s17 + $0x1af0] ss:$8 sps:$4 sm:$0xff]  }
 0x3c6   : > { %10114 = vmatpush2.bf16.msra.mxu1 %v13878_v49  ;;  %10074 = vmatprep.subr.bf16.mxu0 %v13883_v26  ;;  %v13944_v49 = vld [vmem:[%s15085_s17 + $0x1bf0] ss:$8 sps:$4 sm:$0xff]   ;;  %v13949_v26 = vld [vmem:[%s15085_s17 + $0x1ae4] ss:$8 sps:$4 sm:$0xff]  }
 0x3c7   : > { %10115 = vmatprep.subr.bf16.mxu1 %v13886_v27  ;;  %v13952_v27 = vld [vmem:[%s15085_s17 + $0x1be4] ss:$8 sps:$4 sm:$0xff]  }
 0x3c9   : > { %10075 = vmatpush2.bf16.msra.mxu0 %v13881_v23  ;;  %v13947_v23 = vld [vmem:[%s15085_s17 + $0x1ae0] ss:$8 sps:$4 sm:$0xff]  }
 0x3ca   : > { %10116 = vmatpush2.bf16.msra.mxu1 %v13884_v7  ;;  %10076 = vmatprep.subr.bf16.mxu0 %v13889_v54  ;;  %v13950_v7 = vld [vmem:[%s15085_s17 + $0x1be0] ss:$8 sps:$4 sm:$0xff]   ;;  %v13955_v54 = vld [vmem:[%s15085_s17 + $0x1ad4] ss:$8 sps:$4 sm:$0xff]  }
 0x3cb   : > { %10117 = vmatprep.subr.bf16.mxu1 %v13892_v55  ;;  %v13958_v55 = vld [vmem:[%s15085_s17 + $0x1bd4] ss:$8 sps:$4 sm:$0xff]  }
 0x3cd   : > { %10077 = vmatpush2.bf16.msra.mxu0 %v13887_v59  ;;  %v13961_v59 = vld [vmem:[%s15085_s17 + $0x1ac4] ss:$8 sps:$4 sm:$0xff]  }
 0x3ce   : > { %10118 = vmatpush2.bf16.msra.mxu1 %v13890_v24  ;;  %10128 = vmatprep.subr.bf16.mxu0 %v13895_v61  ;;  %v13964_v24 = vld [vmem:[%s15085_s17 + $0x1bc4] ss:$8 sps:$4 sm:$0xff]   ;;  %v13959_v61 = vld [vmem:[%s15085_s17 + $0x1ac0] ss:$8 sps:$4 sm:$0xff]  }
 0x3cf   : > { %10169 = vmatprep.subr.bf16.mxu1 %v13898_v0  ;;  %v13962_v0 = vld [vmem:[%s15085_s17 + $0x1bc0] ss:$8 sps:$4 sm:$0xff]  }
 0x3d0   : > { %v9834_v30 = vpop.f32.mrf.mxu0  ;;  %10079 = vmatmul.mubr.bf16.vlgmr.msra.gmra.mxu0 %v2061_v34  ;;  %v13956_v34 = vld [vmem:[%s15085_s17 + $0x1bd0] ss:$8 sps:$4 sm:$0xff]  }
 0x3d1   : > { %v9875_v45 = vpop.f32.mrf.mxu1  ;;  %10120 = vmatmul.mubr.bf16.vlgmr.msra.gmra.mxu1 %v2083_v62  ;;  %v9835_v9 = vadd.f32 %v9834_v30, %v16088_v32  ;;  %10129 = vmatpush1.bf16.msra.mxu0 %v13893_v2  ;;  %v13970_v62 = vld [vmem:[%s15085_s17 + $0x1bb4] ss:$8 sps:$4 sm:$0xff]   ;;  %v13965_v2 = vld [vmem:[%s15085_s17 + $0x1ab0] ss:$8 sps:$4 sm:$0xff]   ;;  %v13971_v30 = vld [vmem:[%s15085_s17 + $0x1aa0] ss:$8 sps:$4 sm:$0xff]  }
 0x3d2   : > { %10170 = vmatpush1.bf16.msra.mxu1 %v13896_v3  ;;  %v9836_v13 = vpop.f32.mrf.mxu0  ;;  %10130 = vmatprep.subr.bf16.mxu0 %v13901_v63  ;;  %v13968_v3 = vld [vmem:[%s15085_s17 + $0x1bb0] ss:$8 sps:$4 sm:$0xff]   ;;  %v13973_v63 = vld [vmem:[%s15085_s17 + $0x1aa4] ss:$8 sps:$4 sm:$0xff]  }
 0x3d3   : > { %v9877_v14 = vpop.f32.mrf.mxu1  ;;  %10171 = vmatprep.subr.bf16.mxu1 %v13904_v5  ;;  %v16168_v17 = vadd.f32 %v9875_v45, %v9835_v9  ;;  %v9837_v18 = vadd.f32 %v9836_v13, %v16091_v60  ;;  %10160 = vmatprep.mubr.bf16.mxu0 %v2082_v1  ;;  %v13913_v60 = vld [vmem:[%s15085_s17 + $0x1a44] ss:$8 sps:$4 sm:$0xff]   ;;  %v13967_v1 = vld [vmem:[%s15085_s17 + $0x1ab4] ss:$8 sps:$4 sm:$0xff]   ;;  %v13974_v45 = vld [vmem:[%s15085_s17 + $0x1ba0] ss:$8 sps:$4 sm:$0xff]  }
 0x3d4   : > { %10201 = vmatprep.mubr.bf16.mxu1 %v2086_v6  ;;  %v9838_v32 = vpop.f32.mrf.mxu0  ;;  %v13976_v5 = vld [vmem:[%s15085_s17 + $0x1ba4] ss:$8 sps:$4 sm:$0xff]   ;;  %v16218_v6 = vld [vmem:[%s15170_s0 + $0x38] sm:$0xff] }
 0x3d5   : > { %v9879_v16 = vpop.f32.mrf.mxu1  ;;  %v16171_v19 = vadd.f32 %v9877_v14, %v9837_v18  ;;  %10131 = vmatpush1.bf16.msra.mxu0 %v13899_v10  ;;  %v13979_v9 = vld [vmem:[%s15085_s17 + $0x1a94] ss:$8 sps:$4 sm:$0xff]   ;;  %v13977_v13 = vld [vmem:[%s15085_s17 + $0x1a90] ss:$8 sps:$4 sm:$0xff]   ;;  %v2068_v32 = vrot.slane %v16144_v53, %v15173_v50  ;;  %v13998_v53 = vld [vmem:[%s15085_s17 + $0x1c64] ss:$8 sps:$4 sm:$0xff]  }
 0x3d6   : > { %10172 = vmatpush1.bf16.msra.mxu1 %v13902_v51  ;;  %v9839_v22 = vpop.f32.mrf.mxu0  ;;  %10132 = vmatprep.subr.bf16.mxu0 %v13907_v52  ;;  %v13982_v10 = vld [vmem:[%s15085_s17 + $0x1b94] ss:$8 sps:$4 sm:$0xff]   ;;  %v16226_v51 = vrot.slane %v16218_v6, %v15173_v50  ;;  %v13980_v14 = vld [vmem:[%s15085_s17 + $0x1b90] ss:$8 sps:$4 sm:$0xff]   ;;  %v13985_v52 = vld [vmem:[%s15085_s17 + $0x1a84] ss:$8 sps:$4 sm:$0xff]  }
 0x3d7   : > { %v9880_v56 = vpop.f32.mrf.mxu1  ;;  %10173 = vmatprep.subr.bf16.mxu1 %v13910_v40  ;;  %v13988_v40 = vld [vmem:[%s15085_s17 + $0x1b84] ss:$8 sps:$4 sm:$0xff]   ;;  %v13983_v16 = vld [vmem:[%s15085_s17 + $0x1a80] ss:$8 sps:$4 sm:$0xff]   ;;  %v13995_v22 = vld [vmem:[%s15085_s17 + $0x1d74] ss:$8 sps:$4 sm:$0xff]  }
 0x3d8   : > { %v2102_v18 = vcombine.high %v16226_v51, %v16226_v51 }
 0x3d9   : > { %10133 = vmatpush1.bf16.msra.mxu0 %v13905_v20  ;;  %v13986_v20 = vld [vmem:[%s15085_s17 + $0x1b80] ss:$8 sps:$4 sm:$0xff]  }
 0x3da   : > { %10174 = vmatpush1.bf16.msra.mxu1 %v13908_v46  ;;  %10134 = vmatprep.subr.bf16.mxu0 %v13913_v60  ;;  %v13992_v46 = vld [vmem:[%s15085_s17 + $0x1c74] ss:$8 sps:$4 sm:$0xff]   ;;  %v2124_v56 = vrot.slane %v2102_v18, %v15173_v50  ;;  %v2084_v60 = vcombine.high %v2068_v32, %v2068_v32 }
 0x3db   : > { %10175 = vmatprep.subr.bf16.mxu1 %v13916_v58  ;;  %v13990_v58 = vld [vmem:[%s15085_s17 + $0x1c70] ss:$8 sps:$4 sm:$0xff]   ;;  %v14055_v18 = vld [vmem:[%s15085_s17 + $0x1dd4] ss:$8 sps:$4 sm:$0xff]  }
 0x3dd   : > { %10135 = vmatpush1.bf16.msra.mxu0 %v13911_v25  ;;  %v13993_v25 = vld [vmem:[%s15085_s17 + $0x1d70] ss:$8 sps:$4 sm:$0xff]  }
 0x3de   : > { %10176 = vmatpush1.bf16.msra.mxu1 %v13914_v28  ;;  %10136 = vmatprep.subr.bf16.mxu0 %v13919_v29  ;;  %v14001_v28 = vld [vmem:[%s15085_s17 + $0x1d64] ss:$8 sps:$4 sm:$0xff]   ;;  %v2134_v29 = vcombine.high %v2124_v56, %v2124_v56 }
 0x3df   : > { %10177 = vmatprep.subr.bf16.mxu1 %v13922_v31 }
 0x3e1   : > { %10137 = vmatpush1.bf16.msra.mxu0 %v13917_v4 }
 0x3e2   : > { %10178 = vmatpush1.bf16.msra.mxu1 %v13920_v57  ;;  %10138 = vmatprep.subr.bf16.mxu0 %v13925_v35  ;;  %v13996_v35 = vld [vmem:[%s15085_s17 + $0x1c60] ss:$8 sps:$4 sm:$0xff]  }
 0x3e3   : > { %10179 = vmatprep.subr.bf16.mxu1 %v13928_v36  ;;  %v13999_v36 = vld [vmem:[%s15085_s17 + $0x1d60] ss:$8 sps:$4 sm:$0xff]  }
 0x3e5   : > { %10139 = vmatpush1.bf16.msra.mxu0 %v13923_v37 }
 0x3e6   : > { %10180 = vmatpush1.bf16.msra.mxu1 %v13926_v12  ;;  %10140 = vmatprep.subr.bf16.mxu0 %v13931_v38  ;;  %v14004_v38 = vld [vmem:[%s15085_s17 + $0x1c54] ss:$8 sps:$4 sm:$0xff]  }
 0x3e7   : > { %10181 = vmatprep.subr.bf16.mxu1 %v13934_v39  ;;  %v14007_v39 = vld [vmem:[%s15085_s17 + $0x1d54] ss:$8 sps:$4 sm:$0xff]  }
 0x3e9   : > { %10141 = vmatpush1.bf16.msra.mxu0 %v13929_v11 }
 0x3ea   : > { %10182 = vmatpush1.bf16.msra.mxu1 %v13932_v15  ;;  %10142 = vmatprep.subr.bf16.mxu0 %v13937_v41 }
 0x3eb   : > { %10183 = vmatprep.subr.bf16.mxu1 %v13940_v42 }
 0x3ed   : > { %10143 = vmatpush1.bf16.msra.mxu0 %v13935_v8  ;;  %v14002_v8 = vld [vmem:[%s15085_s17 + $0x1c50] ss:$8 sps:$4 sm:$0xff]  }
 0x3ee   : > { %10184 = vmatpush1.bf16.msra.mxu1 %v13938_v43  ;;  %10144 = vmatprep.subr.bf16.mxu0 %v13943_v47  ;;  %v14005_v43 = vld [vmem:[%s15085_s17 + $0x1d50] ss:$8 sps:$4 sm:$0xff]  }
 0x3ef   : > { %10185 = vmatprep.subr.bf16.mxu1 %v13946_v48 }
 0x3f1   : > { %10145 = vmatpush2.bf16.msra.mxu0 %v13941_v21  ;;  %v14013_v21 = vld [vmem:[%s15085_s17 + $0x1d44] ss:$8 sps:$4 sm:$0xff]  }
 0x3f2   : > { %10186 = vmatpush2.bf16.msra.mxu1 %v13944_v49  ;;  %10146 = vmatprep.subr.bf16.mxu0 %v13949_v26  ;;  %v14008_v49 = vld [vmem:[%s15085_s17 + $0x1c40] ss:$8 sps:$4 sm:$0xff]  }
 0x3f3   : > { %10187 = vmatprep.subr.bf16.mxu1 %v13952_v27  ;;  %v14011_v26 = vld [vmem:[%s15085_s17 + $0x1d40] ss:$8 sps:$4 sm:$0xff]   ;;  %v14016_v27 = vld [vmem:[%s15085_s17 + $0x1c34] ss:$8 sps:$4 sm:$0xff]  }
 0x3f5   : > { %10147 = vmatpush2.bf16.msra.mxu0 %v13947_v23  ;;  %v14019_v23 = vld [vmem:[%s15085_s17 + $0x1d34] ss:$8 sps:$4 sm:$0xff]  }
 0x3f6   : > { %10188 = vmatpush2.bf16.msra.mxu1 %v13950_v7  ;;  %10148 = vmatprep.subr.bf16.mxu0 %v13955_v54  ;;  %v14014_v7 = vld [vmem:[%s15085_s17 + $0x1c30] ss:$8 sps:$4 sm:$0xff]  }
 0x3f7   : > { %10189 = vmatprep.subr.bf16.mxu1 %v13958_v55  ;;  %v14017_v54 = vld [vmem:[%s15085_s17 + $0x1d30] ss:$8 sps:$4 sm:$0xff]   ;;  %v14022_v55 = vld [vmem:[%s15085_s17 + $0x1c24] ss:$8 sps:$4 sm:$0xff]  }
 0x3f9   : > { %10149 = vmatpush2.bf16.msra.mxu0 %v13953_v33  ;;  %v14025_v33 = vld [vmem:[%s15085_s17 + $0x1d24] ss:$8 sps:$4 sm:$0xff]  }
 0x3fa   : > { %10190 = vmatpush2.bf16.msra.mxu1 %v13956_v34  ;;  %10150 = vmatprep.subr.bf16.mxu0 %v13961_v59  ;;  %v14020_v34 = vld [vmem:[%s15085_s17 + $0x1c20] ss:$8 sps:$4 sm:$0xff]  }
 0x3fb   : > { %10191 = vmatprep.subr.bf16.mxu1 %v13964_v24  ;;  %v14023_v59 = vld [vmem:[%s15085_s17 + $0x1d20] ss:$8 sps:$4 sm:$0xff]   ;;  %v14028_v24 = vld [vmem:[%s15085_s17 + $0x1c14] ss:$8 sps:$4 sm:$0xff]  }
 0x3fd   : > { %10151 = vmatpush2.bf16.msra.mxu0 %v13959_v61  ;;  %v14031_v61 = vld [vmem:[%s15085_s17 + $0x1d14] ss:$8 sps:$4 sm:$0xff]  }
 0x3fe   : > { %10192 = vmatpush2.bf16.msra.mxu1 %v13962_v0  ;;  %10152 = vmatprep.subr.bf16.mxu0 %v13967_v1  ;;  %v14026_v0 = vld [vmem:[%s15085_s17 + $0x1c10] ss:$8 sps:$4 sm:$0xff]  }
 0x3ff   : > { %10193 = vmatprep.subr.bf16.mxu1 %v13970_v62  ;;  %v14029_v1 = vld [vmem:[%s15085_s17 + $0x1d10] ss:$8 sps:$4 sm:$0xff]   ;;  %v14034_v62 = vld [vmem:[%s15085_s17 + $0x1c04] ss:$8 sps:$4 sm:$0xff]  }
 0x401   : > { %10153 = vmatpush2.bf16.msra.mxu0 %v13965_v2  ;;  %v14037_v2 = vld [vmem:[%s15085_s17 + $0x1d04] ss:$8 sps:$4 sm:$0xff]  }
 0x402   : > { %10194 = vmatpush2.bf16.msra.mxu1 %v13968_v3  ;;  %10154 = vmatprep.subr.bf16.mxu0 %v13973_v63  ;;  %v14032_v3 = vld [vmem:[%s15085_s17 + $0x1c00] ss:$8 sps:$4 sm:$0xff]  }
 0x403   : > { %10195 = vmatprep.subr.bf16.mxu1 %v13976_v5  ;;  %v14035_v63 = vld [vmem:[%s15085_s17 + $0x1d00] ss:$8 sps:$4 sm:$0xff]   ;;  %v14040_v5 = vld [vmem:[%s15085_s17 + $0x1cf4] ss:$8 sps:$4 sm:$0xff]  }
 0x405   : > { %10155 = vmatpush2.bf16.msra.mxu0 %v13971_v30  ;;  %v14043_v30 = vld [vmem:[%s15085_s17 + $0x1df4] ss:$8 sps:$4 sm:$0xff]  }
 0x406   : > { %10196 = vmatpush2.bf16.msra.mxu1 %v13974_v45  ;;  %10156 = vmatprep.subr.bf16.mxu0 %v13979_v9  ;;  %v14038_v45 = vld [vmem:[%s15085_s17 + $0x1cf0] ss:$8 sps:$4 sm:$0xff]  }
 0x407   : > { %10197 = vmatprep.subr.bf16.mxu1 %v13982_v10  ;;  %v14041_v9 = vld [vmem:[%s15085_s17 + $0x1df0] ss:$8 sps:$4 sm:$0xff]   ;;  %v14046_v10 = vld [vmem:[%s15085_s17 + $0x1ce4] ss:$8 sps:$4 sm:$0xff]  }
 0x409   : > { %10157 = vmatpush2.bf16.msra.mxu0 %v13977_v13  ;;  %v14049_v13 = vld [vmem:[%s15085_s17 + $0x1de4] ss:$8 sps:$4 sm:$0xff]  }
 0x40a   : > { %10198 = vmatpush2.bf16.msra.mxu1 %v13980_v14  ;;  %10158 = vmatprep.subr.bf16.mxu0 %v13985_v52  ;;  %v14044_v14 = vld [vmem:[%s15085_s17 + $0x1ce0] ss:$8 sps:$4 sm:$0xff]  }
 0x40b   : > { %10199 = vmatprep.subr.bf16.mxu1 %v13988_v40  ;;  %v14047_v52 = vld [vmem:[%s15085_s17 + $0x1de0] ss:$8 sps:$4 sm:$0xff]   ;;  %v14052_v40 = vld [vmem:[%s15085_s17 + $0x1cd4] ss:$8 sps:$4 sm:$0xff]  }
 0x40d   : > { %10159 = vmatpush2.bf16.msra.mxu0 %v13983_v16  ;;  %v14053_v16 = vld [vmem:[%s15085_s17 + $0x1dd0] ss:$8 sps:$4 sm:$0xff]  }
 0x40e   : > { %10200 = vmatpush2.bf16.msra.mxu1 %v13986_v20  ;;  %10210 = vmatprep.subr.bf16.mxu0 %v13992_v46  ;;  %v14058_v20 = vld [vmem:[%s15085_s17 + $0x1cc4] ss:$8 sps:$4 sm:$0xff]  }
 0x40f   : > { %10251 = vmatprep.subr.bf16.mxu1 %v13995_v22  ;;  %v14061_v46 = vld [vmem:[%s15085_s17 + $0x1dc4] ss:$8 sps:$4 sm:$0xff]   ;;  %v14056_v22 = vld [vmem:[%s15085_s17 + $0x1cc0] ss:$8 sps:$4 sm:$0xff]  }
 0x410   : > { %v9916_v31 = vpop.f32.mrf.mxu0  ;;  %10161 = vmatmul.mubr.bf16.vlgmr.msra.gmra.mxu0 %v2068_v32  ;;  %v14050_v32 = vld [vmem:[%s15085_s17 + $0x1cd0] ss:$8 sps:$4 sm:$0xff]  }
 0x411   : > { %v9957_v4 = vpop.f32.mrf.mxu1  ;;  %10202 = vmatmul.mubr.bf16.vlgmr.msra.gmra.mxu1 %v2084_v60  ;;  %v9917_v57 = vadd.f32 %v9916_v31, %v16168_v17  ;;  %10211 = vmatpush1.bf16.msra.mxu0 %v13990_v58  ;;  %v14064_v60 = vld [vmem:[%s15085_s17 + $0x1cb4] ss:$8 sps:$4 sm:$0xff]   ;;  %v2087_v31 = vcombine.high %v16218_v6, %v16218_v6  ;;  %v14074_v6 = vld [vmem:[%s15085_s17 + $0x1c90] ss:$8 sps:$4 sm:$0xff]  }
 0x412   : > { %10252 = vmatpush1.bf16.msra.mxu1 %v13993_v25  ;;  %v9918_v37 = vpop.f32.mrf.mxu0  ;;  %10212 = vmatprep.subr.bf16.mxu0 %v13998_v53  ;;  %v14067_v58 = vld [vmem:[%s15085_s17 + $0x1db4] ss:$8 sps:$4 sm:$0xff]   ;;  %v14062_v25 = vld [vmem:[%s15085_s17 + $0x1cb0] ss:$8 sps:$4 sm:$0xff]  }
 0x413   : > { %v9959_v12 = vpop.f32.mrf.mxu1  ;;  %10253 = vmatprep.subr.bf16.mxu1 %v14001_v28  ;;  %v16250_v11 = vadd.f32 %v9957_v4, %v9917_v57  ;;  %v9919_v15 = vadd.f32 %v9918_v37, %v16171_v19  ;;  %10242 = vmatprep.mubr.bf16.mxu0 %v2124_v56  ;;  %v14010_v19 = vld [vmem:[%s15085_s17 + $0x1c44] ss:$8 sps:$4 sm:$0xff]   ;;  %v14059_v56 = vld [vmem:[%s15085_s17 + $0x1dc0] ss:$8 sps:$4 sm:$0xff]   ;;  %v14065_v53 = vld [vmem:[%s15085_s17 + $0x1db0] ss:$8 sps:$4 sm:$0xff]   ;;  %v16306_v37 = vrot.slane %v2087_v31, %v15173_v50 }
 0x414   : > { %10283 = vmatprep.mubr.bf16.mxu1 %v2134_v29  ;;  %v9920_v17 = vpop.f32.mrf.mxu0  ;;  %v14070_v28 = vld [vmem:[%s15085_s17 + $0x1ca4] ss:$8 sps:$4 sm:$0xff]   ;;  %v14068_v4 = vld [vmem:[%s15085_s17 + $0x1ca0] ss:$8 sps:$4 sm:$0xff]   ;;  %v14139_v31 = vld [vmem:[%s15085_s17 + $0x1ff4] ss:$8 sps:$4 sm:$0xff]  }
 0x415   : > { %v9961_v41 = vpop.f32.mrf.mxu1  ;;  %v16253_v42 = vadd.f32 %v9959_v12, %v9919_v15  ;;  %10213 = vmatpush1.bf16.msra.mxu0 %v13996_v35  ;;  %v14073_v29 = vld [vmem:[%s15085_s17 + $0x1da4] ss:$8 sps:$4 sm:$0xff]   ;;  %v14071_v57 = vld [vmem:[%s15085_s17 + $0x1da0] ss:$8 sps:$4 sm:$0xff]   ;;  %v14076_v35 = vld [vmem:[%s15085_s17 + $0x1c94] ss:$8 sps:$4 sm:$0xff]   ;;  %v2103_v15 = vcombine.high %v16306_v37, %v16306_v37  ;;  %v2110_v17 = vrot.slane %v16226_v51, %v15173_v50 }
 0x416   : > { %10254 = vmatpush1.bf16.msra.mxu1 %v13999_v36  ;;  %v9921_v47 = vpop.f32.mrf.mxu0  ;;  %10214 = vmatprep.subr.bf16.mxu0 %v14004_v38  ;;  %v14079_v36 = vld [vmem:[%s15085_s17 + $0x1d94] ss:$8 sps:$4 sm:$0xff]   ;;  %v14077_v12 = vld [vmem:[%s15085_s17 + $0x1d90] ss:$8 sps:$4 sm:$0xff]   ;;  %v14082_v38 = vld [vmem:[%s15085_s17 + $0x1c84] ss:$8 sps:$4 sm:$0xff]  }
 0x417   : > { %v9962_v48 = vpop.f32.mrf.mxu1  ;;  %10255 = vmatprep.subr.bf16.mxu1 %v14007_v39  ;;  %v14085_v39 = vld [vmem:[%s15085_s17 + $0x1d84] ss:$8 sps:$4 sm:$0xff]   ;;  %v14080_v41 = vld [vmem:[%s15085_s17 + $0x1c80] ss:$8 sps:$4 sm:$0xff]   ;;  %v14091_v47 = vld [vmem:[%s15085_s17 + $0x1f74] ss:$8 sps:$4 sm:$0xff]  }
 0x418   : > { %v2131_v48 = vrot.slane %v2103_v15, %v15173_v50  ;;  %v14094_v51 = vld [vmem:[%s15085_s17 + $0x1e64] ss:$8 sps:$4 sm:$0xff]   ;;  %v14146_v15 = vld [vmem:[%s15085_s17 + $0x1ed0] ss:$8 sps:$4 sm:$0xff]  }
 0x419   : > { %10215 = vmatpush1.bf16.msra.mxu0 %v14002_v8  ;;  %v14083_v8 = vld [vmem:[%s15085_s17 + $0x1d80] ss:$8 sps:$4 sm:$0xff]  }
 0x41a   : > { %10256 = vmatpush1.bf16.msra.mxu1 %v14005_v43  ;;  %10216 = vmatprep.subr.bf16.mxu0 %v14010_v19  ;;  %v14088_v43 = vld [vmem:[%s15085_s17 + $0x1e74] ss:$8 sps:$4 sm:$0xff]   ;;  %v2132_v19 = vcombine.high %v2110_v17, %v2110_v17 }
 0x41b   : > { %10257 = vmatprep.subr.bf16.mxu1 %v14013_v21  ;;  %v14086_v21 = vld [vmem:[%s15085_s17 + $0x1e70] ss:$8 sps:$4 sm:$0xff]  }
 0x41d   : > { %10217 = vmatpush1.bf16.msra.mxu0 %v14008_v49  ;;  %v14089_v49 = vld [vmem:[%s15085_s17 + $0x1f70] ss:$8 sps:$4 sm:$0xff]  }
 0x41e   : > { %10258 = vmatpush1.bf16.msra.mxu1 %v14011_v26  ;;  %10218 = vmatprep.subr.bf16.mxu0 %v14016_v27  ;;  %v14097_v26 = vld [vmem:[%s15085_s17 + $0x1f64] ss:$8 sps:$4 sm:$0xff]   ;;  %v2135_v27 = vcombine.high %v2131_v48, %v2131_v48 }
 0x41f   : > { %10259 = vmatprep.subr.bf16.mxu1 %v14019_v23 }
 0x421   : > { %10219 = vmatpush1.bf16.msra.mxu0 %v14014_v7 }
 0x422   : > { %10260 = vmatpush1.bf16.msra.mxu1 %v14017_v54  ;;  %10220 = vmatprep.subr.bf16.mxu0 %v14022_v55  ;;  %v14092_v55 = vld [vmem:[%s15085_s17 + $0x1e60] ss:$8 sps:$4 sm:$0xff]  }
 0x423   : > { %10261 = vmatprep.subr.bf16.mxu1 %v14025_v33  ;;  %v14095_v33 = vld [vmem:[%s15085_s17 + $0x1f60] ss:$8 sps:$4 sm:$0xff]  }
 0x425   : > { %10221 = vmatpush1.bf16.msra.mxu0 %v14020_v34 }
 0x426   : > { %10262 = vmatpush1.bf16.msra.mxu1 %v14023_v59  ;;  %10222 = vmatprep.subr.bf16.mxu0 %v14028_v24  ;;  %v14100_v24 = vld [vmem:[%s15085_s17 + $0x1e54] ss:$8 sps:$4 sm:$0xff]  }
 0x427   : > { %10263 = vmatprep.subr.bf16.mxu1 %v14031_v61  ;;  %v14103_v61 = vld [vmem:[%s15085_s17 + $0x1f54] ss:$8 sps:$4 sm:$0xff]  }
 0x429   : > { %10223 = vmatpush1.bf16.msra.mxu0 %v14026_v0 }
 0x42a   : > { %10264 = vmatpush1.bf16.msra.mxu1 %v14029_v1  ;;  %10224 = vmatprep.subr.bf16.mxu0 %v14034_v62 }
 0x42b   : > { %10265 = vmatprep.subr.bf16.mxu1 %v14037_v2 }
 0x42d   : > { %10225 = vmatpush1.bf16.msra.mxu0 %v14032_v3  ;;  %v14098_v3 = vld [vmem:[%s15085_s17 + $0x1e50] ss:$8 sps:$4 sm:$0xff]  }
 0x42e   : > { %10266 = vmatpush1.bf16.msra.mxu1 %v14035_v63  ;;  %10226 = vmatprep.subr.bf16.mxu0 %v14040_v5  ;;  %v14101_v63 = vld [vmem:[%s15085_s17 + $0x1f50] ss:$8 sps:$4 sm:$0xff]  }
 0x42f   : > { %10267 = vmatprep.subr.bf16.mxu1 %v14043_v30 }
 0x431   : > { %10227 = vmatpush2.bf16.msra.mxu0 %v14038_v45  ;;  %v14109_v45 = vld [vmem:[%s15085_s17 + $0x1f44] ss:$8 sps:$4 sm:$0xff]  }
 0x432   : > { %10268 = vmatpush2.bf16.msra.mxu1 %v14041_v9  ;;  %10228 = vmatprep.subr.bf16.mxu0 %v14046_v10  ;;  %v14104_v9 = vld [vmem:[%s15085_s17 + $0x1e40] ss:$8 sps:$4 sm:$0xff]  }
 0x433   : > { %10269 = vmatprep.subr.bf16.mxu1 %v14049_v13  ;;  %v14107_v10 = vld [vmem:[%s15085_s17 + $0x1f40] ss:$8 sps:$4 sm:$0xff]   ;;  %v14112_v13 = vld [vmem:[%s15085_s17 + $0x1e34] ss:$8 sps:$4 sm:$0xff]  }
 0x435   : > { %10229 = vmatpush2.bf16.msra.mxu0 %v14044_v14  ;;  %v14115_v14 = vld [vmem:[%s15085_s17 + $0x1f34] ss:$8 sps:$4 sm:$0xff]  }
 0x436   : > { %10270 = vmatpush2.bf16.msra.mxu1 %v14047_v52  ;;  %10230 = vmatprep.subr.bf16.mxu0 %v14052_v40  ;;  %v14110_v52 = vld [vmem:[%s15085_s17 + $0x1e30] ss:$8 sps:$4 sm:$0xff]  }
 0x437   : > { %10271 = vmatprep.subr.bf16.mxu1 %v14055_v18  ;;  %v14113_v40 = vld [vmem:[%s15085_s17 + $0x1f30] ss:$8 sps:$4 sm:$0xff]   ;;  %v14118_v18 = vld [vmem:[%s15085_s17 + $0x1e24] ss:$8 sps:$4 sm:$0xff]  }
 0x439   : > { %10231 = vmatpush2.bf16.msra.mxu0 %v14050_v32  ;;  %v14121_v32 = vld [vmem:[%s15085_s17 + $0x1f24] ss:$8 sps:$4 sm:$0xff]  }
 0x43a   : > { %10272 = vmatpush2.bf16.msra.mxu1 %v14053_v16  ;;  %10232 = vmatprep.subr.bf16.mxu0 %v14058_v20  ;;  %v14116_v16 = vld [vmem:[%s15085_s17 + $0x1e20] ss:$8 sps:$4 sm:$0xff]  }
 0x43b   : > { %10273 = vmatprep.subr.bf16.mxu1 %v14061_v46  ;;  %v14119_v20 = vld [vmem:[%s15085_s17 + $0x1f20] ss:$8 sps:$4 sm:$0xff]   ;;  %v14124_v46 = vld [vmem:[%s15085_s17 + $0x1e14] ss:$8 sps:$4 sm:$0xff]  }
 0x43d   : > { %10233 = vmatpush2.bf16.msra.mxu0 %v14056_v22  ;;  %v14127_v22 = vld [vmem:[%s15085_s17 + $0x1f14] ss:$8 sps:$4 sm:$0xff]  }
 0x43e   : > { %10274 = vmatpush2.bf16.msra.mxu1 %v14059_v56  ;;  %10234 = vmatprep.subr.bf16.mxu0 %v14064_v60  ;;  %v14122_v56 = vld [vmem:[%s15085_s17 + $0x1e10] ss:$8 sps:$4 sm:$0xff]  }
 0x43f   : > { %10275 = vmatprep.subr.bf16.mxu1 %v14067_v58  ;;  %v14125_v60 = vld [vmem:[%s15085_s17 + $0x1f10] ss:$8 sps:$4 sm:$0xff]   ;;  %v14130_v58 = vld [vmem:[%s15085_s17 + $0x1e04] ss:$8 sps:$4 sm:$0xff]  }
 0x441   : > { %10235 = vmatpush2.bf16.msra.mxu0 %v14062_v25  ;;  %v14133_v25 = vld [vmem:[%s15085_s17 + $0x1f04] ss:$8 sps:$4 sm:$0xff]  }
 0x442   : > { %10276 = vmatpush2.bf16.msra.mxu1 %v14065_v53  ;;  %10236 = vmatprep.subr.bf16.mxu0 %v14070_v28  ;;  %v14128_v53 = vld [vmem:[%s15085_s17 + $0x1e00] ss:$8 sps:$4 sm:$0xff]  }
 0x443   : > { %10277 = vmatprep.subr.bf16.mxu1 %v14073_v29  ;;  %v14131_v28 = vld [vmem:[%s15085_s17 + $0x1f00] ss:$8 sps:$4 sm:$0xff]   ;;  %v14136_v29 = vld [vmem:[%s15085_s17 + $0x1ef4] ss:$8 sps:$4 sm:$0xff]  }
 0x445   : > { %10237 = vmatpush2.bf16.msra.mxu0 %v14068_v4  ;;  %v14134_v4 = vld [vmem:[%s15085_s17 + $0x1ef0] ss:$8 sps:$4 sm:$0xff]  }
 0x446   : > { %10278 = vmatpush2.bf16.msra.mxu1 %v14071_v57  ;;  %10238 = vmatprep.subr.bf16.mxu0 %v14076_v35  ;;  %v14137_v57 = vld [vmem:[%s15085_s17 + $0x1ff0] ss:$8 sps:$4 sm:$0xff]   ;;  %v14142_v35 = vld [vmem:[%s15085_s17 + $0x1ee4] ss:$8 sps:$4 sm:$0xff]  }
 0x447   : > { %10279 = vmatprep.subr.bf16.mxu1 %v14079_v36  ;;  %v14145_v36 = vld [vmem:[%s15085_s17 + $0x1fe4] ss:$8 sps:$4 sm:$0xff]  }
 0x449   : > { %10239 = vmatpush2.bf16.msra.mxu0 %v14074_v6  ;;  %v14140_v6 = vld [vmem:[%s15085_s17 + $0x1ee0] ss:$8 sps:$4 sm:$0xff]  }
 0x44a   : > { %10280 = vmatpush2.bf16.msra.mxu1 %v14077_v12  ;;  %10240 = vmatprep.subr.bf16.mxu0 %v14082_v38  ;;  %v14143_v12 = vld [vmem:[%s15085_s17 + $0x1fe0] ss:$8 sps:$4 sm:$0xff]   ;;  %v14148_v38 = vld [vmem:[%s15085_s17 + $0x1ed4] ss:$8 sps:$4 sm:$0xff]  }
 0x44b   : > { %10281 = vmatprep.subr.bf16.mxu1 %v14085_v39  ;;  %v14151_v39 = vld [vmem:[%s15085_s17 + $0x1fd4] ss:$8 sps:$4 sm:$0xff]  }
 0x44d   : > { %10241 = vmatpush2.bf16.msra.mxu0 %v14080_v41  ;;  %v14154_v41 = vld [vmem:[%s15085_s17 + $0x1ec4] ss:$8 sps:$4 sm:$0xff]  }
 0x44e   : > { %10282 = vmatpush2.bf16.msra.mxu1 %v14083_v8  ;;  %10292 = vmatprep.subr.bf16.mxu0 %v14088_v43  ;;  %v14157_v8 = vld [vmem:[%s15085_s17 + $0x1fc4] ss:$8 sps:$4 sm:$0xff]   ;;  %v14152_v43 = vld [vmem:[%s15085_s17 + $0x1ec0] ss:$8 sps:$4 sm:$0xff]  }
 0x44f   : > { %10333 = vmatprep.subr.bf16.mxu1 %v14091_v47  ;;  %v14155_v47 = vld [vmem:[%s15085_s17 + $0x1fc0] ss:$8 sps:$4 sm:$0xff]  }
 0x450   : > { %v9998_v23 = vpop.f32.mrf.mxu0  ;;  %10243 = vmatmul.mubr.bf16.vlgmr.msra.gmra.mxu0 %v2110_v17  ;;  %v14149_v17 = vld [vmem:[%s15085_s17 + $0x1fd0] ss:$8 sps:$4 sm:$0xff]  }
 0x451   : > { %v10039_v7 = vpop.f32.mrf.mxu1  ;;  %10284 = vmatmul.mubr.bf16.vlgmr.msra.gmra.mxu1 %v2132_v19  ;;  %v9999_v54 = vadd.f32 %v9998_v23, %v16250_v11  ;;  %10293 = vmatpush1.bf16.msra.mxu0 %v14086_v21  ;;  %v14163_v19 = vld [vmem:[%s15085_s17 + $0x1fb4] ss:$8 sps:$4 sm:$0xff]   ;;  %v14158_v21 = vld [vmem:[%s15085_s17 + $0x1eb0] ss:$8 sps:$4 sm:$0xff]   ;;  %v14164_v23 = vld [vmem:[%s15085_s17 + $0x1ea0] ss:$8 sps:$4 sm:$0xff]  }
 0x452   : > { %10334 = vmatpush1.bf16.msra.mxu1 %v14089_v49  ;;  %v10000_v34 = vpop.f32.mrf.mxu0  ;;  %10294 = vmatprep.subr.bf16.mxu0 %v14094_v51  ;;  %v14161_v49 = vld [vmem:[%s15085_s17 + $0x1fb0] ss:$8 sps:$4 sm:$0xff]   ;;  %v14166_v51 = vld [vmem:[%s15085_s17 + $0x1ea4] ss:$8 sps:$4 sm:$0xff]  }
 0x453   : > { %v10041_v59 = vpop.f32.mrf.mxu1  ;;  %10335 = vmatprep.subr.bf16.mxu1 %v14097_v26  ;;  %v16330_v0 = vadd.f32 %v10039_v7, %v9999_v54  ;;  %v10001_v1 = vadd.f32 %v10000_v34, %v16253_v42  ;;  %10324 = vmatprep.mubr.bf16.mxu0 %v2131_v48  ;;  %v14106_v42 = vld [vmem:[%s15085_s17 + $0x1e44] ss:$8 sps:$4 sm:$0xff]   ;;  %v14160_v48 = vld [vmem:[%s15085_s17 + $0x1eb4] ss:$8 sps:$4 sm:$0xff]   ;;  %v14167_v7 = vld [vmem:[%s15085_s17 + $0x1fa0] ss:$8 sps:$4 sm:$0xff]  }
 0x454   : > { %10365 = vmatprep.mubr.bf16.mxu1 %v2135_v27  ;;  %v10002_v11 = vpop.f32.mrf.mxu0  ;;  %v14169_v26 = vld [vmem:[%s15085_s17 + $0x1fa4] ss:$8 sps:$4 sm:$0xff]   ;;  %v16380_v27 = vld [vmem:[%s15170_s0 + $0x40] sm:$0xff]  ;;  %v14170_v34 = vld [vmem:[%s15085_s17 + $0x1e90] ss:$8 sps:$4 sm:$0xff]  }
 0x455   : > { %v10043_v62 = vpop.f32.mrf.mxu1  ;;  %v16333_v2 = vadd.f32 %v10041_v59, %v10001_v1  ;;  %10295 = vmatpush1.bf16.msra.mxu0 %v14092_v55  ;;  %v14172_v54 = vld [vmem:[%s15085_s17 + $0x1e94] ss:$8 sps:$4 sm:$0xff]   ;;  %v14173_v59 = vld [vmem:[%s15085_s17 + $0x1f90] ss:$8 sps:$4 sm:$0xff]   ;;  %v2117_v11 = vrot.slane %v16306_v37, %v15173_v50  ;;  %v14191_v37 = vld [vmem:[%s15085_s17 + $0x2064] ss:$8 sps:$4 sm:$0xff]  }
 0x456   : > { %10336 = vmatpush1.bf16.msra.mxu1 %v14095_v33  ;;  %v10003_v5 = vpop.f32.mrf.mxu0  ;;  %10296 = vmatprep.subr.bf16.mxu0 %v14100_v24  ;;  %v14175_v55 = vld [vmem:[%s15085_s17 + $0x1f94] ss:$8 sps:$4 sm:$0xff]   ;;  %v16388_v33 = vrot.slane %v16380_v27, %v15173_v50  ;;  %v14178_v24 = vld [vmem:[%s15085_s17 + $0x1e84] ss:$8 sps:$4 sm:$0xff]   ;;  %v14176_v62 = vld [vmem:[%s15085_s17 + $0x1e80] ss:$8 sps:$4 sm:$0xff]  }
 0x457   : > { %v10044_v30 = vpop.f32.mrf.mxu1  ;;  %10337 = vmatprep.subr.bf16.mxu1 %v14103_v61  ;;  %v14181_v61 = vld [vmem:[%s15085_s17 + $0x1f84] ss:$8 sps:$4 sm:$0xff]   ;;  %v14188_v5 = vld [vmem:[%s15085_s17 + $0x2174] ss:$8 sps:$4 sm:$0xff]  }
 0x458   : > { %v2151_v1 = vcombine.high %v16388_v33, %v16388_v33 }
 0x459   : > { %10297 = vmatpush1.bf16.msra.mxu0 %v14098_v3  ;;  %v14179_v3 = vld [vmem:[%s15085_s17 + $0x1f80] ss:$8 sps:$4 sm:$0xff]  }
 0x45a   : > { %10338 = vmatpush1.bf16.msra.mxu1 %v14101_v63  ;;  %10298 = vmatprep.subr.bf16.mxu0 %v14106_v42  ;;  %v14185_v63 = vld [vmem:[%s15085_s17 + $0x2074] ss:$8 sps:$4 sm:$0xff]   ;;  %v2173_v30 = vrot.slane %v2151_v1, %v15173_v50  ;;  %v2133_v42 = vcombine.high %v2117_v11, %v2117_v11 }
 0x45b   : > { %10339 = vmatprep.subr.bf16.mxu1 %v14109_v45  ;;  %v14183_v45 = vld [vmem:[%s15085_s17 + $0x2070] ss:$8 sps:$4 sm:$0xff]   ;;  %v14248_v1 = vld [vmem:[%s15085_s17 + $0x21d4] ss:$8 sps:$4 sm:$0xff]  }
 0x45d   : > { %10299 = vmatpush1.bf16.msra.mxu0 %v14104_v9  ;;  %v14186_v9 = vld [vmem:[%s15085_s17 + $0x2170] ss:$8 sps:$4 sm:$0xff]  }
 0x45e   : > { %10340 = vmatpush1.bf16.msra.mxu1 %v14107_v10  ;;  %10300 = vmatprep.subr.bf16.mxu0 %v14112_v13  ;;  %v14194_v10 = vld [vmem:[%s15085_s17 + $0x2164] ss:$8 sps:$4 sm:$0xff]   ;;  %v2183_v13 = vcombine.high %v2173_v30, %v2173_v30 }
 0x45f   : > { %10341 = vmatprep.subr.bf16.mxu1 %v14115_v14 }
 0x461   : > { %10301 = vmatpush1.bf16.msra.mxu0 %v14110_v52 }
 0x462   : > { %10342 = vmatpush1.bf16.msra.mxu1 %v14113_v40  ;;  %10302 = vmatprep.subr.bf16.mxu0 %v14118_v18  ;;  %v14189_v18 = vld [vmem:[%s15085_s17 + $0x2060] ss:$8 sps:$4 sm:$0xff]  }
 0x463   : > { %10343 = vmatprep.subr.bf16.mxu1 %v14121_v32  ;;  %v14192_v32 = vld [vmem:[%s15085_s17 + $0x2160] ss:$8 sps:$4 sm:$0xff]  }
 0x465   : > { %10303 = vmatpush1.bf16.msra.mxu0 %v14116_v16 }
 0x466   : > { %10344 = vmatpush1.bf16.msra.mxu1 %v14119_v20  ;;  %10304 = vmatprep.subr.bf16.mxu0 %v14124_v46  ;;  %v14197_v46 = vld [vmem:[%s15085_s17 + $0x2054] ss:$8 sps:$4 sm:$0xff]  }
 0x467   : > { %10345 = vmatprep.subr.bf16.mxu1 %v14127_v22  ;;  %v14200_v22 = vld [vmem:[%s15085_s17 + $0x2154] ss:$8 sps:$4 sm:$0xff]  }
 0x469   : > { %10305 = vmatpush1.bf16.msra.mxu0 %v14122_v56 }
 0x46a   : > { %10346 = vmatpush1.bf16.msra.mxu1 %v14125_v60  ;;  %10306 = vmatprep.subr.bf16.mxu0 %v14130_v58 }
 0x46b   : > { %10347 = vmatprep.subr.bf16.mxu1 %v14133_v25 }
 0x46d   : > { %10307 = vmatpush1.bf16.msra.mxu0 %v14128_v53  ;;  %v14195_v53 = vld [vmem:[%s15085_s17 + $0x2050] ss:$8 sps:$4 sm:$0xff]  }
 0x46e   : > { %10348 = vmatpush1.bf16.msra.mxu1 %v14131_v28  ;;  %10308 = vmatprep.subr.bf16.mxu0 %v14136_v29  ;;  %v14198_v28 = vld [vmem:[%s15085_s17 + $0x2150] ss:$8 sps:$4 sm:$0xff]  }
 0x46f   : > { %10349 = vmatprep.subr.bf16.mxu1 %v14139_v31 }
 0x471   : > { %10309 = vmatpush2.bf16.msra.mxu0 %v14134_v4  ;;  %v14206_v4 = vld [vmem:[%s15085_s17 + $0x2144] ss:$8 sps:$4 sm:$0xff]  }
 0x472   : > { %10350 = vmatpush2.bf16.msra.mxu1 %v14137_v57  ;;  %10310 = vmatprep.subr.bf16.mxu0 %v14142_v35  ;;  %v14201_v57 = vld [vmem:[%s15085_s17 + $0x2040] ss:$8 sps:$4 sm:$0xff]  }
 0x473   : > { %10351 = vmatprep.subr.bf16.mxu1 %v14145_v36  ;;  %v14204_v35 = vld [vmem:[%s15085_s17 + $0x2140] ss:$8 sps:$4 sm:$0xff]   ;;  %v14209_v36 = vld [vmem:[%s15085_s17 + $0x2034] ss:$8 sps:$4 sm:$0xff]  }
 0x475   : > { %10311 = vmatpush2.bf16.msra.mxu0 %v14140_v6  ;;  %v14212_v6 = vld [vmem:[%s15085_s17 + $0x2134] ss:$8 sps:$4 sm:$0xff]  }
 0x476   : > { %10352 = vmatpush2.bf16.msra.mxu1 %v14143_v12  ;;  %10312 = vmatprep.subr.bf16.mxu0 %v14148_v38  ;;  %v14207_v12 = vld [vmem:[%s15085_s17 + $0x2030] ss:$8 sps:$4 sm:$0xff]  }
 0x477   : > { %10353 = vmatprep.subr.bf16.mxu1 %v14151_v39  ;;  %v14210_v38 = vld [vmem:[%s15085_s17 + $0x2130] ss:$8 sps:$4 sm:$0xff]   ;;  %v14215_v39 = vld [vmem:[%s15085_s17 + $0x2024] ss:$8 sps:$4 sm:$0xff]  }
 0x479   : > { %10313 = vmatpush2.bf16.msra.mxu0 %v14146_v15  ;;  %v14218_v15 = vld [vmem:[%s15085_s17 + $0x2124] ss:$8 sps:$4 sm:$0xff]  }
 0x47a   : > { %10354 = vmatpush2.bf16.msra.mxu1 %v14149_v17  ;;  %10314 = vmatprep.subr.bf16.mxu0 %v14154_v41  ;;  %v14213_v17 = vld [vmem:[%s15085_s17 + $0x2020] ss:$8 sps:$4 sm:$0xff]  }
 0x47b   : > { %10355 = vmatprep.subr.bf16.mxu1 %v14157_v8  ;;  %v14216_v41 = vld [vmem:[%s15085_s17 + $0x2120] ss:$8 sps:$4 sm:$0xff]   ;;  %v14221_v8 = vld [vmem:[%s15085_s17 + $0x2014] ss:$8 sps:$4 sm:$0xff]  }
 0x47d   : > { %10315 = vmatpush2.bf16.msra.mxu0 %v14152_v43  ;;  %v14224_v43 = vld [vmem:[%s15085_s17 + $0x2114] ss:$8 sps:$4 sm:$0xff]  }
 0x47e   : > { %10356 = vmatpush2.bf16.msra.mxu1 %v14155_v47  ;;  %10316 = vmatprep.subr.bf16.mxu0 %v14160_v48  ;;  %v14219_v47 = vld [vmem:[%s15085_s17 + $0x2010] ss:$8 sps:$4 sm:$0xff]  }
 0x47f   : > { %10357 = vmatprep.subr.bf16.mxu1 %v14163_v19  ;;  %v14222_v48 = vld [vmem:[%s15085_s17 + $0x2110] ss:$8 sps:$4 sm:$0xff]   ;;  %v14227_v19 = vld [vmem:[%s15085_s17 + $0x2004] ss:$8 sps:$4 sm:$0xff]  }
 0x481   : > { %10317 = vmatpush2.bf16.msra.mxu0 %v14158_v21  ;;  %v14230_v21 = vld [vmem:[%s15085_s17 + $0x2104] ss:$8 sps:$4 sm:$0xff]  }
 0x482   : > { %10358 = vmatpush2.bf16.msra.mxu1 %v14161_v49  ;;  %10318 = vmatprep.subr.bf16.mxu0 %v14166_v51  ;;  %v14225_v49 = vld [vmem:[%s15085_s17 + $0x2000] ss:$8 sps:$4 sm:$0xff]  }
 0x483   : > { %10359 = vmatprep.subr.bf16.mxu1 %v14169_v26  ;;  %v14228_v51 = vld [vmem:[%s15085_s17 + $0x2100] ss:$8 sps:$4 sm:$0xff]   ;;  %v14233_v26 = vld [vmem:[%s15085_s17 + $0x20f4] ss:$8 sps:$4 sm:$0xff]  }
 0x485   : > { %10319 = vmatpush2.bf16.msra.mxu0 %v14164_v23  ;;  %v14236_v23 = vld [vmem:[%s15085_s17 + $0x21f4] ss:$8 sps:$4 sm:$0xff]  }
 0x486   : > { %10360 = vmatpush2.bf16.msra.mxu1 %v14167_v7  ;;  %10320 = vmatprep.subr.bf16.mxu0 %v14172_v54  ;;  %v14231_v7 = vld [vmem:[%s15085_s17 + $0x20f0] ss:$8 sps:$4 sm:$0xff]  }
 0x487   : > { %10361 = vmatprep.subr.bf16.mxu1 %v14175_v55  ;;  %v14234_v54 = vld [vmem:[%s15085_s17 + $0x21f0] ss:$8 sps:$4 sm:$0xff]   ;;  %v14239_v55 = vld [vmem:[%s15085_s17 + $0x20e4] ss:$8 sps:$4 sm:$0xff]  }
 0x489   : > { %10321 = vmatpush2.bf16.msra.mxu0 %v14170_v34  ;;  %v14242_v34 = vld [vmem:[%s15085_s17 + $0x21e4] ss:$8 sps:$4 sm:$0xff]  }
 0x48a   : > { %10362 = vmatpush2.bf16.msra.mxu1 %v14173_v59  ;;  %10322 = vmatprep.subr.bf16.mxu0 %v14178_v24  ;;  %v14237_v59 = vld [vmem:[%s15085_s17 + $0x20e0] ss:$8 sps:$4 sm:$0xff]  }
 0x48b   : > { %10363 = vmatprep.subr.bf16.mxu1 %v14181_v61  ;;  %v14240_v24 = vld [vmem:[%s15085_s17 + $0x21e0] ss:$8 sps:$4 sm:$0xff]   ;;  %v14245_v61 = vld [vmem:[%s15085_s17 + $0x20d4] ss:$8 sps:$4 sm:$0xff]  }
 0x48d   : > { %10323 = vmatpush2.bf16.msra.mxu0 %v14176_v62  ;;  %v14246_v62 = vld [vmem:[%s15085_s17 + $0x21d0] ss:$8 sps:$4 sm:$0xff]  }
 0x48e   : > { %10364 = vmatpush2.bf16.msra.mxu1 %v14179_v3  ;;  %10374 = vmatprep.subr.bf16.mxu0 %v14185_v63  ;;  %v14251_v3 = vld [vmem:[%s15085_s17 + $0x20c4] ss:$8 sps:$4 sm:$0xff]  }
 0x48f   : > { %10415 = vmatprep.subr.bf16.mxu1 %v14188_v5  ;;  %v14254_v63 = vld [vmem:[%s15085_s17 + $0x21c4] ss:$8 sps:$4 sm:$0xff]   ;;  %v14249_v5 = vld [vmem:[%s15085_s17 + $0x20c0] ss:$8 sps:$4 sm:$0xff]  }
 0x490   : > { %v10080_v14 = vpop.f32.mrf.mxu0  ;;  %10325 = vmatmul.mubr.bf16.vlgmr.msra.gmra.mxu0 %v2117_v11  ;;  %v14243_v11 = vld [vmem:[%s15085_s17 + $0x20d0] ss:$8 sps:$4 sm:$0xff]  }
 0x491   : > { %v10121_v52 = vpop.f32.mrf.mxu1  ;;  %10366 = vmatmul.mubr.bf16.vlgmr.msra.gmra.mxu1 %v2133_v42  ;;  %v10081_v40 = vadd.f32 %v10080_v14, %v16330_v0  ;;  %10375 = vmatpush1.bf16.msra.mxu0 %v14183_v45  ;;  %v14257_v42 = vld [vmem:[%s15085_s17 + $0x20b4] ss:$8 sps:$4 sm:$0xff]   ;;  %v2136_v14 = vcombine.high %v16380_v27, %v16380_v27  ;;  %v14267_v27 = vld [vmem:[%s15085_s17 + $0x2090] ss:$8 sps:$4 sm:$0xff]  }
 0x492   : > { %10416 = vmatpush1.bf16.msra.mxu1 %v14186_v9  ;;  %v10082_v16 = vpop.f32.mrf.mxu0  ;;  %10376 = vmatprep.subr.bf16.mxu0 %v14191_v37  ;;  %v14260_v45 = vld [vmem:[%s15085_s17 + $0x21b4] ss:$8 sps:$4 sm:$0xff]   ;;  %v14255_v9 = vld [vmem:[%s15085_s17 + $0x20b0] ss:$8 sps:$4 sm:$0xff]  }
 0x493   : > { %v10123_v20 = vpop.f32.mrf.mxu1  ;;  %10417 = vmatprep.subr.bf16.mxu1 %v14194_v10  ;;  %v16412_v56 = vadd.f32 %v10121_v52, %v10081_v40  ;;  %v10083_v60 = vadd.f32 %v10082_v16, %v16333_v2  ;;  %10406 = vmatprep.mubr.bf16.mxu0 %v2173_v30  ;;  %v14203_v2 = vld [vmem:[%s15085_s17 + $0x2044] ss:$8 sps:$4 sm:$0xff]   ;;  %v14252_v30 = vld [vmem:[%s15085_s17 + $0x21c0] ss:$8 sps:$4 sm:$0xff]   ;;  %v14258_v37 = vld [vmem:[%s15085_s17 + $0x21b0] ss:$8 sps:$4 sm:$0xff]   ;;  %v16468_v16 = vrot.slane %v2136_v14, %v15173_v50 }
 0x494   : > { %10447 = vmatprep.mubr.bf16.mxu1 %v2183_v13  ;;  %v10084_v0 = vpop.f32.mrf.mxu0  ;;  %v14263_v10 = vld [vmem:[%s15085_s17 + $0x20a4] ss:$8 sps:$4 sm:$0xff]   ;;  %v14261_v52 = vld [vmem:[%s15085_s17 + $0x20a0] ss:$8 sps:$4 sm:$0xff]   ;;  %v14332_v14 = vld [vmem:[%s15085_s17 + $0x23f4] ss:$8 sps:$4 sm:$0xff]  }
 0x495   : > { %v10125_v58 = vpop.f32.mrf.mxu1  ;;  %v16415_v25 = vadd.f32 %v10123_v20, %v10083_v60  ;;  %10377 = vmatpush1.bf16.msra.mxu0 %v14189_v18  ;;  %v14266_v13 = vld [vmem:[%s15085_s17 + $0x21a4] ss:$8 sps:$4 sm:$0xff]   ;;  %v14264_v40 = vld [vmem:[%s15085_s17 + $0x21a0] ss:$8 sps:$4 sm:$0xff]   ;;  %v14269_v18 = vld [vmem:[%s15085_s17 + $0x2094] ss:$8 sps:$4 sm:$0xff]   ;;  %v2152_v60 = vcombine.high %v16468_v16, %v16468_v16  ;;  %v2159_v0 = vrot.slane %v16388_v33, %v15173_v50 }
 0x496   : > { %10418 = vmatpush1.bf16.msra.mxu1 %v14192_v32  ;;  %v10085_v29 = vpop.f32.mrf.mxu0  ;;  %10378 = vmatprep.subr.bf16.mxu0 %v14197_v46  ;;  %v14272_v32 = vld [vmem:[%s15085_s17 + $0x2194] ss:$8 sps:$4 sm:$0xff]   ;;  %v14270_v20 = vld [vmem:[%s15085_s17 + $0x2190] ss:$8 sps:$4 sm:$0xff]   ;;  %v14275_v46 = vld [vmem:[%s15085_s17 + $0x2084] ss:$8 sps:$4 sm:$0xff]  }
 0x497   : > { %v10126_v31 = vpop.f32.mrf.mxu1  ;;  %10419 = vmatprep.subr.bf16.mxu1 %v14200_v22  ;;  %v14278_v22 = vld [vmem:[%s15085_s17 + $0x2184] ss:$8 sps:$4 sm:$0xff]   ;;  %v14273_v58 = vld [vmem:[%s15085_s17 + $0x2080] ss:$8 sps:$4 sm:$0xff]   ;;  %v14284_v29 = vld [vmem:[%s15085_s17 + $0x2374] ss:$8 sps:$4 sm:$0xff]  }
 0x498   : > { %v2180_v31 = vrot.slane %v2152_v60, %v15173_v50  ;;  %v14287_v33 = vld [vmem:[%s15085_s17 + $0x2264] ss:$8 sps:$4 sm:$0xff]   ;;  %v14339_v60 = vld [vmem:[%s15085_s17 + $0x22d0] ss:$8 sps:$4 sm:$0xff]  }
 0x499   : > { %10379 = vmatpush1.bf16.msra.mxu0 %v14195_v53  ;;  %v14276_v53 = vld [vmem:[%s15085_s17 + $0x2180] ss:$8 sps:$4 sm:$0xff]  }
 0x49a   : > { %10420 = vmatpush1.bf16.msra.mxu1 %v14198_v28  ;;  %10380 = vmatprep.subr.bf16.mxu0 %v14203_v2  ;;  %v14281_v28 = vld [vmem:[%s15085_s17 + $0x2274] ss:$8 sps:$4 sm:$0xff]   ;;  %v2181_v2 = vcombine.high %v2159_v0, %v2159_v0 }
 0x49b   : > { %10421 = vmatprep.subr.bf16.mxu1 %v14206_v4  ;;  %v14279_v4 = vld [vmem:[%s15085_s17 + $0x2270] ss:$8 sps:$4 sm:$0xff]  }
 0x49d   : > { %10381 = vmatpush1.bf16.msra.mxu0 %v14201_v57  ;;  %v14282_v57 = vld [vmem:[%s15085_s17 + $0x2370] ss:$8 sps:$4 sm:$0xff]  }
 0x49e   : > { %10422 = vmatpush1.bf16.msra.mxu1 %v14204_v35  ;;  %10382 = vmatprep.subr.bf16.mxu0 %v14209_v36  ;;  %v14290_v35 = vld [vmem:[%s15085_s17 + $0x2364] ss:$8 sps:$4 sm:$0xff]   ;;  %v2184_v36 = vcombine.high %v2180_v31, %v2180_v31 }
 0x49f   : > { %10423 = vmatprep.subr.bf16.mxu1 %v14212_v6 }
 0x4a1   : > { %10383 = vmatpush1.bf16.msra.mxu0 %v14207_v12 }
 0x4a2   : > { %10424 = vmatpush1.bf16.msra.mxu1 %v14210_v38  ;;  %10384 = vmatprep.subr.bf16.mxu0 %v14215_v39  ;;  %v14285_v39 = vld [vmem:[%s15085_s17 + $0x2260] ss:$8 sps:$4 sm:$0xff]  }
 0x4a3   : > { %10425 = vmatprep.subr.bf16.mxu1 %v14218_v15  ;;  %v14288_v15 = vld [vmem:[%s15085_s17 + $0x2360] ss:$8 sps:$4 sm:$0xff]  }
 0x4a5   : > { %10385 = vmatpush1.bf16.msra.mxu0 %v14213_v17 }
 0x4a6   : > { %10426 = vmatpush1.bf16.msra.mxu1 %v14216_v41  ;;  %10386 = vmatprep.subr.bf16.mxu0 %v14221_v8  ;;  %v14293_v8 = vld [vmem:[%s15085_s17 + $0x2254] ss:$8 sps:$4 sm:$0xff]  }
 0x4a7   : > { %10427 = vmatprep.subr.bf16.mxu1 %v14224_v43  ;;  %v14296_v43 = vld [vmem:[%s15085_s17 + $0x2354] ss:$8 sps:$4 sm:$0xff]  }
 0x4a9   : > { %10387 = vmatpush1.bf16.msra.mxu0 %v14219_v47 }
 0x4aa   : > { %10428 = vmatpush1.bf16.msra.mxu1 %v14222_v48  ;;  %10388 = vmatprep.subr.bf16.mxu0 %v14227_v19 }
 0x4ab   : > { %10429 = vmatprep.subr.bf16.mxu1 %v14230_v21 }
 0x4ad   : > { %10389 = vmatpush1.bf16.msra.mxu0 %v14225_v49  ;;  %v14291_v49 = vld [vmem:[%s15085_s17 + $0x2250] ss:$8 sps:$4 sm:$0xff]  }
 0x4ae   : > { %10430 = vmatpush1.bf16.msra.mxu1 %v14228_v51  ;;  %10390 = vmatprep.subr.bf16.mxu0 %v14233_v26  ;;  %v14294_v51 = vld [vmem:[%s15085_s17 + $0x2350] ss:$8 sps:$4 sm:$0xff]  }
 0x4af   : > { %10431 = vmatprep.subr.bf16.mxu1 %v14236_v23 }
 0x4b1   : > { %10391 = vmatpush2.bf16.msra.mxu0 %v14231_v7  ;;  %v14302_v7 = vld [vmem:[%s15085_s17 + $0x2344] ss:$8 sps:$4 sm:$0xff]  }
 0x4b2   : > { %10432 = vmatpush2.bf16.msra.mxu1 %v14234_v54  ;;  %10392 = vmatprep.subr.bf16.mxu0 %v14239_v55  ;;  %v14297_v54 = vld [vmem:[%s15085_s17 + $0x2240] ss:$8 sps:$4 sm:$0xff]  }
 0x4b3   : > { %10433 = vmatprep.subr.bf16.mxu1 %v14242_v34  ;;  %v14300_v55 = vld [vmem:[%s15085_s17 + $0x2340] ss:$8 sps:$4 sm:$0xff]   ;;  %v14305_v34 = vld [vmem:[%s15085_s17 + $0x2234] ss:$8 sps:$4 sm:$0xff]  }
 0x4b5   : > { %10393 = vmatpush2.bf16.msra.mxu0 %v14237_v59  ;;  %v14308_v59 = vld [vmem:[%s15085_s17 + $0x2334] ss:$8 sps:$4 sm:$0xff]  }
 0x4b6   : > { %10434 = vmatpush2.bf16.msra.mxu1 %v14240_v24  ;;  %10394 = vmatprep.subr.bf16.mxu0 %v14245_v61  ;;  %v14303_v24 = vld [vmem:[%s15085_s17 + $0x2230] ss:$8 sps:$4 sm:$0xff]  }
 0x4b7   : > { %10435 = vmatprep.subr.bf16.mxu1 %v14248_v1  ;;  %v14306_v61 = vld [vmem:[%s15085_s17 + $0x2330] ss:$8 sps:$4 sm:$0xff]   ;;  %v14311_v1 = vld [vmem:[%s15085_s17 + $0x2224] ss:$8 sps:$4 sm:$0xff]  }
 0x4b9   : > { %10395 = vmatpush2.bf16.msra.mxu0 %v14243_v11  ;;  %v14314_v11 = vld [vmem:[%s15085_s17 + $0x2324] ss:$8 sps:$4 sm:$0xff]  }
 0x4ba   : > { %10436 = vmatpush2.bf16.msra.mxu1 %v14246_v62  ;;  %10396 = vmatprep.subr.bf16.mxu0 %v14251_v3  ;;  %v14309_v62 = vld [vmem:[%s15085_s17 + $0x2220] ss:$8 sps:$4 sm:$0xff]  }
 0x4bb   : > { %10437 = vmatprep.subr.bf16.mxu1 %v14254_v63  ;;  %v14312_v3 = vld [vmem:[%s15085_s17 + $0x2320] ss:$8 sps:$4 sm:$0xff]   ;;  %v14317_v63 = vld [vmem:[%s15085_s17 + $0x2214] ss:$8 sps:$4 sm:$0xff]  }
 0x4bd   : > { %10397 = vmatpush2.bf16.msra.mxu0 %v14249_v5  ;;  %v14320_v5 = vld [vmem:[%s15085_s17 + $0x2314] ss:$8 sps:$4 sm:$0xff]  }
 0x4be   : > { %10438 = vmatpush2.bf16.msra.mxu1 %v14252_v30  ;;  %10398 = vmatprep.subr.bf16.mxu0 %v14257_v42  ;;  %v14315_v30 = vld [vmem:[%s15085_s17 + $0x2210] ss:$8 sps:$4 sm:$0xff]  }
 0x4bf   : > { %10439 = vmatprep.subr.bf16.mxu1 %v14260_v45  ;;  %v14318_v42 = vld [vmem:[%s15085_s17 + $0x2310] ss:$8 sps:$4 sm:$0xff]   ;;  %v14323_v45 = vld [vmem:[%s15085_s17 + $0x2204] ss:$8 sps:$4 sm:$0xff]  }
 0x4c1   : > { %10399 = vmatpush2.bf16.msra.mxu0 %v14255_v9  ;;  %v14326_v9 = vld [vmem:[%s15085_s17 + $0x2304] ss:$8 sps:$4 sm:$0xff]  }
 0x4c2   : > { %10440 = vmatpush2.bf16.msra.mxu1 %v14258_v37  ;;  %10400 = vmatprep.subr.bf16.mxu0 %v14263_v10  ;;  %v14321_v37 = vld [vmem:[%s15085_s17 + $0x2200] ss:$8 sps:$4 sm:$0xff]  }
 0x4c3   : > { %10441 = vmatprep.subr.bf16.mxu1 %v14266_v13  ;;  %v14324_v10 = vld [vmem:[%s15085_s17 + $0x2300] ss:$8 sps:$4 sm:$0xff]   ;;  %v14329_v13 = vld [vmem:[%s15085_s17 + $0x22f4] ss:$8 sps:$4 sm:$0xff]  }
 0x4c5   : > { %10401 = vmatpush2.bf16.msra.mxu0 %v14261_v52  ;;  %v14327_v52 = vld [vmem:[%s15085_s17 + $0x22f0] ss:$8 sps:$4 sm:$0xff]  }
 0x4c6   : > { %10442 = vmatpush2.bf16.msra.mxu1 %v14264_v40  ;;  %10402 = vmatprep.subr.bf16.mxu0 %v14269_v18  ;;  %v14330_v40 = vld [vmem:[%s15085_s17 + $0x23f0] ss:$8 sps:$4 sm:$0xff]   ;;  %v14335_v18 = vld [vmem:[%s15085_s17 + $0x22e4] ss:$8 sps:$4 sm:$0xff]  }
 0x4c7   : > { %10443 = vmatprep.subr.bf16.mxu1 %v14272_v32  ;;  %v14338_v32 = vld [vmem:[%s15085_s17 + $0x23e4] ss:$8 sps:$4 sm:$0xff]  }
 0x4c9   : > { %10403 = vmatpush2.bf16.msra.mxu0 %v14267_v27  ;;  %v14333_v27 = vld [vmem:[%s15085_s17 + $0x22e0] ss:$8 sps:$4 sm:$0xff]  }
 0x4ca   : > { %10444 = vmatpush2.bf16.msra.mxu1 %v14270_v20  ;;  %10404 = vmatprep.subr.bf16.mxu0 %v14275_v46  ;;  %v14336_v20 = vld [vmem:[%s15085_s17 + $0x23e0] ss:$8 sps:$4 sm:$0xff]   ;;  %v14341_v46 = vld [vmem:[%s15085_s17 + $0x22d4] ss:$8 sps:$4 sm:$0xff]  }
 0x4cb   : > { %10445 = vmatprep.subr.bf16.mxu1 %v14278_v22  ;;  %v14344_v22 = vld [vmem:[%s15085_s17 + $0x23d4] ss:$8 sps:$4 sm:$0xff]  }
 0x4cd   : > { %10405 = vmatpush2.bf16.msra.mxu0 %v14273_v58  ;;  %v14347_v58 = vld [vmem:[%s15085_s17 + $0x22c4] ss:$8 sps:$4 sm:$0xff]  }
 0x4ce   : > { %10446 = vmatpush2.bf16.msra.mxu1 %v14276_v53  ;;  %10456 = vmatprep.subr.bf16.mxu0 %v14281_v28  ;;  %v14350_v53 = vld [vmem:[%s15085_s17 + $0x23c4] ss:$8 sps:$4 sm:$0xff]   ;;  %v14345_v28 = vld [vmem:[%s15085_s17 + $0x22c0] ss:$8 sps:$4 sm:$0xff]  }
 0x4cf   : > { %10497 = vmatprep.subr.bf16.mxu1 %v14284_v29  ;;  %v14348_v29 = vld [vmem:[%s15085_s17 + $0x23c0] ss:$8 sps:$4 sm:$0xff]  }
 0x4d0   : > { %v10162_v6 = vpop.f32.mrf.mxu0  ;;  %10407 = vmatmul.mubr.bf16.vlgmr.msra.gmra.mxu0 %v2159_v0  ;;  %v14342_v0 = vld [vmem:[%s15085_s17 + $0x23d0] ss:$8 sps:$4 sm:$0xff]  }
 0x4d1   : > { %v10203_v12 = vpop.f32.mrf.mxu1  ;;  %10448 = vmatmul.mubr.bf16.vlgmr.msra.gmra.mxu1 %v2181_v2  ;;  %v10163_v38 = vadd.f32 %v10162_v6, %v16412_v56  ;;  %10457 = vmatpush1.bf16.msra.mxu0 %v14279_v4  ;;  %v14356_v2 = vld [vmem:[%s15085_s17 + $0x23b4] ss:$8 sps:$4 sm:$0xff]   ;;  %v14351_v4 = vld [vmem:[%s15085_s17 + $0x22b0] ss:$8 sps:$4 sm:$0xff]   ;;  %v14357_v6 = vld [vmem:[%s15085_s17 + $0x22a0] ss:$8 sps:$4 sm:$0xff]  }
 0x4d2   : > { %10498 = vmatpush1.bf16.msra.mxu1 %v14282_v57  ;;  %v10164_v17 = vpop.f32.mrf.mxu0  ;;  %10458 = vmatprep.subr.bf16.mxu0 %v14287_v33  ;;  %v14354_v57 = vld [vmem:[%s15085_s17 + $0x23b0] ss:$8 sps:$4 sm:$0xff]   ;;  %v14359_v33 = vld [vmem:[%s15085_s17 + $0x22a4] ss:$8 sps:$4 sm:$0xff]  }
 0x4d3   : > { %v10205_v41 = vpop.f32.mrf.mxu1  ;;  %10499 = vmatprep.subr.bf16.mxu1 %v14290_v35  ;;  %v16492_v47 = vadd.f32 %v10203_v12, %v10163_v38  ;;  %v10165_v48 = vadd.f32 %v10164_v17, %v16415_v25  ;;  %10488 = vmatprep.mubr.bf16.mxu0 %v2180_v31  ;;  %v14299_v25 = vld [vmem:[%s15085_s17 + $0x2244] ss:$8 sps:$4 sm:$0xff]   ;;  %v14353_v31 = vld [vmem:[%s15085_s17 + $0x22b4] ss:$8 sps:$4 sm:$0xff]   ;;  %v14360_v12 = vld [vmem:[%s15085_s17 + $0x23a0] ss:$8 sps:$4 sm:$0xff]  }
 0x4d4   : > { %10529 = vmatprep.mubr.bf16.mxu1 %v2184_v36  ;;  %v10166_v56 = vpop.f32.mrf.mxu0  ;;  %v14362_v35 = vld [vmem:[%s15085_s17 + $0x23a4] ss:$8 sps:$4 sm:$0xff]   ;;  %v14365_v38 = vld [vmem:[%s15085_s17 + $0x2294] ss:$8 sps:$4 sm:$0xff]   ;;  %v14363_v17 = vld [vmem:[%s15085_s17 + $0x2290] ss:$8 sps:$4 sm:$0xff]  }
 0x4d5   : > { %v10207_v19 = vpop.f32.mrf.mxu1  ;;  %v16495_v21 = vadd.f32 %v10205_v41, %v10165_v48  ;;  %10459 = vmatpush1.bf16.msra.mxu0 %v14285_v39  ;;  %v16542_v36 = vld [vmem:[%s15170_s0 + $0x48] sm:$0xff]  ;;  %v14368_v39 = vld [vmem:[%s15085_s17 + $0x2394] ss:$8 sps:$4 sm:$0xff]   ;;  %v14366_v41 = vld [vmem:[%s15085_s17 + $0x2390] ss:$8 sps:$4 sm:$0xff]   ;;  %v2166_v56 = vrot.slane %v16468_v16, %v15173_v50 }
 0x4d6   : > { %10500 = vmatpush1.bf16.msra.mxu1 %v14288_v15  ;;  %v10167_v26 = vpop.f32.mrf.mxu0  ;;  %10460 = vmatprep.subr.bf16.mxu0 %v14293_v8  ;;  %v16550_v15 = vrot.slane %v16542_v36, %v15173_v50  ;;  %v14371_v8 = vld [vmem:[%s15085_s17 + $0x2284] ss:$8 sps:$4 sm:$0xff]   ;;  %v14369_v19 = vld [vmem:[%s15085_s17 + $0x2280] ss:$8 sps:$4 sm:$0xff]  }
 0x4d7   : > { %v10208_v23 = vpop.f32.mrf.mxu1  ;;  %10501 = vmatprep.subr.bf16.mxu1 %v14296_v43  ;;  %v14374_v43 = vld [vmem:[%s15085_s17 + $0x2384] ss:$8 sps:$4 sm:$0xff]   ;;  %v14381_v26 = vld [vmem:[%s15085_s17 + $0x2574] ss:$8 sps:$4 sm:$0xff]  }
 0x4d8   : > { %v2200_v48 = vcombine.high %v16550_v15, %v16550_v15  ;;  %v14384_v16 = vld [vmem:[%s15085_s17 + $0x2464] ss:$8 sps:$4 sm:$0xff]  }
 0x4d9   : > { %10461 = vmatpush1.bf16.msra.mxu0 %v14291_v49  ;;  %v14372_v49 = vld [vmem:[%s15085_s17 + $0x2380] ss:$8 sps:$4 sm:$0xff]  }
 0x4da   : > { %10502 = vmatpush1.bf16.msra.mxu1 %v14294_v51  ;;  %10462 = vmatprep.subr.bf16.mxu0 %v14299_v25  ;;  %v14378_v51 = vld [vmem:[%s15085_s17 + $0x2474] ss:$8 sps:$4 sm:$0xff]   ;;  %v2222_v23 = vrot.slane %v2200_v48, %v15173_v50  ;;  %v2182_v25 = vcombine.high %v2166_v56, %v2166_v56 }
 0x4db   : > { %10503 = vmatprep.subr.bf16.mxu1 %v14302_v7  ;;  %v14376_v7 = vld [vmem:[%s15085_s17 + $0x2470] ss:$8 sps:$4 sm:$0xff]   ;;  %v14441_v48 = vld [vmem:[%s15085_s17 + $0x25d4] ss:$8 sps:$4 sm:$0xff]  }
 0x4dd   : > { %10463 = vmatpush1.bf16.msra.mxu0 %v14297_v54  ;;  %v14379_v54 = vld [vmem:[%s15085_s17 + $0x2570] ss:$8 sps:$4 sm:$0xff]  }
 0x4de   : > { %10504 = vmatpush1.bf16.msra.mxu1 %v14300_v55  ;;  %10464 = vmatprep.subr.bf16.mxu0 %v14305_v34  ;;  %v14387_v55 = vld [vmem:[%s15085_s17 + $0x2564] ss:$8 sps:$4 sm:$0xff]   ;;  %v2232_v34 = vcombine.high %v2222_v23, %v2222_v23 }
 0x4df   : > { %10505 = vmatprep.subr.bf16.mxu1 %v14308_v59 }
 0x4e1   : > { %10465 = vmatpush1.bf16.msra.mxu0 %v14303_v24 }
 0x4e2   : > { %10506 = vmatpush1.bf16.msra.mxu1 %v14306_v61  ;;  %10466 = vmatprep.subr.bf16.mxu0 %v14311_v1  ;;  %v14382_v1 = vld [vmem:[%s15085_s17 + $0x2460] ss:$8 sps:$4 sm:$0xff]  }
 0x4e3   : > { %10507 = vmatprep.subr.bf16.mxu1 %v14314_v11  ;;  %v14385_v11 = vld [vmem:[%s15085_s17 + $0x2560] ss:$8 sps:$4 sm:$0xff]  }
 0x4e5   : > { %10467 = vmatpush1.bf16.msra.mxu0 %v14309_v62 }
 0x4e6   : > { %10508 = vmatpush1.bf16.msra.mxu1 %v14312_v3  ;;  %10468 = vmatprep.subr.bf16.mxu0 %v14317_v63  ;;  %v14390_v63 = vld [vmem:[%s15085_s17 + $0x2454] ss:$8 sps:$4 sm:$0xff]  }
 0x4e7   : > { %10509 = vmatprep.subr.bf16.mxu1 %v14320_v5  ;;  %v14393_v5 = vld [vmem:[%s15085_s17 + $0x2554] ss:$8 sps:$4 sm:$0xff]  }
 0x4e9   : > { %10469 = vmatpush1.bf16.msra.mxu0 %v14315_v30 }
 0x4ea   : > { %10510 = vmatpush1.bf16.msra.mxu1 %v14318_v42  ;;  %10470 = vmatprep.subr.bf16.mxu0 %v14323_v45 }
 0x4eb   : > { %10511 = vmatprep.subr.bf16.mxu1 %v14326_v9 }
 0x4ed   : > { %10471 = vmatpush1.bf16.msra.mxu0 %v14321_v37  ;;  %v14388_v37 = vld [vmem:[%s15085_s17 + $0x2450] ss:$8 sps:$4 sm:$0xff]  }
 0x4ee   : > { %10512 = vmatpush1.bf16.msra.mxu1 %v14324_v10  ;;  %10472 = vmatprep.subr.bf16.mxu0 %v14329_v13  ;;  %v14391_v10 = vld [vmem:[%s15085_s17 + $0x2550] ss:$8 sps:$4 sm:$0xff]  }
 0x4ef   : > { %10513 = vmatprep.subr.bf16.mxu1 %v14332_v14 }
 0x4f1   : > { %10473 = vmatpush2.bf16.msra.mxu0 %v14327_v52  ;;  %v14399_v52 = vld [vmem:[%s15085_s17 + $0x2544] ss:$8 sps:$4 sm:$0xff]  }
 0x4f2   : > { %10514 = vmatpush2.bf16.msra.mxu1 %v14330_v40  ;;  %10474 = vmatprep.subr.bf16.mxu0 %v14335_v18  ;;  %v14394_v40 = vld [vmem:[%s15085_s17 + $0x2440] ss:$8 sps:$4 sm:$0xff]  }
 0x4f3   : > { %10515 = vmatprep.subr.bf16.mxu1 %v14338_v32  ;;  %v14397_v18 = vld [vmem:[%s15085_s17 + $0x2540] ss:$8 sps:$4 sm:$0xff]   ;;  %v14402_v32 = vld [vmem:[%s15085_s17 + $0x2434] ss:$8 sps:$4 sm:$0xff]  }
 0x4f5   : > { %10475 = vmatpush2.bf16.msra.mxu0 %v14333_v27  ;;  %v14405_v27 = vld [vmem:[%s15085_s17 + $0x2534] ss:$8 sps:$4 sm:$0xff]  }
 0x4f6   : > { %10516 = vmatpush2.bf16.msra.mxu1 %v14336_v20  ;;  %10476 = vmatprep.subr.bf16.mxu0 %v14341_v46  ;;  %v14400_v20 = vld [vmem:[%s15085_s17 + $0x2430] ss:$8 sps:$4 sm:$0xff]  }
 0x4f7   : > { %10517 = vmatprep.subr.bf16.mxu1 %v14344_v22  ;;  %v14403_v46 = vld [vmem:[%s15085_s17 + $0x2530] ss:$8 sps:$4 sm:$0xff]   ;;  %v14408_v22 = vld [vmem:[%s15085_s17 + $0x2424] ss:$8 sps:$4 sm:$0xff]  }
 0x4f9   : > { %10477 = vmatpush2.bf16.msra.mxu0 %v14339_v60  ;;  %v14411_v60 = vld [vmem:[%s15085_s17 + $0x2524] ss:$8 sps:$4 sm:$0xff]  }
 0x4fa   : > { %10518 = vmatpush2.bf16.msra.mxu1 %v14342_v0  ;;  %10478 = vmatprep.subr.bf16.mxu0 %v14347_v58  ;;  %v14406_v0 = vld [vmem:[%s15085_s17 + $0x2420] ss:$8 sps:$4 sm:$0xff]  }
 0x4fb   : > { %10519 = vmatprep.subr.bf16.mxu1 %v14350_v53  ;;  %v14409_v58 = vld [vmem:[%s15085_s17 + $0x2520] ss:$8 sps:$4 sm:$0xff]   ;;  %v14414_v53 = vld [vmem:[%s15085_s17 + $0x2414] ss:$8 sps:$4 sm:$0xff]  }
 0x4fd   : > { %10479 = vmatpush2.bf16.msra.mxu0 %v14345_v28  ;;  %v14417_v28 = vld [vmem:[%s15085_s17 + $0x2514] ss:$8 sps:$4 sm:$0xff]  }
 0x4fe   : > { %10520 = vmatpush2.bf16.msra.mxu1 %v14348_v29  ;;  %10480 = vmatprep.subr.bf16.mxu0 %v14353_v31  ;;  %v14412_v29 = vld [vmem:[%s15085_s17 + $0x2410] ss:$8 sps:$4 sm:$0xff]  }
 0x4ff   : > { %10521 = vmatprep.subr.bf16.mxu1 %v14356_v2  ;;  %v14415_v31 = vld [vmem:[%s15085_s17 + $0x2510] ss:$8 sps:$4 sm:$0xff]   ;;  %v14420_v2 = vld [vmem:[%s15085_s17 + $0x2404] ss:$8 sps:$4 sm:$0xff]  }
 0x501   : > { %10481 = vmatpush2.bf16.msra.mxu0 %v14351_v4  ;;  %v14423_v4 = vld [vmem:[%s15085_s17 + $0x2504] ss:$8 sps:$4 sm:$0xff]  }
 0x502   : > { %10522 = vmatpush2.bf16.msra.mxu1 %v14354_v57  ;;  %10482 = vmatprep.subr.bf16.mxu0 %v14359_v33  ;;  %v14418_v57 = vld [vmem:[%s15085_s17 + $0x2400] ss:$8 sps:$4 sm:$0xff]  }
 0x503   : > { %10523 = vmatprep.subr.bf16.mxu1 %v14362_v35  ;;  %v14421_v33 = vld [vmem:[%s15085_s17 + $0x2500] ss:$8 sps:$4 sm:$0xff]   ;;  %v14426_v35 = vld [vmem:[%s15085_s17 + $0x24f4] ss:$8 sps:$4 sm:$0xff]  }
 0x505   : > { %10483 = vmatpush2.bf16.msra.mxu0 %v14357_v6  ;;  %v14429_v6 = vld [vmem:[%s15085_s17 + $0x25f4] ss:$8 sps:$4 sm:$0xff]  }
 0x506   : > { %10524 = vmatpush2.bf16.msra.mxu1 %v14360_v12  ;;  %10484 = vmatprep.subr.bf16.mxu0 %v14365_v38  ;;  %v14424_v12 = vld [vmem:[%s15085_s17 + $0x24f0] ss:$8 sps:$4 sm:$0xff]  }
 0x507   : > { %10525 = vmatprep.subr.bf16.mxu1 %v14368_v39  ;;  %v14427_v38 = vld [vmem:[%s15085_s17 + $0x25f0] ss:$8 sps:$4 sm:$0xff]   ;;  %v14432_v39 = vld [vmem:[%s15085_s17 + $0x24e4] ss:$8 sps:$4 sm:$0xff]  }
 0x509   : > { %10485 = vmatpush2.bf16.msra.mxu0 %v14363_v17  ;;  %v14435_v17 = vld [vmem:[%s15085_s17 + $0x25e4] ss:$8 sps:$4 sm:$0xff]  }
 0x50a   : > { %10526 = vmatpush2.bf16.msra.mxu1 %v14366_v41  ;;  %10486 = vmatprep.subr.bf16.mxu0 %v14371_v8  ;;  %v14430_v41 = vld [vmem:[%s15085_s17 + $0x24e0] ss:$8 sps:$4 sm:$0xff]  }
 0x50b   : > { %10527 = vmatprep.subr.bf16.mxu1 %v14374_v43  ;;  %v14433_v8 = vld [vmem:[%s15085_s17 + $0x25e0] ss:$8 sps:$4 sm:$0xff]   ;;  %v14438_v43 = vld [vmem:[%s15085_s17 + $0x24d4] ss:$8 sps:$4 sm:$0xff]  }
 0x50d   : > { %10487 = vmatpush2.bf16.msra.mxu0 %v14369_v19  ;;  %v14439_v19 = vld [vmem:[%s15085_s17 + $0x25d0] ss:$8 sps:$4 sm:$0xff]  }
 0x50e   : > { %10528 = vmatpush2.bf16.msra.mxu1 %v14372_v49  ;;  %10538 = vmatprep.subr.bf16.mxu0 %v14378_v51  ;;  %v14444_v49 = vld [vmem:[%s15085_s17 + $0x24c4] ss:$8 sps:$4 sm:$0xff]  }
 0x50f   : > { %10579 = vmatprep.subr.bf16.mxu1 %v14381_v26  ;;  %v14447_v51 = vld [vmem:[%s15085_s17 + $0x25c4] ss:$8 sps:$4 sm:$0xff]   ;;  %v14442_v26 = vld [vmem:[%s15085_s17 + $0x24c0] ss:$8 sps:$4 sm:$0xff]  }
 0x510   : > { %v10244_v59 = vpop.f32.mrf.mxu0  ;;  %10489 = vmatmul.mubr.bf16.vlgmr.msra.gmra.mxu0 %v2166_v56  ;;  %v14436_v56 = vld [vmem:[%s15085_s17 + $0x24d0] ss:$8 sps:$4 sm:$0xff]  }
 0x511   : > { %v10285_v24 = vpop.f32.mrf.mxu1  ;;  %10530 = vmatmul.mubr.bf16.vlgmr.msra.gmra.mxu1 %v2182_v25  ;;  %v10245_v61 = vadd.f32 %v10244_v59, %v16492_v47  ;;  %10539 = vmatpush1.bf16.msra.mxu0 %v14376_v7  ;;  %v14450_v25 = vld [vmem:[%s15085_s17 + $0x24b4] ss:$8 sps:$4 sm:$0xff]   ;;  %v2185_v59 = vcombine.high %v16542_v36, %v16542_v36  ;;  %v14460_v36 = vld [vmem:[%s15085_s17 + $0x2490] ss:$8 sps:$4 sm:$0xff]  }
 0x512   : > { %10580 = vmatpush1.bf16.msra.mxu1 %v14379_v54  ;;  %v10246_v62 = vpop.f32.mrf.mxu0  ;;  %10540 = vmatprep.subr.bf16.mxu0 %v14384_v16  ;;  %v14453_v7 = vld [vmem:[%s15085_s17 + $0x25b4] ss:$8 sps:$4 sm:$0xff]   ;;  %v14448_v54 = vld [vmem:[%s15085_s17 + $0x24b0] ss:$8 sps:$4 sm:$0xff]  }
 0x513   : > { %v10287_v3 = vpop.f32.mrf.mxu1  ;;  %10581 = vmatprep.subr.bf16.mxu1 %v14387_v55  ;;  %v16574_v30 = vadd.f32 %v10285_v24, %v10245_v61  ;;  %v10247_v42 = vadd.f32 %v10246_v62, %v16495_v21  ;;  %10570 = vmatprep.mubr.bf16.mxu0 %v2222_v23  ;;  %v14396_v21 = vld [vmem:[%s15085_s17 + $0x2444] ss:$8 sps:$4 sm:$0xff]   ;;  %v14445_v23 = vld [vmem:[%s15085_s17 + $0x25c0] ss:$8 sps:$4 sm:$0xff]   ;;  %v14451_v16 = vld [vmem:[%s15085_s17 + $0x25b0] ss:$8 sps:$4 sm:$0xff]   ;;  %v16630_v62 = vrot.slane %v2185_v59, %v15173_v50 }
 0x514   : > { %10611 = vmatprep.mubr.bf16.mxu1 %v2232_v34  ;;  %v10248_v47 = vpop.f32.mrf.mxu0  ;;  %v14456_v55 = vld [vmem:[%s15085_s17 + $0x24a4] ss:$8 sps:$4 sm:$0xff]   ;;  %v14454_v24 = vld [vmem:[%s15085_s17 + $0x24a0] ss:$8 sps:$4 sm:$0xff]   ;;  %v14525_v59 = vld [vmem:[%s15085_s17 + $0x27f4] ss:$8 sps:$4 sm:$0xff]  }
 0x515   : > { %v10289_v45 = vpop.f32.mrf.mxu1  ;;  %v16577_v9 = vadd.f32 %v10287_v3, %v10247_v42  ;;  %10541 = vmatpush1.bf16.msra.mxu0 %v14382_v1  ;;  %v14459_v34 = vld [vmem:[%s15085_s17 + $0x25a4] ss:$8 sps:$4 sm:$0xff]   ;;  %v14457_v61 = vld [vmem:[%s15085_s17 + $0x25a0] ss:$8 sps:$4 sm:$0xff]   ;;  %v14462_v1 = vld [vmem:[%s15085_s17 + $0x2494] ss:$8 sps:$4 sm:$0xff]   ;;  %v2201_v42 = vcombine.high %v16630_v62, %v16630_v62  ;;  %v2208_v47 = vrot.slane %v16550_v15, %v15173_v50 }
 0x516   : > { %10582 = vmatpush1.bf16.msra.mxu1 %v14385_v11  ;;  %v10249_v13 = vpop.f32.mrf.mxu0  ;;  %10542 = vmatprep.subr.bf16.mxu0 %v14390_v63  ;;  %v14465_v11 = vld [vmem:[%s15085_s17 + $0x2594] ss:$8 sps:$4 sm:$0xff]   ;;  %v14463_v3 = vld [vmem:[%s15085_s17 + $0x2590] ss:$8 sps:$4 sm:$0xff]   ;;  %v14468_v63 = vld [vmem:[%s15085_s17 + $0x2484] ss:$8 sps:$4 sm:$0xff]  }
 0x517   : > { %v10290_v14 = vpop.f32.mrf.mxu1  ;;  %10583 = vmatprep.subr.bf16.mxu1 %v14393_v5  ;;  %v14471_v5 = vld [vmem:[%s15085_s17 + $0x2584] ss:$8 sps:$4 sm:$0xff]   ;;  %v14466_v45 = vld [vmem:[%s15085_s17 + $0x2480] ss:$8 sps:$4 sm:$0xff]   ;;  %v14477_v13 = vld [vmem:[%s15085_s17 + $0x2774] ss:$8 sps:$4 sm:$0xff]  }
 0x518   : > { %v2229_v14 = vrot.slane %v2201_v42, %v15173_v50  ;;  %v14480_v15 = vld [vmem:[%s15085_s17 + $0x2664] ss:$8 sps:$4 sm:$0xff]   ;;  %v14532_v42 = vld [vmem:[%s15085_s17 + $0x26d0] ss:$8 sps:$4 sm:$0xff]  }
 0x519   : > { %10543 = vmatpush1.bf16.msra.mxu0 %v14388_v37  ;;  %v14469_v37 = vld [vmem:[%s15085_s17 + $0x2580] ss:$8 sps:$4 sm:$0xff]  }
 0x51a   : > { %10584 = vmatpush1.bf16.msra.mxu1 %v14391_v10  ;;  %10544 = vmatprep.subr.bf16.mxu0 %v14396_v21  ;;  %v14474_v10 = vld [vmem:[%s15085_s17 + $0x2674] ss:$8 sps:$4 sm:$0xff]   ;;  %v2230_v21 = vcombine.high %v2208_v47, %v2208_v47 }
 0x51b   : > { %10585 = vmatprep.subr.bf16.mxu1 %v14399_v52  ;;  %v14472_v52 = vld [vmem:[%s15085_s17 + $0x2670] ss:$8 sps:$4 sm:$0xff]  }
 0x51d   : > { %10545 = vmatpush1.bf16.msra.mxu0 %v14394_v40  ;;  %v14475_v40 = vld [vmem:[%s15085_s17 + $0x2770] ss:$8 sps:$4 sm:$0xff]  }
 0x51e   : > { %10586 = vmatpush1.bf16.msra.mxu1 %v14397_v18  ;;  %10546 = vmatprep.subr.bf16.mxu0 %v14402_v32  ;;  %v14483_v18 = vld [vmem:[%s15085_s17 + $0x2764] ss:$8 sps:$4 sm:$0xff]   ;;  %v2233_v32 = vcombine.high %v2229_v14, %v2229_v14 }
 0x51f   : > { %10587 = vmatprep.subr.bf16.mxu1 %v14405_v27 }
 0x521   : > { %10547 = vmatpush1.bf16.msra.mxu0 %v14400_v20 }
 0x522   : > { %10588 = vmatpush1.bf16.msra.mxu1 %v14403_v46  ;;  %10548 = vmatprep.subr.bf16.mxu0 %v14408_v22  ;;  %v14478_v22 = vld [vmem:[%s15085_s17 + $0x2660] ss:$8 sps:$4 sm:$0xff]  }
 0x523   : > { %10589 = vmatprep.subr.bf16.mxu1 %v14411_v60  ;;  %v14481_v60 = vld [vmem:[%s15085_s17 + $0x2760] ss:$8 sps:$4 sm:$0xff]  }
 0x525   : > { %10549 = vmatpush1.bf16.msra.mxu0 %v14406_v0 }
 0x526   : > { %10590 = vmatpush1.bf16.msra.mxu1 %v14409_v58  ;;  %10550 = vmatprep.subr.bf16.mxu0 %v14414_v53  ;;  %v14486_v53 = vld [vmem:[%s15085_s17 + $0x2654] ss:$8 sps:$4 sm:$0xff]  }
 0x527   : > { %10591 = vmatprep.subr.bf16.mxu1 %v14417_v28  ;;  %v14489_v28 = vld [vmem:[%s15085_s17 + $0x2754] ss:$8 sps:$4 sm:$0xff]  }
 0x529   : > { %10551 = vmatpush1.bf16.msra.mxu0 %v14412_v29 }
 0x52a   : > { %10592 = vmatpush1.bf16.msra.mxu1 %v14415_v31  ;;  %10552 = vmatprep.subr.bf16.mxu0 %v14420_v2 }
 0x52b   : > { %10593 = vmatprep.subr.bf16.mxu1 %v14423_v4 }
 0x52d   : > { %10553 = vmatpush1.bf16.msra.mxu0 %v14418_v57  ;;  %v14484_v57 = vld [vmem:[%s15085_s17 + $0x2650] ss:$8 sps:$4 sm:$0xff]  }
 0x52e   : > { %10594 = vmatpush1.bf16.msra.mxu1 %v14421_v33  ;;  %10554 = vmatprep.subr.bf16.mxu0 %v14426_v35  ;;  %v14487_v33 = vld [vmem:[%s15085_s17 + $0x2750] ss:$8 sps:$4 sm:$0xff]  }
 0x52f   : > { %10595 = vmatprep.subr.bf16.mxu1 %v14429_v6 }
 0x531   : > { %10555 = vmatpush2.bf16.msra.mxu0 %v14424_v12  ;;  %v14495_v12 = vld [vmem:[%s15085_s17 + $0x2744] ss:$8 sps:$4 sm:$0xff]  }
 0x532   : > { %10596 = vmatpush2.bf16.msra.mxu1 %v14427_v38  ;;  %10556 = vmatprep.subr.bf16.mxu0 %v14432_v39  ;;  %v14490_v38 = vld [vmem:[%s15085_s17 + $0x2640] ss:$8 sps:$4 sm:$0xff]  }
 0x533   : > { %10597 = vmatprep.subr.bf16.mxu1 %v14435_v17  ;;  %v14493_v39 = vld [vmem:[%s15085_s17 + $0x2740] ss:$8 sps:$4 sm:$0xff]   ;;  %v14498_v17 = vld [vmem:[%s15085_s17 + $0x2634] ss:$8 sps:$4 sm:$0xff]  }
 0x535   : > { %10557 = vmatpush2.bf16.msra.mxu0 %v14430_v41  ;;  %v14501_v41 = vld [vmem:[%s15085_s17 + $0x2734] ss:$8 sps:$4 sm:$0xff]  }
 0x536   : > { %10598 = vmatpush2.bf16.msra.mxu1 %v14433_v8  ;;  %10558 = vmatprep.subr.bf16.mxu0 %v14438_v43  ;;  %v14496_v8 = vld [vmem:[%s15085_s17 + $0x2630] ss:$8 sps:$4 sm:$0xff]  }
 0x537   : > { %10599 = vmatprep.subr.bf16.mxu1 %v14441_v48  ;;  %v14499_v43 = vld [vmem:[%s15085_s17 + $0x2730] ss:$8 sps:$4 sm:$0xff]   ;;  %v14504_v48 = vld [vmem:[%s15085_s17 + $0x2624] ss:$8 sps:$4 sm:$0xff]  }
 0x539   : > { %10559 = vmatpush2.bf16.msra.mxu0 %v14436_v56  ;;  %v14507_v56 = vld [vmem:[%s15085_s17 + $0x2724] ss:$8 sps:$4 sm:$0xff]  }
 0x53a   : > { %10600 = vmatpush2.bf16.msra.mxu1 %v14439_v19  ;;  %10560 = vmatprep.subr.bf16.mxu0 %v14444_v49  ;;  %v14502_v19 = vld [vmem:[%s15085_s17 + $0x2620] ss:$8 sps:$4 sm:$0xff]  }
 0x53b   : > { %10601 = vmatprep.subr.bf16.mxu1 %v14447_v51  ;;  %v14505_v49 = vld [vmem:[%s15085_s17 + $0x2720] ss:$8 sps:$4 sm:$0xff]   ;;  %v14510_v51 = vld [vmem:[%s15085_s17 + $0x2614] ss:$8 sps:$4 sm:$0xff]  }
 0x53d   : > { %10561 = vmatpush2.bf16.msra.mxu0 %v14442_v26  ;;  %v14513_v26 = vld [vmem:[%s15085_s17 + $0x2714] ss:$8 sps:$4 sm:$0xff]  }
 0x53e   : > { %10602 = vmatpush2.bf16.msra.mxu1 %v14445_v23  ;;  %10562 = vmatprep.subr.bf16.mxu0 %v14450_v25  ;;  %v14508_v23 = vld [vmem:[%s15085_s17 + $0x2610] ss:$8 sps:$4 sm:$0xff]  }
 0x53f   : > { %10603 = vmatprep.subr.bf16.mxu1 %v14453_v7  ;;  %v14511_v25 = vld [vmem:[%s15085_s17 + $0x2710] ss:$8 sps:$4 sm:$0xff]   ;;  %v14516_v7 = vld [vmem:[%s15085_s17 + $0x2604] ss:$8 sps:$4 sm:$0xff]  }
 0x541   : > { %10563 = vmatpush2.bf16.msra.mxu0 %v14448_v54  ;;  %v14519_v54 = vld [vmem:[%s15085_s17 + $0x2704] ss:$8 sps:$4 sm:$0xff]  }
 0x542   : > { %10604 = vmatpush2.bf16.msra.mxu1 %v14451_v16  ;;  %10564 = vmatprep.subr.bf16.mxu0 %v14456_v55  ;;  %v14514_v16 = vld [vmem:[%s15085_s17 + $0x2600] ss:$8 sps:$4 sm:$0xff]  }
 0x543   : > { %10605 = vmatprep.subr.bf16.mxu1 %v14459_v34  ;;  %v14517_v55 = vld [vmem:[%s15085_s17 + $0x2700] ss:$8 sps:$4 sm:$0xff]   ;;  %v14522_v34 = vld [vmem:[%s15085_s17 + $0x26f4] ss:$8 sps:$4 sm:$0xff]  }
 0x545   : > { %10565 = vmatpush2.bf16.msra.mxu0 %v14454_v24  ;;  %v14520_v24 = vld [vmem:[%s15085_s17 + $0x26f0] ss:$8 sps:$4 sm:$0xff]  }
 0x546   : > { %10606 = vmatpush2.bf16.msra.mxu1 %v14457_v61  ;;  %10566 = vmatprep.subr.bf16.mxu0 %v14462_v1  ;;  %v14523_v61 = vld [vmem:[%s15085_s17 + $0x27f0] ss:$8 sps:$4 sm:$0xff]   ;;  %v14528_v1 = vld [vmem:[%s15085_s17 + $0x26e4] ss:$8 sps:$4 sm:$0xff]  }
 0x547   : > { %10607 = vmatprep.subr.bf16.mxu1 %v14465_v11  ;;  %v14531_v11 = vld [vmem:[%s15085_s17 + $0x27e4] ss:$8 sps:$4 sm:$0xff]  }
 0x549   : > { %10567 = vmatpush2.bf16.msra.mxu0 %v14460_v36  ;;  %v14526_v36 = vld [vmem:[%s15085_s17 + $0x26e0] ss:$8 sps:$4 sm:$0xff]  }
 0x54a   : > { %10608 = vmatpush2.bf16.msra.mxu1 %v14463_v3  ;;  %10568 = vmatprep.subr.bf16.mxu0 %v14468_v63  ;;  %v14529_v3 = vld [vmem:[%s15085_s17 + $0x27e0] ss:$8 sps:$4 sm:$0xff]   ;;  %v14534_v63 = vld [vmem:[%s15085_s17 + $0x26d4] ss:$8 sps:$4 sm:$0xff]  }
 0x54b   : > { %10609 = vmatprep.subr.bf16.mxu1 %v14471_v5  ;;  %v14537_v5 = vld [vmem:[%s15085_s17 + $0x27d4] ss:$8 sps:$4 sm:$0xff]  }
 0x54d   : > { %10569 = vmatpush2.bf16.msra.mxu0 %v14466_v45  ;;  %v14540_v45 = vld [vmem:[%s15085_s17 + $0x26c4] ss:$8 sps:$4 sm:$0xff]  }
 0x54e   : > { %10610 = vmatpush2.bf16.msra.mxu1 %v14469_v37  ;;  %10620 = vmatprep.subr.bf16.mxu0 %v14474_v10  ;;  %v14543_v37 = vld [vmem:[%s15085_s17 + $0x27c4] ss:$8 sps:$4 sm:$0xff]   ;;  %v14538_v10 = vld [vmem:[%s15085_s17 + $0x26c0] ss:$8 sps:$4 sm:$0xff]  }
 0x54f   : > { %10661 = vmatprep.subr.bf16.mxu1 %v14477_v13  ;;  %v14541_v13 = vld [vmem:[%s15085_s17 + $0x27c0] ss:$8 sps:$4 sm:$0xff]  }
 0x550   : > { %v10326_v27 = vpop.f32.mrf.mxu0  ;;  %10571 = vmatmul.mubr.bf16.vlgmr.msra.gmra.mxu0 %v2208_v47  ;;  %v14535_v47 = vld [vmem:[%s15085_s17 + $0x27d0] ss:$8 sps:$4 sm:$0xff]  }
 0x551   : > { %v10367_v20 = vpop.f32.mrf.mxu1  ;;  %10612 = vmatmul.mubr.bf16.vlgmr.msra.gmra.mxu1 %v2230_v21  ;;  %v10327_v46 = vadd.f32 %v10326_v27, %v16574_v30  ;;  %10621 = vmatpush1.bf16.msra.mxu0 %v14472_v52  ;;  %v14549_v21 = vld [vmem:[%s15085_s17 + $0x27b4] ss:$8 sps:$4 sm:$0xff]   ;;  %v14544_v52 = vld [vmem:[%s15085_s17 + $0x26b0] ss:$8 sps:$4 sm:$0xff]   ;;  %v14553_v27 = vld [vmem:[%s15085_s17 + $0x27a0] ss:$8 sps:$4 sm:$0xff]  }
 0x552   : > { %10662 = vmatpush1.bf16.msra.mxu1 %v14475_v40  ;;  %v10328_v0 = vpop.f32.mrf.mxu0  ;;  %10622 = vmatprep.subr.bf16.mxu0 %v14480_v15  ;;  %v14547_v40 = vld [vmem:[%s15085_s17 + $0x27b0] ss:$8 sps:$4 sm:$0xff]   ;;  %v14552_v15 = vld [vmem:[%s15085_s17 + $0x26a4] ss:$8 sps:$4 sm:$0xff]  }
 0x553   : > { %v10369_v58 = vpop.f32.mrf.mxu1  ;;  %10663 = vmatprep.subr.bf16.mxu1 %v14483_v18  ;;  %v16654_v29 = vadd.f32 %v10367_v20, %v10327_v46  ;;  %v10329_v31 = vadd.f32 %v10328_v0, %v16577_v9  ;;  %10652 = vmatprep.mubr.bf16.mxu0 %v2229_v14  ;;  %v14492_v9 = vld [vmem:[%s15085_s17 + $0x2644] ss:$8 sps:$4 sm:$0xff]   ;;  %v14546_v14 = vld [vmem:[%s15085_s17 + $0x26b4] ss:$8 sps:$4 sm:$0xff]   ;;  %v14559_v0 = vld [vmem:[%s15085_s17 + $0x2790] ss:$8 sps:$4 sm:$0xff]  }
 0x554   : > { %10693 = vmatprep.mubr.bf16.mxu1 %v2233_v32  ;;  %v10330_v30 = vpop.f32.mrf.mxu0  ;;  %v14555_v18 = vld [vmem:[%s15085_s17 + $0x27a4] ss:$8 sps:$4 sm:$0xff]   ;;  %v14550_v32 = vld [vmem:[%s15085_s17 + $0x26a0] ss:$8 sps:$4 sm:$0xff]   ;;  %v14558_v20 = vld [vmem:[%s15085_s17 + $0x2694] ss:$8 sps:$4 sm:$0xff]  }
 0x555   : > { %v10371_v2 = vpop.f32.mrf.mxu1  ;;  %v16657_v4 = vadd.f32 %v10369_v58, %v10329_v31  ;;  %10623 = vmatpush1.bf16.msra.mxu0 %v14478_v22  ;;  %v14561_v46 = vld [vmem:[%s15085_s17 + $0x2794] ss:$8 sps:$4 sm:$0xff]   ;;  %v16708_v22 = vld.sshfl [vmem:[%s15170_s0 + $0x50] sm:$0x33 pattern:$0x75316420]  ;;  %v2215_v31 = vrot.slane %v16630_v62, %v15173_v50 }
 0x556   : > { %10664 = vmatpush1.bf16.msra.mxu1 %v14481_v60  ;;  %v10331_v35 = vpop.f32.mrf.mxu0  ;;  %10624 = vmatprep.subr.bf16.mxu0 %v14486_v53  ;;  %v14556_v60 = vld [vmem:[%s15085_s17 + $0x2690] ss:$8 sps:$4 sm:$0xff]   ;;  %v14564_v58 = vld [vmem:[%s15085_s17 + $0x2684] ss:$8 sps:$4 sm:$0xff]   ;;  %v14562_v30 = vld [vmem:[%s15085_s17 + $0x2680] ss:$8 sps:$4 sm:$0xff]  }
 0x557   : > { %v10372_v6 = vpop.f32.mrf.mxu1  ;;  %10665 = vmatprep.subr.bf16.mxu1 %v14489_v28  ;;  %v14567_v53 = vld [vmem:[%s15085_s17 + $0x2784] ss:$8 sps:$4 sm:$0xff]   ;;  %v2241_v28 = vcombine.high %v16708_v22, %v16708_v22  ;;  %v14565_v2 = vld [vmem:[%s15085_s17 + $0x2780] ss:$8 sps:$4 sm:$0xff]  }
 0x558   : > { %v2231_v6 = vcombine.high %v2215_v31, %v2215_v31  ;;  %v14577_v62 = vld [vmem:[%s15085_s17 + $0x2864] ss:$8 sps:$4 sm:$0xff]  }
 0x559   : > { %10625 = vmatpush1.bf16.msra.mxu0 %v14484_v57  ;;  %v14571_v57 = vld [vmem:[%s15085_s17 + $0x2874] ss:$8 sps:$4 sm:$0xff]   ;;  %v2255_v35 = vrot.slane %v2241_v28, %v15173_v50  ;;  %v14629_v28 = vld [vmem:[%s15085_s17 + $0x28d0] ss:$8 sps:$4 sm:$0xff]  }
 0x55a   : > { %10666 = vmatpush1.bf16.msra.mxu1 %v14487_v33  ;;  %10626 = vmatprep.subr.bf16.mxu0 %v14492_v9  ;;  %v14574_v33 = vld [vmem:[%s15085_s17 + $0x2974] ss:$8 sps:$4 sm:$0xff]   ;;  %v14569_v9 = vld [vmem:[%s15085_s17 + $0x2870] ss:$8 sps:$4 sm:$0xff]  }
 0x55b   : > { %10667 = vmatprep.subr.bf16.mxu1 %v14495_v12  ;;  %v14572_v12 = vld [vmem:[%s15085_s17 + $0x2970] ss:$8 sps:$4 sm:$0xff]  }
 0x55d   : > { %10627 = vmatpush1.bf16.msra.mxu0 %v14490_v38  ;;  %v14580_v38 = vld [vmem:[%s15085_s17 + $0x2964] ss:$8 sps:$4 sm:$0xff]  }
 0x55e   : > { %10668 = vmatpush1.bf16.msra.mxu1 %v14493_v39  ;;  %10628 = vmatprep.subr.bf16.mxu0 %v14498_v17  ;;  %v2257_v39 = vcombine.high %v2255_v35, %v2255_v35 }
 0x55f   : > { %10669 = vmatprep.subr.bf16.mxu1 %v14501_v41 }
 0x561   : > { %10629 = vmatpush1.bf16.msra.mxu0 %v14496_v8 }
 0x562   : > { %10670 = vmatpush1.bf16.msra.mxu1 %v14499_v43  ;;  %10630 = vmatprep.subr.bf16.mxu0 %v14504_v48  ;;  %v14575_v43 = vld [vmem:[%s15085_s17 + $0x2860] ss:$8 sps:$4 sm:$0xff]  }
 0x563   : > { %10671 = vmatprep.subr.bf16.mxu1 %v14507_v56  ;;  %v14578_v48 = vld [vmem:[%s15085_s17 + $0x2960] ss:$8 sps:$4 sm:$0xff]  }
 0x565   : > { %10631 = vmatpush1.bf16.msra.mxu0 %v14502_v19 }
 0x566   : > { %10672 = vmatpush1.bf16.msra.mxu1 %v14505_v49  ;;  %10632 = vmatprep.subr.bf16.mxu0 %v14510_v51  ;;  %v14583_v49 = vld [vmem:[%s15085_s17 + $0x2854] ss:$8 sps:$4 sm:$0xff]  }
 0x567   : > { %10673 = vmatprep.subr.bf16.mxu1 %v14513_v26  ;;  %v14586_v51 = vld [vmem:[%s15085_s17 + $0x2954] ss:$8 sps:$4 sm:$0xff]  }
 0x569   : > { %10633 = vmatpush1.bf16.msra.mxu0 %v14508_v23 }
 0x56a   : > { %10674 = vmatpush1.bf16.msra.mxu1 %v14511_v25  ;;  %10634 = vmatprep.subr.bf16.mxu0 %v14516_v7 }
 0x56b   : > { %10675 = vmatprep.subr.bf16.mxu1 %v14519_v54  ;;  %v14581_v54 = vld [vmem:[%s15085_s17 + $0x2850] ss:$8 sps:$4 sm:$0xff]  }
 0x56d   : > { %10635 = vmatpush1.bf16.msra.mxu0 %v14514_v16  ;;  %v14584_v16 = vld [vmem:[%s15085_s17 + $0x2950] ss:$8 sps:$4 sm:$0xff]  }
 0x56e   : > { %10676 = vmatpush1.bf16.msra.mxu1 %v14517_v55  ;;  %10636 = vmatprep.subr.bf16.mxu0 %v14522_v34 }
 0x56f   : > { %10677 = vmatprep.subr.bf16.mxu1 %v14525_v59  ;;  %v14592_v59 = vld [vmem:[%s15085_s17 + $0x2944] ss:$8 sps:$4 sm:$0xff]  }
 0x571   : > { %10637 = vmatpush2.bf16.msra.mxu0 %v14520_v24  ;;  %v14587_v24 = vld [vmem:[%s15085_s17 + $0x2840] ss:$8 sps:$4 sm:$0xff]  }
 0x572   : > { %10678 = vmatpush2.bf16.msra.mxu1 %v14523_v61  ;;  %10638 = vmatprep.subr.bf16.mxu0 %v14528_v1  ;;  %v14590_v61 = vld [vmem:[%s15085_s17 + $0x2940] ss:$8 sps:$4 sm:$0xff]   ;;  %v14595_v1 = vld [vmem:[%s15085_s17 + $0x2834] ss:$8 sps:$4 sm:$0xff]  }
 0x573   : > { %10679 = vmatprep.subr.bf16.mxu1 %v14531_v11  ;;  %v14598_v11 = vld [vmem:[%s15085_s17 + $0x2934] ss:$8 sps:$4 sm:$0xff]  }
 0x575   : > { %10639 = vmatpush2.bf16.msra.mxu0 %v14526_v36  ;;  %v14593_v36 = vld [vmem:[%s15085_s17 + $0x2830] ss:$8 sps:$4 sm:$0xff]  }
 0x576   : > { %10680 = vmatpush2.bf16.msra.mxu1 %v14529_v3  ;;  %10640 = vmatprep.subr.bf16.mxu0 %v14534_v63  ;;  %v14596_v3 = vld [vmem:[%s15085_s17 + $0x2930] ss:$8 sps:$4 sm:$0xff]   ;;  %v14601_v63 = vld [vmem:[%s15085_s17 + $0x2824] ss:$8 sps:$4 sm:$0xff]  }
 0x577   : > { %10681 = vmatprep.subr.bf16.mxu1 %v14537_v5  ;;  %v14604_v5 = vld [vmem:[%s15085_s17 + $0x2924] ss:$8 sps:$4 sm:$0xff]  }
 0x579   : > { %10641 = vmatpush2.bf16.msra.mxu0 %v14532_v42  ;;  %v14599_v42 = vld [vmem:[%s15085_s17 + $0x2820] ss:$8 sps:$4 sm:$0xff]  }
 0x57a   : > { %10682 = vmatpush2.bf16.msra.mxu1 %v14535_v47  ;;  %10642 = vmatprep.subr.bf16.mxu0 %v14540_v45  ;;  %v14602_v47 = vld [vmem:[%s15085_s17 + $0x2920] ss:$8 sps:$4 sm:$0xff]   ;;  %v14607_v45 = vld [vmem:[%s15085_s17 + $0x2814] ss:$8 sps:$4 sm:$0xff]  }
 0x57b   : > { %10683 = vmatprep.subr.bf16.mxu1 %v14543_v37  ;;  %v14610_v37 = vld [vmem:[%s15085_s17 + $0x2914] ss:$8 sps:$4 sm:$0xff]  }
 0x57d   : > { %10643 = vmatpush2.bf16.msra.mxu0 %v14538_v10  ;;  %v14605_v10 = vld [vmem:[%s15085_s17 + $0x2810] ss:$8 sps:$4 sm:$0xff]  }
 0x57e   : > { %10684 = vmatpush2.bf16.msra.mxu1 %v14541_v13  ;;  %10644 = vmatprep.subr.bf16.mxu0 %v14546_v14  ;;  %v14608_v13 = vld [vmem:[%s15085_s17 + $0x2910] ss:$8 sps:$4 sm:$0xff]   ;;  %v14613_v14 = vld [vmem:[%s15085_s17 + $0x2804] ss:$8 sps:$4 sm:$0xff]  }
 0x57f   : > { %10685 = vmatprep.subr.bf16.mxu1 %v14549_v21  ;;  %v14616_v21 = vld [vmem:[%s15085_s17 + $0x2904] ss:$8 sps:$4 sm:$0xff]  }
 0x581   : > { %10645 = vmatpush2.bf16.msra.mxu0 %v14544_v52  ;;  %v14611_v52 = vld [vmem:[%s15085_s17 + $0x2800] ss:$8 sps:$4 sm:$0xff]  }
 0x582   : > { %10686 = vmatpush2.bf16.msra.mxu1 %v14547_v40  ;;  %10646 = vmatprep.subr.bf16.mxu0 %v14552_v15  ;;  %v14614_v40 = vld [vmem:[%s15085_s17 + $0x2900] ss:$8 sps:$4 sm:$0xff]   ;;  %v14619_v15 = vld [vmem:[%s15085_s17 + $0x28f4] ss:$8 sps:$4 sm:$0xff]  }
 0x583   : > { %10687 = vmatprep.subr.bf16.mxu1 %v14555_v18  ;;  %v14622_v18 = vld [vmem:[%s15085_s17 + $0x29f4] ss:$8 sps:$4 sm:$0xff]  }
 0x585   : > { %10647 = vmatpush2.bf16.msra.mxu0 %v14550_v32  ;;  %v14617_v32 = vld [vmem:[%s15085_s17 + $0x28f0] ss:$8 sps:$4 sm:$0xff]  }
 0x586   : > { %10688 = vmatpush2.bf16.msra.mxu1 %v14553_v27  ;;  %10648 = vmatprep.subr.bf16.mxu0 %v14558_v20  ;;  %v14620_v27 = vld [vmem:[%s15085_s17 + $0x29f0] ss:$8 sps:$4 sm:$0xff]   ;;  %v14625_v20 = vld [vmem:[%s15085_s17 + $0x28e4] ss:$8 sps:$4 sm:$0xff]  }
 0x587   : > { %10689 = vmatprep.subr.bf16.mxu1 %v14561_v46  ;;  %v14628_v46 = vld [vmem:[%s15085_s17 + $0x29e4] ss:$8 sps:$4 sm:$0xff]  }
 0x589   : > { %10649 = vmatpush2.bf16.msra.mxu0 %v14556_v60  ;;  %v14623_v60 = vld [vmem:[%s15085_s17 + $0x28e0] ss:$8 sps:$4 sm:$0xff]  }
 0x58a   : > { %10690 = vmatpush2.bf16.msra.mxu1 %v14559_v0  ;;  %10650 = vmatprep.subr.bf16.mxu0 %v14564_v58  ;;  %v14626_v0 = vld [vmem:[%s15085_s17 + $0x29e0] ss:$8 sps:$4 sm:$0xff]   ;;  %v14631_v58 = vld [vmem:[%s15085_s17 + $0x28d4] ss:$8 sps:$4 sm:$0xff]  }
 0x58b   : > { %10691 = vmatprep.subr.bf16.mxu1 %v14567_v53  ;;  %v14634_v53 = vld [vmem:[%s15085_s17 + $0x29d4] ss:$8 sps:$4 sm:$0xff]  }
 0x58d   : > { %10651 = vmatpush2.bf16.msra.mxu0 %v14562_v30  ;;  %v14637_v30 = vld [vmem:[%s15085_s17 + $0x28c4] ss:$8 sps:$4 sm:$0xff]  }
 0x58e   : > { %10692 = vmatpush2.bf16.msra.mxu1 %v14565_v2  ;;  %10702 = vmatprep.subr.bf16.mxu0 %v14571_v57  ;;  %v14640_v2 = vld [vmem:[%s15085_s17 + $0x29c4] ss:$8 sps:$4 sm:$0xff]   ;;  %v14635_v57 = vld [vmem:[%s15085_s17 + $0x28c0] ss:$8 sps:$4 sm:$0xff]  }
 0x58f   : > { %10743 = vmatprep.subr.bf16.mxu1 %v14574_v33  ;;  %v14638_v33 = vld [vmem:[%s15085_s17 + $0x29c0] ss:$8 sps:$4 sm:$0xff]  }
 0x590   : > { %v10408_v17 = vpop.f32.mrf.mxu0  ;;  %10653 = vmatmul.mubr.bf16.vlgmr.msra.gmra.mxu0 %v2215_v31  ;;  %v14632_v31 = vld [vmem:[%s15085_s17 + $0x29d0] ss:$8 sps:$4 sm:$0xff]  }
 0x591   : > { %v10449_v41 = vpop.f32.mrf.mxu1  ;;  %10694 = vmatmul.mubr.bf16.vlgmr.msra.gmra.mxu1 %v2231_v6  ;;  %v10409_v8 = vadd.f32 %v10408_v17, %v16654_v29  ;;  %10703 = vmatpush1.bf16.msra.mxu0 %v14569_v9  ;;  %v14646_v6 = vld [vmem:[%s15085_s17 + $0x29b4] ss:$8 sps:$4 sm:$0xff]   ;;  %v14641_v9 = vld [vmem:[%s15085_s17 + $0x28b0] ss:$8 sps:$4 sm:$0xff]   ;;  %v14650_v17 = vld [vmem:[%s15085_s17 + $0x29a0] ss:$8 sps:$4 sm:$0xff]  }
 0x592   : > { %10744 = vmatpush1.bf16.msra.mxu1 %v14572_v12  ;;  %v10410_v56 = vpop.f32.mrf.mxu0  ;;  %10704 = vmatprep.subr.bf16.mxu0 %v14577_v62  ;;  %v14644_v12 = vld [vmem:[%s15085_s17 + $0x29b0] ss:$8 sps:$4 sm:$0xff]   ;;  %v14649_v62 = vld [vmem:[%s15085_s17 + $0x28a4] ss:$8 sps:$4 sm:$0xff]  }
 0x593   : > { %v10451_v19 = vpop.f32.mrf.mxu1  ;;  %10745 = vmatprep.subr.bf16.mxu1 %v14580_v38  ;;  %v16732_v26 = vadd.f32 %v10449_v41, %v10409_v8  ;;  %v10411_v23 = vadd.f32 %v10410_v56, %v16657_v4  ;;  %10734 = vmatprep.mubr.bf16.mxu0 %v2255_v35  ;;  %v14589_v4 = vld [vmem:[%s15085_s17 + $0x2844] ss:$8 sps:$4 sm:$0xff]   ;;  %v14643_v35 = vld [vmem:[%s15085_s17 + $0x28b4] ss:$8 sps:$4 sm:$0xff]  }
 0x594   : > { %10775 = vmatprep.mubr.bf16.mxu1 %v2257_v39  ;;  %v10412_v29 = vpop.f32.mrf.mxu0  ;;  %v14652_v38 = vld [vmem:[%s15085_s17 + $0x29a4] ss:$8 sps:$4 sm:$0xff]   ;;  %v14647_v39 = vld [vmem:[%s15085_s17 + $0x28a0] ss:$8 sps:$4 sm:$0xff]   ;;  %v14655_v41 = vld [vmem:[%s15085_s17 + $0x2894] ss:$8 sps:$4 sm:$0xff]  }
 0x595   : > { %v10453_v25 = vpop.f32.mrf.mxu1  ;;  %v16735_v7 = vadd.f32 %v10451_v19, %v10411_v23  ;;  %10705 = vmatpush1.bf16.msra.mxu0 %v14575_v43  ;;  %v14658_v8 = vld [vmem:[%s15085_s17 + $0x2994] ss:$8 sps:$4 sm:$0xff]   ;;  %v14653_v43 = vld [vmem:[%s15085_s17 + $0x2890] ss:$8 sps:$4 sm:$0xff]   ;;  %v14661_v56 = vld [vmem:[%s15085_s17 + $0x2884] ss:$8 sps:$4 sm:$0xff]  }
 0x596   : > { %10746 = vmatpush1.bf16.msra.mxu1 %v14578_v48  ;;  %v10413_v55 = vpop.f32.mrf.mxu0  ;;  %10706 = vmatprep.subr.bf16.mxu0 %v14583_v49  ;;  %v14656_v48 = vld [vmem:[%s15085_s17 + $0x2990] ss:$8 sps:$4 sm:$0xff]   ;;  %v14664_v19 = vld [vmem:[%s15085_s17 + $0x2984] ss:$8 sps:$4 sm:$0xff]   ;;  %v2248_v49 = vrot.slane %v16708_v22, %v15173_v50  ;;  %v14662_v23 = vld [vmem:[%s15085_s17 + $0x2980] ss:$8 sps:$4 sm:$0xff]  }
 0x597   : > { %v10454_v34 = vpop.f32.mrf.mxu1  ;;  %10747 = vmatprep.subr.bf16.mxu1 %v14586_v51  ;;  %v14659_v51 = vld [vmem:[%s15085_s17 + $0x2880] ss:$8 sps:$4 sm:$0xff]   ;;  %s16925_s17 = sld [smem:[#allocation16_spill]] (!%p12477_p9) }
 0x598   : > { %v2256_v29 = vcombine.high %v2248_v49, %v2248_v49 }
 0x599   : > { %10707 = vmatpush1.bf16.msra.mxu0 %v14581_v54 }
 0x59a   : > { %10748 = vmatpush1.bf16.msra.mxu1 %v14584_v16  ;;  %10708 = vmatprep.subr.bf16.mxu0 %v14589_v4 }
 0x59b   : > { %10749 = vmatprep.subr.bf16.mxu1 %v14592_v59 }
 0x59d   : > { %10709 = vmatpush1.bf16.msra.mxu0 %v14587_v24  ;;  %p12479_p1 = scmp.ne.s32.totalorder (!%p12477_p9), %s16925_s17, 0 }
 0x59e   : > { %10750 = vmatpush1.bf16.msra.mxu1 %v14590_v61  ;;  %10710 = vmatprep.subr.bf16.mxu0 %v14595_v1 }
 0x59f   : > { %10751 = vmatprep.subr.bf16.mxu1 %v14598_v11 }
 0x5a1   : > { %10711 = vmatpush1.bf16.msra.mxu0 %v14593_v36 }
 0x5a2   : > { %10752 = vmatpush1.bf16.msra.mxu1 %v14596_v3  ;;  %10712 = vmatprep.subr.bf16.mxu0 %v14601_v63 }
 0x5a3   : > { %10753 = vmatprep.subr.bf16.mxu1 %v14604_v5 }
 0x5a5   : > { %10713 = vmatpush1.bf16.msra.mxu0 %v14599_v42 }
 0x5a6   : > { %10754 = vmatpush1.bf16.msra.mxu1 %v14602_v47  ;;  %10714 = vmatprep.subr.bf16.mxu0 %v14607_v45 }
 0x5a7   : > { %10755 = vmatprep.subr.bf16.mxu1 %v14610_v37 }
 0x5a9   : > { %10715 = vmatpush1.bf16.msra.mxu0 %v14605_v10 }
 0x5aa   : > { %10756 = vmatpush1.bf16.msra.mxu1 %v14608_v13  ;;  %10716 = vmatprep.subr.bf16.mxu0 %v14613_v14 }
 0x5ab   : > { %10757 = vmatprep.subr.bf16.mxu1 %v14616_v21 }
 0x5ad   : > { %10717 = vmatpush1.bf16.msra.mxu0 %v14611_v52 }
 0x5ae   : > { %10758 = vmatpush1.bf16.msra.mxu1 %v14614_v40  ;;  %10718 = vmatprep.subr.bf16.mxu0 %v14619_v15 }
 0x5af   : > { %10759 = vmatprep.subr.bf16.mxu1 %v14622_v18 }
 0x5b1   : > { %10719 = vmatpush2.bf16.msra.mxu0 %v14617_v32 }
 0x5b2   : > { %10760 = vmatpush2.bf16.msra.mxu1 %v14620_v27  ;;  %10720 = vmatprep.subr.bf16.mxu0 %v14625_v20 }
 0x5b3   : > { %10761 = vmatprep.subr.bf16.mxu1 %v14628_v46 }
 0x5b5   : > { %10721 = vmatpush2.bf16.msra.mxu0 %v14623_v60  ;;  %v14889_v60 = vmov 1983009808  }
 0x5b6   : > { %10762 = vmatpush2.bf16.msra.mxu1 %v14626_v0  ;;  %10722 = vmatprep.subr.bf16.mxu0 %v14631_v58  ;;  %v10788_v0 = vunpack.c.l.s4 %v14889_v60 }
 0x5b7   : > { %10763 = vmatprep.subr.bf16.mxu1 %v14634_v53 }
 0x5b9   : > { %10723 = vmatpush2.bf16.msra.mxu0 %v14629_v28 }
 0x5ba   : > { %10764 = vmatpush2.bf16.msra.mxu1 %v14632_v31  ;;  %10724 = vmatprep.subr.bf16.mxu0 %v14637_v30  ;;  %v10789_v30 = vunpack.c.0.s8 %v10788_v0 }
 0x5bb   : > { %10765 = vmatprep.subr.bf16.mxu1 %v14640_v2 }
 0x5bd   : > { %10725 = vmatpush2.bf16.msra.mxu0 %v14635_v57 }
 0x5be   : > { %10766 = vmatpush2.bf16.msra.mxu1 %v14638_v33  ;;  %10726 = vmatprep.subr.bf16.mxu0 %v14643_v35 }
 0x5bf   : > { %10767 = vmatprep.subr.bf16.mxu1 %v14646_v6 }
 0x5c1   : > { %10727 = vmatpush2.bf16.msra.mxu0 %v14641_v9 }
 0x5c2   : > { %10768 = vmatpush2.bf16.msra.mxu1 %v14644_v12  ;;  %10728 = vmatprep.subr.bf16.mxu0 %v14649_v62  ;;  %v16796_v62 = vsub.s32 %v10789_v30, %v15160_v44 }
 0x5c3   : > { %10769 = vmatprep.subr.bf16.mxu1 %v14652_v38 }
 0x5c5   : > { %10729 = vmatpush2.bf16.msra.mxu0 %v14647_v39 }
 0x5c6   : > { %10770 = vmatpush2.bf16.msra.mxu1 %v14650_v17  ;;  %10730 = vmatprep.subr.bf16.mxu0 %v14655_v41  ;;  %v375_v41 = vld [vmem:[#allocation2] sm:$0xf] }
 0x5c7   : > { %10771 = vmatprep.subr.bf16.mxu1 %v14658_v8 }
 0x5c9   : > { %10731 = vmatpush2.bf16.msra.mxu0 %v14653_v43 }
 0x5ca   : > { %10772 = vmatpush2.bf16.msra.mxu1 %v14656_v48  ;;  %10732 = vmatprep.subr.bf16.mxu0 %v14661_v56 }
 0x5cb   : > { %10773 = vmatprep.subr.bf16.mxu1 %v14664_v19 }
 0x5cd   : > { %10733 = vmatpush2.bf16.msra.mxu0 %v14659_v51 }
 0x5ce   : > { %10774 = vmatpush2.bf16.msra.mxu1 %v14662_v23 }
 0x5d0   : > { %v10490_v25 = vpop.f32.mrf.mxu0  ;;  %10735 = vmatmul.mubr.bf16.vlgmr.msra.gmra.mxu0 %v2248_v49 }
 0x5d1   : > { %v10531_v54 = vpop.f32.mrf.mxu1  ;;  %10776 = vmatmul.mubr.bf16.vlgmr.msra.gmra.mxu1 %v2256_v29  ;;  %v10491_v16 = vadd.f32 %v10490_v25, %v16732_v26 }
 0x5d2   : > { %v10492_v55 = vpop.f32.mrf.mxu0 }
 0x5d3   : > { %v10533_v34 = vpop.f32.mrf.mxu1  ;;  %v10532_v4 = vadd.f32 %v10531_v54, %v10491_v16  ;;  %v10493_v50 = vadd.f32 %v10492_v55, %v16735_v7 }
 0x5d4   : > { %v10494_v22 = vpop.f32.mrf.mxu0 }
 0x5d5   : > { %v10535_v59 = vpop.f32.mrf.mxu1  ;;  %v10534_v24 = vadd.f32 %v10533_v34, %v10493_v50 }
 0x5d6   : > { %v10495_v61 = vpop.f32.mrf.mxu0 }
 0x5d7   : > { %v10536_v1 = vpop.f32.mrf.mxu1 }
 0x610   : > { %v10572_v11 = vpop.f32.mrf.mxu0 }
 0x611   : > { %v10613_v36 = vpop.f32.mrf.mxu1  ;;  %v10573_v3 = vadd.f32 %v10572_v11, %v10532_v4 }
 0x612   : > { %v10574_v63 = vpop.f32.mrf.mxu0 }
 0x613   : > { %v10615_v5 = vpop.f32.mrf.mxu1  ;;  %v10614_v42 = vadd.f32 %v10613_v36, %v10573_v3  ;;  %v10575_v47 = vadd.f32 %v10574_v63, %v10534_v24 }
 0x614   : > { %v10576_v45 = vpop.f32.mrf.mxu0 }
 0x615   : > { %v10617_v37 = vpop.f32.mrf.mxu1  ;;  %v10616_v26 = vadd.f32 %v10615_v5, %v10575_v47 }
 0x616   : > { %v10577_v10 = vpop.f32.mrf.mxu0 }
 0x617   : > { %v10618_v13 = vpop.f32.mrf.mxu1 }
 0x650   : > { %v10654_v14 = vpop.f32.mrf.mxu0 }
 0x651   : > { %v10695_v21 = vpop.f32.mrf.mxu1  ;;  %v10655_v7 = vadd.f32 %v10654_v14, %v10614_v42 }
 0x652   : > { %v10656_v52 = vpop.f32.mrf.mxu0 }
 0x653   : > { %v10697_v40 = vpop.f32.mrf.mxu1  ;;  %v10696_v15 = vadd.f32 %v10695_v21, %v10655_v7  ;;  %v10657_v46 = vadd.f32 %v10656_v52, %v10616_v26 }
 0x654   : > { %v10658_v18 = vpop.f32.mrf.mxu0 }
 0x655   : > { %v10699_v32 = vpop.f32.mrf.mxu1  ;;  %v10698_v28 = vadd.f32 %v10697_v40, %v10657_v46 }
 0x656   : > { %v10659_v27 = vpop.f32.mrf.mxu0 }
 0x657   : > { %v10700_v20 = vpop.f32.mrf.mxu1 }
 0x690   : > { %v10736_v58 = vpop.f32.mrf.mxu0 }
 0x691   : > { %v10777_v53 = vpop.f32.mrf.mxu1  ;;  %v10737_v31 = vadd.f32 %v10736_v58, %v10696_v15 }
 0x692   : > { %v10738_v2 = vpop.f32.mrf.mxu0 }
 0x693   : > { %v10779_v57 = vpop.f32.mrf.mxu1  ;;  %v10739_v33 = vadd.f32 %v10738_v2, %v10698_v28  ;;  %v10778_v9 = vadd.f32 %v10777_v53, %v10737_v31 }
 0x694   : > { %v10740_v35 = vpop.f32.mrf.mxu0 }
 0x695   : > { %v10781_v6 = vpop.f32.mrf.mxu1  ;;  %v10780_v12 = vadd.f32 %v10779_v57, %v10739_v33 }
 0x696   : > { %v10741_v38 = vpop.f32.mrf.mxu0 }
 0x697   : > { %v10782_v39 = vpop.f32.mrf.mxu1  ;;  %v10786_v17 = vcombine.low %v10778_v9, %v10780_v12 }
 0x699   : > { %v10793_v8 = vrot.slane %v10786_v17, %v16796_v62  ;;  %10800 = sbr.rel (%p12477_p9) target bundleno = 2265 (0x8d9), region = 64 }
 0x69b   : > { %v10795_v43 = vadd.f32 %v10793_v8, %v375_v41 }
 0x69d   : > { %10796 = vst [vmem:[#allocation2] sm:$0xf] %v10795_v43 }
 0x69e   : > { %v10854_v48 = vld [vmem:[%s15104_s28 + $0xf8] sm:$0xff]  ;;  %v10853_v19 = vld [vmem:[%s15104_s28 + $0xf0] sm:$0xff]  ;;  %v10852_v51 = vld [vmem:[%s15104_s28 + $0xe8] sm:$0xff]  ;;  %v10806_v34 = vsub.s32 0, %v15160_v44  ;;  %v10810_v4 = vsub.s32 1, %v15160_v44 }
 0x69f   : > { %v10838_v56 = vld [vmem:[%s15104_s28 + $0x78] sm:$0xff]  ;;  %12486 = vmatprep.subr.mxu0 %v10854_v48  ;;  %v10837_v49 = vld [vmem:[%s15104_s28 + $0x70] sm:$0xff]  ;;  %v10836_v23 = vld [vmem:[%s15104_s28 + $0x68] sm:$0xff] }
 0x6a0   : > { %12487 = vmatpush3.msra.mxu0 %v10838_v56  ;;  %v10851_v29 = vld [vmem:[%s15104_s28 + $0xe0] sm:$0xff]  ;;  %v10850_v54 = vld [vmem:[%s15104_s28 + $0xd8] sm:$0xff]  ;;  %v10849_v55 = vld [vmem:[%s15104_s28 + $0xd0] sm:$0xff] }
 0x6a1   : > { %12488 = vmatprep.subr.mxu0 %v10853_v19  ;;  %v10835_v25 = vld [vmem:[%s15104_s28 + $0x60] sm:$0xff]  ;;  %v10834_v16 = vld [vmem:[%s15104_s28 + $0x58] sm:$0xff]  ;;  %v10833_v50 = vld [vmem:[%s15104_s28 + $0x50] sm:$0xff] }
 0x6a2   : > { %12489 = vmatpush3.msra.mxu0 %v10837_v49  ;;  %v10848_v22 = vld [vmem:[%s15104_s28 + $0xc8] sm:$0xff]  ;;  %v10802_v24 = vld [vmem:[%s15097_s24] sm:$0x3]  ;;  %v10847_v61 = vld [vmem:[%s15104_s28 + $0xc0] sm:$0xff] }
 0x6a3   : > { %12490 = vmatprep.subr.mxu0 %v10852_v51  ;;  %v10832_v59 = vld [vmem:[%s15104_s28 + $0x48] sm:$0xff]  ;;  %v10807_v1 = vrot.slane %v10802_v24, %v10806_v34  ;;  %v10811_v11 = vrot.slane %v10802_v24, %v10810_v4  ;;  %v10831_v36 = vld [vmem:[%s15104_s28 + $0x40] sm:$0xff]  ;;  %v10846_v44 = vld [vmem:[%s15104_s28 + $0xb8] sm:$0xff] }
 0x6a4   : > { %12491 = vmatpush3.msra.mxu0 %v10836_v23  ;;  %v10830_v63 = vld [vmem:[%s15104_s28 + $0x38] sm:$0xff]  ;;  %v10845_v42 = vld [vmem:[%s15104_s28 + $0xb0] sm:$0xff]  ;;  %v10844_v37 = vld [vmem:[%s15104_s28 + $0xa8] sm:$0xff] }
 0x6a5   : > { %12492 = vmatprep.subr.mxu0 %v10851_v29  ;;  %v10812_v3 = vcombine.low %v10807_v1, %v10811_v11  ;;  %v10801_v5 = vld [vmem:[#allocation2] sm:$0xf]  ;;  %v10829_v45 = vld [vmem:[%s15104_s28 + $0x30] sm:$0xff]  ;;  %v10828_v10 = vld [vmem:[%s15104_s28 + $0x28] sm:$0xff] }
 0x6a6   : > { %12493 = vmatpush3.msra.mxu0 %v10835_v25  ;;  %v10843_v13 = vld [vmem:[%s15104_s28 + $0xa0] sm:$0xff]  ;;  %v10842_v7 = vld [vmem:[%s15104_s28 + $0x98] sm:$0xff]  ;;  %v10841_v15 = vld [vmem:[%s15104_s28 + $0x90] sm:$0xff] }
 0x6a7   : > { %12494 = vmatprep.subr.mxu0 %v10850_v54  ;;  %v10819_v47 = vrot.slane %v10812_v3, %v16796_v62  ;;  %v10827_v21 = vld [vmem:[%s15104_s28 + $0x20] sm:$0xff]  ;;  %v10826_v40 = vld [vmem:[%s15104_s28 + $0x18] sm:$0xff]  ;;  %v10825_v32 = vld [vmem:[%s15104_s28 + $0x10] sm:$0xff] }
 0x6a8   : > { %12495 = vmatpush3.msra.mxu0 %v10834_v16  ;;  %v10840_v27 = vld [vmem:[%s15104_s28 + $0x88] sm:$0xff]  ;;  %v10839_v46 = vld [vmem:[%s15104_s28 + $0x80] sm:$0xff]  ;;  %v12478_v58 = vld [vmem:[%s325_s8] ss:$0 sm:$0xff] }
 0x6a9   : > { %12496 = vmatprep.subr.mxu0 %v10849_v55  ;;  %v10821_v26 = vadd.f32 %v10819_v47, %v10801_v5  ;;  %v10824_v20 = vld [vmem:[%s15104_s28 + $0x8] sm:$0xff]  ;;  %v10823_v60 = vld [vmem:[%s15104_s28] sm:$0xff] }
 0x6aa   : > { %12497 = vmatpush3.msra.mxu0 %v10833_v50 }
 0x6ab   : > { %12498 = vmatprep.subr.mxu0 %v10848_v22  ;;  %v10822_v14 = vmax.f32 %v10821_v26, 0.0 }
 0x6ac   : > { %12499 = vmatpush3.msra.mxu0 %v10832_v59 }
 0x6ad   : > { %12500 = vmatprep.subr.mxu0 %v10847_v61  ;;  %v10869_v52 = vrot.slane %v10822_v14, %v16796_v62 }
 0x6ae   : > { %12501 = vmatpush3.msra.mxu0 %v10831_v36 }
 0x6af   : > { %12502 = vmatprep.subr.mxu0 %v10846_v44  ;;  %v10870_v18 = vcombine.high %v10869_v52, %v10869_v52 }
 0x6b0   : > { %12503 = vmatpush3.msra.mxu0 %v10830_v63 }
 0x6b1   : > { %12504 = vmatprep.subr.mxu0 %v10845_v42  ;;  %10937 = vmatprep.mubr.f32.mxu0 %v10870_v18 }
 0x6b2   : > { %12505 = vmatpush3.msra.mxu0 %v10829_v45 }
 0x6b3   : > { %12506 = vmatprep.subr.mxu0 %v10844_v37 }
 0x6b4   : > { %12507 = vmatpush3.msra.mxu0 %v10828_v10 }
 0x6b5   : > { %12508 = vmatprep.subr.mxu0 %v10843_v13 }
 0x6b6   : > { %12509 = vmatpush3.msra.mxu0 %v10827_v21 }
 0x6b7   : > { %12510 = vmatprep.subr.mxu0 %v10842_v7 }
 0x6b8   : > { %12511 = vmatpush3.msra.mxu0 %v10826_v40 }
 0x6b9   : > { %12512 = vmatprep.subr.mxu0 %v10841_v15 }
 0x6ba   : > { %12513 = vmatpush3.msra.mxu0 %v10825_v32 }
 0x6bb   : > { %12514 = vmatprep.subr.mxu0 %v10840_v27 }
 0x6bc   : > { %12515 = vmatpush3.msra.mxu0 %v10824_v20 }
 0x6bd   : > { %12516 = vmatprep.subr.mxu0 %v10839_v46 }
 0x6be   : > { %12517 = vmatpush3.msra.mxu0 %v10823_v60 }
 0x6bf   : > { %10938 = vmatmul.mubr.f32.vlgmr.msra.gmra.mxu0 %v10869_v52 }
 0x77f   : > { %v12518_v0 = vpop.f32.mrf.mxu0 }
 0x780   : > { %10946 = sbr.rel (%p12479_p1) target bundleno = 1927 (0x787), region = 68 }
 0x781   : > { %v12519_v53 = vpop.f32.mrf.mxu0 }
 0x782   : > { %v12520_v28 = vadd.f32 %v12519_v53, %v12518_v0 }
 0x784   : > { %v10940_v31 = vadd.f32 %v12520_v28, %v12478_v58 }
 0x786   : > { %10947 = vst [vmem:[%s15117_s5] sm:$0x3] %v10940_v31 }
 0x787 PF: > { %s16926_s30 = sld [smem:[#allocation16_spill]] }
 0x78d   : > { %p12480_p2 = scmp.ne.s32.totalorder %s16926_s30, 1 }
 0x78f   : > { %10951 = sbr.rel (%p12480_p2) target bundleno = 2265 (0x8d9), region = 72 }
 0x794   : > { %vm10952_vm0 = vcmask 1041408  }
 0x795   : > { %v10953_v30 = vsel %vm10952_vm0, %v10940_v31, 0.0 }
 0x796   : > { %v10954_v2 = vrot.slane %v10953_v30, 4 }
 0x798   : > { %v10955_v57 = vadd.f32 %v10954_v2, %v10953_v30 }
 0x79a   : > { %v10956_v33 = vrot.slane %v10955_v57, 2 }
 0x79c   : > { %v10957_v35 = vadd.f32 %v10956_v33, %v10955_v57 }
 0x79e   : > { %v10958_v6 = vrot.slane %v10957_v35, 1 }
 0x7a0   : > { %v10959_v9 = vadd.f32 %v10958_v6, %v10957_v35 }
 0x7a2   : > { %10960 = vmax.xlane.f32.xlu0 %v10959_v9 }
 0x82b   : > { %v10961_v12 = vpop.xlane.xlu0 %10960 }
 0x82c   : > { %v10962_v62 = vsub.f32 %v10959_v9, %v10961_v12 }
 0x82e   : > { %v10963_v38 = vmul.f32 1.442695, %v10962_v62 }
 0x830   : > { %14665 = vpow2.f32 %v10963_v38 }
 0x83d   : > { %v14666_v39 = vpop.eup %14665 }
 0x83e   : > { %10965 = vadd.xlane.f32.xlu0 %v14666_v39 }
 0x8c7   : > { %v10966_v17 = vpop.xlane.xlu0 %10965 }
 0x8c8   : > { %14667 = vrcp.f32 %v10966_v17 }
 0x8d5   : > { %v14668_v41 = vpop.eup %14667 }
 0x8d6   : > { %v10968_v8 = vmul.f32 %v14668_v41, %v14666_v39 }
 0x8d8   : > { %10969 = vst [vmem:[%s15117_s5] sm:$0x3] %v10968_v8 }
 0x8d9 PF: > { %s16927_s22 = sld [smem:[#allocation18_spill]]  ;;  %s16930_s6 = smov %s15050_s19 }
 0x8da   : > { %s16928_s18 = sld [smem:[#allocation13_spill]]  ;;  %s16933_s19 = smov %s14847_s20 }
 0x8db   : > { %s16929_s21 = sld [smem:[#allocation14_spill]]  ;;  %s16934_s20 = smov %s15047_s7 }
 0x8dc   : > { %s16931_s24 = sld [smem:[#allocation17_spill]]  ;;  %s16937_s25 = smov %s14875_s27 }
 0x8dd   : > { %s16932_s26 = sld [smem:[#allocation21_spill]]  ;;  %s16938_s27 = smov %s16944_s14 }
 0x8df   : > { %s24_s28 = sadd.s32 1, %s16927_s22   ;;  %s16935_s22 = smov %s14859_s23 }
 0x8e0   : > { %p21_p3 = scmp.ge.s32.totalorder %s24_s28, 6   ;;  %s16936_s23 = smov %s16930_s6 }
 0x8e2   :  { %23 = sbr.rel (!%p21_p3) target bundleno = 15 (0xf), region = 134 }
 0x8e7   :  { %10989 = vsyncpa [#allocation4], 1 }
 0x8e8   :  { %10991 = vsyncpa [#allocation4 + $0x1], 1 }
 0x8e9   :  { %10992 = vsyncpa [#allocation6], 1 }
 0x8ea   :  { %10994 = vsyncpa [#allocation6 + $0x1], 1 }
 0x8eb   :  { %10995 = vsyncpa [#allocation9], 1 }
 0x8ec   :  { %10997 = vsyncpa [#allocation9 + $0x1], 1 }

</bundles_post_ra>
